<compile_context>
chip_gen: v5e
topology: v5e:2x2
jax: 0.10.0
libtpu: 0.0.40
codegen_flags: <defaults>
</compile_context>

<pallas_src>
import math

import jax
import jax.numpy as jnp
import numpy as np
from jax.experimental import pallas as pl
from jax.experimental.pallas import tpu as pltpu

_INV_SQRT2 = 0.7071067811865476
_LN_EPS = 1e-5  # nn.LayerNorm default


def _gelu_exact(x):
    # nn.GELU() default (erf form)
    return 0.5 * x * (1.0 + jax.lax.erf(x * _INV_SQRT2))


def _attention_pooling_kernel(x_ref, bias_ref, w1_ref, b1_ref, gamma_ref, beta_ref,
                              w2_ref, b2_ref, wout_ref, bout_ref, out_ref):
    # Per grid step:
    #   x_ref     : [Bb, S, H]   activations for Bb batch rows
    #   bias_ref  : [Bb, S]      additive attention-mask bias (0 attend / -inf masked)
    #   w1_ref    : [H, A*H]     all heads' first Linear weights, pre-transposed & stacked
    #   b1_ref    : [1, A*H]
    #   gamma_ref : [A, 1, H], beta_ref: [A, 1, H]   per-head LayerNorm affine
    #   w2_ref    : [A, 1, H], b2_ref:   [A, 1, 1]   per-head score Linear(H, 1)
    #   wout_ref  : [A*H, H]     output Linear weight.T
    #   bout_ref  : [1, H]
    #   out_ref   : [Bb, H]
    Bb, S, H = x_ref.shape
    A = gamma_ref.shape[0]
    M = Bb * S

    x3 = x_ref[...]                                   # [Bb, S, H]
    x2 = x3.reshape(M, H)                             # leading-dim merge only (lanes untouched)
    bias = bias_ref[...]                              # [Bb, S], lane-dense over S

    # --- fused first Linear for ALL heads: one big MXU matmul ---
    y = jnp.dot(x2, w1_ref[...], preferred_element_type=jnp.float32) + b1_ref[...]   # [M, A*H]

    embs = []
    for h in range(A):                                # static unroll over heads
        y_h = y[:, h * H:(h + 1) * H]                 # [M, H] static 128-lane slice

        # LayerNorm(H) over the hidden (lane) axis
        mu = jnp.mean(y_h, axis=-1, keepdims=True)
        var = jnp.mean((y_h - mu) * (y_h - mu), axis=-1, keepdims=True)
        ln = (y_h - mu) * jax.lax.rsqrt(var + _LN_EPS)
        ln = ln * gamma_ref[h] + beta_ref[h]          # [1, H] broadcasts over M

        g = _gelu_exact(ln)                           # [M, H]

        # score Linear(H, 1) as a lane-axis dot -> [Bb, S] directly (S on lanes),
        # then add the additive mask bias (masked_fill(-inf) equivalent).
        g3 = g.reshape(Bb, S, H)                      # leading-dim split only
        s = jnp.sum(g3 * w2_ref[h], axis=-1) + b2_ref[h]    # [Bb, S]
        s = s + bias

        # masked softmax over the sequence (lane) axis; dropout is identity in eval.
        # TODO(synk): training-mode dropout (RNG mask on the attention weights) not implemented.
        m = jnp.max(s, axis=-1, keepdims=True)        # [Bb, 1]
        e = jnp.exp(s - m)
        w = e / jnp.sum(e, axis=-1, keepdims=True)    # [Bb, S]

        # attention-weighted pooling over S
        if S >= 128:
            # long sequences: run the S-reduction on the MXU (batched matmul)
            emb = jnp.einsum("bqs,bsh->bqh", w[:, None, :], x3,
                             preferred_element_type=jnp.float32)[:, 0, :]   # [Bb, H]
        else:
            emb = jnp.sum(w[:, :, None] * x3, axis=1)                        # [Bb, H]
        embs.append(emb)

    # fused output Linear: lane-concat the head embeddings and do ONE matmul
    cat = jnp.concatenate(embs, axis=-1)              # [Bb, A*H]
    out = jnp.dot(cat, wout_ref[...], preferred_element_type=jnp.float32) + bout_ref[...]
    out_ref[...] = out.astype(out_ref.dtype)


def _round_up(v, m):
    return (v + m - 1) // m * m


def _pick_block_b(B, S, H, A, max_block_b, vmem_budget_bytes):
    """Largest batch block (multiple of 8) whose working set fits the VMEM budget."""
    # resident parameters (f32): w1 [H,A*H], wout [A*H,H] + small vectors
    weight_bytes = 4 * (2 * A * H * H + 4 * A * H + H + A)
    # live f32 per batch row per step: y [S, A*H] (dominant), ~3 head temporaries [S,H],
    # double-buffered x block 2*[S,H], scores/softmax ~[S]
    per_row_bytes = 4 * S * (A * H + 5 * H + 8)
    avail = max(vmem_budget_bytes - weight_bytes, 8 * per_row_bytes)
    bb = int(min(avail // per_row_bytes, max_block_b))
    bb = max(8, (bb // 8) * 8)                  # (8,128) tiling: batch block multiple of 8
    if bb >= B and B > 8:                       # keep >= 2 grid steps (v7x has 2 TensorCores)
        bb = max(8, _round_up(-(-B // 2), 8))
    bb = min(bb, _round_up(B, 8))
    return bb


def attention_pooling(x, attention_mask, w1, b1, gamma, beta, w2, b2, wout, bout,
                      *, block_b=None, max_block_b=256,
                      vmem_budget_bytes=40 * 1024 * 1024,     # safe on v7x (64 MiB VMEM)
                      vmem_limit_bytes=48 * 1024 * 1024):     # raise on v5e/v6e (128 MiB)
    """x: [B, S, H], attention_mask: [B, S] (1 = masked).  PyTorch-layout params:
       w1: [A, H, H] (out, in), b1: [A, H], gamma/beta: [A, H], w2: [A, H], b2: [A],
       wout: [H, A*H], bout: [H].  Returns [B, H]."""
    B, S, H = x.shape
    A = w1.shape[0]

    if block_b is None:
        Bb = _pick_block_b(B, S, H, A, max_block_b, vmem_budget_bytes)
    else:
        Bb = min(max(8, _round_up(block_b, 8)), _round_up(B, 8))

    # Pad the batch to a multiple of Bb (padded rows are unmasked zeros; sliced off below).
    B_pad = _round_up(B, Bb)
    bias = jnp.where(attention_mask == 1, -jnp.inf, 0.0).astype(jnp.float32)   # [B, S]
    if B_pad != B:
        x = jnp.pad(x, ((0, B_pad - B), (0, 0), (0, 0)))
        bias = jnp.pad(bias, ((0, B_pad - B), (0, 0)))

    # One-time parameter re-layout (host side, tiny).
    w1_all = jnp.concatenate([w1[h].T for h in range(A)], axis=1)    # [H, A*H]
    b1_all = b1.reshape(1, A * H)
    gamma_k = gamma.reshape(A, 1, H)
    beta_k = beta.reshape(A, 1, H)
    w2_k = w2.reshape(A, 1, H)
    b2_k = b2.reshape(A, 1, 1)
    wout_t = wout.T                                                  # [A*H, H]
    bout_k = bout.reshape(1, H)

    out = pl.pallas_call(
        _attention_pooling_kernel,
        out_shape=jax.ShapeDtypeStruct((B_pad, H), x.dtype),
        grid_spec=pltpu.PrefetchScalarGridSpec(
            num_scalar_prefetch=0,
            grid=(B_pad // Bb,),
            in_specs=[
                pl.BlockSpec((Bb, S, H), lambda i: (i, 0, 0)),   # x (batch block)
                pl.BlockSpec((Bb, S), lambda i: (i, 0)),         # additive mask bias
                pl.BlockSpec((H, A * H), lambda i: (0, 0)),      # fused head Linear weight
                pl.BlockSpec((1, A * H), lambda i: (0, 0)),      # fused head Linear bias
                pl.BlockSpec((A, 1, H), lambda i: (0, 0, 0)),    # LN gamma
                pl.BlockSpec((A, 1, H), lambda i: (0, 0, 0)),    # LN beta
                pl.BlockSpec((A, 1, H), lambda i: (0, 0, 0)),    # score weight
                pl.BlockSpec((A, 1, 1), lambda i: (0, 0, 0)),    # score bias
                pl.BlockSpec((A * H, H), lambda i: (0, 0)),      # output Linear weight.T
                pl.BlockSpec((1, H), lambda i: (0, 0)),          # output Linear bias
            ],
            out_specs=pl.BlockSpec((Bb, H), lambda i: (i, 0)),
        ),
        compiler_params=pltpu.CompilerParams(
            dimension_semantics=("parallel",),
            vmem_limit_bytes=vmem_limit_bytes),
    )(x, bias, w1_all, b1_all, gamma_k, beta_k, w2_k, b2_k, wout_t, bout_k)

    return out[:B] if B_pad != B else out


def reference(x, mask, w1, b1, gamma, beta, w2, b2, wout, bout):
    """Plain-JAX reference mirroring the PyTorch forward literally (eval mode)."""
    A = w1.shape[0]
    embs = []
    for h in range(A):
        y = jnp.einsum("bsh,oh->bso", x, w1[h]) + b1[h]
        mu = jnp.mean(y, axis=-1, keepdims=True)
        var = jnp.mean((y - mu) ** 2, axis=-1, keepdims=True)
        y = (y - mu) * jax.lax.rsqrt(var + _LN_EPS) * gamma[h] + beta[h]
        y = _gelu_exact(y)
        s = jnp.einsum("bsh,h->bs", y, w2[h]) + b2[h]
        s = jnp.where(mask == 1.0, -jnp.inf, s)
        w = jax.nn.softmax(s, axis=-1)                     # dropout is identity in eval
        embs.append(jnp.einsum("bs,bsh->bh", w, x))
    cat = jnp.concatenate(embs, axis=-1)
    return cat @ wout.T + bout


if __name__ == "__main__":
    # Small, TPU-friendly shapes consistent with the module: hidden_size=128, 4 heads.
    # B=16 so the auto-picked block (Bb=8) gives a 2-step grid (both TCs busy on v7x).
    B, S, H, A = 16, 16, 128, 4

    key = jax.random.PRNGKey(0)
    ks = jax.random.split(key, 10)
    x = jax.random.normal(ks[0], (B, S, H), jnp.float32)
    # attention_mask: 1 = masked (padding), 0 = attend; keep at least one attended token per row.
    mask = (jax.random.uniform(ks[1], (B, S)) < 0.3).astype(jnp.float32)
    mask = mask.at[:, 0].set(0.0)

    scale = 1.0 / math.sqrt(H)
    w1 = jax.random.normal(ks[2], (A, H, H), jnp.float32) * scale
    b1 = 0.1 * jax.random.normal(ks[3], (A, H), jnp.float32)
    gamma = 1.0 + 0.1 * jax.random.normal(ks[4], (A, H), jnp.float32)
    beta = 0.1 * jax.random.normal(ks[5], (A, H), jnp.float32)
    w2 = jax.random.normal(ks[6], (A, H), jnp.float32) * scale
    b2 = 0.1 * jax.random.normal(ks[7], (A,), jnp.float32)
    wout = jax.random.normal(ks[8], (H, A * H), jnp.float32) * (1.0 / math.sqrt(A * H))
    bout = 0.1 * jax.random.normal(ks[9], (H,), jnp.float32)

    out = attention_pooling(x, mask, w1, b1, gamma, beta, w2, b2, wout, bout)
    out = jax.block_until_ready(out)

    ref = jax.block_until_ready(reference(x, mask, w1, b1, gamma, beta, w2, b2, wout, bout))
    np.testing.assert_allclose(np.asarray(out), np.asarray(ref), rtol=1e-3, atol=1e-3)
    assert out.shape == (B, H)

    print("KERNEL_OK")
</pallas_src>

<mosaic_0001>
module attributes {stable_mosaic.version = 11 : i64} {
  func.func @_attention_pooling_kernel(%arg0: i32, %arg1: memref<8x16x128xf32, #tpu.memory_space<vmem>>, %arg2: memref<8x16xf32, #tpu.memory_space<vmem>>, %arg3: memref<128x512xf32, #tpu.memory_space<vmem>>, %arg4: memref<1x512xf32, #tpu.memory_space<vmem>>, %arg5: memref<4x1x128xf32, #tpu.memory_space<vmem>>, %arg6: memref<4x1x128xf32, #tpu.memory_space<vmem>>, %arg7: memref<4x1x128xf32, #tpu.memory_space<vmem>>, %arg8: memref<4x1x1xf32, #tpu.memory_space<vmem>>, %arg9: memref<512x128xf32, #tpu.memory_space<vmem>>, %arg10: memref<1x128xf32, #tpu.memory_space<vmem>>, %arg11: memref<8x128xf32, #tpu.memory_space<vmem>>) attributes {dimension_semantics = [#tpu.dimension_semantics<parallel>], iteration_bounds = array<i64: 2>, scalar_prefetch = 0 : i64, scratch_operands = 0 : i64, tpu.core_type = #tpu.core_type<tc>, window_params = [{transform_indices = @transform_0, window_bounds = array<i64: 8, 16, 128>}, {transform_indices = @transform_1, window_bounds = array<i64: 8, 16>}, {pipeline_mode = #tpu.pipeline_mode<synchronous>, transform_indices = @transform_2, window_bounds = array<i64: 128, 512>}, {pipeline_mode = #tpu.pipeline_mode<synchronous>, transform_indices = @transform_3, window_bounds = array<i64: 1, 512>}, {pipeline_mode = #tpu.pipeline_mode<synchronous>, transform_indices = @transform_4, window_bounds = array<i64: 4, 1, 128>}, {pipeline_mode = #tpu.pipeline_mode<synchronous>, transform_indices = @transform_5, window_bounds = array<i64: 4, 1, 128>}, {pipeline_mode = #tpu.pipeline_mode<synchronous>, transform_indices = @transform_6, window_bounds = array<i64: 4, 1, 128>}, {pipeline_mode = #tpu.pipeline_mode<synchronous>, transform_indices = @transform_7, window_bounds = array<i64: 4, 1, 1>}, {pipeline_mode = #tpu.pipeline_mode<synchronous>, transform_indices = @transform_8, window_bounds = array<i64: 512, 128>}, {pipeline_mode = #tpu.pipeline_mode<synchronous>, transform_indices = @transform_9, window_bounds = array<i64: 1, 128>}, {transform_indices = @transform_10, window_bounds = array<i64: 8, 128>}]} {
    %c0 = arith.constant 0 : index
    %c0_0 = arith.constant 0 : index
    %c0_1 = arith.constant 0 : index
    %0 = vector.load %arg1[%c0, %c0_0, %c0_1] : memref<8x16x128xf32, #tpu.memory_space<vmem>>, vector<8x16x128xf32>
    %1 = vector.shape_cast %0 : vector<8x16x128xf32> to vector<128x128xf32>
    %c0_2 = arith.constant 0 : index
    %c0_3 = arith.constant 0 : index
    %2 = vector.load %arg2[%c0_2, %c0_3] : memref<8x16xf32, #tpu.memory_space<vmem>>, vector<8x16xf32>
    %c0_4 = arith.constant 0 : index
    %c0_5 = arith.constant 0 : index
    %3 = vector.load %arg3[%c0_4, %c0_5] : memref<128x512xf32, #tpu.memory_space<vmem>>, vector<128x512xf32>
    %cst = arith.constant dense<0.000000e+00> : vector<128x512xf32>
    %4 = tpu.matmul %1, %3, %cst {dimension_numbers = #tpu.dot_dimension_numbers<[1], [0], [0], [1], [0, 0, 1, 1], [], []>} : vector<128x128xf32>, vector<128x512xf32>, vector<128x512xf32> -> vector<128x512xf32>
    %c0_6 = arith.constant 0 : index
    %c0_7 = arith.constant 0 : index
    %5 = vector.load %arg4[%c0_6, %c0_7] : memref<1x512xf32, #tpu.memory_space<vmem>>, vector<1x512xf32>
    %6 = vector.broadcast %5 : vector<1x512xf32> to vector<128x512xf32>
    %7 = arith.addf %4, %6 : vector<128x512xf32>
    %8 = vector.extract_strided_slice %7 {offsets = [0, 0], sizes = [128, 128], strides = [1, 1]} : vector<128x512xf32> to vector<128x128xf32>
    %cst_8 = arith.constant dense<0.000000e+00> : vector<128xf32>
    %9 = vector.multi_reduction <add>, %8, %cst_8 [1] : vector<128x128xf32> to vector<128xf32>
    %10 = vector.shape_cast %9 : vector<128xf32> to vector<128x1xf32>
    %cst_9 = arith.constant 1.280000e+02 : f32
    %11 = vector.broadcast %cst_9 : f32 to vector<128x1xf32>
    %12 = arith.divf %10, %11 : vector<128x1xf32>
    %13 = vector.broadcast %12 : vector<128x1xf32> to vector<128x128xf32>
    %14 = arith.subf %8, %13 : vector<128x128xf32>
    %15 = vector.broadcast %12 : vector<128x1xf32> to vector<128x128xf32>
    %16 = arith.subf %8, %15 : vector<128x128xf32>
    %17 = arith.mulf %14, %16 : vector<128x128xf32>
    %cst_10 = arith.constant dense<0.000000e+00> : vector<128xf32>
    %18 = vector.multi_reduction <add>, %17, %cst_10 [1] : vector<128x128xf32> to vector<128xf32>
    %19 = vector.shape_cast %18 : vector<128xf32> to vector<128x1xf32>
    %cst_11 = arith.constant 1.280000e+02 : f32
    %20 = vector.broadcast %cst_11 : f32 to vector<128x1xf32>
    %21 = arith.divf %19, %20 : vector<128x1xf32>
    %22 = vector.broadcast %12 : vector<128x1xf32> to vector<128x128xf32>
    %23 = arith.subf %8, %22 : vector<128x128xf32>
    %cst_12 = arith.constant 9.99999974E-6 : f32
    %24 = vector.broadcast %cst_12 : f32 to vector<128x1xf32>
    %25 = arith.addf %21, %24 : vector<128x1xf32>
    %26 = math.rsqrt %25 : vector<128x1xf32>
    %27 = vector.broadcast %26 : vector<128x1xf32> to vector<128x128xf32>
    %28 = arith.mulf %23, %27 : vector<128x128xf32>
    %c0_13 = arith.constant 0 : index
    %c0_14 = arith.constant 0 : index
    %c0_15 = arith.constant 0 : index
    %29 = vector.load %arg5[%c0_13, %c0_14, %c0_15] : memref<4x1x128xf32, #tpu.memory_space<vmem>>, vector<1x1x128xf32>
    %30 = vector.shape_cast %29 : vector<1x1x128xf32> to vector<1x128xf32>
    %31 = vector.broadcast %30 : vector<1x128xf32> to vector<128x128xf32>
    %32 = arith.mulf %28, %31 : vector<128x128xf32>
    %c0_16 = arith.constant 0 : index
    %c0_17 = arith.constant 0 : index
    %c0_18 = arith.constant 0 : index
    %33 = vector.load %arg6[%c0_16, %c0_17, %c0_18] : memref<4x1x128xf32, #tpu.memory_space<vmem>>, vector<1x1x128xf32>
    %34 = vector.shape_cast %33 : vector<1x1x128xf32> to vector<1x128xf32>
    %35 = vector.broadcast %34 : vector<1x128xf32> to vector<128x128xf32>
    %36 = arith.addf %32, %35 : vector<128x128xf32>
    %cst_19 = arith.constant 5.000000e-01 : f32
    %37 = vector.broadcast %cst_19 : f32 to vector<128x128xf32>
    %38 = arith.mulf %37, %36 : vector<128x128xf32>
    %cst_20 = arith.constant 0.707106769 : f32
    %39 = vector.broadcast %cst_20 : f32 to vector<128x128xf32>
    %40 = arith.mulf %36, %39 : vector<128x128xf32>
    %41 = math.erf %40 : vector<128x128xf32>
    %cst_21 = arith.constant 1.000000e+00 : f32
    %42 = vector.broadcast %cst_21 : f32 to vector<128x128xf32>
    %43 = arith.addf %42, %41 : vector<128x128xf32>
    %44 = arith.mulf %38, %43 : vector<128x128xf32>
    %45 = vector.shape_cast %44 : vector<128x128xf32> to vector<8x16x128xf32>
    %c0_22 = arith.constant 0 : index
    %c0_23 = arith.constant 0 : index
    %c0_24 = arith.constant 0 : index
    %46 = vector.load %arg7[%c0_22, %c0_23, %c0_24] : memref<4x1x128xf32, #tpu.memory_space<vmem>>, vector<1x1x128xf32>
    %47 = vector.shape_cast %46 : vector<1x1x128xf32> to vector<1x128xf32>
    %48 = vector.shape_cast %47 : vector<1x128xf32> to vector<1x1x128xf32>
    %49 = vector.broadcast %48 : vector<1x1x128xf32> to vector<8x16x128xf32>
    %50 = arith.mulf %45, %49 : vector<8x16x128xf32>
    %cst_25 = arith.constant dense<0.000000e+00> : vector<8x16xf32>
    %51 = vector.multi_reduction <add>, %50, %cst_25 [2] : vector<8x16x128xf32> to vector<8x16xf32>
    %c0_26 = arith.constant 0 : index
    %c0_27 = arith.constant 0 : index
    %c0_28 = arith.constant 0 : index
    %52 = vector.load %arg8[%c0_26, %c0_27, %c0_28] : memref<4x1x1xf32, #tpu.memory_space<vmem>>, vector<1x1x1xf32>
    %53 = vector.shape_cast %52 : vector<1x1x1xf32> to vector<1x1xf32>
    %54 = vector.broadcast %53 : vector<1x1xf32> to vector<8x16xf32>
    %55 = arith.addf %51, %54 : vector<8x16xf32>
    %56 = arith.addf %55, %2 : vector<8x16xf32>
    %cst_29 = arith.constant dense<0xFF800000> : vector<8xf32>
    %57 = vector.multi_reduction <maximumf>, %56, %cst_29 [1] : vector<8x16xf32> to vector<8xf32>
    %58 = vector.shape_cast %57 : vector<8xf32> to vector<8x1xf32>
    %59 = vector.broadcast %58 : vector<8x1xf32> to vector<8x16xf32>
    %60 = arith.subf %56, %59 : vector<8x16xf32>
    %61 = math.exp %60 : vector<8x16xf32>
    %cst_30 = arith.constant dense<0.000000e+00> : vector<8xf32>
    %62 = vector.multi_reduction <add>, %61, %cst_30 [1] : vector<8x16xf32> to vector<8xf32>
    %63 = vector.shape_cast %62 : vector<8xf32> to vector<8x1xf32>
    %64 = vector.broadcast %63 : vector<8x1xf32> to vector<8x16xf32>
    %65 = arith.divf %61, %64 : vector<8x16xf32>
    %66 = vector.shape_cast %65 : vector<8x16xf32> to vector<8x16x1xf32>
    %67 = vector.broadcast %66 : vector<8x16x1xf32> to vector<8x16x128xf32>
    %68 = arith.mulf %67, %0 : vector<8x16x128xf32>
    %cst_31 = arith.constant dense<0.000000e+00> : vector<8x128xf32>
    %69 = vector.multi_reduction <add>, %68, %cst_31 [1] : vector<8x16x128xf32> to vector<8x128xf32>
    %70 = vector.extract_strided_slice %7 {offsets = [0, 128], sizes = [128, 128], strides = [1, 1]} : vector<128x512xf32> to vector<128x128xf32>
    %cst_32 = arith.constant dense<0.000000e+00> : vector<128xf32>
    %71 = vector.multi_reduction <add>, %70, %cst_32 [1] : vector<128x128xf32> to vector<128xf32>
    %72 = vector.shape_cast %71 : vector<128xf32> to vector<128x1xf32>
    %cst_33 = arith.constant 1.280000e+02 : f32
    %73 = vector.broadcast %cst_33 : f32 to vector<128x1xf32>
    %74 = arith.divf %72, %73 : vector<128x1xf32>
    %75 = vector.broadcast %74 : vector<128x1xf32> to vector<128x128xf32>
    %76 = arith.subf %70, %75 : vector<128x128xf32>
    %77 = vector.broadcast %74 : vector<128x1xf32> to vector<128x128xf32>
    %78 = arith.subf %70, %77 : vector<128x128xf32>
    %79 = arith.mulf %76, %78 : vector<128x128xf32>
    %cst_34 = arith.constant dense<0.000000e+00> : vector<128xf32>
    %80 = vector.multi_reduction <add>, %79, %cst_34 [1] : vector<128x128xf32> to vector<128xf32>
    %81 = vector.shape_cast %80 : vector<128xf32> to vector<128x1xf32>
    %cst_35 = arith.constant 1.280000e+02 : f32
    %82 = vector.broadcast %cst_35 : f32 to vector<128x1xf32>
    %83 = arith.divf %81, %82 : vector<128x1xf32>
    %84 = vector.broadcast %74 : vector<128x1xf32> to vector<128x128xf32>
    %85 = arith.subf %70, %84 : vector<128x128xf32>
    %cst_36 = arith.constant 9.99999974E-6 : f32
    %86 = vector.broadcast %cst_36 : f32 to vector<128x1xf32>
    %87 = arith.addf %83, %86 : vector<128x1xf32>
    %88 = math.rsqrt %87 : vector<128x1xf32>
    %89 = vector.broadcast %88 : vector<128x1xf32> to vector<128x128xf32>
    %90 = arith.mulf %85, %89 : vector<128x128xf32>
    %c1 = arith.constant 1 : index
    %c0_37 = arith.constant 0 : index
    %c0_38 = arith.constant 0 : index
    %91 = vector.load %arg5[%c1, %c0_37, %c0_38] : memref<4x1x128xf32, #tpu.memory_space<vmem>>, vector<1x1x128xf32>
    %92 = vector.shape_cast %91 : vector<1x1x128xf32> to vector<1x128xf32>
    %93 = vector.broadcast %92 : vector<1x128xf32> to vector<128x128xf32>
    %94 = arith.mulf %90, %93 : vector<128x128xf32>
    %c1_39 = arith.constant 1 : index
    %c0_40 = arith.constant 0 : index
    %c0_41 = arith.constant 0 : index
    %95 = vector.load %arg6[%c1_39, %c0_40, %c0_41] : memref<4x1x128xf32, #tpu.memory_space<vmem>>, vector<1x1x128xf32>
    %96 = vector.shape_cast %95 : vector<1x1x128xf32> to vector<1x128xf32>
    %97 = vector.broadcast %96 : vector<1x128xf32> to vector<128x128xf32>
    %98 = arith.addf %94, %97 : vector<128x128xf32>
    %cst_42 = arith.constant 5.000000e-01 : f32
    %99 = vector.broadcast %cst_42 : f32 to vector<128x128xf32>
    %100 = arith.mulf %99, %98 : vector<128x128xf32>
    %cst_43 = arith.constant 0.707106769 : f32
    %101 = vector.broadcast %cst_43 : f32 to vector<128x128xf32>
    %102 = arith.mulf %98, %101 : vector<128x128xf32>
    %103 = math.erf %102 : vector<128x128xf32>
    %cst_44 = arith.constant 1.000000e+00 : f32
    %104 = vector.broadcast %cst_44 : f32 to vector<128x128xf32>
    %105 = arith.addf %104, %103 : vector<128x128xf32>
    %106 = arith.mulf %100, %105 : vector<128x128xf32>
    %107 = vector.shape_cast %106 : vector<128x128xf32> to vector<8x16x128xf32>
    %c1_45 = arith.constant 1 : index
    %c0_46 = arith.constant 0 : index
    %c0_47 = arith.constant 0 : index
    %108 = vector.load %arg7[%c1_45, %c0_46, %c0_47] : memref<4x1x128xf32, #tpu.memory_space<vmem>>, vector<1x1x128xf32>
    %109 = vector.shape_cast %108 : vector<1x1x128xf32> to vector<1x128xf32>
    %110 = vector.shape_cast %109 : vector<1x128xf32> to vector<1x1x128xf32>
    %111 = vector.broadcast %110 : vector<1x1x128xf32> to vector<8x16x128xf32>
    %112 = arith.mulf %107, %111 : vector<8x16x128xf32>
    %cst_48 = arith.constant dense<0.000000e+00> : vector<8x16xf32>
    %113 = vector.multi_reduction <add>, %112, %cst_48 [2] : vector<8x16x128xf32> to vector<8x16xf32>
    %c1_49 = arith.constant 1 : index
    %c0_50 = arith.constant 0 : index
    %c0_51 = arith.constant 0 : index
    %114 = vector.load %arg8[%c1_49, %c0_50, %c0_51] : memref<4x1x1xf32, #tpu.memory_space<vmem>>, vector<1x1x1xf32>
    %115 = vector.shape_cast %114 : vector<1x1x1xf32> to vector<1x1xf32>
    %116 = vector.broadcast %115 : vector<1x1xf32> to vector<8x16xf32>
    %117 = arith.addf %113, %116 : vector<8x16xf32>
    %118 = arith.addf %117, %2 : vector<8x16xf32>
    %cst_52 = arith.constant dense<0xFF800000> : vector<8xf32>
    %119 = vector.multi_reduction <maximumf>, %118, %cst_52 [1] : vector<8x16xf32> to vector<8xf32>
    %120 = vector.shape_cast %119 : vector<8xf32> to vector<8x1xf32>
    %121 = vector.broadcast %120 : vector<8x1xf32> to vector<8x16xf32>
    %122 = arith.subf %118, %121 : vector<8x16xf32>
    %123 = math.exp %122 : vector<8x16xf32>
    %cst_53 = arith.constant dense<0.000000e+00> : vector<8xf32>
    %124 = vector.multi_reduction <add>, %123, %cst_53 [1] : vector<8x16xf32> to vector<8xf32>
    %125 = vector.shape_cast %124 : vector<8xf32> to vector<8x1xf32>
    %126 = vector.broadcast %125 : vector<8x1xf32> to vector<8x16xf32>
    %127 = arith.divf %123, %126 : vector<8x16xf32>
    %128 = vector.shape_cast %127 : vector<8x16xf32> to vector<8x16x1xf32>
    %129 = vector.broadcast %128 : vector<8x16x1xf32> to vector<8x16x128xf32>
    %130 = arith.mulf %129, %0 : vector<8x16x128xf32>
    %cst_54 = arith.constant dense<0.000000e+00> : vector<8x128xf32>
    %131 = vector.multi_reduction <add>, %130, %cst_54 [1] : vector<8x16x128xf32> to vector<8x128xf32>
    %132 = vector.extract_strided_slice %7 {offsets = [0, 256], sizes = [128, 128], strides = [1, 1]} : vector<128x512xf32> to vector<128x128xf32>
    %cst_55 = arith.constant dense<0.000000e+00> : vector<128xf32>
    %133 = vector.multi_reduction <add>, %132, %cst_55 [1] : vector<128x128xf32> to vector<128xf32>
    %134 = vector.shape_cast %133 : vector<128xf32> to vector<128x1xf32>
    %cst_56 = arith.constant 1.280000e+02 : f32
    %135 = vector.broadcast %cst_56 : f32 to vector<128x1xf32>
    %136 = arith.divf %134, %135 : vector<128x1xf32>
    %137 = vector.broadcast %136 : vector<128x1xf32> to vector<128x128xf32>
    %138 = arith.subf %132, %137 : vector<128x128xf32>
    %139 = vector.broadcast %136 : vector<128x1xf32> to vector<128x128xf32>
    %140 = arith.subf %132, %139 : vector<128x128xf32>
    %141 = arith.mulf %138, %140 : vector<128x128xf32>
    %cst_57 = arith.constant dense<0.000000e+00> : vector<128xf32>
    %142 = vector.multi_reduction <add>, %141, %cst_57 [1] : vector<128x128xf32> to vector<128xf32>
    %143 = vector.shape_cast %142 : vector<128xf32> to vector<128x1xf32>
    %cst_58 = arith.constant 1.280000e+02 : f32
    %144 = vector.broadcast %cst_58 : f32 to vector<128x1xf32>
    %145 = arith.divf %143, %144 : vector<128x1xf32>
    %146 = vector.broadcast %136 : vector<128x1xf32> to vector<128x128xf32>
    %147 = arith.subf %132, %146 : vector<128x128xf32>
    %cst_59 = arith.constant 9.99999974E-6 : f32
    %148 = vector.broadcast %cst_59 : f32 to vector<128x1xf32>
    %149 = arith.addf %145, %148 : vector<128x1xf32>
    %150 = math.rsqrt %149 : vector<128x1xf32>
    %151 = vector.broadcast %150 : vector<128x1xf32> to vector<128x128xf32>
    %152 = arith.mulf %147, %151 : vector<128x128xf32>
    %c2 = arith.constant 2 : index
    %c0_60 = arith.constant 0 : index
    %c0_61 = arith.constant 0 : index
    %153 = vector.load %arg5[%c2, %c0_60, %c0_61] : memref<4x1x128xf32, #tpu.memory_space<vmem>>, vector<1x1x128xf32>
    %154 = vector.shape_cast %153 : vector<1x1x128xf32> to vector<1x128xf32>
    %155 = vector.broadcast %154 : vector<1x128xf32> to vector<128x128xf32>
    %156 = arith.mulf %152, %155 : vector<128x128xf32>
    %c2_62 = arith.constant 2 : index
    %c0_63 = arith.constant 0 : index
    %c0_64 = arith.constant 0 : index
    %157 = vector.load %arg6[%c2_62, %c0_63, %c0_64] : memref<4x1x128xf32, #tpu.memory_space<vmem>>, vector<1x1x128xf32>
    %158 = vector.shape_cast %157 : vector<1x1x128xf32> to vector<1x128xf32>
    %159 = vector.broadcast %158 : vector<1x128xf32> to vector<128x128xf32>
    %160 = arith.addf %156, %159 : vector<128x128xf32>
    %cst_65 = arith.constant 5.000000e-01 : f32
    %161 = vector.broadcast %cst_65 : f32 to vector<128x128xf32>
    %162 = arith.mulf %161, %160 : vector<128x128xf32>
    %cst_66 = arith.constant 0.707106769 : f32
    %163 = vector.broadcast %cst_66 : f32 to vector<128x128xf32>
    %164 = arith.mulf %160, %163 : vector<128x128xf32>
    %165 = math.erf %164 : vector<128x128xf32>
    %cst_67 = arith.constant 1.000000e+00 : f32
    %166 = vector.broadcast %cst_67 : f32 to vector<128x128xf32>
    %167 = arith.addf %166, %165 : vector<128x128xf32>
    %168 = arith.mulf %162, %167 : vector<128x128xf32>
    %169 = vector.shape_cast %168 : vector<128x128xf32> to vector<8x16x128xf32>
    %c2_68 = arith.constant 2 : index
    %c0_69 = arith.constant 0 : index
    %c0_70 = arith.constant 0 : index
    %170 = vector.load %arg7[%c2_68, %c0_69, %c0_70] : memref<4x1x128xf32, #tpu.memory_space<vmem>>, vector<1x1x128xf32>
    %171 = vector.shape_cast %170 : vector<1x1x128xf32> to vector<1x128xf32>
    %172 = vector.shape_cast %171 : vector<1x128xf32> to vector<1x1x128xf32>
    %173 = vector.broadcast %172 : vector<1x1x128xf32> to vector<8x16x128xf32>
    %174 = arith.mulf %169, %173 : vector<8x16x128xf32>
    %cst_71 = arith.constant dense<0.000000e+00> : vector<8x16xf32>
    %175 = vector.multi_reduction <add>, %174, %cst_71 [2] : vector<8x16x128xf32> to vector<8x16xf32>
    %c2_72 = arith.constant 2 : index
    %c0_73 = arith.constant 0 : index
    %c0_74 = arith.constant 0 : index
    %176 = vector.load %arg8[%c2_72, %c0_73, %c0_74] : memref<4x1x1xf32, #tpu.memory_space<vmem>>, vector<1x1x1xf32>
    %177 = vector.shape_cast %176 : vector<1x1x1xf32> to vector<1x1xf32>
    %178 = vector.broadcast %177 : vector<1x1xf32> to vector<8x16xf32>
    %179 = arith.addf %175, %178 : vector<8x16xf32>
    %180 = arith.addf %179, %2 : vector<8x16xf32>
    %cst_75 = arith.constant dense<0xFF800000> : vector<8xf32>
    %181 = vector.multi_reduction <maximumf>, %180, %cst_75 [1] : vector<8x16xf32> to vector<8xf32>
    %182 = vector.shape_cast %181 : vector<8xf32> to vector<8x1xf32>
    %183 = vector.broadcast %182 : vector<8x1xf32> to vector<8x16xf32>
    %184 = arith.subf %180, %183 : vector<8x16xf32>
    %185 = math.exp %184 : vector<8x16xf32>
    %cst_76 = arith.constant dense<0.000000e+00> : vector<8xf32>
    %186 = vector.multi_reduction <add>, %185, %cst_76 [1] : vector<8x16xf32> to vector<8xf32>
    %187 = vector.shape_cast %186 : vector<8xf32> to vector<8x1xf32>
    %188 = vector.broadcast %187 : vector<8x1xf32> to vector<8x16xf32>
    %189 = arith.divf %185, %188 : vector<8x16xf32>
    %190 = vector.shape_cast %189 : vector<8x16xf32> to vector<8x16x1xf32>
    %191 = vector.broadcast %190 : vector<8x16x1xf32> to vector<8x16x128xf32>
    %192 = arith.mulf %191, %0 : vector<8x16x128xf32>
    %cst_77 = arith.constant dense<0.000000e+00> : vector<8x128xf32>
    %193 = vector.multi_reduction <add>, %192, %cst_77 [1] : vector<8x16x128xf32> to vector<8x128xf32>
    %194 = vector.extract_strided_slice %7 {offsets = [0, 384], sizes = [128, 128], strides = [1, 1]} : vector<128x512xf32> to vector<128x128xf32>
    %cst_78 = arith.constant dense<0.000000e+00> : vector<128xf32>
    %195 = vector.multi_reduction <add>, %194, %cst_78 [1] : vector<128x128xf32> to vector<128xf32>
    %196 = vector.shape_cast %195 : vector<128xf32> to vector<128x1xf32>
    %cst_79 = arith.constant 1.280000e+02 : f32
    %197 = vector.broadcast %cst_79 : f32 to vector<128x1xf32>
    %198 = arith.divf %196, %197 : vector<128x1xf32>
    %199 = vector.broadcast %198 : vector<128x1xf32> to vector<128x128xf32>
    %200 = arith.subf %194, %199 : vector<128x128xf32>
    %201 = vector.broadcast %198 : vector<128x1xf32> to vector<128x128xf32>
    %202 = arith.subf %194, %201 : vector<128x128xf32>
    %203 = arith.mulf %200, %202 : vector<128x128xf32>
    %cst_80 = arith.constant dense<0.000000e+00> : vector<128xf32>
    %204 = vector.multi_reduction <add>, %203, %cst_80 [1] : vector<128x128xf32> to vector<128xf32>
    %205 = vector.shape_cast %204 : vector<128xf32> to vector<128x1xf32>
    %cst_81 = arith.constant 1.280000e+02 : f32
    %206 = vector.broadcast %cst_81 : f32 to vector<128x1xf32>
    %207 = arith.divf %205, %206 : vector<128x1xf32>
    %208 = vector.broadcast %198 : vector<128x1xf32> to vector<128x128xf32>
    %209 = arith.subf %194, %208 : vector<128x128xf32>
    %cst_82 = arith.constant 9.99999974E-6 : f32
    %210 = vector.broadcast %cst_82 : f32 to vector<128x1xf32>
    %211 = arith.addf %207, %210 : vector<128x1xf32>
    %212 = math.rsqrt %211 : vector<128x1xf32>
    %213 = vector.broadcast %212 : vector<128x1xf32> to vector<128x128xf32>
    %214 = arith.mulf %209, %213 : vector<128x128xf32>
    %c3 = arith.constant 3 : index
    %c0_83 = arith.constant 0 : index
    %c0_84 = arith.constant 0 : index
    %215 = vector.load %arg5[%c3, %c0_83, %c0_84] : memref<4x1x128xf32, #tpu.memory_space<vmem>>, vector<1x1x128xf32>
    %216 = vector.shape_cast %215 : vector<1x1x128xf32> to vector<1x128xf32>
    %217 = vector.broadcast %216 : vector<1x128xf32> to vector<128x128xf32>
    %218 = arith.mulf %214, %217 : vector<128x128xf32>
    %c3_85 = arith.constant 3 : index
    %c0_86 = arith.constant 0 : index
    %c0_87 = arith.constant 0 : index
    %219 = vector.load %arg6[%c3_85, %c0_86, %c0_87] : memref<4x1x128xf32, #tpu.memory_space<vmem>>, vector<1x1x128xf32>
    %220 = vector.shape_cast %219 : vector<1x1x128xf32> to vector<1x128xf32>
    %221 = vector.broadcast %220 : vector<1x128xf32> to vector<128x128xf32>
    %222 = arith.addf %218, %221 : vector<128x128xf32>
    %cst_88 = arith.constant 5.000000e-01 : f32
    %223 = vector.broadcast %cst_88 : f32 to vector<128x128xf32>
    %224 = arith.mulf %223, %222 : vector<128x128xf32>
    %cst_89 = arith.constant 0.707106769 : f32
    %225 = vector.broadcast %cst_89 : f32 to vector<128x128xf32>
    %226 = arith.mulf %222, %225 : vector<128x128xf32>
    %227 = math.erf %226 : vector<128x128xf32>
    %cst_90 = arith.constant 1.000000e+00 : f32
    %228 = vector.broadcast %cst_90 : f32 to vector<128x128xf32>
    %229 = arith.addf %228, %227 : vector<128x128xf32>
    %230 = arith.mulf %224, %229 : vector<128x128xf32>
    %231 = vector.shape_cast %230 : vector<128x128xf32> to vector<8x16x128xf32>
    %c3_91 = arith.constant 3 : index
    %c0_92 = arith.constant 0 : index
    %c0_93 = arith.constant 0 : index
    %232 = vector.load %arg7[%c3_91, %c0_92, %c0_93] : memref<4x1x128xf32, #tpu.memory_space<vmem>>, vector<1x1x128xf32>
    %233 = vector.shape_cast %232 : vector<1x1x128xf32> to vector<1x128xf32>
    %234 = vector.shape_cast %233 : vector<1x128xf32> to vector<1x1x128xf32>
    %235 = vector.broadcast %234 : vector<1x1x128xf32> to vector<8x16x128xf32>
    %236 = arith.mulf %231, %235 : vector<8x16x128xf32>
    %cst_94 = arith.constant dense<0.000000e+00> : vector<8x16xf32>
    %237 = vector.multi_reduction <add>, %236, %cst_94 [2] : vector<8x16x128xf32> to vector<8x16xf32>
    %c3_95 = arith.constant 3 : index
    %c0_96 = arith.constant 0 : index
    %c0_97 = arith.constant 0 : index
    %238 = vector.load %arg8[%c3_95, %c0_96, %c0_97] : memref<4x1x1xf32, #tpu.memory_space<vmem>>, vector<1x1x1xf32>
    %239 = vector.shape_cast %238 : vector<1x1x1xf32> to vector<1x1xf32>
    %240 = vector.broadcast %239 : vector<1x1xf32> to vector<8x16xf32>
    %241 = arith.addf %237, %240 : vector<8x16xf32>
    %242 = arith.addf %241, %2 : vector<8x16xf32>
    %cst_98 = arith.constant dense<0xFF800000> : vector<8xf32>
    %243 = vector.multi_reduction <maximumf>, %242, %cst_98 [1] : vector<8x16xf32> to vector<8xf32>
    %244 = vector.shape_cast %243 : vector<8xf32> to vector<8x1xf32>
    %245 = vector.broadcast %244 : vector<8x1xf32> to vector<8x16xf32>
    %246 = arith.subf %242, %245 : vector<8x16xf32>
    %247 = math.exp %246 : vector<8x16xf32>
    %cst_99 = arith.constant dense<0.000000e+00> : vector<8xf32>
    %248 = vector.multi_reduction <add>, %247, %cst_99 [1] : vector<8x16xf32> to vector<8xf32>
    %249 = vector.shape_cast %248 : vector<8xf32> to vector<8x1xf32>
    %250 = vector.broadcast %249 : vector<8x1xf32> to vector<8x16xf32>
    %251 = arith.divf %247, %250 : vector<8x16xf32>
    %252 = vector.shape_cast %251 : vector<8x16xf32> to vector<8x16x1xf32>
    %253 = vector.broadcast %252 : vector<8x16x1xf32> to vector<8x16x128xf32>
    %254 = arith.mulf %253, %0 : vector<8x16x128xf32>
    %cst_100 = arith.constant dense<0.000000e+00> : vector<8x128xf32>
    %255 = vector.multi_reduction <add>, %254, %cst_100 [1] : vector<8x16x128xf32> to vector<8x128xf32>
    %256 = tpu.concatenate %69, %131, %193, %255 in 1 : vector<8x128xf32>, vector<8x128xf32>, vector<8x128xf32>, vector<8x128xf32> -> vector<8x512xf32>
    %c0_101 = arith.constant 0 : index
    %c0_102 = arith.constant 0 : index
    %257 = vector.load %arg9[%c0_101, %c0_102] : memref<512x128xf32, #tpu.memory_space<vmem>>, vector<512x128xf32>
    %cst_103 = arith.constant dense<0.000000e+00> : vector<8x128xf32>
    %258 = tpu.matmul %256, %257, %cst_103 {dimension_numbers = #tpu.dot_dimension_numbers<[1], [0], [0], [1], [0, 0, 1, 1], [], []>} : vector<8x512xf32>, vector<512x128xf32>, vector<8x128xf32> -> vector<8x128xf32>
    %c0_104 = arith.constant 0 : index
    %c0_105 = arith.constant 0 : index
    %259 = vector.load %arg10[%c0_104, %c0_105] : memref<1x128xf32, #tpu.memory_space<vmem>>, vector<1x128xf32>
    %260 = vector.broadcast %259 : vector<1x128xf32> to vector<8x128xf32>
    %261 = arith.addf %258, %260 : vector<8x128xf32>
    %c0_106 = arith.constant 0 : index
    %c0_107 = arith.constant 0 : index
    %262 = vector.load %arg11[%c0_106, %c0_107] : memref<8x128xf32, #tpu.memory_space<vmem>>, vector<8x128xf32>
    tpu.vector_store %arg11[%c0_106, %c0_107], %261 {strides = array<i32>} : memref<8x128xf32, #tpu.memory_space<vmem>>, vector<8x128xf32>,
    return
  }
  func.func @transform_0(%arg0: i32) -> (i32, i32, i32) {
    %c0_i32 = arith.constant 0 : i32
    %c0_i32_0 = arith.constant 0 : i32
    %c0_i32_1 = arith.constant 0 : i32
    return %arg0, %c0_i32, %c0_i32_0 : i32, i32, i32
  }
  func.func @transform_1(%arg0: i32) -> (i32, i32) {
    %c0_i32 = arith.constant 0 : i32
    %c0_i32_0 = arith.constant 0 : i32
    return %arg0, %c0_i32 : i32, i32
  }
  func.func @transform_2(%arg0: i32) -> (i32, i32) {
    %c0_i32 = arith.constant 0 : i32
    %c0_i32_0 = arith.constant 0 : i32
    %c0_i32_1 = arith.constant 0 : i32
    return %c0_i32, %c0_i32_0 : i32, i32
  }
  func.func @transform_3(%arg0: i32) -> (i32, i32) {
    %c0_i32 = arith.constant 0 : i32
    %c0_i32_0 = arith.constant 0 : i32
    %c0_i32_1 = arith.constant 0 : i32
    return %c0_i32, %c0_i32_0 : i32, i32
  }
  func.func @transform_4(%arg0: i32) -> (i32, i32, i32) {
    %c0_i32 = arith.constant 0 : i32
    %c0_i32_0 = arith.constant 0 : i32
    %c0_i32_1 = arith.constant 0 : i32
    %c0_i32_2 = arith.constant 0 : i32
    return %c0_i32, %c0_i32_0, %c0_i32_1 : i32, i32, i32
  }
  func.func @transform_5(%arg0: i32) -> (i32, i32, i32) {
    %c0_i32 = arith.constant 0 : i32
    %c0_i32_0 = arith.constant 0 : i32
    %c0_i32_1 = arith.constant 0 : i32
    %c0_i32_2 = arith.constant 0 : i32
    return %c0_i32, %c0_i32_0, %c0_i32_1 : i32, i32, i32
  }
  func.func @transform_6(%arg0: i32) -> (i32, i32, i32) {
    %c0_i32 = arith.constant 0 : i32
    %c0_i32_0 = arith.constant 0 : i32
    %c0_i32_1 = arith.constant 0 : i32
    %c0_i32_2 = arith.constant 0 : i32
    return %c0_i32, %c0_i32_0, %c0_i32_1 : i32, i32, i32
  }
  func.func @transform_7(%arg0: i32) -> (i32, i32, i32) {
    %c0_i32 = arith.constant 0 : i32
    %c0_i32_0 = arith.constant 0 : i32
    %c0_i32_1 = arith.constant 0 : i32
    %c0_i32_2 = arith.constant 0 : i32
    return %c0_i32, %c0_i32_0, %c0_i32_1 : i32, i32, i32
  }
  func.func @transform_8(%arg0: i32) -> (i32, i32) {
    %c0_i32 = arith.constant 0 : i32
    %c0_i32_0 = arith.constant 0 : i32
    %c0_i32_1 = arith.constant 0 : i32
    return %c0_i32, %c0_i32_0 : i32, i32
  }
  func.func @transform_9(%arg0: i32) -> (i32, i32) {
    %c0_i32 = arith.constant 0 : i32
    %c0_i32_0 = arith.constant 0 : i32
    %c0_i32_1 = arith.constant 0 : i32
    return %c0_i32, %c0_i32_0 : i32, i32
  }
  func.func @transform_10(%arg0: i32) -> (i32, i32) {
    %c0_i32 = arith.constant 0 : i32
    %c0_i32_0 = arith.constant 0 : i32
    return %arg0, %c0_i32 : i32, i32
  }
}

</mosaic_0001>

<bundles_post_ra>
// kernel: tpu_custom_call.1
= control target key start
LH: loop header
LB: loop body
LE: loop exit
PB: predicated region body
PF: predicated region fallthrough
CT: control target
= control target key end

     0   :  { %s16487_s0 = inlined_call_operand.hbm [shape: f32[16,16,128], index: 0, kind: input, shape index: {}]   ;;  %s16488_s1 = inlined_call_operand.hbm [shape: f32[16,16], index: 1, kind: input, shape index: {}]   ;;  %s16489_s2 = inlined_call_operand.hbm [shape: f32[128,512], index: 2, kind: input, shape index: {}]   ;;  %s16490_s3 = inlined_call_operand.vmem [shape: f32[1,512], index: 3, kind: input, shape index: {}]   ;;  %s16491_s4 = inlined_call_operand.hbm [shape: f32[4,1,128], index: 4, kind: input, shape index: {}]   ;;  %s16492_s5 = inlined_call_operand.hbm [shape: f32[4,1,128], index: 5, kind: input, shape index: {}]   ;;  %s16493_s6 = inlined_call_operand.vmem [shape: f32[4,1,128], index: 6, kind: input, shape index: {}]   ;;  %s16494_s7 = inlined_call_operand.vmem [shape: f32[4,1,1], index: 7, kind: input, shape index: {}]   ;;  %s16495_s8 = inlined_call_operand.hbm [shape: f32[512,128], index: 8, kind: input, shape index: {}]   ;;  %s16496_s9 = inlined_call_operand.vmem [shape: f32[1,128], index: 9, kind: input, shape index: {}]   ;;  %s16497_s10 = inlined_call_operand.hbm [shape: f32[16,128], index: 10, kind: output, shape index: {}]  }
   0x1   :  { %16701 = sst [smem:[#allocation100_spill]] %s16489_s2 }
   0x2   :  { %16702 = sst [smem:[#allocation101_spill]] %s16491_s4 }
   0x3   :  { %16703 = sst [smem:[#allocation102_spill]] %s16492_s5 }
   0x4   :  { %16704 = sst [smem:[#allocation103_spill]] %s16495_s8 }
   0x5   :  { %15 = vsyncpa [#allocation3], 0 }
   0x6   :  { %17 = vsyncpa [#allocation3 + $0x1], 0 }
   0x7   :  { %18 = vsyncpa [#allocation6], 0 }
   0x8   :  { %20 = vsyncpa [#allocation6 + $0x1], 0 }
   0x9   :  { %21 = vsyncpa [#allocation9], 0 }
   0xa   :  { %22 = vsyncpa [#allocation12], 0 }
   0xb   :  { %23 = vsyncpa [#allocation4], 0 }
   0xc   :  { %25 = vsyncpa [#allocation4 + $0x1], 0  ;;  %s9290_s13 = smov 0   ;;  %s9292_s14 = smov 0  }
   0xd   :  { %s9294_s15 = smov 0   ;;  %s9296_s16 = smov 0  }
   0xe LB: > { %16705 = sst [smem:[#allocation20_spill]] %s9209_s13  ;;  %s9311_s17 = sadd.s32 4294967295, %s9221_s16   ;;  %s9221_s16 = sphi %s9296_s16, %s17379_s16   ;;  %s9217_s15 = sphi %s9294_s15, %s17381_s15   ;;  %s9213_s14 = sphi %s9292_s14, %s17383_s14   ;;  %s9209_s13 = sphi %s9290_s13, %s17382_s13  }
   0xf   : > { %16706 = sst [smem:[#allocation21_spill]] %s9217_s15  ;;  %s8210_s18 = sadd.s32 4294967294, %s9221_s16  }
  0x10   : > { %p51_p0 = scmp.ne.s32.totalorder %s9213_s14, %s9209_s13  ;;  %p52_p1 = scmp.eq.s32.totalorder %s9311_s17, 0 }
  0x11   : > { %p269_p2 = scmp.eq.s32.totalorder %s9311_s17, 1  ;;  %p275_p3 = scmp.eq.s32.totalorder %s8210_s18, 1 }
  0x12   : > { %p9320_p4 = por %p52_p1, %p51_p0  ;;  %p8211_p5 = scmp.ge.s32.totalorder %s9221_s16, 1 }
  0x13   : > { %p9325_p6 = por %p275_p3, %p51_p0  ;;  %p282_p7 = scmp.lt.s32.totalorder %s9221_s16, 3 }
  0x14   : > { %s16710_s2 = sld [smem:[#allocation100_spill]]  ;;  %s9223_s25 = smov [#allocation7]  }
  0x15   : > { %s16708_s20 = scalar_select %p9325_p6, 1, 0 }
  0x16   : > { %p9333_p8 = pnand %p8211_p5, %p282_p7  ;;  %s295_s26 = sshll.u32 %s9223_s25, 4  ;;  %s296_s26 = int_to_ptr.vmem [resolvable:$true] %s295_s26 }
  0x17   : > { %16709 = sst [smem:[#allocation22_spill]] %s16708_s20  ;;  %s9224_s11 = smov 512  }
  0x18   : > { %p8329_p9 = pneg %p9333_p8  ;;  %s16713_s4 = sld [smem:[#allocation101_spill]] }
  0x19   : > { %s9225_s12 = smov 32   ;;  %s9226_s18 = smov [#allocation8]  }
  0x1a   : > { %s293_s23 = sshll.u32 %s16710_s2, 4  ;;  %p9341_p10 = pnand %p8329_p9, %p52_p1  ;;  %s294_s23 = int_to_ptr.hbm [resolvable:$true] %s293_s23 }
  0x1b   : > { %s312_s21 = sshll.u32 %s9226_s18, 4  ;;  %s9227_s22 = smov 16   ;;  %s313_s21 = int_to_ptr.vmem [resolvable:$true] %s312_s21 }
  0x1c   : > { %8332 = dma.hbm_to_vmem [thread:$0]  (!%p9341_p10), %s294_s23, 8192, %s296_s26, [#allocation6], %s9224_s11, %s9224_s11, %s9225_s12  }
  0x1d   : > { %s9228_s25 = smov 1   ;;  %s16714_s5 = sld [smem:[#allocation102_spill]] }
  0x1e   : > { %s310_s30 = sshll.u32 %s16713_s4, 4  ;;  %s9229_s29 = smov [#allocation10]   ;;  %s311_s30 = int_to_ptr.hbm [resolvable:$true] %s310_s30 }
  0x1f   : > { %8335 = dma.hbm_to_vmem [thread:$0]  (!%p9341_p10), %s311_s30, 64, %s313_s21, [#allocation9], %s9227_s22, %s9227_s22, %s9228_s25  }
  0x20   : > { %s326_s23 = sshll.u32 %s9229_s29, 4  ;;  %s16715_s8 = sld [smem:[#allocation103_spill]]  ;;  %s327_s23 = int_to_ptr.vmem [resolvable:$true] %s326_s23 }
  0x21   : > { %s9230_s2 = smov [#allocation11]   ;;  %s16499_s30 = smov 128  }
  0x22   : > { %s346_s20 = sshll.u32 %s9230_s2, 4  ;;  %s16500_s18 = smov 8   ;;  %s347_s20 = int_to_ptr.vmem [resolvable:$true] %s346_s20 }
  0x23   : > { %s324_s28 = sshll.u32 %s16714_s5, 4  ;;  %s9367_s21 = sadd.s32 1, %s9221_s16   ;;  %s325_s28 = int_to_ptr.hbm [resolvable:$true] %s324_s28 }
  0x24   : > { %8338 = dma.hbm_to_vmem [thread:$0]  (!%p9341_p10), %s325_s28, 64, %s327_s23, [#allocation9], %s9227_s22, %s9227_s22, %s9228_s25  }
  0x25   : > { %16716 = sst [smem:[#allocation23_spill]] %s9367_s21  ;;  %s35_s29 = ssub.s32 %s9221_s16, %s9367_s21 }
  0x26   : > { %s344_s12 = sshll.u32 %s16715_s8, 4  ;;  %p36_p12 = scmp.eq.s32.totalorder %s35_s29, 0  ;;  %s345_s12 = int_to_ptr.hbm [resolvable:$true] %s344_s12 }
  0x27   : > { %8341 = dma.hbm_to_vmem [thread:$0]  (!%p9341_p10), %s345_s12, 8192, %s347_s20, [#allocation12], %s16499_s30, %s16499_s30, %s16500_s18  }
  0x28   : > { %s38_s22 = sadd.s32 1, %s9217_s15  ;;  %p45_p13 = scmp.ne.s32.totalorder %s9217_s15, %s9213_s14 }
  0x29   : > { %p46_p0 = scmp.eq.s32.totalorder %s9221_s16, 0  ;;  %p8357_p7 = scmp.lt.s32.totalorder %s9221_s16, 2 }
  0x2a   : > { %s9376_s25 = scalar_select %p36_p12, %s9217_s15, %s38_s22  }
  0x2b   : > { %p47_p3 = por %p46_p0, %p45_p13  ;;  %p9380_p5 = por %p269_p2, %p45_p13 }
  0x2c   : > { %16717 = sst [smem:[#allocation24_spill]] %s9376_s25  ;;  %s9386_s27 = sand.u32 1, %s9217_s15  }
  0x2d   : > { %s8217_s23 = sshll.u32 %s9386_s27, 7  ;;  %s8306_s26 = sshll.u32 %s9221_s16, 7 }
  0x2e   : > { %s373_s2 = scalar_lea.hbm %s16487_s0, %s8306_s26  ;;  %s367_s20 = scalar_lea.vmem [#allocation2], %s8217_s23 }
  0x2f   : > { %s376_s29 = sshll.u32 %s367_s20, 4  ;;  %s374_s22 = sshll.u32 %s373_s2, 4  ;;  %s377_s29 = int_to_ptr.vmem [resolvable:$true] %s376_s29  ;;  %s375_s22 = int_to_ptr.hbm [resolvable:$true] %s374_s22 }
  0x30   : > { %p9393_p2 = pnand %p8357_p7, %p47_p3  ;;  %s386_s18 = sand.u32 1, %s9221_s16  }
  0x31   : > { %s8221_s4 = sshll.u32 %s9386_s27, 3  ;;  %s364_s5 = scalar_lea.sflag [#allocation3], %s9386_s27 }
  0x32   : > { %s9079_s8 = sshra.s32 %s375_s22, 4  ;;  %p9083_p10 = pneg %p9393_p2  ;;  %s9080_s8 = int_to_ptr.hbm [resolvable:$true] %s9079_s8 }
  0x33   : > { %s9081_s25 = scalar_lea.hbm %s9080_s8, 128  ;;  %s9086_s11 = scalar_lea.hbm %s16487_s0, 256 }
  0x34   : > { %p9082_p9 = scmp.ne.s32.totalorder %s9080_s8, %s9081_s25  ;;  %p9087_p0 = scmp.lt.s32.totalorder %s9080_s8, %s16487_s0 }
  0x35   : > { %p9088_p3 = scmp.lt.s32.totalorder %s9086_s11, %s9081_s25 }
  0x36   : > { %p9084_p12 = pnand %p9083_p10, %p9082_p9 }
  0x37   : > { %p9089_p7 = por %p9088_p3, %p9087_p0 }
  0x38   : > { %p9085_p13 = pneg %p9084_p12 }
  0x3a   : > { %p9090_p11 = pnand %p9089_p7, %p9085_p13 }
  0x3c   : > { %9093 = shalt.err (!%p9090_p11)
}
  0x3d   : > { %s16720_s27 = smov 8   ;;  %s16721_s20 = smov 128  }
  0x3e   : > { %8345 = dma.hbm_to_vmem [thread:$0]  (!%p9393_p2), %s375_s22, 2048, %s377_s29, %s364_s5, %s16721_s20, %s16721_s20, %s16720_s27  }
  0x3f   : > { %s8222_s15 = sshll.u32 %s9221_s16, 3  ;;  %s390_s13 = scalar_lea.vmem [#allocation5], %s8221_s4 }
  0x40   : > { %s394_s26 = scalar_lea.hbm %s16488_s1, %s8222_s15  ;;  %s398_s12 = sshll.u32 %s390_s13, 4  ;;  %s399_s12 = int_to_ptr.vmem [resolvable:$true] %s398_s12 }
  0x41   : > { %s396_s8 = sshll.u32 %s394_s26, 4  ;;  %s387_s25 = scalar_lea.sflag [#allocation6], %s386_s18  ;;  %s397_s8 = int_to_ptr.hbm [resolvable:$true] %s396_s8 }
  0x42   : > { %s9109_s11 = sshra.s32 %s397_s8, 4  ;;  %s9116_s22 = scalar_lea.hbm %s16488_s1, 16  ;;  %s9110_s11 = int_to_ptr.hbm [resolvable:$true] %s9109_s11 }
  0x43   : > { %s9111_s2 = scalar_lea.hbm %s9110_s11, 8  ;;  %p9117_p13 = scmp.lt.s32.totalorder %s9110_s11, %s16488_s1 }
  0x44   : > { %p9112_p11 = scmp.ne.s32.totalorder %s9110_s11, %s9111_s2  ;;  %p9118_p0 = scmp.lt.s32.totalorder %s9116_s22, %s9111_s2 }
  0x46   : > { %p9114_p9 = pnand %p9112_p11, %p9083_p10  ;;  %p9119_p3 = por %p9118_p0, %p9117_p13 }
  0x48   : > { %p9115_p12 = pneg %p9114_p9 }
  0x4a   : > { %p9120_p7 = pnand %p9119_p3, %p9115_p12 }
  0x4c   : > { %9123 = shalt.err (!%p9120_p7)
}
  0x4d   : > { %8348 = dma.hbm_to_vmem [thread:$0]  (!%p9393_p2), %s397_s8, 128, %s399_s12, %s387_s25  }
  0x4e   : > { %407 = sbr.rel (%p9333_p8) target bundleno = 3399 (0xd47), region = 60 }
  0x53   : > { %s9434_s4 = sand.u32 1, %s9213_s14  }
  0x54   : > { %s8224_s13 = sshll.u32 %s9434_s4, 7  ;;  %s410_s18 = scalar_lea.sflag [#allocation3], %s9434_s4 }
  0x55   : > { %s9438_s27 = scalar_lea.vmem [#allocation2], %s8224_s13 }
  0x56   : > { %9184 = dma.done.wait (%p9320_p4), %s410_s18, 2048  }
  0x57   : > { %9186 = vsyncadd (%p9320_p4), %s410_s18, 4294965248  ;;  %s419_s24 = sand.u32 1, %s9311_s17   ;;  %s8225_s30 = sshll.u32 %s9434_s4, 3 }
  0x58   : > { %s420_s20 = scalar_lea.sflag [#allocation6], %s419_s24  ;;  %s9448_s23 = scalar_lea.vmem [#allocation5], %s8225_s30 }
  0x59   : > { %9188 = dma.done.wait (%p9320_p4), %s420_s20, 128  }
  0x5a   : > { %9190 = vsyncadd (%p9320_p4), %s420_s20, 4294967168 }
  0x5b   : > { %9192 = dma.done.wait (%p52_p1), [#allocation6], 8192  }
  0x5c   : > { %9194 = vsyncadd (%p52_p1), [#allocation6], 4294959104 }
  0x5d   : > { %9196 = dma.done.wait (%p52_p1), [#allocation9], 128  }
  0x5e   : > { %9198 = vsyncadd (%p52_p1), [#allocation9], 4294967168 }
  0x5f   : > { %9200 = dma.done.wait (%p52_p1), [#allocation12], 8192  }
  0x60   : > { %9202 = vsyncadd (%p52_p1), [#allocation12], 4294959104  ;;  %v564_v0 = vld [vmem:[#allocation7 + $0x1e0] sm:$0xff]  ;;  %v565_v1 = vld [vmem:[#allocation7 + $0x1e8] sm:$0xff]  ;;  %v16505_v18 = vlaneseq  ;;  %s8302_s22 = sshll.u32 %s9311_s17, 3  ;;  %s485_s18 = scalar_lea.vmem [#allocation13], %s8225_s30 }
  0x61   : > { %v566_v2 = vld [vmem:[#allocation7 + $0x1f0] sm:$0xff]  ;;  %578 = vmatpush.msra.mxu0 %v564_v0  ;;  %643 = vmatpush.msra.mxu1 %v565_v1  ;;  %v560_v3 = vld [vmem:[#allocation7 + $0x1c0] sm:$0xff]  ;;  %v561_v4 = vld [vmem:[#allocation7 + $0x1c8] sm:$0xff]  ;;  %v9233_v1 = vmov 0   ;;  %s8074_s13 = scalar_lea.hbm %s16497_s10, %s8302_s22  ;;  %s8076_s24 = sshll.u32 %s485_s18, 4  ;;  %s8077_s24 = int_to_ptr.vmem [resolvable:$true] %s8076_s24 }
  0x62   : > { %v562_v5 = vld [vmem:[#allocation7 + $0x1d0] sm:$0xff]  ;;  %708 = vmatpush.msra.mxu2 %v566_v2  ;;  %v556_v6 = vld [vmem:[#allocation7 + $0x1a0] sm:$0xff]  ;;  %v557_v7 = vld [vmem:[#allocation7 + $0x1a8] sm:$0xff]  ;;  %v9467_v22 = vshrl.u32 %v16505_v18, 7  ;;  %s8078_s20 = sshll.u32 %s8074_s13, 4  ;;  %s8064_s17 = scalar_lea.sflag [#allocation4], %s9434_s4  ;;  %s8079_s20 = int_to_ptr.hbm [resolvable:$true] %s8078_s20 }
  0x63   : > { %579 = vmatpush.msra.mxu0 %v560_v3  ;;  %644 = vmatpush.msra.mxu1 %v561_v4  ;;  %v558_v8 = vld [vmem:[#allocation7 + $0x1b0] sm:$0xff]  ;;  %v552_v9 = vld [vmem:[#allocation7 + $0x180] sm:$0xff]  ;;  %v553_v10 = vld [vmem:[#allocation7 + $0x188] sm:$0xff]  ;;  %s9159_s30 = scalar_lea.hbm %s16497_s10, 16 }
  0x64   : > { %709 = vmatpush.msra.mxu2 %v562_v5  ;;  %v554_v11 = vld [vmem:[#allocation7 + $0x190] sm:$0xff]  ;;  %v548_v12 = vld [vmem:[#allocation7 + $0x160] sm:$0xff]  ;;  %v549_v13 = vld [vmem:[#allocation7 + $0x168] sm:$0xff]  ;;  %v9470_v26 = vadd.s32 8, %v9467_v22  ;;  %8407 = vset.pattern.permute.xlu1 %v9467_v22 }
  0x65   : > { %580 = vmatpush.msra.mxu0 %v556_v6  ;;  %645 = vmatpush.msra.mxu1 %v557_v7  ;;  %v550_v14 = vld [vmem:[#allocation7 + $0x170] sm:$0xff]  ;;  %v544_v15 = vld [vmem:[#allocation7 + $0x140] sm:$0xff]  ;;  %v545_v16 = vld [vmem:[#allocation7 + $0x148] sm:$0xff] }
  0x66   : > { %710 = vmatpush.msra.mxu2 %v558_v8  ;;  %v546_v17 = vld [vmem:[#allocation7 + $0x150] sm:$0xff]  ;;  %v540_v19 = vld [vmem:[#allocation7 + $0x120] sm:$0xff]  ;;  %v541_v20 = vld [vmem:[#allocation7 + $0x128] sm:$0xff]  ;;  %8408 = vset.pattern.permute.xlu2 %v9470_v26 }
  0x67   : > { %581 = vmatpush.msra.mxu0 %v552_v9  ;;  %646 = vmatpush.msra.mxu1 %v553_v10  ;;  %v542_v21 = vld [vmem:[#allocation7 + $0x130] sm:$0xff]  ;;  %v536_v23 = vld [vmem:[#allocation7 + $0x100] sm:$0xff]  ;;  %v537_v24 = vld [vmem:[#allocation7 + $0x108] sm:$0xff] }
  0x68   : > { %711 = vmatpush.msra.mxu2 %v554_v11  ;;  %v538_v25 = vld [vmem:[#allocation7 + $0x110] sm:$0xff]  ;;  %v532_v27 = vld [vmem:[#allocation7 + $0xe0] sm:$0xff]  ;;  %v533_v28 = vld [vmem:[#allocation7 + $0xe8] sm:$0xff]  ;;  %8411 = vset.pattern.permute.xlu0 %v9467_v22 }
  0x69   : > { %582 = vmatpush.msra.mxu0 %v548_v12  ;;  %647 = vmatpush.msra.mxu1 %v549_v13  ;;  %v534_v29 = vld [vmem:[#allocation7 + $0xf0] sm:$0xff]  ;;  %v528_v30 = vld [vmem:[#allocation7 + $0xc0] sm:$0xff]  ;;  %v529_v31 = vld [vmem:[#allocation7 + $0xc8] sm:$0xff] }
  0x6a   : > { %712 = vmatpush.msra.mxu2 %v550_v14  ;;  %v530_v32 = vld [vmem:[#allocation7 + $0xd0] sm:$0xff]  ;;  %v524_v33 = vld [vmem:[#allocation7 + $0xa0] sm:$0xff]  ;;  %v525_v34 = vld [vmem:[#allocation7 + $0xa8] sm:$0xff] }
  0x6b   : > { %583 = vmatpush.msra.mxu0 %v544_v15  ;;  %648 = vmatpush.msra.mxu1 %v545_v16  ;;  %v526_v35 = vld [vmem:[#allocation7 + $0xb0] sm:$0xff]  ;;  %v520_v37 = vld [vmem:[#allocation7 + $0x80] sm:$0xff]  ;;  %v521_v38 = vld [vmem:[#allocation7 + $0x88] sm:$0xff] }
  0x6c   : > { %713 = vmatpush.msra.mxu2 %v546_v17  ;;  %v9475_v36 = vld [vmem:[%s9448_s23] sm:$0xff]  ;;  %v516_v41 = vld [vmem:[#allocation7 + $0x60] sm:$0xff]  ;;  %v517_v42 = vld [vmem:[#allocation7 + $0x68] sm:$0xff]  ;;  %s9153_s23 = sshra.s32 %s8079_s20, 4  ;;  %s9154_s23 = int_to_ptr.hbm [resolvable:$true] %s9153_s23 }
  0x6d   : > { %584 = vmatpush.msra.mxu0 %v540_v19  ;;  %649 = vmatpush.msra.mxu1 %v541_v20  ;;  %v1985_v39 = vperm.slane %v9475_v36, 0  ;;  %v522_v40 = vld [vmem:[#allocation7 + $0x90] sm:$0xff]  ;;  %v512_v44 = vld [vmem:[#allocation7 + $0x40] sm:$0xff]  ;;  %v513_v45 = vld [vmem:[#allocation7 + $0x48] sm:$0xff]  ;;  %v1998_v54 = vperm.slane %v9475_v36, 1  ;;  %v2011_v56 = vperm.slane %v9475_v36, 2  ;;  %p9160_p2 = scmp.lt.s32.totalorder %s9154_s23, %s16497_s10 }
  0x6e   : > { %714 = vmatpush.msra.mxu2 %v542_v21  ;;  %v518_v43 = vld [vmem:[#allocation7 + $0x70] sm:$0xff]  ;;  %v508_v47 = vld [vmem:[#allocation7 + $0x20] sm:$0xff]  ;;  %v509_v48 = vld [vmem:[#allocation7 + $0x28] sm:$0xff]  ;;  %v2024_v58 = vperm.slane %v9475_v36, 3  ;;  %v2037_v60 = vperm.slane %v9475_v36, 4  ;;  %v2050_v62 = vperm.slane %v9475_v36, 5 }
  0x6f   : > { %585 = vmatpush.msra.mxu0 %v536_v23  ;;  %650 = vmatpush.msra.mxu1 %v537_v24  ;;  %v514_v46 = vld [vmem:[#allocation7 + $0x50] sm:$0xff]  ;;  %v504_v50 = vld [vmem:[#allocation7] sm:$0xff]  ;;  %v505_v51 = vld [vmem:[#allocation7 + $0x8] sm:$0xff]  ;;  %v2063_v4 = vperm.slane %v9475_v36, 6  ;;  %v2076_v6 = vperm.slane %v9475_v36, 7  ;;  %s9155_s19 = scalar_lea.hbm %s9154_s23, 8 }
  0x70   : > { %715 = vmatpush.msra.mxu2 %v538_v25  ;;  %1990 = vperm.xlu1 %8407, %v1985_v39   ;;  %v510_v49 = vld [vmem:[#allocation7 + $0x30] sm:$0xff]  ;;  %v9489_v55 = vld [vmem:[%s9438_s27 + $0x8] sm:$0xff]  ;;  %v9496_v57 = vld [vmem:[%s9438_s27 + $0x10] sm:$0xff]  ;;  %p9156_p1 = scmp.ne.s32.totalorder %s9154_s23, %s9155_s19  ;;  %p9161_p10 = scmp.lt.s32.totalorder %s9159_s30, %s9155_s19 }
  0x71   : > { %586 = vmatpush.msra.mxu0 %v532_v27  ;;  %651 = vmatpush.msra.mxu1 %v533_v28  ;;  %v506_v52 = vld [vmem:[#allocation7 + $0x10] sm:$0xff]  ;;  %v9503_v59 = vld [vmem:[%s9438_s27 + $0x18] sm:$0xff]  ;;  %v9520_v63 = vld [vmem:[%s9438_s27 + $0x28] sm:$0xff] }
  0x72   : > { %716 = vmatpush.msra.mxu2 %v534_v29  ;;  %1996 = vperm.xlu2 %8408, %v1985_v39   ;;  %v9480_v53 = vld [vmem:[%s9438_s27] sm:$0xff]  ;;  %v9529_v2 = vld [vmem:[%s9438_s27 + $0x30] sm:$0xff]  ;;  %v9541_v5 = vld [vmem:[%s9438_s27 + $0x38] sm:$0xff]  ;;  %p9157_p4 = pnand %p9156_p1, %p9380_p5  ;;  %p9162_p11 = por %p9161_p10, %p9160_p2 }
  0x73   : > { %587 = vmatpush.msra.mxu0 %v528_v30  ;;  %652 = vmatpush.msra.mxu1 %v529_v31  ;;  %v9513_v61 = vld [vmem:[%s9438_s27 + $0x20] sm:$0xff]  ;;  %v9554_v8 = vld [vmem:[%s9438_s27 + $0x48] sm:$0xff]  ;;  %v9560_v9 = vld [vmem:[%s9438_s27 + $0x50] sm:$0xff] }
  0x74   : > { %717 = vmatpush.msra.mxu2 %v530_v32  ;;  %2029 = vperm.xlu0 %8411, %v2024_v58   ;;  %v8420_v0 = vld [vmem:[%s16494_s7] ss:$0 sm:$0xff]  ;;  %v8421_v3 = vld [vmem:[%s16494_s7 + $0x1] ss:$0 sm:$0xff]  ;;  %v9566_v10 = vld [vmem:[%s9438_s27 + $0x58] sm:$0xff]  ;;  %p9158_p8 = pneg %p9157_p4 }
  0x75   : > { %588 = vmatpush.msra.mxu0 %v524_v33  ;;  %653 = vmatpush.msra.mxu1 %v525_v34  ;;  %v9548_v7 = vld [vmem:[%s9438_s27 + $0x40] sm:$0xff]  ;;  %v9578_v12 = vld [vmem:[%s9438_s27 + $0x68] sm:$0xff]  ;;  %v9584_v13 = vld [vmem:[%s9438_s27 + $0x70] sm:$0xff] }
  0x76   : > { %718 = vmatpush.msra.mxu2 %v526_v35  ;;  %v9572_v11 = vld [vmem:[%s9438_s27 + $0x60] sm:$0xff]  ;;  %v9590_v14 = vld [vmem:[%s9438_s27 + $0x78] sm:$0xff]  ;;  %v531_v18 = vld [vmem:[#allocation7 + $0xd8] sm:$0xff]  ;;  %p9163_p9 = pnand %p9162_p11, %p9158_p8 }
  0x77   : > { %589 = vmatpush.msra.mxu0 %v520_v37  ;;  %654 = vmatpush.msra.mxu1 %v521_v38  ;;  %v9595_v15 = vld [vmem:[%s16490_s3] sm:$0xf] }
  0x78   : > { %719 = vmatpush.msra.mxu2 %v522_v40  ;;  %8410 = vset.pattern.permute.xlu1 %v9470_v26  ;;  %16722 = vst [vmem:[#allocation25_spill] sm:$0xff] %v9595_v15  ;;  %v9601_v16 = vperm.slane %v9595_v15, 0  ;;  %v9607_v21 = vperm.slane %v9595_v15, 1 }
  0x79   : > { %590 = vmatpush.msra.mxu0 %v516_v41  ;;  %655 = vmatpush.msra.mxu1 %v517_v42 }
  0x7a   : > { %720 = vmatpush.msra.mxu2 %v518_v43  ;;  %8409 = vset.pattern.permute.xlu2 %v9467_v22 }
  0x7b   : > { %591 = vmatpush.msra.mxu0 %v512_v44  ;;  %656 = vmatpush.msra.mxu1 %v513_v45 }
  0x7c   : > { %721 = vmatpush.msra.mxu2 %v514_v46  ;;  %8414 = vset.pattern.permute.xlu0 %v9470_v26 }
  0x7d   : > { %592 = vmatpush.msra.mxu0 %v508_v47  ;;  %657 = vmatpush.msra.mxu1 %v509_v48 }
  0x7e   : > { %722 = vmatpush.msra.mxu2 %v510_v49 }
  0x7f   : > { %593 = vmatpush.msra.mxu0 %v504_v50  ;;  %658 = vmatpush.msra.mxu1 %v505_v51 }
  0x80   : > { %723 = vmatpush.msra.mxu2 %v506_v52  ;;  %594 = vmatmul.f32.vlgmr.msra.gmra.mxu0 %v9480_v53 }
  0x81   : > { %659 = vmatmul.f32.vlgmr.msra.gmra.mxu1 %v9480_v53  ;;  %724 = vmatmul.f32.vlgmr.msra.gmra.mxu2 %v9480_v53 }
  0x82   : > { %2009 = vperm.xlu1 %8410, %v1998_v54   ;;  %2003 = vperm.xlu2 %8409, %v1998_v54  }
  0x84   : > { %2061 = vperm.xlu0 %8414, %v2050_v62  }
  0x88   : > { %597 = vmatmul.f32.gmra.mxu0 %v9489_v55 }
  0x89   : > { %662 = vmatmul.f32.gmra.mxu1 %v9489_v55  ;;  %727 = vmatmul.f32.gmra.mxu2 %v9489_v55 }
  0x8a   : > { %2022 = vperm.xlu1 %8410, %v2011_v56   ;;  %2016 = vperm.xlu2 %8409, %v2011_v56  }
  0x8c   : > { %8415 = vset.pattern.permute.xlu0 %v9233_v1 }
  0x8d   : > { %1965 = vperm.xlu0 %8415, %v8420_v0  }
  0x90   : > { %600 = vmatmul.f32.gmra.mxu0 %v9496_v57 }
  0x91   : > { %665 = vmatmul.f32.gmra.mxu1 %v9496_v57  ;;  %730 = vmatmul.f32.gmra.mxu2 %v9496_v57 }
  0x92   : > { %8413 = vset.pattern.permute.xlu1 %v9467_v22  ;;  %8412 = vset.pattern.permute.xlu2 %v9470_v26 }
  0x95   : > { %3817 = vperm.xlu0 %8415, %v8421_v3  }
  0x98   : > { %603 = vmatmul.f32.gmra.mxu0 %v9503_v59 }
  0x99   : > { %668 = vmatmul.f32.gmra.mxu1 %v9503_v59  ;;  %733 = vmatmul.f32.gmra.mxu2 %v9503_v59 }
  0x9a   : > { %2042 = vperm.xlu1 %8413, %v2037_v60   ;;  %2035 = vperm.xlu2 %8412, %v2024_v58  }
  0xa0   : > { %606 = vmatmul.f32.gmra.mxu0 %v9513_v61 }
  0xa1   : > { %736 = vmatmul.f32.gmra.mxu2 %v9513_v61  ;;  %671 = vmatmul.f32.gmra.mxu1 %v9513_v61 }
  0xa2   : > { %2055 = vperm.xlu1 %8413, %v2050_v62   ;;  %2048 = vperm.xlu2 %8412, %v2037_v60  }
  0xa8   : > { %609 = vmatmul.f32.gmra.mxu0 %v9520_v63 }
  0xa9   : > { %739 = vmatmul.f32.gmra.mxu2 %v9520_v63  ;;  %674 = vmatmul.f32.gmra.mxu1 %v9520_v63 }
  0xaa   : > { %8417 = vset.pattern.permute.xlu1 %v9470_v26  ;;  %8416 = vset.pattern.permute.xlu2 %v9467_v22  ;;  %v9611_v22 = vperm.slane %v9595_v15, 2 }
  0xb0   : > { %612 = vmatmul.f32.gmra.mxu0 %v9529_v2 }
  0xb1   : > { %742 = vmatmul.f32.gmra.mxu2 %v9529_v2  ;;  %677 = vmatmul.f32.gmra.mxu1 %v9529_v2 }
  0xb2   : > { %2074 = vperm.xlu1 %8417, %v2063_v4   ;;  %2068 = vperm.xlu2 %8416, %v2063_v4  }
  0xb8   : > { %615 = vmatmul.f32.gmra.mxu0 %v9541_v5 }
  0xb9   : > { %745 = vmatmul.f32.gmra.mxu2 %v9541_v5  ;;  %680 = vmatmul.f32.gmra.mxu1 %v9541_v5 }
  0xba   : > { %2087 = vperm.xlu1 %8417, %v2076_v6   ;;  %2081 = vperm.xlu2 %8416, %v2076_v6  }
  0xc0   : > { %618 = vmatmul.f32.gmra.mxu0 %v9548_v7 }
  0xc1   : > { %748 = vmatmul.f32.gmra.mxu2 %v9548_v7  ;;  %683 = vmatmul.f32.gmra.mxu1 %v9548_v7 }
  0xc2   : > { %8418 = vset.pattern.permute.xlu1 %v9233_v1  ;;  %8419 = vset.pattern.permute.xlu2 %v9233_v1 }
  0xc8   : > { %621 = vmatmul.f32.gmra.mxu0 %v9554_v8 }
  0xc9   : > { %751 = vmatmul.f32.gmra.mxu2 %v9554_v8  ;;  %686 = vmatmul.f32.gmra.mxu1 %v9554_v8 }
  0xd0   : > { %624 = vmatmul.f32.gmra.mxu0 %v9560_v9 }
  0xd1   : > { %754 = vmatmul.f32.gmra.mxu2 %v9560_v9  ;;  %689 = vmatmul.f32.gmra.mxu1 %v9560_v9 }
  0xd8   : > { %627 = vmatmul.f32.gmra.mxu0 %v9566_v10 }
  0xd9   : > { %757 = vmatmul.f32.gmra.mxu2 %v9566_v10  ;;  %692 = vmatmul.f32.gmra.mxu1 %v9566_v10 }
  0xe0   : > { %630 = vmatmul.f32.gmra.mxu0 %v9572_v11 }
  0xe1   : > { %760 = vmatmul.f32.gmra.mxu2 %v9572_v11  ;;  %695 = vmatmul.f32.gmra.mxu1 %v9572_v11 }
  0xe8   : > { %633 = vmatmul.f32.gmra.mxu0 %v9578_v12 }
  0xe9   : > { %698 = vmatmul.f32.gmra.mxu1 %v9578_v12  ;;  %763 = vmatmul.f32.gmra.mxu2 %v9578_v12 }
  0xf0   : > { %636 = vmatmul.f32.gmra.mxu0 %v9584_v13 }
  0xf1   : > { %701 = vmatmul.f32.gmra.mxu1 %v9584_v13  ;;  %766 = vmatmul.f32.gmra.mxu2 %v9584_v13 }
  0xf8   : > { %639 = vmatmul.f32.gmra.mxu0 %v9590_v14 }
  0xf9   : > { %704 = vmatmul.f32.gmra.mxu1 %v9590_v14  ;;  %769 = vmatmul.f32.gmra.mxu2 %v9590_v14 }
  0xfd   : > { %v595_v17 = vpop.f32.mrf.mxu0 }
  0xfe   : > { %v9604_v19 = vadd.f32 %v595_v17, %v9601_v16  ;;  %v660_v20 = vpop.f32.mrf.mxu1  ;;  %v9689_v17 = vpop.permute.xlu1 %1990 }
  0xff   : > { %v9614_v23 = vadd.f32 %v660_v20, %v9607_v21  ;;  %16723 = vst [vmem:[#allocation26_spill] sm:$0xff] %v9689_v17 }
 0x100   : > { %838 = vadd.xlane.f32.xlu0 %v9604_v19 }
 0x104   : > { %v725_v24 = vpop.f32.mrf.mxu2 }
 0x105   : > { %v9617_v25 = vadd.f32 %v725_v24, %v9611_v22  ;;  %v598_v26 = vpop.f32.mrf.mxu0 }
 0x106   : > { %v663_v27 = vpop.f32.mrf.mxu1  ;;  %v9629_v32 = vadd.f32 %v598_v26, %v9601_v16 }
 0x107   : > { %v9620_v28 = vadd.f32 %v663_v27, %v9607_v21  ;;  %4412 = vadd.xlane.f32.xlu1 %v9617_v25 }
 0x108   : > { %2693 = vadd.xlane.f32.xlu0 %v9614_v23 }
 0x109   : > { %2695 = vadd.xlane.f32.xlu2 %v9620_v28 }
 0x10c   : > { %v728_v29 = vpop.f32.mrf.mxu2 }
 0x10d   : > { %v601_v30 = vpop.f32.mrf.mxu0  ;;  %v9626_v31 = vadd.f32 %v728_v29, %v9611_v22  ;;  %v567_v29 = vld [vmem:[#allocation7 + $0x1f8] sm:$0xff] }
 0x10e   : > { %v9632_v33 = vadd.f32 %v601_v30, %v9601_v16  ;;  %v666_v34 = vpop.f32.mrf.mxu1  ;;  %773 = vmatpush.msra.mxu3 %v567_v29 }
 0x10f   : > { %v9638_v35 = vadd.f32 %v666_v34, %v9607_v21  ;;  %v563_v34 = vld [vmem:[#allocation7 + $0x1d8] sm:$0xff] }
 0x110   : > { %842 = vadd.xlane.f32.xlu1 %v9632_v33  ;;  %840 = vadd.xlane.f32.xlu0 %v9629_v32 }
 0x111   : > { %4414 = vadd.xlane.f32.xlu2 %v9626_v31  ;;  %774 = vmatpush.msra.mxu3 %v563_v34 }
 0x114   : > { %v731_v36 = vpop.f32.mrf.mxu2 }
 0x115   : > { %v604_v37 = vpop.f32.mrf.mxu0  ;;  %v9646_v41 = vadd.f32 %v731_v36, %v9611_v22 }
 0x116   : > { %v669_v38 = vpop.f32.mrf.mxu1  ;;  %v9649_v43 = vadd.f32 %v604_v37, %v9601_v16  ;;  %v9702_v37 = vpop.permute.xlu2 %1996 }
 0x117   : > { %v9641_v39 = vadd.f32 %v669_v38, %v9607_v21  ;;  %16724 = vst [vmem:[#allocation27_spill] sm:$0xff] %v9702_v37  ;;  %v559_v38 = vld [vmem:[#allocation7 + $0x1b8] sm:$0xff] }
 0x118   : > { %2697 = vadd.xlane.f32.xlu1 %v9638_v35  ;;  %775 = vmatpush.msra.mxu3 %v559_v38  ;;  %v515_v37 = vld [vmem:[#allocation7 + $0x58] sm:$0xff] }
 0x119   : > { %2699 = vadd.xlane.f32.xlu0 %v9641_v39 }
 0x11c   : > { %v734_v40 = vpop.f32.mrf.mxu2 }
 0x11d   : > { %v607_v42 = vpop.f32.mrf.mxu0  ;;  %v9658_v46 = vadd.f32 %v734_v40, %v9611_v22  ;;  %v555_v40 = vld [vmem:[#allocation7 + $0x198] sm:$0xff] }
 0x11e   : > { %v9652_v44 = vadd.f32 %v607_v42, %v9601_v16  ;;  %v672_v45 = vpop.f32.mrf.mxu1  ;;  %776 = vmatpush.msra.mxu3 %v555_v40 }
 0x11f   : > { %v9661_v47 = vadd.f32 %v672_v45, %v9607_v21 }
 0x120   : > { %846 = vadd.xlane.f32.xlu2 %v9652_v44  ;;  %844 = vadd.xlane.f32.xlu1 %v9649_v43 }
 0x121   : > { %4416 = vadd.xlane.f32.xlu0 %v9646_v41 }
 0x124   : > { %v737_v48 = vpop.f32.mrf.mxu2 }
 0x125   : > { %v610_v49 = vpop.f32.mrf.mxu0  ;;  %v9666_v51 = vadd.f32 %v737_v48, %v9611_v22 }
 0x126   : > { %v675_v50 = vpop.f32.mrf.mxu1  ;;  %v9684_v4 = vadd.f32 %v610_v49, %v9601_v16  ;;  %v9711_v49 = vpop.permute.xlu1 %2009 }
 0x127   : > { %v9669_v52 = vadd.f32 %v675_v50, %v9607_v21  ;;  %16725 = vst [vmem:[#allocation28_spill] sm:$0xff] %v9711_v49 }
 0x128   : > { %2701 = vadd.xlane.f32.xlu2 %v9661_v47  ;;  %4418 = vadd.xlane.f32.xlu1 %v9658_v46 }
 0x12c   : > { %v740_v54 = vpop.f32.mrf.mxu2 }
 0x12d   : > { %v613_v56 = vpop.f32.mrf.mxu0  ;;  %v9698_v36 = vadd.f32 %v740_v54, %v9611_v22  ;;  %v551_v54 = vld [vmem:[#allocation7 + $0x178] sm:$0xff] }
 0x12e   : > { %v9672_v58 = vadd.f32 %v613_v56, %v9601_v16  ;;  %v678_v60 = vpop.f32.mrf.mxu1  ;;  %777 = vmatpush.msra.mxu3 %v551_v54  ;;  %v9732_v49 = vpop.permute.xlu1 %2022 }
 0x12f   : > { %v9678_v1 = vadd.f32 %v678_v60, %v9607_v21  ;;  %16728 = vst [vmem:[#allocation31_spill] sm:$0xff] %v9732_v49  ;;  %v519_v49 = vld [vmem:[#allocation7 + $0x78] sm:$0xff] }
 0x130   : > { %4420 = vadd.xlane.f32.xlu2 %v9666_v51  ;;  %2703 = vadd.xlane.f32.xlu1 %v9669_v52 }
 0x131   : > { %850 = vadd.xlane.f32.xlu0 %v9672_v58 }
 0x134   : > { %v743_v62 = vpop.f32.mrf.mxu2 }
 0x135   : > { %v616_v0 = vpop.f32.mrf.mxu0  ;;  %v9681_v3 = vadd.f32 %v743_v62, %v9611_v22  ;;  %v547_v62 = vld [vmem:[#allocation7 + $0x158] sm:$0xff] }
 0x136   : > { %v681_v6 = vpop.f32.mrf.mxu1  ;;  %v9692_v20 = vadd.f32 %v616_v0, %v9601_v16  ;;  %778 = vmatpush.msra.mxu3 %v547_v62  ;;  %v543_v0 = vld [vmem:[#allocation7 + $0x138] sm:$0xff]  ;;  %v9745_v17 = vpop.permute.xlu1 %2042 }
 0x137   : > { %v9695_v24 = vadd.f32 %v681_v6, %v9607_v21  ;;  %v539_v6 = vld [vmem:[#allocation7 + $0x118] sm:$0xff]  ;;  %16731 = vst [vmem:[#allocation34_spill] sm:$0xff] %v9745_v17 }
 0x138   : > { %848 = vadd.xlane.f32.xlu2 %v9684_v4  ;;  %4424 = vadd.xlane.f32.xlu1 %v9681_v3 }
 0x139   : > { %2705 = vadd.xlane.f32.xlu0 %v9678_v1  ;;  %779 = vmatpush.msra.mxu3 %v543_v0  ;;  %v523_v0 = vld [vmem:[#allocation7 + $0x98] sm:$0xff] }
 0x13b   : > { %780 = vmatpush.msra.mxu3 %v539_v6 }
 0x13c   : > { %v746_v26 = vpop.f32.mrf.mxu2 }
 0x13d   : > { %v619_v27 = vpop.f32.mrf.mxu0  ;;  %v9706_v42 = vadd.f32 %v746_v26, %v9611_v22  ;;  %v9719_v26 = vpop.permute.xlu2 %2003 }
 0x13e   : > { %v684_v30 = vpop.f32.mrf.mxu1  ;;  %16726 = vst [vmem:[#allocation29_spill] sm:$0xff] %v9719_v26  ;;  %v9730_v54 = vadd.f32 %v619_v27, %v9601_v16 }
 0x13f   : > { %v9709_v45 = vadd.f32 %v684_v30, %v9607_v21  ;;  %v9721_v30 = vpop.permute.xlu0 %2029 }
 0x140   : > { %2707 = vadd.xlane.f32.xlu2 %v9695_v24  ;;  %852 = vadd.xlane.f32.xlu1 %v9692_v20  ;;  %16727 = vst [vmem:[#allocation30_spill] sm:$0xff] %v9721_v30 }
 0x141   : > { %4422 = vadd.xlane.f32.xlu0 %v9698_v36 }
 0x144   : > { %v749_v48 = vpop.f32.mrf.mxu2 }
 0x145   : > { %v622_v50 = vpop.f32.mrf.mxu0  ;;  %v9743_v30 = vpop.permute.xlu2 %2016 }
 0x146   : > { %v9714_v56 = vadd.f32 %v622_v50, %v9601_v16  ;;  %v687_v60 = vpop.f32.mrf.mxu1  ;;  %v535_v50 = vld [vmem:[#allocation7 + $0xf8] sm:$0xff]  ;;  %16730 = vst [vmem:[#allocation33_spill] sm:$0xff] %v9743_v30 }
 0x147   : > { %v9724_v38 = vadd.f32 %v687_v60, %v9607_v21  ;;  %781 = vmatpush.msra.mxu3 %v535_v50  ;;  %v527_v60 = vld [vmem:[#allocation7 + $0xb8] sm:$0xff] }
 0x148   : > { %4426 = vadd.xlane.f32.xlu2 %v9706_v42  ;;  %2709 = vadd.xlane.f32.xlu1 %v9709_v45 }
 0x149   : > { %856 = vadd.xlane.f32.xlu0 %v9714_v56  ;;  %782 = vmatpush.msra.mxu3 %v531_v18  ;;  %v9747_v18 = vpop.permute.xlu0 %2061 }
 0x14a   : > { %16732 = vst [vmem:[#allocation35_spill] sm:$0xff] %v9747_v18 }
 0x14b   : > { %783 = vmatpush.msra.mxu3 %v527_v60  ;;  %v9750_v60 = vadd.f32 %v749_v48, %v9611_v22 }
 0x14c   : > { %v752_v29 = vpop.f32.mrf.mxu2 }
 0x14d   : > { %v625_v34 = vpop.f32.mrf.mxu0  ;;  %v9727_v40 = vadd.f32 %v752_v29, %v9611_v22  ;;  %784 = vmatpush.msra.mxu3 %v523_v0  ;;  %v507_v0 = vld [vmem:[#allocation7 + $0x18] sm:$0xff] }
 0x14e   : > { %v690_v62 = vpop.f32.mrf.mxu1  ;;  %v9738_v6 = vadd.f32 %v625_v34, %v9601_v16  ;;  %v511_v34 = vld [vmem:[#allocation7 + $0x38] sm:$0xff] }
 0x14f   : > { %v9741_v27 = vadd.f32 %v690_v62, %v9607_v21  ;;  %785 = vmatpush.msra.mxu3 %v519_v49  ;;  %v9234_v62 = vmov 128.0   ;;  %v9761_v49 = vpop.permute.xlu2 %2035 }
 0x150   : > { %854 = vadd.xlane.f32.xlu2 %v9730_v54  ;;  %4430 = vadd.xlane.f32.xlu1 %v9727_v40  ;;  %8437 = vrcp.f32 %v9234_v62  ;;  %16735 = vst [vmem:[#allocation38_spill] sm:$0xff] %v9761_v49 }
 0x151   : > { %2711 = vadd.xlane.f32.xlu0 %v9724_v38  ;;  %16729 = vst [vmem:[#allocation32_spill] sm:$0xff] %v9741_v27  ;;  %786 = vmatpush.msra.mxu3 %v515_v37 }
 0x153   : > { %787 = vmatpush.msra.mxu3 %v511_v34 }
 0x154   : > { %v755_v29 = vpop.f32.mrf.mxu2 }
 0x155   : > { %v628_v50 = vpop.f32.mrf.mxu0  ;;  %v9756_v17 = vadd.f32 %v755_v29, %v9611_v22  ;;  %788 = vmatpush.msra.mxu3 %v507_v0  ;;  %v9769_v29 = vpop.permute.xlu1 %2055 }
 0x156   : > { %v693_v26 = vpop.f32.mrf.mxu1  ;;  %789 = vmatmul.f32.vlgmr.msra.gmra.mxu3 %v9480_v53  ;;  %v8438_v62 = vpop.eup %8437  ;;  %16737 = vst [vmem:[#allocation40_spill] sm:$0xff] %v9769_v29  ;;  %v9781_v53 = vadd.f32 %v628_v50, %v9601_v16 }
 0x157   : > { %16733 = vst [vmem:[#allocation36_spill] sm:$0xff] %v9756_v17  ;;  %v9759_v18 = vadd.f32 %v693_v26, %v9607_v21  ;;  %v9771_v26 = vpop.permute.xlu0 %1965  ;;  %v871_v34 = vmul.f32 128.0, %v8438_v62  ;;  %v9784_v29 = vpop.permute.xlu2 %2048  ;;  %vm875_vm0 = vweird.f32 %v8438_v62 }
 0x158   : > { %2713 = vadd.xlane.f32.xlu2 %v9741_v27  ;;  %858 = vadd.xlane.f32.xlu1 %v9738_v6  ;;  %16738 = vst [vmem:[#allocation41_spill] sm:$0xff] %v9771_v26 }
 0x159   : > { %4428 = vadd.xlane.f32.xlu0 %v9750_v60  ;;  %16734 = vst [vmem:[#allocation37_spill] sm:$0xff] %v9759_v18  ;;  %v872_v26 = vsub.f32 1.0, %v871_v34 }
 0x15a   : > { %16740 = vst [vmem:[#allocation43_spill] sm:$0xff] %v9784_v29 }
 0x15c   : > { %v758_v48 = vpop.f32.mrf.mxu2 }
 0x15d   : > { %v631_v30 = vpop.f32.mrf.mxu0 }
 0x15e   : > { %v9764_v15 = vadd.f32 %v631_v30, %v9601_v16  ;;  %v696_v37 = vpop.f32.mrf.mxu1  ;;  %792 = vmatmul.f32.gmra.mxu3 %v9489_v55 }
 0x15f   : > { %v9775_v30 = vadd.f32 %v696_v37, %v9607_v21  ;;  %v9791_v37 = vpop.permute.xlu0 %3817  ;;  %v9800_v34 = vpop.permute.xlu2 %2068 }
 0x160   : > { %16736 = vst [vmem:[#allocation39_spill] sm:$0xff] %v9764_v15  ;;  %4432 = vadd.xlane.f32.xlu2 %v9756_v17  ;;  %2715 = vadd.xlane.f32.xlu1 %v9759_v18 }
 0x161   : > { %862 = vadd.xlane.f32.xlu0 %v9764_v15  ;;  %v9788_v15 = vpop.permute.xlu1 %2074  ;;  %16742 = vst [vmem:[#allocation45_spill] sm:$0xff] %v9791_v37 }
 0x162   : > { %16741 = vst [vmem:[#allocation44_spill] sm:$0xff] %v9788_v15 }
 0x163   : > { %16745 = vst [vmem:[#allocation48_spill] sm:$0xff] %v9800_v34 }
 0x164   : > { %v761_v49 = vpop.f32.mrf.mxu2 }
 0x165   : > { %v634_v0 = vpop.f32.mrf.mxu0  ;;  %v9778_v27 = vadd.f32 %v761_v49, %v9611_v22  ;;  %v873_v49 = vmul.f32 %v8438_v62, %v872_v26 }
 0x166   : > { %v699_v17 = vpop.f32.mrf.mxu1  ;;  %v9794_v50 = vadd.f32 %v634_v0, %v9601_v16  ;;  %795 = vmatmul.f32.gmra.mxu3 %v9496_v57 }
 0x167   : > { %16739 = vst [vmem:[#allocation42_spill] sm:$0xff] %v9778_v27  ;;  %v9797_v18 = vadd.f32 %v699_v17, %v9607_v21  ;;  %v874_v15 = vadd.f32 %v8438_v62, %v873_v49 }
 0x168   : > { %860 = vadd.xlane.f32.xlu2 %v9781_v53  ;;  %4436 = vadd.xlane.f32.xlu1 %v9778_v27  ;;  %16743 = vst [vmem:[#allocation46_spill] sm:$0xff] %v9794_v50  ;;  %v9803_v27 = vadd.f32 %v758_v48, %v9611_v22 }
 0x169   : > { %2717 = vadd.xlane.f32.xlu0 %v9775_v30  ;;  %16744 = vst [vmem:[#allocation47_spill] sm:$0xff] %v9797_v18  ;;  %v9808_v17 = vpop.permute.xlu1 %2087  ;;  %v9810_v0 = vsel %vm875_vm0, %v8438_v62, %v874_v15  ;;  %v9825_v15 = vpop.permute.xlu2 %2081 }
 0x16a   : > { %16746 = vst [vmem:[#allocation49_spill] sm:$0xff] %v9808_v17 }
 0x16b   : > { %16747 = vst [vmem:[#allocation50_spill] sm:$0xff] %v9810_v0 }
 0x16c   : > { %v764_v29 = vpop.f32.mrf.mxu2  ;;  %16749 = vst [vmem:[#allocation52_spill] sm:$0xff] %v9825_v15 }
 0x16d   : > { %v637_v55 = vpop.f32.mrf.mxu0  ;;  %v9816_v48 = vadd.f32 %v764_v29, %v9611_v22 }
 0x16e   : > { %v702_v26 = vpop.f32.mrf.mxu1  ;;  %798 = vmatmul.f32.gmra.mxu3 %v9503_v59  ;;  %v9835_v59 = vadd.f32 %v637_v55, %v9601_v16 }
 0x16f   : > { %v9813_v57 = vadd.f32 %v702_v26, %v9607_v21  ;;  %16748 = vst [vmem:[#allocation51_spill] sm:$0xff] %v9816_v48 }
 0x170   : > { %2719 = vadd.xlane.f32.xlu2 %v9797_v18  ;;  %864 = vadd.xlane.f32.xlu1 %v9794_v50 }
 0x171   : > { %4434 = vadd.xlane.f32.xlu0 %v9803_v27 }
 0x173   : > { %v839_v37 = vpop.xlane.xlu0 %838 }
 0x174   : > { %v877_v34 = vmul.f32 %v9810_v0, %v839_v37  ;;  %v767_v50 = vpop.f32.mrf.mxu2 }
 0x175   : > { %v640_v49 = vpop.f32.mrf.mxu0 }
 0x176   : > { %v9820_v18 = vadd.f32 %v640_v49, %v9601_v16  ;;  %v705_v62 = vpop.f32.mrf.mxu1  ;;  %v9829_v29 = vsub.f32 %v9604_v19, %v877_v34  ;;  %801 = vmatmul.f32.gmra.mxu3 %v9513_v61 }
 0x177   : > { %v9832_v49 = vadd.f32 %v705_v62, %v9607_v21 }
 0x178   : > { %4438 = vadd.xlane.f32.xlu2 %v9816_v48  ;;  %2721 = vadd.xlane.f32.xlu1 %v9813_v57  ;;  %v909_v48 = vmul.f32 %v9829_v29, %v9829_v29 }
 0x179   : > { %868 = vadd.xlane.f32.xlu0 %v9820_v18 }
 0x17a   : > { %v4413_v26 = vpop.xlane.xlu1 %4412 }
 0x17b   : > { %v2694_v37 = vpop.xlane.xlu0 %2693  ;;  %v4444_v61 = vmul.f32 %v4413_v26, %v9810_v0 }
 0x17c   : > { %v2725_v17 = vmul.f32 %v2694_v37, %v9810_v0  ;;  %v2696_v19 = vpop.xlane.xlu2 %2695  ;;  %v770_v34 = vpop.f32.mrf.mxu2  ;;  %v9850_v37 = vadd.f32 %v767_v50, %v9611_v22 }
 0x17d   : > { %v9847_v55 = vadd.f32 %v770_v34, %v9611_v22  ;;  %v2726_v15 = vmul.f32 %v2696_v19, %v9810_v0  ;;  %v9864_v22 = vsub.f32 %v9617_v25, %v4444_v61 }
 0x17e   : > { %v9844_v21 = vsub.f32 %v9614_v23, %v2725_v17  ;;  %804 = vmatmul.f32.gmra.mxu3 %v9520_v63 }
 0x17f   : > { %v9861_v17 = vsub.f32 %v9620_v28, %v2726_v15  ;;  %16750 = vst [vmem:[#allocation53_spill] sm:$0xff] %v9864_v22 }
 0x180   : > { %866 = vadd.xlane.f32.xlu2 %v9835_v59  ;;  %925 = vadd.xlane.f32.xlu1 %v909_v48  ;;  %v2757_v48 = vmul.f32 %v9844_v21, %v9844_v21 }
 0x181   : > { %2723 = vadd.xlane.f32.xlu0 %v9832_v49 }
 0x183   : > { %v843_v62 = vpop.xlane.xlu1 %842  ;;  %v841_v16 = vpop.xlane.xlu0 %840 }
 0x184   : > { %v879_v23 = vmul.f32 %v9810_v0, %v843_v62  ;;  %v4415_v50 = vpop.xlane.xlu2 %4414  ;;  %v878_v63 = vmul.f32 %v9810_v0, %v841_v16  ;;  %v2758_v62 = vmul.f32 %v9861_v17, %v9861_v17 }
 0x186   : > { %v9867_v19 = vsub.f32 %v9632_v33, %v879_v23  ;;  %807 = vmatmul.f32.gmra.mxu3 %v9529_v2  ;;  %v9879_v33 = vsub.f32 %v9629_v32, %v878_v63 }
 0x188   : > { %4442 = vadd.xlane.f32.xlu1 %v9847_v55  ;;  %2773 = vadd.xlane.f32.xlu2 %v2757_v48  ;;  %v4476_v48 = vmul.f32 %v9864_v22, %v9864_v22  ;;  %v911_v25 = vmul.f32 %v9867_v19, %v9867_v19 }
 0x189   : > { %4440 = vadd.xlane.f32.xlu0 %v9850_v37 }
 0x18b   : > { %v2698_v26 = vpop.xlane.xlu1 %2697 }
 0x18c   : > { %v2700_v34 = vpop.xlane.xlu0 %2699  ;;  %v2727_v28 = vmul.f32 %v2698_v26, %v9810_v0  ;;  %v910_v26 = vmul.f32 %v9879_v33, %v9879_v33 }
 0x18d   : > { %v2728_v2 = vmul.f32 %v2700_v34, %v9810_v0 }
 0x18e   : > { %v9882_v61 = vsub.f32 %v9638_v35, %v2727_v28  ;;  %810 = vmatmul.f32.gmra.mxu3 %v9541_v5 }
 0x190   : > { %2775 = vadd.xlane.f32.xlu1 %v2758_v62  ;;  %4492 = vadd.xlane.f32.xlu2 %v4476_v48  ;;  %v4445_v62 = vmul.f32 %v4415_v50, %v9810_v0  ;;  %v2759_v32 = vmul.f32 %v9882_v61, %v9882_v61  ;;  %v9899_v48 = vsub.f32 %v9641_v39, %v2728_v2 }
 0x191   : > { %929 = vadd.xlane.f32.xlu0 %v911_v25 }
 0x192   : > { %v9902_v50 = vsub.f32 %v9626_v31, %v4445_v62 }
 0x193   : > { %v847_v15 = vpop.xlane.xlu2 %846  ;;  %v845_v16 = vpop.xlane.xlu1 %844 }
 0x194   : > { %v4417_v23 = vpop.xlane.xlu0 %4416  ;;  %v880_v35 = vmul.f32 %v9810_v0, %v845_v16  ;;  %v4477_v39 = vmul.f32 %v9902_v50, %v9902_v50 }
 0x195   : > { %v4446_v22 = vmul.f32 %v4417_v23, %v9810_v0 }
 0x196   : > { %v9905_v25 = vsub.f32 %v9649_v43, %v880_v35  ;;  %813 = vmatmul.f32.gmra.mxu3 %v9548_v7  ;;  %v881_v7 = vmul.f32 %v9810_v0, %v847_v15 }
 0x197   : > { %v9893_v63 = vsub.f32 %v9646_v41, %v4446_v22  ;;  %v2760_v22 = vmul.f32 %v9899_v48, %v9899_v48 }
 0x198   : > { %927 = vadd.xlane.f32.xlu2 %v910_v26  ;;  %v912_v31 = vmul.f32 %v9905_v25, %v9905_v25 }
 0x199   : > { %2777 = vadd.xlane.f32.xlu0 %v2759_v32  ;;  %v4478_v34 = vmul.f32 %v9893_v63, %v9893_v63 }
 0x19b   : > { %4496 = vadd.xlane.f32.xlu1 %v4478_v34  ;;  %v2702_v5 = vpop.xlane.xlu2 %2701  ;;  %v4419_v28 = vpop.xlane.xlu1 %4418 }
 0x19c   : > { %v4447_v41 = vmul.f32 %v4419_v28, %v9810_v0  ;;  %v2729_v16 = vmul.f32 %v2702_v5, %v9810_v0 }
 0x19e   : > { %v9917_v43 = vsub.f32 %v9658_v46, %v4447_v41  ;;  %v9920_v62 = vsub.f32 %v9661_v47, %v2729_v16  ;;  %816 = vmatmul.f32.gmra.mxu3 %v9554_v8  ;;  %v9929_v46 = vsub.f32 %v9652_v44, %v881_v7 }
 0x1a0   : > { %2779 = vadd.xlane.f32.xlu2 %v2760_v22  ;;  %v4479_v32 = vmul.f32 %v9917_v43, %v9917_v43  ;;  %v2761_v35 = vmul.f32 %v9920_v62, %v9920_v62  ;;  %v913_v41 = vmul.f32 %v9929_v46, %v9929_v46 }
 0x1a1   : > { %4494 = vadd.xlane.f32.xlu0 %v4477_v39 }
 0x1a3   : > { %931 = vadd.xlane.f32.xlu1 %v912_v31  ;;  %v4421_v23 = vpop.xlane.xlu2 %4420  ;;  %v2704_v2 = vpop.xlane.xlu1 %2703 }
 0x1a4   : > { %v851_v26 = vpop.xlane.xlu0 %850  ;;  %v2730_v22 = vmul.f32 %v2704_v2, %v9810_v0 }
 0x1a6   : > { %819 = vmatmul.f32.gmra.mxu3 %v9560_v9 }
 0x1a8   : > { %4498 = vadd.xlane.f32.xlu2 %v4479_v32  ;;  %v9946_v32 = vsub.f32 %v9669_v52, %v2730_v22  ;;  %v883_v52 = vmul.f32 %v9810_v0, %v851_v26 }
 0x1ab   : > { %2781 = vadd.xlane.f32.xlu1 %v2761_v35  ;;  %v849_v34 = vpop.xlane.xlu2 %848  ;;  %v4425_v5 = vpop.xlane.xlu1 %4424 }
 0x1ac   : > { %v882_v47 = vmul.f32 %v9810_v0, %v849_v34  ;;  %v2706_v28 = vpop.xlane.xlu0 %2705  ;;  %v4450_v9 = vmul.f32 %v4425_v5, %v9810_v0  ;;  %v2762_v34 = vmul.f32 %v9946_v32, %v9946_v32 }
 0x1ad   : > { %v2731_v15 = vmul.f32 %v2706_v28, %v9810_v0 }
 0x1ae   : > { %v9936_v8 = vsub.f32 %v9684_v4, %v882_v47  ;;  %822 = vmatmul.f32.gmra.mxu3 %v9566_v10  ;;  %v9963_v5 = vsub.f32 %v9681_v3, %v4450_v9 }
 0x1af   : > { %v9943_v39 = vsub.f32 %v9678_v1, %v2731_v15  ;;  %v4448_v1 = vmul.f32 %v4421_v23, %v9810_v0  ;;  %v9969_v23 = vsub.f32 %v9672_v58, %v883_v52 }
 0x1b0   : > { %933 = vadd.xlane.f32.xlu2 %v913_v41  ;;  %v914_v44 = vmul.f32 %v9936_v8, %v9936_v8  ;;  %v4482_v26 = vmul.f32 %v9963_v5, %v9963_v5 }
 0x1b1   : > { %v2763_v2 = vmul.f32 %v9943_v39, %v9943_v39  ;;  %v9966_v15 = vsub.f32 %v9666_v51, %v4448_v1  ;;  %v915_v51 = vmul.f32 %v9969_v23, %v9969_v23 }
 0x1b2   : > { %935 = vadd.xlane.f32.xlu0 %v914_v44 }
 0x1b3   : > { %v2708_v16 = vpop.xlane.xlu2 %2707  ;;  %v853_v31 = vpop.xlane.xlu1 %852  ;;  %v4480_v3 = vmul.f32 %v9966_v15, %v9966_v15 }
 0x1b4   : > { %v4423_v7 = vpop.xlane.xlu0 %4422  ;;  %v884_v41 = vmul.f32 %v9810_v0, %v853_v31  ;;  %v2732_v22 = vmul.f32 %v2708_v16, %v9810_v0 }
 0x1b5   : > { %v4449_v4 = vmul.f32 %v4423_v7, %v9810_v0 }
 0x1b6   : > { %825 = vmatmul.f32.gmra.mxu3 %v9572_v11  ;;  %v9981_v58 = vsub.f32 %v9692_v20, %v884_v41  ;;  %v9985_v11 = vsub.f32 %v9695_v24, %v2732_v22 }
 0x1b7   : > { %v9954_v35 = vsub.f32 %v9698_v36, %v4449_v4 }
 0x1b8   : > { %2785 = vadd.xlane.f32.xlu2 %v2763_v2  ;;  %16751 = vst [vmem:[#allocation54_spill] sm:$0xff] %v9981_v58  ;;  %v916_v16 = vmul.f32 %v9981_v58, %v9981_v58  ;;  %v2764_v24 = vmul.f32 %v9985_v11, %v9985_v11 }
 0x1b9   : > { %v4481_v47 = vmul.f32 %v9954_v35, %v9954_v35  ;;  %16752 = vst [vmem:[#allocation55_spill] sm:$0xff] %v9985_v11 }
 0x1ba   : > { %2783 = vadd.xlane.f32.xlu0 %v2762_v34 }
 0x1bb   : > { %4502 = vadd.xlane.f32.xlu1 %v4481_v47  ;;  %v4427_v10 = vpop.xlane.xlu2 %4426  ;;  %v2710_v28 = vpop.xlane.xlu1 %2709 }
 0x1bc   : > { %v857_v36 = vpop.xlane.xlu0 %856  ;;  %v2733_v20 = vmul.f32 %v2710_v28, %v9810_v0 }
 0x1be   : > { %828 = vmatmul.f32.gmra.mxu3 %v9578_v12  ;;  %v10003_v41 = vsub.f32 %v9709_v45, %v2733_v20  ;;  %v886_v45 = vmul.f32 %v9810_v0, %v857_v36 }
 0x1c0   : > { %4504 = vadd.xlane.f32.xlu2 %v4482_v26  ;;  %16755 = vst [vmem:[#allocation58_spill] sm:$0xff] %v10003_v41  ;;  %v2765_v22 = vmul.f32 %v10003_v41, %v10003_v41 }
 0x1c2   : > { %4500 = vadd.xlane.f32.xlu0 %v4480_v3 }
 0x1c3   : > { %937 = vadd.xlane.f32.xlu1 %v915_v51  ;;  %v855_v44 = vpop.xlane.xlu2 %854  ;;  %v4431_v31 = vpop.xlane.xlu1 %4430 }
 0x1c4   : > { %v885_v7 = vmul.f32 %v9810_v0, %v855_v44  ;;  %v2712_v4 = vpop.xlane.xlu0 %2711  ;;  %v4453_v28 = vmul.f32 %v4431_v31, %v9810_v0 }
 0x1c5   : > { %v2734_v9 = vmul.f32 %v2712_v4, %v9810_v0 }
 0x1c6   : > { %v9991_v2 = vsub.f32 %v9730_v54, %v885_v7  ;;  %831 = vmatmul.f32.gmra.mxu3 %v9584_v13  ;;  %v10020_v44 = vsub.f32 %v9727_v40, %v4453_v28 }
 0x1c7   : > { %v10000_v34 = vsub.f32 %v9724_v38, %v2734_v9  ;;  %v4451_v38 = vmul.f32 %v4427_v10, %v9810_v0  ;;  %v10026_v10 = vsub.f32 %v9714_v56, %v886_v45 }
 0x1c8   : > { %16753 = vst [vmem:[#allocation56_spill] sm:$0xff] %v9991_v2  ;;  %939 = vadd.xlane.f32.xlu2 %v916_v16  ;;  %v917_v1 = vmul.f32 %v9991_v2, %v9991_v2  ;;  %v4485_v36 = vmul.f32 %v10020_v44, %v10020_v44 }
 0x1c9   : > { %16754 = vst [vmem:[#allocation57_spill] sm:$0xff] %v10000_v34  ;;  %v2766_v26 = vmul.f32 %v10000_v34, %v10000_v34  ;;  %v10023_v7 = vsub.f32 %v9706_v42, %v4451_v38  ;;  %v918_v42 = vmul.f32 %v10026_v10, %v10026_v10 }
 0x1ca   : > { %941 = vadd.xlane.f32.xlu0 %v917_v1  ;;  %16757 = vst [vmem:[#allocation60_spill] sm:$0xff] %v10020_v44 }
 0x1cb   : > { %2787 = vadd.xlane.f32.xlu1 %v2764_v24  ;;  %v2714_v52 = vpop.xlane.xlu2 %2713  ;;  %v859_v47 = vpop.xlane.xlu1 %858  ;;  %16758 = vst [vmem:[#allocation61_spill] sm:$0xff] %v10023_v7  ;;  %v4483_v40 = vmul.f32 %v10023_v7, %v10023_v7 }
 0x1cc   : > { %v4429_v54 = vpop.xlane.xlu0 %4428  ;;  %16759 = vst [vmem:[#allocation62_spill] sm:$0xff] %v10026_v10  ;;  %v887_v4 = vmul.f32 %v9810_v0, %v859_v47  ;;  %v2735_v9 = vmul.f32 %v2714_v52, %v9810_v0 }
 0x1cd   : > { %v4452_v12 = vmul.f32 %v4429_v54, %v9810_v0 }
 0x1ce   : > { %834 = vmatmul.f32.gmra.mxu3 %v9590_v14  ;;  %v10038_v56 = vsub.f32 %v9738_v6, %v887_v4  ;;  %v16761_v14 = vld [vmem:[#allocation32_spill] sm:$0xff]  ;;  %v16765_v4 = vld [vmem:[#allocation37_spill] sm:$0xff] }
 0x1cf   : > { %v10011_v3 = vsub.f32 %v9750_v60, %v4452_v12  ;;  %v10042_v47 = vsub.f32 %v16761_v14, %v2735_v9 }
 0x1d0   : > { %2791 = vadd.xlane.f32.xlu2 %v2766_v26  ;;  %16760 = vst [vmem:[#allocation63_spill] sm:$0xff] %v10038_v56  ;;  %v919_v52 = vmul.f32 %v10038_v56, %v10038_v56 }
 0x1d1   : > { %16756 = vst [vmem:[#allocation59_spill] sm:$0xff] %v10011_v3  ;;  %v4484_v51 = vmul.f32 %v10011_v3, %v10011_v3  ;;  %v2767_v26 = vmul.f32 %v10042_v47, %v10042_v47 }
 0x1d2   : > { %2789 = vadd.xlane.f32.xlu0 %v2765_v22  ;;  %16762 = vst [vmem:[#allocation32_spill] sm:$0xff] %v10042_v47 }
 0x1d3   : > { %4508 = vadd.xlane.f32.xlu1 %v4484_v51  ;;  %v4433_v13 = vpop.xlane.xlu2 %4432  ;;  %v2716_v31 = vpop.xlane.xlu1 %2715 }
 0x1d4   : > { %v863_v60 = vpop.xlane.xlu0 %862  ;;  %v2736_v6 = vmul.f32 %v2716_v31, %v9810_v0 }
 0x1d8   : > { %4510 = vadd.xlane.f32.xlu2 %v4485_v36 }
 0x1da   : > { %4506 = vadd.xlane.f32.xlu0 %v4483_v40 }
 0x1db   : > { %943 = vadd.xlane.f32.xlu1 %v918_v42  ;;  %v861_v16 = vpop.xlane.xlu2 %860  ;;  %v4437_v20 = vpop.xlane.xlu1 %4436 }
 0x1dc   : > { %v888_v1 = vmul.f32 %v9810_v0, %v861_v16  ;;  %v2718_v24 = vpop.xlane.xlu0 %2717  ;;  %v4456_v36 = vmul.f32 %v4437_v20, %v9810_v0  ;;  %v889_v16 = vmul.f32 %v9810_v0, %v863_v60 }
 0x1dd   : > { %v2737_v54 = vmul.f32 %v2718_v24, %v9810_v0  ;;  %v16768_v24 = vld [vmem:[#allocation42_spill] sm:$0xff] }
 0x1de   : > { %v10048_v12 = vsub.f32 %v9781_v53, %v888_v1  ;;  %v10059_v53 = vsub.f32 %v16765_v4, %v2736_v6  ;;  %v10075_v20 = vsub.f32 %v16768_v24, %v4456_v36  ;;  %v16774_v36 = vld [vmem:[#allocation46_spill] sm:$0xff] }
 0x1df   : > { %v10056_v38 = vsub.f32 %v9775_v30, %v2737_v54  ;;  %v4454_v30 = vmul.f32 %v4433_v13, %v9810_v0  ;;  %v16772_v13 = vld [vmem:[#allocation39_spill] sm:$0xff] }
 0x1e0   : > { %16763 = vst [vmem:[#allocation64_spill] sm:$0xff] %v10048_v12  ;;  %945 = vadd.xlane.f32.xlu2 %v919_v52  ;;  %v920_v28 = vmul.f32 %v10048_v12, %v10048_v12  ;;  %v2768_v42 = vmul.f32 %v10059_v53, %v10059_v53  ;;  %v16770_v52 = vld [vmem:[#allocation36_spill] sm:$0xff]  ;;  %v4488_v60 = vmul.f32 %v10075_v20, %v10075_v20 }
 0x1e1   : > { %16764 = vst [vmem:[#allocation65_spill] sm:$0xff] %v10056_v38  ;;  %v2769_v40 = vmul.f32 %v10056_v38, %v10056_v38  ;;  %v10078_v6 = vsub.f32 %v16770_v52, %v4454_v30 }
 0x1e2   : > { %947 = vadd.xlane.f32.xlu0 %v920_v28  ;;  %16766 = vst [vmem:[#allocation37_spill] sm:$0xff] %v10059_v53  ;;  %v10081_v28 = vsub.f32 %v16772_v13, %v889_v16 }
 0x1e3   : > { %2793 = vadd.xlane.f32.xlu1 %v2767_v26  ;;  %v2720_v22 = vpop.xlane.xlu2 %2719  ;;  %v865_v45 = vpop.xlane.xlu1 %864  ;;  %16769 = vst [vmem:[#allocation42_spill] sm:$0xff] %v10075_v20 }
 0x1e4   : > { %v4435_v51 = vpop.xlane.xlu0 %4434  ;;  %16771 = vst [vmem:[#allocation36_spill] sm:$0xff] %v10078_v6  ;;  %v890_v26 = vmul.f32 %v9810_v0, %v865_v45  ;;  %v2738_v4 = vmul.f32 %v2720_v22, %v9810_v0 }
 0x1e5   : > { %v4455_v31 = vmul.f32 %v4435_v51, %v9810_v0  ;;  %16773 = vst [vmem:[#allocation39_spill] sm:$0xff] %v10081_v28  ;;  %v4486_v51 = vmul.f32 %v10078_v6, %v10078_v6 }
 0x1e7   : > { %v10066_v9 = vsub.f32 %v9803_v27, %v4455_v31  ;;  %v921_v31 = vmul.f32 %v10081_v28, %v10081_v28 }
 0x1e8   : > { %2797 = vadd.xlane.f32.xlu2 %v2769_v40  ;;  %v10092_v40 = vsub.f32 %v16774_v36, %v890_v26 }
 0x1e9   : > { %16767 = vst [vmem:[#allocation66_spill] sm:$0xff] %v10066_v9  ;;  %v4487_v1 = vmul.f32 %v10066_v9, %v10066_v9 }
 0x1ea   : > { %2795 = vadd.xlane.f32.xlu0 %v2768_v42  ;;  %16775 = vst [vmem:[#allocation46_spill] sm:$0xff] %v10092_v40  ;;  %v922_v22 = vmul.f32 %v10092_v40, %v10092_v40 }
 0x1eb   : > { %4514 = vadd.xlane.f32.xlu1 %v4487_v1  ;;  %v4439_v14 = vpop.xlane.xlu2 %4438  ;;  %v2722_v54 = vpop.xlane.xlu1 %2721  ;;  %v16776_v1 = vld [vmem:[#allocation47_spill] sm:$0xff] }
 0x1ec   : > { %v869_v27 = vpop.xlane.xlu0 %868  ;;  %v10096_v24 = vsub.f32 %v16776_v1, %v2738_v4  ;;  %v2739_v26 = vmul.f32 %v2722_v54, %v9810_v0 }
 0x1ee   : > { %16777 = vst [vmem:[#allocation47_spill] sm:$0xff] %v10096_v24  ;;  %v2770_v4 = vmul.f32 %v10096_v24, %v10096_v24 }
 0x1f0   : > { %4516 = vadd.xlane.f32.xlu2 %v4488_v60  ;;  %v10104_v60 = vpop.f32.mrf.mxu3 }
 0x1f2   : > { %4512 = vadd.xlane.f32.xlu0 %v4486_v51 }
 0x1f3   : > { %949 = vadd.xlane.f32.xlu1 %v921_v31  ;;  %v867_v30 = vpop.xlane.xlu2 %866  ;;  %v926_v42 = vpop.xlane.xlu1 %925 }
 0x1f4   : > { %v891_v45 = vmul.f32 %v9810_v0, %v867_v30  ;;  %v2724_v16 = vpop.xlane.xlu0 %2723  ;;  %v957_v54 = vmul.f32 %v926_v42, %v9810_v0 }
 0x1f5   : > { %v2740_v52 = vmul.f32 %v2724_v16, %v9810_v0 }
 0x1f6   : > { %v10102_v13 = vsub.f32 %v9835_v59, %v891_v45  ;;  %v10115_v45 = vsub.f32 %v9813_v57, %v2739_v26  ;;  %v892_v26 = vmul.f32 %v9810_v0, %v869_v27  ;;  %v10129_v42 = vadd.f32 1e-05, %v957_v54  ;;  %v16786_v54 = vld [vmem:[#allocation25_spill] sm:$0xff] }
 0x1f7   : > { %v10112_v31 = vsub.f32 %v9832_v49, %v2740_v52  ;;  %v4457_v49 = vmul.f32 %v4439_v14, %v9810_v0 }
 0x1f8   : > { %16778 = vst [vmem:[#allocation67_spill] sm:$0xff] %v10102_v13  ;;  %951 = vadd.xlane.f32.xlu2 %v922_v22  ;;  %v923_v51 = vmul.f32 %v10102_v13, %v10102_v13  ;;  %v2771_v52 = vmul.f32 %v10115_v45, %v10115_v45  ;;  %v793_v57 = vpop.f32.mrf.mxu3  ;;  %8439 = vrsqrt.f32 %v10129_v42  ;;  %vm995_vm2 = vweird.f32 %v10129_v42 }
 0x1f9   : > { %16779 = vst [vmem:[#allocation68_spill] sm:$0xff] %v10112_v31  ;;  %v2772_v22 = vmul.f32 %v10112_v31, %v10112_v31 }
 0x1fa   : > { %953 = vadd.xlane.f32.xlu0 %v923_v51  ;;  %16780 = vst [vmem:[#allocation69_spill] sm:$0xff] %v10115_v45 }
 0x1fb   : > { %2799 = vadd.xlane.f32.xlu1 %v2770_v4  ;;  %v4443_v36 = vpop.xlane.xlu1 %4442  ;;  %v2774_v30 = vpop.xlane.xlu2 %2773 }
 0x1fc   : > { %v4441_v59 = vpop.xlane.xlu0 %4440  ;;  %v4459_v1 = vmul.f32 %v4443_v36, %v9810_v0 }
 0x1fd   : > { %v4458_v16 = vmul.f32 %v4441_v59, %v9810_v0  ;;  %v16783_v59 = vld [vmem:[#allocation51_spill] sm:$0xff] }
 0x1fe   : > { %v10134_v36 = vsub.f32 %v9847_v55, %v4459_v1  ;;  %v10137_v14 = vsub.f32 %v16783_v59, %v4457_v49 }
 0x1ff   : > { %v10123_v51 = vsub.f32 %v9850_v37, %v4458_v16  ;;  %v10141_v16 = vsub.f32 %v9820_v18, %v892_v26 }
 0x200   : > { %2803 = vadd.xlane.f32.xlu2 %v2772_v22  ;;  %16782 = vst [vmem:[#allocation71_spill] sm:$0xff] %v10134_v36  ;;  %v4491_v27 = vmul.f32 %v10134_v36, %v10134_v36  ;;  %v10146_v22 = vperm.slane %v16786_v54, 3  ;;  %v4489_v55 = vmul.f32 %v10137_v14, %v10137_v14  ;;  %v796_v49 = vpop.f32.mrf.mxu3 }
 0x201   : > { %16781 = vst [vmem:[#allocation70_spill] sm:$0xff] %v10123_v51  ;;  %v4490_v4 = vmul.f32 %v10123_v51, %v10123_v51  ;;  %v924_v1 = vmul.f32 %v10141_v16, %v10141_v16 }
 0x202   : > { %2801 = vadd.xlane.f32.xlu0 %v2771_v52  ;;  %16784 = vst [vmem:[#allocation51_spill] sm:$0xff] %v10137_v14  ;;  %v8440_v52 = vpop.eup %8439  ;;  %v10154_v36 = vadd.f32 %v793_v57, %v10146_v22  ;;  %v10158_v54 = vadd.f32 %v796_v49, %v10146_v22 }
 0x203   : > { %4520 = vadd.xlane.f32.xlu1 %v4490_v4  ;;  %v4493_v37 = vpop.xlane.xlu2 %4492  ;;  %16785 = vst [vmem:[#allocation72_spill] sm:$0xff] %v10141_v16  ;;  %v2805_v4 = vmul.f32 %v2774_v30, %v9810_v0  ;;  %v2776_v59 = vpop.xlane.xlu1 %2775  ;;  %vm996_vm1 = vweird.f32 %v8440_v52 }
 0x204   : > { %16787 = vst [vmem:[#allocation25_spill] sm:$0xff] %v10146_v22  ;;  %v930_v18 = vpop.xlane.xlu0 %929  ;;  %v4524_v30 = vmul.f32 %v4493_v37, %v9810_v0  ;;  %vm997_vm3 = vmor %vm995_vm2, %vm996_vm1 }
 0x205   : > { %16788 = vst [vmem:[#allocation73_spill] sm:$0xff] %v10154_v36  ;;  %v10160_v31 = vadd.f32 1e-05, %v2805_v4  ;;  %v959_v57 = vmul.f32 %v930_v18, %v9810_v0 }
 0x206   : > { %16789 = vst [vmem:[#allocation74_spill] sm:$0xff] %v10158_v54 }
 0x207   : > { %8441 = vrsqrt.f32 %v10160_v31  ;;  %vm2843_vm4 = vweird.f32 %v10160_v31 }
 0x208   : > { %4522 = vadd.xlane.f32.xlu2 %v4491_v27  ;;  %v990_v27 = vmul.f32 %v8440_v52, %v10129_v42 }
 0x20a   : > { %4518 = vadd.xlane.f32.xlu0 %v4489_v55  ;;  %v2806_v55 = vmul.f32 %v2776_v59, %v9810_v0  ;;  %v991_v16 = vmul.f32 %v8440_v52, %v990_v27  ;;  %v10173_v59 = vadd.f32 1e-05, %v959_v57 }
 0x20b   : > { %955 = vadd.xlane.f32.xlu1 %v924_v1  ;;  %v928_v26 = vpop.xlane.xlu2 %927 }
 0x20c   : > { %v10168_v45 = vadd.f32 1e-05, %v2806_v55  ;;  %v958_v49 = vmul.f32 %v928_v26, %v9810_v0  ;;  %v2778_v4 = vpop.xlane.xlu0 %2777  ;;  %v992_v51 = vmul.f32 0.5, %v991_v16  ;;  %vm1015_vm8 = vweird.f32 %v10173_v59 }
 0x20d   : > { %v2807_v37 = vmul.f32 %v2778_v4, %v9810_v0  ;;  %v10176_v27 = vpop.eup %8441 }
 0x20e   : > { %v4497_v14 = vpop.xlane.xlu1 %4496  ;;  %8443 = vrsqrt.f32 %v10168_v45  ;;  %v993_v18 = vsub.f32 1.5, %v992_v51  ;;  %v2838_v16 = vmul.f32 %v10176_v27, %v10160_v31  ;;  %vm2844_vm5 = vweird.f32 %v10176_v27 }
 0x20f   : > { %v10185_v26 = vadd.f32 1e-05, %v2807_v37  ;;  %v4526_v55 = vmul.f32 %v4497_v14, %v9810_v0  ;;  %v8422_v37 = vld [vmem:[%s16494_s7 + $0x2] ss:$0 sm:$0xff]  ;;  %vm2853_vm6 = vweird.f32 %v10168_v45  ;;  %vm10267_vm9 = vmor %vm2843_vm4, %vm2844_vm5 }
 0x210   : > { %6133 = vadd.xlane.f32.xlu2 %v10154_v36  ;;  %v10171_v36 = vadd.f32 1e-05, %v4524_v30  ;;  %v994_v57 = vmul.f32 %v8440_v52, %v993_v18  ;;  %v2839_v13 = vmul.f32 %v10176_v27, %v2838_v16 }
 0x211   : > { %v10201_v14 = vadd.f32 1e-05, %v4526_v55  ;;  %vm2863_vm0 = vweird.f32 %v10185_v26 }
 0x212   : > { %6135 = vadd.xlane.f32.xlu0 %v10158_v54  ;;  %v10179_v54 = vadd.f32 1e-05, %v958_v49  ;;  %8445 = vrsqrt.f32 %v10171_v36  ;;  %v998_v6 = vsel %vm997_vm3, %v8440_v52, %v994_v57  ;;  %v2840_v20 = vmul.f32 0.5, %v2839_v13  ;;  %v10217_v57 = vld [vmem:[#allocation8] ss:$0 sm:$0xff] }
 0x213   : > { %v2780_v1 = vpop.xlane.xlu2 %2779  ;;  %8447 = vrsqrt.f32 %v10173_v59  ;;  %v1149_v55 = vmul.f32 %v998_v6, %v9829_v29  ;;  %vm4562_vm7 = vweird.f32 %v10171_v36  ;;  %vm4582_vm5 = vweird.f32 %v10201_v14 }
 0x214   : > { %8449 = vrsqrt.f32 %v10179_v54  ;;  %v10189_v49 = vpop.eup %8443  ;;  %v2808_v18 = vmul.f32 %v2780_v1, %v9810_v0  ;;  %v4495_v40 = vpop.xlane.xlu0 %4494  ;;  %vm1005_vm13 = vweird.f32 %v10179_v54 }
 0x215   : > { %8451 = vrsqrt.f32 %v10185_v26  ;;  %v2848_v42 = vmul.f32 %v10189_v49, %v10168_v45  ;;  %v4525_v52 = vmul.f32 %v4495_v40, %v9810_v0  ;;  %v10229_v40 = vadd.f32 %v10104_v60, %v10146_v22 }
 0x216   : > { %v932_v4 = vpop.xlane.xlu1 %931  ;;  %8453 = vrsqrt.f32 %v10201_v14  ;;  %v10214_v1 = vadd.f32 1e-05, %v2808_v18  ;;  %v2841_v18 = vsub.f32 1.5, %v2840_v20  ;;  %vm2854_vm10 = vweird.f32 %v10189_v49 }
 0x217   : > { %v2849_v38 = vmul.f32 %v10189_v49, %v2848_v42  ;;  %v960_v12 = vmul.f32 %v932_v4, %v9810_v0  ;;  %16790 = vst [vmem:[#allocation75_spill] sm:$0xff] %v10229_v40  ;;  %v10235_v7 = vadd.f32 1e-05, %v4525_v52  ;;  %vm10310_vm14 = vmor %vm2853_vm6, %vm2854_vm10 }
 0x218   : > { %v10191_v51 = vpop.eup %8445  ;;  %8455 = vrsqrt.f32 %v10214_v1 }
 0x219   : > { %v10199_v24 = vpop.eup %8447  ;;  %v4557_v16 = vmul.f32 %v10191_v51, %v10171_v36  ;;  %v2850_v20 = vmul.f32 0.5, %v2849_v38  ;;  %v10242_v22 = vadd.f32 1e-05, %v960_v12  ;;  %8457 = vrsqrt.f32 %v10235_v7 }
 0x21a   : > { %v10206_v28 = vpop.eup %8449  ;;  %v1010_v53 = vmul.f32 %v10199_v24, %v10173_v59  ;;  %vm4563_vm11 = vweird.f32 %v10191_v51  ;;  %vm1016_vm12 = vweird.f32 %v10199_v24  ;;  %vm4572_vm10 = vweird.f32 %v10235_v7 }
 0x21b   : > { %v4499_v30 = vpop.xlane.xlu2 %4498  ;;  %v10219_v9 = vpop.eup %8451  ;;  %v1000_v13 = vmul.f32 %v10206_v28, %v10179_v54  ;;  %8459 = vrsqrt.f32 %v10242_v22  ;;  %vm1006_vm15 = vweird.f32 %v10206_v28  ;;  %vm10325_vm1 = vmor %vm4562_vm7, %vm4563_vm11 }
 0x21c   : > { %v4527_v29 = vmul.f32 %v4499_v30, %v9810_v0  ;;  %v1011_v47 = vmul.f32 %v10199_v24, %v1010_v53  ;;  %v2858_v42 = vmul.f32 %v10219_v9, %v10185_v26  ;;  %v10238_v30 = vld [vmem:[#allocation10] ss:$0 sm:$0xff]  ;;  %v10244_v53 = vpop.eup %8453  ;;  %vm10338_vm2 = vmor %vm1015_vm8, %vm1016_vm12  ;;  %vm2864_vm4 = vweird.f32 %v10219_v9 }
 0x21d   : > { %16791 = vst [vmem:[#allocation76_spill] sm:$0xff] %v10238_v30  ;;  %v1001_v60 = vmul.f32 %v10206_v28, %v1000_v13  ;;  %vm10365_vm3 = vmor %vm1005_vm13, %vm1006_vm15  ;;  %vm4583_vm7 = vweird.f32 %v10244_v53  ;;  %vm2873_vm8 = vweird.f32 %v10214_v1  ;;  %vm1025_vm13 = vweird.f32 %v10242_v22 }
 0x21e   : > { %v2782_v56 = vpop.xlane.xlu1 %2781  ;;  %v10247_v44 = vadd.f32 1e-05, %v4527_v29  ;;  %v1012_v41 = vmul.f32 0.5, %v1011_v47  ;;  %v2859_v12 = vmul.f32 %v10219_v9, %v2858_v42  ;;  %v10261_v47 = vpop.eup %8455  ;;  %vm10388_vm6 = vmor %vm2863_vm0, %vm2864_vm4 }
 0x21f   : > { %v2809_v52 = vmul.f32 %v2782_v56, %v9810_v0  ;;  %v1002_v29 = vmul.f32 0.5, %v1001_v60  ;;  %v4577_v56 = vmul.f32 %v10244_v53, %v10201_v14  ;;  %vm10426_vm11 = vmor %vm4582_vm5, %vm4583_vm7 }
 0x220   : > { %8461 = vrsqrt.f32 %v10247_v44 }
 0x221   : > { %v10273_v42 = vadd.f32 1e-05, %v2809_v52  ;;  %v1003_v34 = vsub.f32 1.5, %v1002_v29  ;;  %v4578_v11 = vmul.f32 %v10244_v53, %v4577_v56 }
 0x223   : > { %v934_v6 = vpop.xlane.xlu2 %933  ;;  %8463 = vrsqrt.f32 %v10273_v42  ;;  %v4579_v58 = vmul.f32 0.5, %v4578_v11 }
 0x224   : > { %5536 = vperm.xlu1 %8418, %v8422_v37   ;;  %v4558_v37 = vmul.f32 %v10191_v51, %v4557_v16  ;;  %v1169_v16 = vmul.f32 %v10217_v57, %v1149_v55  ;;  %v2842_v55 = vmul.f32 %v10176_v27, %v2841_v18  ;;  %v961_v38 = vmul.f32 %v934_v6, %v9810_v0 }
 0x225   : > { %v936_v4 = vpop.xlane.xlu0 %935  ;;  %v4580_v54 = vsub.f32 1.5, %v4579_v58 }
 0x226   : > { %v4559_v10 = vmul.f32 0.5, %v4558_v37  ;;  %v1189_v13 = vadd.f32 %v10238_v30, %v1169_v16  ;;  %v2851_v37 = vsub.f32 1.5, %v2850_v20  ;;  %v2846_v16 = vsel %vm10267_vm9, %v10176_v27, %v2842_v55  ;;  %v10288_v27 = vpop.eup %8457 }
 0x227   : > { %v1013_v20 = vsub.f32 1.5, %v1012_v41  ;;  %v10278_v60 = vadd.f32 1e-05, %v961_v38  ;;  %v962_v31 = vmul.f32 %v936_v4, %v9810_v0  ;;  %v2868_v41 = vmul.f32 %v10261_v47, %v10214_v1  ;;  %v10297_v6 = vpop.eup %8459 }
 0x228   : > { %v4560_v18 = vsub.f32 1.5, %v4559_v10  ;;  %v2860_v10 = vmul.f32 0.5, %v2859_v12  ;;  %v2852_v52 = vmul.f32 %v10189_v49, %v2851_v37  ;;  %v10291_v4 = vmul.f32 %v2846_v16, %v9844_v21  ;;  %v10304_v21 = vpop.eup %8461 }
 0x229   : > { %v10295_v12 = vmul.f32 0.70710677, %v1189_v13  ;;  %v1014_v37 = vmul.f32 %v10199_v24, %v1013_v20  ;;  %8465 = vrsqrt.f32 %v10278_v60  ;;  %v10301_v29 = vadd.f32 1e-05, %v962_v31 }
 0x22a   : > { %v4561_v55 = vmul.f32 %v10191_v51, %v4560_v18  ;;  %v2861_v16 = vsub.f32 1.5, %v2860_v10  ;;  %v10316_v20 = vmul.f32 0.5, %v1189_v13  ;;  %v1004_v31 = vmul.f32 %v10206_v28, %v1003_v34 }
 0x22b   : > { %v2786_v3 = vpop.xlane.xlu2 %2785  ;;  %v2869_v10 = vmul.f32 %v10261_v47, %v2868_v41  ;;  %v4567_v36 = vmul.f32 %v10288_v27, %v10235_v7  ;;  %v1020_v11 = vmul.f32 %v10297_v6, %v10242_v22  ;;  %v1237_v34 = vmul.f32 %v10295_v12, %v10295_v12  ;;  %v10356_v41 = vpop.eup %8463 }
 0x22c   : > { %v2811_v56 = vmul.f32 %v2786_v3, %v9810_v0  ;;  %16796 = vst [vmem:[#allocation77_spill] sm:$0xff] %v10316_v20  ;;  %v2856_v3 = vsel %vm10310_vm14, %v10189_v49, %v2852_v52  ;;  %v4565_v13 = vsel %vm10325_vm1, %v10191_v51, %v4561_v55  ;;  %v1018_v51 = vsel %vm10338_vm2, %v10199_v24, %v1014_v37 }
 0x22d   : > { %v2784_v38 = vpop.xlane.xlu0 %2783  ;;  %v4587_v59 = vmul.f32 %v10304_v21, %v10247_v44  ;;  %8467 = vrsqrt.f32 %v10301_v29  ;;  %v10359_v55 = vmul.f32 %v2856_v3, %v9861_v17  ;;  %v2862_v24 = vmul.f32 %v10219_v9, %v2861_v16 }
 0x22e   : > { %v4503_v2 = vpop.xlane.xlu1 %4502  ;;  %v10354_v52 = vadd.f32 1e-05, %v2811_v56  ;;  %v16804_v56 = vld [vmem:[#allocation53_spill] sm:$0xff]  ;;  %v1008_v17 = vsel %vm10365_vm3, %v10206_v28, %v1004_v31  ;;  %v2870_v3 = vmul.f32 0.5, %v2869_v10  ;;  %v10381_v49 = vmul.f32 %v1018_v51, %v9867_v19 }
 0x22f   : > { %16801 = vst [vmem:[#allocation78_spill] sm:$0xff] %v10359_v55  ;;  %v10372_v37 = vpop.eup %8465  ;;  %v10375_v45 = vmul.f32 %v4565_v13, %v16804_v56  ;;  %v4568_v16 = vmul.f32 %v10288_v27, %v4567_v36  ;;  %v1021_v55 = vmul.f32 %v10297_v6, %v1020_v11  ;;  %v2810_v20 = vmul.f32 %v2784_v38, %v9810_v0 }
 0x230   : > { %16805 = vst [vmem:[#allocation53_spill] sm:$0xff] %v10381_v49  ;;  %v4588_v28 = vmul.f32 %v10304_v21, %v4587_v59  ;;  %v2878_v58 = vmul.f32 %v10356_v41, %v10273_v42  ;;  %8469 = vrsqrt.f32 %v10354_v52  ;;  %v10396_v19 = vmin.f32 %v1237_v34, 16.0 }
 0x231   : > { %v10399_v31 = vmul.f32 %v1008_v17, %v9879_v33  ;;  %v2866_v26 = vsel %vm10388_vm6, %v10219_v9, %v2862_v24  ;;  %v1030_v38 = vmul.f32 %v10372_v37, %v10278_v60  ;;  %v4581_v11 = vmul.f32 %v10244_v53, %v4580_v54 }
 0x232   : > { %v2871_v34 = vsub.f32 1.5, %v2870_v3  ;;  %vm2874_vm9 = vweird.f32 %v10261_v47  ;;  %v4529_v33 = vmul.f32 %v4503_v2, %v9810_v0  ;;  %v4569_v59 = vmul.f32 0.5, %v4568_v16 }
 0x233   : > { %v4505_v30 = vpop.xlane.xlu2 %4504  ;;  %v10408_v36 = vpop.eup %8467  ;;  %v1022_v9 = vmul.f32 0.5, %v1021_v55  ;;  %v10413_v18 = vadd.f32 1e-05, %v2810_v20  ;;  %v10417_v56 = vmul.f32 %v2866_v26, %v9882_v61  ;;  %v4589_v17 = vmul.f32 0.5, %v4588_v28  ;;  %vm10462_vm15 = vmor %vm2873_vm8, %vm2874_vm9 }
 0x234   : > { %v4530_v24 = vmul.f32 %v4505_v30, %v9810_v0  ;;  %v2879_v54 = vmul.f32 %v10356_v41, %v2878_v58  ;;  %v1239_v3 = vmul.f32 2.1237322e-06, %v10396_v19  ;;  %vm4573_vm12 = vweird.f32 %v10288_v27 }
 0x235   : > { %v4501_v10 = vpop.xlane.xlu0 %4500  ;;  %16808 = vst [vmem:[#allocation79_spill] sm:$0xff] %v10417_v56  ;;  %v1031_v61 = vmul.f32 %v10372_v37, %v1030_v38  ;;  %v1040_v30 = vmul.f32 %v10408_v36, %v10301_v29  ;;  %v4585_v14 = vsel %vm10426_vm11, %v10244_v53, %v4581_v11  ;;  %v2872_v16 = vmul.f32 %v10261_v47, %v2871_v34  ;;  %vm10487_vm4 = vmor %vm4572_vm10, %vm4573_vm12 }
 0x236   : > { %v938_v51 = vpop.xlane.xlu1 %937  ;;  %v10436_v55 = vpop.eup %8469  ;;  %vm4592_vm14 = vweird.f32 %v10247_v44  ;;  %v10443_v13 = vadd.f32 1e-05, %v4529_v33  ;;  %v4528_v28 = vmul.f32 %v4501_v10, %v9810_v0  ;;  %v4570_v58 = vsub.f32 1.5, %v4569_v59 }
 0x237   : > { %v963_v20 = vmul.f32 %v938_v51, %v9810_v0  ;;  %v1023_v26 = vsub.f32 1.5, %v1022_v9  ;;  %8471 = vrsqrt.f32 %v10413_v18  ;;  %v10447_v38 = vadd.f32 1e-05, %v4530_v24 }
 0x238   : > { %v4590_v51 = vsub.f32 1.5, %v4589_v17  ;;  %v2880_v49 = vmul.f32 0.5, %v2879_v54  ;;  %v1240_v56 = vadd.f32 0.00028619796, %v1239_v3  ;;  %v1250_v2 = vmul.f32 3.8918573e-05, %v10396_v19 }
 0x239   : > { %v1032_v53 = vmul.f32 0.5, %v1031_v61  ;;  %v1041_v11 = vmul.f32 %v10408_v36, %v1040_v30  ;;  %v2898_v34 = vmul.f32 %v10436_v55, %v10354_v52  ;;  %v10453_v33 = vadd.f32 1e-05, %v963_v20 }
 0x23a   : > { %v10456_v59 = vmul.f32 %v4585_v14, %v9893_v63  ;;  %vm1026_vm0 = vweird.f32 %v10297_v6  ;;  %vm2883_vm1 = vweird.f32 %v10273_v42  ;;  %8473 = vrsqrt.f32 %v10443_v13 }
 0x23b   : > { %v940_v10 = vpop.xlane.xlu2 %939  ;;  %v10469_v24 = vadd.f32 1e-05, %v4528_v28  ;;  %v2876_v63 = vsel %vm10462_vm15, %v10261_v47, %v2872_v16  ;;  %v4571_v17 = vmul.f32 %v10288_v27, %v4570_v58  ;;  %v1024_v1 = vmul.f32 %v10297_v6, %v1023_v26  ;;  %vm10500_vm5 = vmor %vm1025_vm13, %vm1026_vm0 }
 0x23c   : > { %vm1035_vm2 = vweird.f32 %v10278_v60  ;;  %8475 = vrsqrt.f32 %v10447_v38  ;;  %v4591_v3 = vmul.f32 %v10304_v21, %v4590_v51  ;;  %vm4593_vm3 = vweird.f32 %v10304_v21 }
 0x23d   : > { %v942_v54 = vpop.xlane.xlu0 %941  ;;  %v2881_v61 = vsub.f32 1.5, %v2880_v49  ;;  %v964_v30 = vmul.f32 %v940_v10, %v9810_v0  ;;  %v10481_v20 = vpop.eup %8471  ;;  %v1033_v14 = vsub.f32 1.5, %v1032_v53  ;;  %v1042_v16 = vmul.f32 0.5, %v1041_v11  ;;  %vm10517_vm7 = vmor %vm4592_vm14, %vm4593_vm3 }
 0x23e   : > { %v2899_v28 = vmul.f32 %v10436_v55, %v2898_v34  ;;  %8477 = vrsqrt.f32 %v10453_v33  ;;  %v10494_v49 = vmul.f32 %v2876_v63, %v9899_v48  ;;  %vm2884_vm6 = vweird.f32 %v10356_v41 }
 0x23f   : > { %8479 = vrsqrt.f32 %v10469_v24  ;;  %v965_v7 = vmul.f32 %v942_v54, %v9810_v0  ;;  %v4575_v26 = vsel %vm10487_vm4, %v10288_v27, %v4571_v17  ;;  %v1028_v48 = vsel %vm10500_vm5, %v10297_v6, %v1024_v1  ;;  %v2788_v17 = vpop.xlane.xlu1 %2787  ;;  %vm10557_vm10 = vmor %vm2883_vm1, %vm2884_vm6 }
 0x240   : > { %16815 = vst [vmem:[#allocation80_spill] sm:$0xff] %v10494_v49  ;;  %vm1045_vm8 = vweird.f32 %v10301_v29  ;;  %v1241_v51 = vmul.f32 %v1240_v56, %v10396_v19  ;;  %v10523_v53 = vpop.eup %8473  ;;  %v4595_v27 = vsel %vm10517_vm7, %v10304_v21, %v4591_v3  ;;  %v2882_v6 = vmul.f32 %v10356_v41, %v2881_v61  ;;  %v10546_v3 = vld [vmem:[#allocation8 + $0x2] ss:$0 sm:$0xff]  ;;  %v10646_v29 = vld [vmem:[#allocation10 + $0x1] ss:$0 sm:$0xff] }
 0x241   : > { %v2888_v11 = vmul.f32 %v10481_v20, %v10413_v18  ;;  %v10531_v44 = vadd.f32 1e-05, %v964_v30  ;;  %v1034_v10 = vmul.f32 %v10372_v37, %v1033_v14  ;;  %vm1036_vm9 = vweird.f32 %v10372_v37 }
 0x242   : > { %v10533_v34 = vpop.eup %8475  ;;  %v1043_v56 = vsub.f32 1.5, %v1042_v16  ;;  %v2900_v9 = vmul.f32 0.5, %v2899_v28  ;;  %v10538_v63 = vmul.f32 %v4575_v26, %v9902_v50  ;;  %v10541_v21 = vmul.f32 %v1028_v48, %v9905_v25  ;;  %vm10573_vm12 = vmor %vm1035_vm2, %vm1036_vm9  ;;  %v10582_v28 = vld [vmem:[#allocation10 + $0x2] ss:$0 sm:$0xff] }
 0x243   : > { %v10543_v1 = vadd.f32 1e-05, %v965_v7  ;;  %v1251_v54 = vadd.f32 0.001143296, %v1250_v2  ;;  %v10551_v30 = vmul.f32 %v4595_v27, %v9917_v43  ;;  %vm1046_vm11 = vweird.f32 %v10408_v36 }
 0x244   : > { %16820 = vst [vmem:[#allocation81_spill] sm:$0xff] %v10541_v21  ;;  %v10548_v61 = vpop.eup %8477  ;;  %v4607_v25 = vmul.f32 %v10523_v53, %v10443_v13  ;;  %v1242_v2 = vadd.f32 0.0036580483, %v1241_v51  ;;  %v2886_v43 = vsel %vm10557_vm10, %v10356_v41, %v2882_v6  ;;  %vm2903_vm13 = vweird.f32 %v10354_v52  ;;  %vm10608_vm14 = vmor %vm1045_vm8, %vm1046_vm11 }
 0x245   : > { %v10564_v47 = vpop.eup %8479  ;;  %v2889_v14 = vmul.f32 %v10481_v20, %v2888_v11  ;;  %v4617_v16 = vmul.f32 %v10533_v34, %v10447_v38  ;;  %8481 = vrsqrt.f32 %v10531_v44  ;;  %v1038_v41 = vsel %vm10573_vm12, %v10372_v37, %v1034_v10 }
 0x246   : > { %v10588_v60 = vmul.f32 %v10408_v36, %v1043_v56  ;;  %v2901_v58 = vsub.f32 1.5, %v2900_v9  ;;  %v2812_v7 = vmul.f32 %v2788_v17, %v9810_v0  ;;  %v1050_v26 = vmul.f32 %v10548_v61, %v10453_v33  ;;  %v10616_v9 = vld [vmem:[#allocation8 + $0x1] ss:$0 sm:$0xff] }
 0x247   : > { %8483 = vrsqrt.f32 %v10543_v1  ;;  %v1252_v48 = vmul.f32 %v1251_v54, %v10396_v19  ;;  %v4737_v22 = vmul.f32 %v10546_v3, %v10375_v45  ;;  %v10598_v51 = vmul.f32 %v2886_v43, %v9920_v62  ;;  %v2792_v43 = vpop.xlane.xlu2 %2791 }
 0x248   : > { %v4608_v37 = vmul.f32 %v10523_v53, %v4607_v25  ;;  %v4597_v27 = vmul.f32 %v10564_v47, %v10469_v24  ;;  %v1243_v6 = vmul.f32 %v1242_v2, %v10396_v19  ;;  %v2890_v10 = vmul.f32 0.5, %v2889_v14 }
 0x249   : > { %16825 = vst [vmem:[#allocation82_spill] sm:$0xff] %v10598_v51  ;;  %v4618_v45 = vmul.f32 %v10533_v34, %v4617_v16  ;;  %v1253_v62 = vadd.f32 0.014752088, %v1252_v48  ;;  %v10614_v56 = vadd.f32 %v10582_v28, %v4737_v22  ;;  %v10619_v17 = vmul.f32 %v1038_v41, %v9929_v46  ;;  %v4509_v48 = vpop.xlane.xlu1 %4508 }
 0x24a   : > { %vm2904_vm15 = vweird.f32 %v10436_v55  ;;  %v10626_v54 = vadd.f32 1e-05, %v2812_v7  ;;  %v10631_v25 = vmul.f32 %v10436_v55, %v2901_v58  ;;  %v1051_v2 = vmul.f32 %v10548_v61, %v1050_v26 }
 0x24b   : > { %16828 = vst [vmem:[#allocation83_spill] sm:$0xff] %v10619_v17  ;;  %v10628_v50 = vpop.eup %8481  ;;  %v1254_v46 = vmul.f32 %v1253_v62, %v10396_v19  ;;  %v10636_v42 = vmul.f32 0.70710677, %v10614_v56  ;;  %v4609_v14 = vmul.f32 0.5, %v4608_v37  ;;  %vm2893_vm0 = vweird.f32 %v10413_v18  ;;  %vm10652_vm3 = vmor %vm2903_vm13, %vm2904_vm15 }
 0x24c   : > { %vm2894_vm1 = vweird.f32 %v10481_v20  ;;  %v4598_v16 = vmul.f32 %v10564_v47, %v4597_v27  ;;  %v1244_v41 = vadd.f32 0.05243302, %v1243_v6  ;;  %vm4613_vm2 = vweird.f32 %v10523_v53 }
 0x24d   : > { %v10641_v7 = vpop.eup %8483  ;;  %v2891_v58 = vsub.f32 1.5, %v2890_v10  ;;  %v4619_v26 = vmul.f32 0.5, %v4618_v45  ;;  %v1255_v22 = vadd.f32 0.112945676, %v1254_v46  ;;  %v3018_v62 = vmul.f32 %v10616_v9, %v10291_v4  ;;  %vm10696_vm9 = vmor %vm2893_vm0, %vm2894_vm1 }
 0x24e   : > { %6131 = vadd.xlane.f32.xlu1 %v10229_v40  ;;  %v1060_v27 = vmul.f32 %v10628_v50, %v10531_v44  ;;  %8485 = vrsqrt.f32 %v10626_v54  ;;  %v2814_v6 = vmul.f32 %v2792_v43, %v9810_v0  ;;  %v4806_v4 = vmul.f32 %v10636_v42, %v10636_v42 }
 0x24f   : > { %v2906_v10 = vsel %vm10652_vm3, %v10436_v55, %v10631_v25  ;;  %vm4612_vm4 = vweird.f32 %v10443_v13  ;;  %vm4623_vm5 = vweird.f32 %v10533_v34  ;;  %v1052_v52 = vmul.f32 0.5, %v1051_v2 }
 0x250   : > { %v1256_v45 = vmul.f32 %v1255_v22, %v10396_v19  ;;  %vm4622_vm6 = vweird.f32 %v10447_v38  ;;  %v4599_v46 = vmul.f32 0.5, %v4598_v16  ;;  %v1070_v43 = vmul.f32 %v10641_v7, %v10543_v1  ;;  %vm10720_vm10 = vmor %vm4612_vm4, %vm4613_vm2 }
 0x251   : > { %v4532_v40 = vmul.f32 %v4509_v48, %v9810_v0  ;;  %v10673_v51 = vmin.f32 %v4806_v4, 16.0  ;;  %v4610_v17 = vsub.f32 1.5, %v4609_v14  ;;  %v2892_v55 = vmul.f32 %v10481_v20, %v2891_v58  ;;  %vm10739_vm11 = vmor %vm4622_vm6, %vm4623_vm5 }
 0x252   : > { %v1257_v25 = vadd.f32 0.4994258, %v1256_v45  ;;  %v10677_v37 = vadd.f32 %v10646_v29, %v3018_v62  ;;  %v4620_v2 = vsub.f32 1.5, %v4619_v26  ;;  %v1061_v22 = vmul.f32 %v10628_v50, %v1060_v27 }
 0x253   : > { %v10680_v49 = vadd.f32 1e-05, %v2814_v6  ;;  %v4819_v16 = vmul.f32 3.8918573e-05, %v10673_v51  ;;  %v1053_v21 = vsub.f32 1.5, %v1052_v52  ;;  %vm1056_vm7 = vweird.f32 %v10548_v61 }
 0x254   : > { %vm4603_vm8 = vweird.f32 %v10564_v47  ;;  %v1258_v14 = vmul.f32 %v1257_v25, %v10396_v19  ;;  %v10686_v48 = vpop.eup %8485  ;;  %v4600_v58 = vsub.f32 1.5, %v4599_v46  ;;  %v1071_v62 = vmul.f32 %v10641_v7, %v1070_v43 }
 0x255   : > { %v10689_v4 = vadd.f32 1e-05, %v4532_v40  ;;  %v4820_v26 = vadd.f32 0.001143296, %v4819_v16  ;;  %v4611_v27 = vmul.f32 %v10523_v53, %v4610_v17  ;;  %v1245_v52 = vmul.f32 %v1244_v41, %v10396_v19 }
 0x256   : > { %v10701_v45 = vadd.f32 1.0, %v1258_v14  ;;  %v10704_v46 = vmul.f32 0.70710677, %v10677_v37  ;;  %v2896_v40 = vsel %vm10696_vm9, %v10481_v20, %v2892_v55  ;;  %v4621_v17 = vmul.f32 %v10533_v34, %v4620_v2 }
 0x257   : > { %v1062_v43 = vmul.f32 0.5, %v1061_v22  ;;  %8487 = vrsqrt.f32 %v10680_v49  ;;  %v1054_v18 = vmul.f32 %v10548_v61, %v1053_v21  ;;  %v2908_v25 = vmul.f32 %v10686_v48, %v10626_v54 }
 0x258   : > { %8489 = vrcp.f32 %v10701_v45  ;;  %v4808_v41 = vmul.f32 2.1237322e-06, %v10673_v51  ;;  %v4601_v55 = vmul.f32 %v10564_v47, %v4600_v58  ;;  %v1072_v2 = vmul.f32 0.5, %v1071_v62 }
 0x259   : > { %8491 = vrsqrt.f32 %v10689_v4  ;;  %v4821_v21 = vmul.f32 %v4820_v26, %v10673_v51  ;;  %v16835_v22 = vsel %vm10608_vm14, %v10408_v36, %v10588_v60  ;;  %vm1055_vm12 = vweird.f32 %v10453_v33  ;;  %v2790_v26 = vpop.xlane.xlu0 %2789 }
 0x25a   : > { %v10733_v16 = vmul.f32 %v16835_v22, %v9936_v8  ;;  %v1246_v14 = vadd.f32 0.18741608, %v1245_v52  ;;  %v3087_v58 = vmul.f32 %v10704_v46, %v10704_v46  ;;  %v10747_v11 = vmul.f32 %v2906_v10, %v9943_v39  ;;  %vm10757_vm13 = vmor %vm1055_vm12, %vm1056_vm7 }
 0x25b   : > { %v4615_v8 = vsel %vm10720_vm10, %v10523_v53, %v4611_v27  ;;  %v10753_v36 = vmul.f32 %v2896_v40, %v9946_v32  ;;  %vm4602_vm14 = vweird.f32 %v10469_v24  ;;  %v4625_v39 = vsel %vm10739_vm11, %v10533_v34, %v4621_v17 }
 0x25c   : > { %16838 = vst [vmem:[#allocation84_spill] sm:$0xff] %v10747_v11  ;;  %v1058_v33 = vsel %vm10757_vm13, %v10548_v61, %v1054_v18  ;;  %vm10770_vm15 = vmor %vm4602_vm14, %vm4603_vm8  ;;  %v2909_v53 = vmul.f32 %v10686_v48, %v2908_v25  ;;  %v4809_v60 = vadd.f32 0.00028619796, %v4808_v41  ;;  %v1063_v34 = vsub.f32 1.5, %v1062_v43 }
 0x25d   : > { %v10775_v10 = vpop.eup %8487  ;;  %v4605_v24 = vsel %vm10770_vm15, %v10564_v47, %v4601_v55  ;;  %v1073_v62 = vsub.f32 1.5, %v1072_v2  ;;  %v4822_v27 = vadd.f32 0.014752088, %v4821_v21  ;;  %v10781_v6 = vmul.f32 %v4615_v8, %v9954_v35 }
 0x25e   : > { %v8490_v61 = vpop.eup %8489  ;;  %vm1066_vm0 = vweird.f32 %v10628_v50  ;;  %v1247_v52 = vmul.f32 %v1246_v14, %v10396_v19  ;;  %v10785_v40 = vmin.f32 %v3087_v58, 16.0  ;;  %v10790_v18 = vmul.f32 %v4625_v39, %v9963_v5  ;;  %v4511_v58 = vpop.xlane.xlu2 %4510 }
 0x25f   : > { %v10787_v17 = vpop.eup %8491  ;;  %v10793_v47 = vmul.f32 %v1058_v33, %v9969_v23  ;;  %vm1076_vm1 = vweird.f32 %v10641_v7  ;;  %v1261_v43 = vmul.f32 %v8490_v61, %v10701_v45  ;;  %v10798_v35 = vmul.f32 %v4605_v24, %v9966_v15  ;;  %v944_v24 = vpop.xlane.xlu1 %943 }
 0x260   : > { %vm1065_vm2 = vweird.f32 %v10531_v44  ;;  %v2910_v19 = vmul.f32 0.5, %v2909_v53  ;;  %v2928_v25 = vmul.f32 %v10775_v10, %v10680_v49  ;;  %v4810_v41 = vmul.f32 %v4809_v60, %v10673_v51 }
 0x261   : > { %v10805_v5 = vmul.f32 %v10628_v50, %v1063_v34  ;;  %v10808_v23 = vmul.f32 %v10641_v7, %v1073_v62  ;;  %vm1075_vm3 = vweird.f32 %v10543_v1  ;;  %v1262_v20 = vsub.f32 1.0, %v1261_v43  ;;  %vm10833_vm9 = vmor %vm1065_vm2, %vm1066_vm0 }
 0x262   : > { %v4823_v15 = vmul.f32 %v4822_v27, %v10673_v51  ;;  %v4637_v55 = vmul.f32 %v10787_v17, %v10689_v4  ;;  %v1248_v2 = vadd.f32 1.1283791, %v1247_v52  ;;  %v1271_v21 = vand.u32 2147483648, %v10701_v45  ;;  %vm10848_vm11 = vmor %vm1075_vm3, %vm1076_vm1 }
 0x263   : > { %v3100_v22 = vmul.f32 3.8918573e-05, %v10785_v40  ;;  %v1263_v13 = vmul.f32 %v8490_v61, %v1262_v20  ;;  %vm1266_vm4 = vweird.f32 %v8490_v61  ;;  %v1269_v14 = vand.u32 2147483647, %v10701_v45 }
 0x264   : > { %v3089_v8 = vmul.f32 2.1237322e-06, %v10785_v40  ;;  %v2911_v38 = vsub.f32 1.5, %v2910_v19  ;;  %v2929_v39 = vmul.f32 %v10775_v10, %v2928_v25  ;;  %v4811_v33 = vadd.f32 0.0036580483, %v4810_v41 }
 0x265   : > { %v1170_v32 = vmul.f32 %v10217_v57, %v10399_v31  ;;  %v1264_v53 = vadd.f32 %v8490_v61, %v1263_v13  ;;  %vm1265_vm5 = vweird.f32 %v10701_v45  ;;  %v2813_v60 = vmul.f32 %v2790_v26, %v9810_v0  ;;  %v4507_v57 = vpop.xlane.xlu0 %4506 }
 0x266   : > { %v4824_v34 = vadd.f32 0.112945676, %v4823_v15  ;;  %v4638_v62 = vmul.f32 %v10787_v17, %v4637_v55  ;;  %vm1267_vm6 = vmor %vm1265_vm5, %vm1266_vm4  ;;  %v1272_v27 = vor.u32 1.1754944e-38, %v1271_v21  ;;  %v4533_v52 = vmul.f32 %v4511_v58, %v9810_v0 }
 0x267   : > { %v3101_v43 = vadd.f32 0.001143296, %v3100_v22  ;;  %vm2914_vm7 = vweird.f32 %v10686_v48  ;;  %v1249_v19 = vmul.f32 %v1248_v2, %v10295_v12  ;;  %v1268_v25 = vsel %vm1267_vm6, %v8490_v61, %v1264_v53  ;;  %v16845_v2 = vld [vmem:[#allocation76_spill] sm:$0xff] }
 0x268   : > { %vm1270_vm8 = vcmp.eq.f32.partialorder %v1269_v14, 8.507059e+37  ;;  %v3090_v31 = vadd.f32 0.00028619796, %v3089_v8  ;;  %v2930_v45 = vmul.f32 0.5, %v2929_v39  ;;  %v966_v26 = vmul.f32 %v944_v24, %v9810_v0 }
 0x269   : > { %v1273_v41 = vsel %vm1270_vm8, %v1272_v27, %v1268_v25  ;;  %v4812_v20 = vmul.f32 %v4811_v33, %v10673_v51  ;;  %vm2913_vm10 = vweird.f32 %v10626_v54  ;;  %v10838_v61 = vadd.f32 1e-05, %v2813_v60  ;;  %v10868_v33 = vld [vmem:[%s16493_s6] ss:$0 sm:$0xff]  ;;  %v946_v27 = vpop.xlane.xlu2 %945 }
 0x26a   : > { %v1274_v12 = vmul.f32 %v1273_v41, %v1249_v19  ;;  %v4825_v55 = vmul.f32 %v4824_v34, %v10673_v51  ;;  %v10842_v21 = vadd.f32 %v16845_v2, %v1170_v32  ;;  %vm2933_vm12 = vweird.f32 %v10680_v49  ;;  %vm10898_vm14 = vmor %vm2913_vm10, %vm2914_vm7 }
 0x26b   : > { %v4639_v22 = vmul.f32 0.5, %v4638_v62  ;;  %v10853_v13 = vadd.f32 1e-05, %v4533_v52  ;;  %v4531_v14 = vmul.f32 %v4507_v57, %v9810_v0  ;;  %v3102_v58 = vmul.f32 %v3101_v43, %v10785_v40 }
 0x26c   : > { %v1068_v8 = vsel %vm10833_vm9, %v10628_v50, %v10805_v5  ;;  %v1078_v1 = vsel %vm10848_vm11, %v10641_v7, %v10808_v23  ;;  %v8231_v39 = vclamps-f32 %v1274_v12, 1.0  ;;  %v3091_v32 = vmul.f32 %v3090_v31, %v10785_v40 }
 0x26d   : > { %v2912_v53 = vmul.f32 %v10686_v48, %v2911_v38  ;;  %v2931_v60 = vsub.f32 1.5, %v2930_v45  ;;  %v10872_v24 = vadd.f32 1e-05, %v966_v26  ;;  %v4813_v34 = vadd.f32 0.05243302, %v4812_v20  ;;  %v16848_v38 = vld [vmem:[#allocation77_spill] sm:$0xff] }
 0x26e   : > { %v1877_v50 = vadd.f32 1.0, %v8231_v39  ;;  %8493 = vrsqrt.f32 %v10838_v61  ;;  %v4826_v5 = vadd.f32 0.4994258, %v4825_v55  ;;  %v10876_v7 = vmul.f32 0.70710677, %v10842_v21  ;;  %v16853_v39 = vld [vmem:[#allocation54_spill] sm:$0xff] }
 0x26f   : > { %v4640_v23 = vsub.f32 1.5, %v4639_v22  ;;  %8495 = vrsqrt.f32 %v10853_v13  ;;  %v10879_v62 = vadd.f32 1e-05, %v4531_v14  ;;  %v3103_v52 = vadd.f32 0.014752088, %v3102_v58 }
 0x270   : > { %vm2934_vm13 = vweird.f32 %v10775_v10  ;;  %v1893_v43 = vmul.f32 %v1877_v50, %v16848_v38  ;;  %v4827_v19 = vmul.f32 %v4826_v5, %v10673_v51  ;;  %v3092_v25 = vadd.f32 0.0036580483, %v3091_v32  ;;  %v16858_v5 = vld [vmem:[#allocation79_spill] sm:$0xff] }
 0x271   : > { %v2932_v57 = vmul.f32 %v10775_v10, %v2931_v60  ;;  %8497 = vrsqrt.f32 %v10872_v24  ;;  %v4814_v31 = vmul.f32 %v4813_v34, %v10673_v51  ;;  %v3104_v45 = vmul.f32 %v3103_v52, %v10785_v40  ;;  %vm10914_vm0 = vmor %vm2933_vm12, %vm2934_vm13 }
 0x272   : > { %v1913_v41 = vmul.f32 %v10868_v33, %v1893_v43  ;;  %v967_v26 = vmul.f32 %v946_v27, %v9810_v0  ;;  %v10890_v20 = vadd.f32 1.0, %v4827_v19  ;;  %v1277_v15 = vmul.f32 %v10876_v7, %v10876_v7  ;;  %v16859_v27 = vld [vmem:[#allocation55_spill] sm:$0xff] }
 0x273   : > { %v4641_v55 = vmul.f32 %v10787_v17, %v4640_v23  ;;  %vm4643_vm15 = vweird.f32 %v10787_v17  ;;  %8499 = vrsqrt.f32 %v10879_v62  ;;  %v3105_v2 = vadd.f32 0.112945676, %v3104_v45 }
 0x274   : > { %v10905_v44 = vpop.eup %8493  ;;  %v2916_v22 = vsel %vm10898_vm14, %v10686_v48, %v2912_v53  ;;  %vm4642_vm1 = vweird.f32 %v10689_v4  ;;  %1929 = vadd.xlane.f32.xlu2 %v1913_v41  ;;  %8501 = vrcp.f32 %v10890_v20  ;;  %v3093_v14 = vmul.f32 %v3092_v25, %v10785_v40  ;;  %v16854_v48 = vld [vmem:[#allocation56_spill] sm:$0xff]  ;;  %v16860_v41 = vld [vmem:[#allocation57_spill] sm:$0xff] }
 0x275   : > { %v10921_v58 = vpop.eup %8495  ;;  %v10924_v32 = vmul.f32 %v1068_v8, %v16853_v39  ;;  %v10927_v53 = vmul.f32 %v1078_v1, %v16854_v48  ;;  %v2936_v49 = vsel %vm10914_vm0, %v10775_v10, %v2932_v57  ;;  %v4815_v60 = vadd.f32 0.18741608, %v4814_v31  ;;  %vm10934_vm2 = vmor %vm4642_vm1, %vm4643_vm15 }
 0x276   : > { %v10938_v34 = vadd.f32 1e-05, %v967_v26  ;;  %v3106_v50 = vmul.f32 %v3105_v2, %v10785_v40  ;;  %v10941_v8 = vmin.f32 %v1277_v15, 16.0  ;;  %v3020_v1 = vmul.f32 %v10616_v9, %v16858_v5 }
 0x277   : > { %16855 = vst [vmem:[#allocation76_spill] sm:$0xff] %v10927_v53  ;;  %v10945_v23 = vpop.eup %8497  ;;  %v10948_v10 = vmul.f32 %v2916_v22, %v16859_v27  ;;  %v4645_v52 = vsel %vm10934_vm2, %v10787_v17, %v4641_v55  ;;  %v2918_v38 = vmul.f32 %v10905_v44, %v10838_v61  ;;  %v10956_v43 = vmul.f32 0.5, %v10614_v56  ;;  %v16862_v55 = vld [vmem:[#allocation59_spill] sm:$0xff] }
 0x278   : > { %v4647_v19 = vmul.f32 %v10921_v58, %v10853_v13  ;;  %v3094_v25 = vadd.f32 0.05243302, %v3093_v14  ;;  %v3107_v57 = vadd.f32 0.4994258, %v3106_v50  ;;  %v1279_v31 = vmul.f32 2.1237322e-06, %v10941_v8 }
 0x279   : > { %v10961_v45 = vpop.eup %8499  ;;  %v10964_v26 = vmul.f32 %v2936_v49, %v16860_v41  ;;  %v4816_v17 = vmul.f32 %v4815_v60, %v10673_v51  ;;  %v10968_v15 = vmul.f32 0.5, %v10677_v37  ;;  %v1290_v56 = vmul.f32 3.8918573e-05, %v10941_v8 }
 0x27a   : > { %v8502_v12 = vpop.eup %8501  ;;  %v10972_v2 = vmul.f32 %v4645_v52, %v16862_v55  ;;  %8503 = vrsqrt.f32 %v10938_v34  ;;  %v3108_v22 = vmul.f32 %v3107_v57, %v10785_v40  ;;  %v10977_v54 = vadd.f32 %v10646_v29, %v3020_v1 }
 0x27b   : > { %16861 = vst [vmem:[#allocation77_spill] sm:$0xff] %v10964_v26  ;;  %v2919_v14 = vmul.f32 %v10905_v44, %v2918_v38  ;;  %v1080_v51 = vmul.f32 %v10945_v23, %v10872_v24  ;;  %v4830_v37 = vmul.f32 %v8502_v12, %v10890_v20  ;;  %v1280_v39 = vadd.f32 0.00028619796, %v1279_v31  ;;  %v2794_v31 = vpop.xlane.xlu1 %2793 }
 0x27c   : > { %16863 = vst [vmem:[#allocation54_spill] sm:$0xff] %v10972_v2  ;;  %v4648_v48 = vmul.f32 %v10921_v58, %v4647_v19  ;;  %v4627_v49 = vmul.f32 %v10961_v45, %v10879_v62  ;;  %v3095_v60 = vmul.f32 %v3094_v25, %v10785_v40  ;;  %v10987_v4 = vadd.f32 1.0, %v3108_v22 }
 0x27d   : > { %v4817_v50 = vadd.f32 1.1283791, %v4816_v17  ;;  %v4831_v5 = vsub.f32 1.0, %v4830_v37  ;;  %v10990_v1 = vmul.f32 0.5, %v10842_v21  ;;  %v1291_v27 = vadd.f32 0.001143296, %v1290_v56 }
 0x27e   : > { %v4838_v52 = vand.u32 2147483647, %v10890_v20  ;;  %v4840_v38 = vand.u32 2147483648, %v10890_v20  ;;  %8505 = vrcp.f32 %v10987_v4  ;;  %v10996_v19 = vmul.f32 0.70710677, %v10977_v54 }
 0x27f   : > { %v10998_v57 = vmul.f32 0.5, %v2919_v14  ;;  %v4832_v25 = vmul.f32 %v8502_v12, %v4831_v5  ;;  %vm4835_vm3 = vweird.f32 %v8502_v12  ;;  %v1281_v41 = vmul.f32 %v1280_v39, %v10941_v8 }
 0x280   : > { %v11001_v17 = vpop.eup %8503  ;;  %v11003_v21 = vmul.f32 0.5, %v4648_v48  ;;  %v1081_v56 = vmul.f32 %v10945_v23, %v1080_v51  ;;  %v4628_v55 = vmul.f32 %v10961_v45, %v4627_v49  ;;  %v3096_v22 = vadd.f32 0.18741608, %v3095_v60  ;;  %v16864_v49 = vld [vmem:[#allocation78_spill] sm:$0xff] }
 0x281   : > { %v4818_v37 = vmul.f32 %v4817_v50, %v10636_v42  ;;  %v4833_v26 = vadd.f32 %v8502_v12, %v4832_v25  ;;  %vm4834_vm4 = vweird.f32 %v10890_v20  ;;  %v1292_v14 = vmul.f32 %v1291_v27, %v10941_v8 }
 0x282   : > { %vm4836_vm5 = vmor %vm4834_vm4, %vm4835_vm3  ;;  %vm4839_vm6 = vcmp.eq.f32.partialorder %v4838_v52, 8.507059e+37  ;;  %v4841_v5 = vor.u32 1.1754944e-38, %v4840_v38  ;;  %v2815_v39 = vmul.f32 %v2794_v31, %v9810_v0  ;;  %v3167_v48 = vmul.f32 %v10996_v19, %v10996_v19 }
 0x283   : > { %v4837_v53 = vsel %vm4836_vm5, %v8502_v12, %v4833_v26  ;;  %v1282_v51 = vadd.f32 0.0036580483, %v1281_v41  ;;  %v1293_v2 = vadd.f32 0.014752088, %v1292_v14  ;;  %v3019_v60 = vmul.f32 %v10616_v9, %v16864_v49 }
 0x284   : > { %v8506_v42 = vpop.eup %8505  ;;  %v2921_v50 = vsub.f32 1.5, %v10998_v57  ;;  %v1090_v20 = vmul.f32 %v11001_v17, %v10938_v34  ;;  %v4842_v27 = vsel %vm4839_vm6, %v4841_v5, %v4837_v53  ;;  %v3097_v52 = vmul.f32 %v3096_v22, %v10785_v40 }
 0x285   : > { %v11019_v38 = vmul.f32 0.5, %v1081_v56  ;;  %v4843_v25 = vmul.f32 %v4842_v27, %v4818_v37  ;;  %v3111_v31 = vmul.f32 %v8506_v42, %v10987_v4  ;;  %v11022_v26 = vmin.f32 %v3167_v48, 16.0 }
 0x286   : > { %v11024_v12 = vmul.f32 0.5, %v4628_v55  ;;  %v11026_v41 = vadd.f32 1e-05, %v2815_v39  ;;  %v3121_v9 = vand.u32 2147483648, %v10987_v4  ;;  %v1294_v57 = vmul.f32 %v1293_v2, %v10941_v8  ;;  %v11041_v2 = vld [vmem:[%s16493_s6 + $0x2] ss:$0 sm:$0xff] }
 0x287   : > { %vm2924_vm7 = vweird.f32 %v10905_v44  ;;  %v8265_v53 = vclamps-f32 %v4843_v25, 1.0  ;;  %v3112_v14 = vsub.f32 1.0, %v3111_v31  ;;  %v1283_v40 = vmul.f32 %v1282_v51, %v10941_v8 }
 0x288   : > { %v11033_v56 = vadd.f32 %v10646_v29, %v3019_v60  ;;  %v1091_v22 = vmul.f32 %v11001_v17, %v1090_v20  ;;  %v3098_v37 = vadd.f32 1.1283791, %v3097_v52  ;;  %v3119_v55 = vand.u32 2147483647, %v10987_v4 }
 0x289   : > { %v1295_v5 = vadd.f32 0.112945676, %v1294_v57  ;;  %vm2923_vm8 = vweird.f32 %v10838_v61  ;;  %v5446_v39 = vadd.f32 1.0, %v8265_v53  ;;  %v3113_v48 = vmul.f32 %v8506_v42, %v3112_v14 }
 0x28a   : > { %vm3116_vm9 = vweird.f32 %v8506_v42  ;;  %v3169_v51 = vmul.f32 2.1237322e-06, %v11022_v26  ;;  %vm3115_vm10 = vweird.f32 %v10987_v4  ;;  %v3122_v29 = vor.u32 1.1754944e-38, %v3121_v9  ;;  %vm11077_vm1 = vmor %vm2923_vm8, %vm2924_vm7 }
 0x28b   : > { %v1296_v49 = vmul.f32 %v1295_v5, %v10941_v8  ;;  %v3180_v60 = vmul.f32 3.8918573e-05, %v11022_v26  ;;  %v5462_v20 = vmul.f32 %v5446_v39, %v10956_v43  ;;  %v3114_v27 = vadd.f32 %v8506_v42, %v3113_v48  ;;  %vm3117_vm12 = vmor %vm3115_vm10, %vm3116_vm9  ;;  %v948_v39 = vpop.xlane.xlu0 %947 }
 0x28c   : > { %v1284_v52 = vadd.f32 0.05243302, %v1283_v40  ;;  %v11049_v25 = vmul.f32 0.70710677, %v11033_v56  ;;  %vm4653_vm11 = vweird.f32 %v10921_v58  ;;  %v3170_v57 = vadd.f32 0.00028619796, %v3169_v51 }
 0x28d   : > { %v1297_v31 = vadd.f32 0.4994258, %v1296_v49  ;;  %v3181_v53 = vadd.f32 0.001143296, %v3180_v60  ;;  %vm4652_vm13 = vweird.f32 %v10853_v13  ;;  %v5483_v4 = vmul.f32 %v11041_v2, %v5462_v20 }
 0x28e   : > { %v3099_v9 = vmul.f32 %v3098_v37, %v10704_v46  ;;  %v3118_v14 = vsel %vm3117_vm12, %v8506_v42, %v3114_v27  ;;  %vm3120_vm14 = vcmp.eq.f32.partialorder %v3119_v55, 8.507059e+37  ;;  %v11056_v43 = vmul.f32 %v10905_v44, %v2921_v50  ;;  %vm11113_vm4 = vmor %vm4652_vm13, %vm4653_vm11 }
 0x28f   : > { %v4650_v40 = vsub.f32 1.5, %v11003_v21  ;;  %vm1085_vm15 = vweird.f32 %v10872_v24  ;;  %v3123_v5 = vsel %vm3120_vm14, %v3122_v29, %v3118_v14  ;;  %v1298_v48 = vmul.f32 %v1297_v31, %v10941_v8  ;;  %5499 = vadd.xlane.f32.xlu0 %v5483_v4 }
 0x290   : > { %v1083_v51 = vsub.f32 1.5, %v11019_v38  ;;  %vm4632_vm0 = vweird.f32 %v10879_v62  ;;  %v1092_v49 = vmul.f32 0.5, %v1091_v22  ;;  %v3124_v46 = vmul.f32 %v3123_v5, %v3099_v9 }
 0x291   : > { %v1285_v42 = vmul.f32 %v1284_v52, %v10941_v8  ;;  %v11064_v37 = vadd.f32 1.0, %v1298_v48  ;;  %v3171_v50 = vmul.f32 %v3170_v57, %v11022_v26  ;;  %v3182_v21 = vmul.f32 %v3181_v53, %v11022_v26  ;;  %v11096_v52 = vld [vmem:[%s16493_s6 + $0x1] ss:$0 sm:$0xff]  ;;  %v2798_v53 = vpop.xlane.xlu2 %2797 }
 0x292   : > { %v3127_v55 = vmul.f32 %v11049_v25, %v11049_v25  ;;  %v4630_v29 = vsub.f32 1.5, %v11024_v12  ;;  %8507 = vrsqrt.f32 %v11026_v41  ;;  %v8247_v38 = vclamps-f32 %v3124_v46, 1.0 }
 0x293   : > { %v968_v22 = vmul.f32 %v948_v39, %v9810_v0  ;;  %vm1086_vm2 = vweird.f32 %v10945_v23  ;;  %vm4633_vm3 = vweird.f32 %v10961_v45  ;;  %8509 = vrcp.f32 %v11064_v37 }
 0x294   : > { %v4739_v12 = vmul.f32 %v10546_v3, %v10456_v59  ;;  %v11091_v61 = vmul.f32 %v10921_v58, %v4650_v40  ;;  %v3727_v27 = vadd.f32 1.0, %v8247_v38  ;;  %v1286_v31 = vadd.f32 0.18741608, %v1285_v42  ;;  %vm11133_vm5 = vmor %vm1085_vm15, %vm1086_vm2 }
 0x295   : > { %v11099_v57 = vmul.f32 %v10945_v23, %v1083_v51  ;;  %v3172_v59 = vadd.f32 0.0036580483, %v3171_v50  ;;  %v3183_v4 = vadd.f32 0.014752088, %v3182_v21  ;;  %v11101_v9 = vmin.f32 %v3127_v55, 16.0  ;;  %vm11144_vm6 = vmor %vm4632_vm0, %vm4633_vm3 }
 0x296   : > { %v11104_v14 = vmul.f32 %v10961_v45, %v4630_v29  ;;  %v1093_v40 = vsub.f32 1.5, %v1092_v49  ;;  %v3743_v5 = vmul.f32 %v3727_v27, %v10968_v15  ;;  %v11107_v39 = vadd.f32 1e-05, %v968_v22 }
 0x297   : > { %v3184_v51 = vmul.f32 %v3183_v4, %v11022_v26  ;;  %v3129_v46 = vmul.f32 2.1237322e-06, %v11101_v9  ;;  %v3140_v42 = vmul.f32 3.8918573e-05, %v11101_v9  ;;  %v11121_v49 = vadd.f32 %v10582_v28, %v4739_v12 }
 0x298   : > { %v11123_v15 = vpop.eup %8507  ;;  %v3764_v21 = vmul.f32 %v11096_v52, %v3743_v5  ;;  %v2817_v55 = vmul.f32 %v2798_v53, %v9810_v0  ;;  %v1287_v29 = vmul.f32 %v1286_v31, %v10941_v8  ;;  %vm1096_vm7 = vweird.f32 %v11001_v17 }
 0x299   : > { %v8510_v38 = vpop.eup %8509  ;;  %v3173_v24 = vmul.f32 %v3172_v59, %v11022_v26  ;;  %v3185_v12 = vadd.f32 0.112945676, %v3184_v51  ;;  %v3130_v27 = vadd.f32 0.00028619796, %v3129_v46  ;;  %v3141_v4 = vadd.f32 0.001143296, %v3140_v42 }
 0x29a   : > { %v1088_v8 = vsel %vm11133_vm5, %v10945_v23, %v11099_v57  ;;  %v4635_v62 = vsel %vm11144_vm6, %v10961_v45, %v11104_v14  ;;  %v1094_v31 = vmul.f32 %v11001_v17, %v1093_v40  ;;  %3780 = vadd.xlane.f32.xlu1 %v3764_v21  ;;  %v1301_v53 = vmul.f32 %v8510_v38, %v11064_v37  ;;  %v4515_v40 = vpop.xlane.xlu1 %4514 }
 0x29b   : > { %vm1095_vm8 = vweird.f32 %v10938_v34  ;;  %v2938_v59 = vmul.f32 %v11123_v15, %v11026_v41  ;;  %8511 = vrsqrt.f32 %v11107_v39  ;;  %v3186_v5 = vmul.f32 %v3185_v12, %v11022_v26  ;;  %v16878_v34 = vld [vmem:[#allocation60_spill] sm:$0xff] }
 0x29c   : > { %v11166_v23 = vmul.f32 0.70710677, %v11121_v49  ;;  %v11168_v57 = vadd.f32 1e-05, %v2817_v55  ;;  %v1302_v45 = vsub.f32 1.0, %v1301_v53  ;;  %v1311_v14 = vand.u32 2147483648, %v11064_v37  ;;  %vm11205_vm13 = vmor %vm1095_vm8, %vm1096_vm7 }
 0x29d   : > { %v3142_v51 = vmul.f32 %v3141_v4, %v11101_v9  ;;  %v1288_v46 = vadd.f32 1.1283791, %v1287_v29  ;;  %v3174_v42 = vadd.f32 0.05243302, %v3173_v24  ;;  %v3187_v50 = vadd.f32 0.4994258, %v3186_v5 }
 0x29e   : > { %v3131_v21 = vmul.f32 %v3130_v27, %v11101_v9  ;;  %v1303_v22 = vmul.f32 %v8510_v38, %v1302_v45  ;;  %vm1306_vm9 = vweird.f32 %v8510_v38  ;;  %v1309_v12 = vand.u32 2147483647, %v11064_v37 }
 0x29f   : > { %v3143_v13 = vadd.f32 0.014752088, %v3142_v51  ;;  %v2939_v20 = vmul.f32 %v11123_v15, %v2938_v59  ;;  %v4535_v55 = vmul.f32 %v4515_v40, %v9810_v0  ;;  %v3188_v53 = vmul.f32 %v3187_v50, %v11022_v26 }
 0x2a0   : > { %v4886_v11 = vmul.f32 %v11166_v23, %v11166_v23  ;;  %v1304_v4 = vadd.f32 %v8510_v38, %v1303_v22  ;;  %vm1305_vm10 = vweird.f32 %v11064_v37  ;;  %v1312_v29 = vor.u32 1.1754944e-38, %v1311_v14  ;;  %v16873_v22 = vld [vmem:[#allocation58_spill] sm:$0xff] }
 0x2a1   : > { %v3144_v24 = vmul.f32 %v3143_v13, %v11101_v9  ;;  %v11181_v27 = vpop.eup %8511  ;;  %vm1307_vm11 = vmor %vm1305_vm10, %vm1306_vm9  ;;  %v3175_v5 = vmul.f32 %v3174_v42, %v11022_v26  ;;  %v11184_v45 = vadd.f32 1.0, %v3188_v53  ;;  %v3132_v59 = vadd.f32 0.0036580483, %v3131_v21 }
 0x2a2   : > { %v4738_v40 = vmul.f32 %v10546_v3, %v10538_v63  ;;  %8513 = vrsqrt.f32 %v11168_v57  ;;  %v1289_v51 = vmul.f32 %v1288_v46, %v10876_v7  ;;  %v1308_v50 = vsel %vm1307_vm11, %v8510_v38, %v1304_v4  ;;  %v16883_v4 = vld [vmem:[#allocation61_spill] sm:$0xff] }
 0x2a3   : > { %vm1310_vm12 = vcmp.eq.f32.partialorder %v1309_v12, 8.507059e+37  ;;  %8515 = vrcp.f32 %v11184_v45  ;;  %v3145_v13 = vadd.f32 0.112945676, %v3144_v24  ;;  %v11191_v14 = vmin.f32 %v4886_v11, 16.0 }
 0x2a4   : > { %v1313_v37 = vsel %vm1310_vm12, %v1312_v29, %v1308_v50  ;;  %v16874_v42 = vsel %vm11077_vm1, %v10905_v44, %v11056_v43  ;;  %v1100_v3 = vmul.f32 %v11181_v27, %v11107_v39  ;;  %v11211_v7 = vadd.f32 1e-05, %v4535_v55  ;;  %v16881_v55 = vld [vmem:[#allocation62_spill] sm:$0xff] }
 0x2a5   : > { %v11199_v21 = vmul.f32 %v16874_v42, %v16873_v22  ;;  %v1314_v11 = vmul.f32 %v1313_v37, %v1289_v51  ;;  %v1098_v44 = vsel %vm11205_vm13, %v11001_v17, %v1094_v31  ;;  %v3176_v43 = vadd.f32 0.18741608, %v3175_v5 }
 0x2a6   : > { %v3133_v60 = vmul.f32 %v3132_v59, %v11101_v9  ;;  %v11218_v38 = vadd.f32 %v10582_v28, %v4738_v40  ;;  %v16879_v46 = vsel %vm11113_vm4, %v10921_v58, %v11091_v61  ;;  %v11229_v53 = vmul.f32 %v1088_v8, %v16881_v55  ;;  %v16885_v59 = vld [vmem:[#allocation63_spill] sm:$0xff] }
 0x2a7   : > { %16875 = vst [vmem:[#allocation56_spill] sm:$0xff] %v11199_v21  ;;  %v11226_v12 = vmul.f32 %v16879_v46, %v16878_v34  ;;  %v11232_v29 = vmul.f32 %v4635_v62, %v16883_v4  ;;  %v8232_v17 = vclamps-f32 %v1314_v11, 1.0  ;;  %v2940_v31 = vmul.f32 0.5, %v2939_v20 }
 0x2a8   : > { %16882 = vst [vmem:[#allocation55_spill] sm:$0xff] %v11229_v53  ;;  %v3146_v24 = vmul.f32 %v3145_v13, %v11101_v9  ;;  %v4888_v28 = vmul.f32 2.1237322e-06, %v11191_v14  ;;  %v4899_v5 = vmul.f32 3.8918573e-05, %v11191_v14  ;;  %v11237_v48 = vpop.eup %8513  ;;  %v11240_v58 = vmul.f32 %v1098_v44, %v16885_v59 }
 0x2a9   : > { %16880 = vst [vmem:[#allocation79_spill] sm:$0xff] %v11226_v12  ;;  %v1101_v61 = vmul.f32 %v11181_v27, %v1100_v3  ;;  %v1878_v8 = vadd.f32 1.0, %v8232_v17  ;;  %8517 = vrsqrt.f32 %v11211_v7  ;;  %v8516_v62 = vpop.eup %8515  ;;  %v3177_v40 = vmul.f32 %v3176_v43, %v11022_v26 }
 0x2aa   : > { %16884 = vst [vmem:[#allocation57_spill] sm:$0xff] %v11232_v29  ;;  %v3134_v20 = vadd.f32 0.05243302, %v3133_v60  ;;  %v3147_v51 = vadd.f32 0.4994258, %v3146_v24  ;;  %v11250_v13 = vmul.f32 0.5, %v10977_v54  ;;  %v3191_v22 = vmul.f32 %v8516_v62, %v11184_v45 }
 0x2ab   : > { %16886 = vst [vmem:[#allocation59_spill] sm:$0xff] %v11240_v58  ;;  %v11246_v50 = vmul.f32 0.70710677, %v11218_v38  ;;  %v1894_v37 = vmul.f32 %v1878_v8, %v10990_v1  ;;  %v4900_v42 = vadd.f32 0.001143296, %v4899_v5  ;;  %v2941_v63 = vsub.f32 1.5, %v2940_v31  ;;  %v2796_v1 = vpop.xlane.xlu0 %2795 }
 0x2ac   : > { %v2958_v3 = vmul.f32 %v11237_v48, %v11168_v57  ;;  %v3148_v11 = vmul.f32 %v3147_v51, %v11101_v9  ;;  %v4889_v26 = vadd.f32 0.00028619796, %v4888_v28  ;;  %v1102_v44 = vmul.f32 0.5, %v1101_v61 }
 0x2ad   : > { %v1914_v43 = vmul.f32 %v10868_v33, %v1894_v37  ;;  %v3192_v60 = vsub.f32 1.0, %v3191_v22  ;;  %v3201_v34 = vand.u32 2147483648, %v11184_v45  ;;  %v3178_v46 = vadd.f32 1.1283791, %v3177_v40 }
 0x2ae   : > { %v3135_v54 = vmul.f32 %v3134_v20, %v11101_v9  ;;  %v11259_v55 = vadd.f32 1.0, %v3148_v11  ;;  %v4846_v4 = vmul.f32 %v11246_v50, %v11246_v50  ;;  %vm3196_vm14 = vweird.f32 %v8516_v62  ;;  %v4517_v20 = vpop.xlane.xlu2 %4516 }
 0x2af   : > { %v11263_v17 = vpop.eup %8517  ;;  %1931 = vadd.xlane.f32.xlu0 %v1914_v43  ;;  %v3193_v31 = vmul.f32 %v8516_v62, %v3192_v60  ;;  %v3199_v24 = vand.u32 2147483647, %v11184_v45  ;;  %v4901_v33 = vmul.f32 %v4900_v42, %v11191_v14  ;;  %v2959_v28 = vmul.f32 %v11237_v48, %v2958_v3  ;;  %v11274_v42 = vld [vmem:[#allocation8 + $0x2] ss:$0 sm:$0xff] }
 0x2b0   : > { %v2816_v5 = vmul.f32 %v2796_v1, %v9810_v0  ;;  %8519 = vrcp.f32 %v11259_v55  ;;  %v4890_v59 = vmul.f32 %v4889_v26, %v11191_v14  ;;  %v1103_v61 = vsub.f32 1.5, %v1102_v44 }
 0x2b1   : > { %v3194_v8 = vadd.f32 %v8516_v62, %v3193_v31  ;;  %vm3195_vm15 = vweird.f32 %v11184_v45  ;;  %v3202_v40 = vor.u32 1.1754944e-38, %v3201_v34  ;;  %v3136_v51 = vadd.f32 0.18741608, %v3135_v54 }
 0x2b2   : > { %vm3197_vm0 = vmor %vm3195_vm15, %vm3196_vm14  ;;  %v4902_v37 = vadd.f32 0.014752088, %v4901_v33  ;;  %v11272_v22 = vmin.f32 %v4846_v4, 16.0  ;;  %v4740_v3 = vmul.f32 %v11274_v42, %v10551_v30  ;;  %v4667_v11 = vmul.f32 %v11263_v17, %v11211_v7 }
 0x2b3   : > { %v3179_v26 = vmul.f32 %v3178_v46, %v10996_v19  ;;  %v3198_v44 = vsel %vm3197_vm0, %v8516_v62, %v3194_v8  ;;  %vm3200_vm1 = vcmp.eq.f32.partialorder %v3199_v24, 8.507059e+37  ;;  %v11281_v43 = vadd.f32 1e-05, %v2816_v5  ;;  %v11294_v24 = vld [vmem:[#allocation10 + $0x2] ss:$0 sm:$0xff] }
 0x2b4   : > { %v3203_v45 = vsel %vm3200_vm1, %v3202_v40, %v3198_v44  ;;  %v4536_v60 = vmul.f32 %v4517_v20, %v9810_v0  ;;  %v4891_v34 = vadd.f32 0.0036580483, %v4890_v59  ;;  %v11285_v1 = vmul.f32 %v11123_v15, %v2941_v63 }
 0x2b5   : > { %v11287_v54 = vmul.f32 0.5, %v2959_v28  ;;  %v3204_v4 = vmul.f32 %v3203_v45, %v3179_v26  ;;  %v4903_v30 = vmul.f32 %v4902_v37, %v11191_v14  ;;  %vm2944_vm2 = vweird.f32 %v11123_v15 }
 0x2b6   : > { %v8520_v31 = vpop.eup %8519  ;;  %v3137_v19 = vmul.f32 %v3136_v51, %v11101_v9  ;;  %v4848_v62 = vmul.f32 2.1237322e-06, %v11272_v22  ;;  %v4859_v46 = vmul.f32 3.8918573e-05, %v11272_v22  ;;  %v11297_v33 = vadd.f32 %v11294_v24, %v4740_v3 }
 0x2b7   : > { %v11300_v63 = vmul.f32 %v11181_v27, %v1103_v61  ;;  %v11303_v28 = vmul.f32 %v11263_v17, %v4667_v11  ;;  %v8249_v5 = vclamps-f32 %v3204_v4, 1.0  ;;  %v3151_v59 = vmul.f32 %v8520_v31, %v11259_v55 }
 0x2b8   : > { %vm2943_vm3 = vweird.f32 %v11026_v41  ;;  %vm1106_vm4 = vweird.f32 %v11181_v27  ;;  %8521 = vrsqrt.f32 %v11281_v43  ;;  %v11309_v9 = vadd.f32 1e-05, %v4536_v60 }
 0x2b9   : > { %v4892_v8 = vmul.f32 %v4891_v34, %v11191_v14  ;;  %v4904_v40 = vadd.f32 0.112945676, %v4903_v30  ;;  %v3729_v20 = vadd.f32 1.0, %v8249_v5  ;;  %v3152_v61 = vsub.f32 1.0, %v3151_v59  ;;  %vm11340_vm10 = vmor %vm2943_vm3, %vm2944_vm2 }
 0x2ba   : > { %v4849_v51 = vadd.f32 0.00028619796, %v4848_v62  ;;  %v4860_v37 = vadd.f32 0.001143296, %v4859_v46  ;;  %vm1105_vm5 = vweird.f32 %v11107_v39  ;;  %v3138_v3 = vadd.f32 1.1283791, %v3137_v19 }
 0x2bb   : > { %v3161_v11 = vand.u32 2147483648, %v11259_v55  ;;  %v4905_v26 = vmul.f32 %v4904_v40, %v11191_v14  ;;  %v11316_v44 = vmul.f32 0.70710677, %v11297_v33  ;;  %v3745_v45 = vmul.f32 %v3729_v20, %v11250_v13  ;;  %vm11361_vm11 = vmor %vm1105_vm5, %vm1106_vm4 }
 0x2bc   : > { %v3153_v60 = vmul.f32 %v8520_v31, %v3152_v61  ;;  %vm3156_vm6 = vweird.f32 %v8520_v31  ;;  %v3159_v34 = vand.u32 2147483647, %v11259_v55  ;;  %v4893_v4 = vadd.f32 0.05243302, %v4892_v8 }
 0x2bd   : > { %v4906_v30 = vadd.f32 0.4994258, %v4905_v26  ;;  %v4850_v62 = vmul.f32 %v4849_v51, %v11272_v22  ;;  %v4861_v46 = vmul.f32 %v4860_v37, %v11272_v22  ;;  %v3766_v19 = vmul.f32 %v11096_v52, %v3745_v45  ;;  %v950_v45 = vpop.xlane.xlu1 %949 }
 0x2be   : > { %v3154_v5 = vadd.f32 %v8520_v31, %v3153_v60  ;;  %vm3155_vm7 = vweird.f32 %v11259_v55  ;;  %v4926_v59 = vmul.f32 %v11316_v44, %v11316_v44  ;;  %v11326_v40 = vpop.eup %8521  ;;  %v3162_v13 = vor.u32 1.1754944e-38, %v3161_v11 }
 0x2bf   : > { %vm3157_vm8 = vmor %vm3155_vm7, %vm3156_vm6  ;;  %v4907_v20 = vmul.f32 %v4906_v30, %v11191_v14  ;;  %v4851_v8 = vadd.f32 0.0036580483, %v4850_v62  ;;  %v4862_v61 = vadd.f32 0.014752088, %v4861_v46  ;;  %3784 = vadd.xlane.f32.xlu2 %v3766_v19  ;;  %v3139_v51 = vmul.f32 %v3138_v3, %v11049_v25  ;;  %v16889_v30 = vld [vmem:[#allocation81_spill] sm:$0xff] }
 0x2c0   : > { %v3158_v37 = vsel %vm3157_vm8, %v8520_v31, %v3154_v5  ;;  %vm3160_vm9 = vcmp.eq.f32.partialorder %v3159_v34, 8.507059e+37  ;;  %v11330_v26 = vmin.f32 %v4926_v59, 16.0  ;;  %8523 = vrsqrt.f32 %v11309_v9  ;;  %v11346_v34 = vld [vmem:[#allocation8] ss:$0 sm:$0xff] }
 0x2c1   : > { %v3163_v55 = vsel %vm3160_vm9, %v3162_v13, %v3158_v37  ;;  %v4894_v60 = vmul.f32 %v4893_v4, %v11191_v14  ;;  %v11334_v53 = vadd.f32 1.0, %v4907_v20  ;;  %v4863_v31 = vmul.f32 %v4862_v61, %v11272_v22  ;;  %v11374_v37 = vld [vmem:[#allocation10] ss:$0 sm:$0xff] }
 0x2c2   : > { %v3164_v25 = vmul.f32 %v3163_v55, %v3139_v51  ;;  %v4928_v3 = vmul.f32 2.1237322e-06, %v11330_v26  ;;  %v1172_v4 = vmul.f32 %v11346_v34, %v16889_v30  ;;  %v2946_v62 = vsel %vm11340_vm10, %v11123_v15, %v11285_v1 }
 0x2c3   : > { %v3056_v41 = vmul.f32 0.5, %v11033_v56  ;;  %8525 = vrcp.f32 %v11334_v53  ;;  %v4852_v46 = vmul.f32 %v4851_v8, %v11272_v22  ;;  %v2961_v5 = vsub.f32 1.5, %v11287_v54 }
 0x2c4   : > { %v8248_v59 = vclamps-f32 %v3164_v25, 1.0  ;;  %v969_v13 = vmul.f32 %v950_v45, %v9810_v0  ;;  %v4864_v15 = vadd.f32 0.112945676, %v4863_v31  ;;  %v1108_v56 = vsel %vm11361_vm11, %v11181_v27, %v11300_v63  ;;  %v16892_v45 = vld [vmem:[#allocation32_spill] sm:$0xff] }
 0x2c5   : > { %v4895_v1 = vadd.f32 0.18741608, %v4894_v60  ;;  %v4929_v20 = vadd.f32 0.00028619796, %v4928_v3  ;;  %v4939_v8 = vmul.f32 3.8918573e-05, %v11330_v26  ;;  %v11377_v54 = vadd.f32 %v11374_v37, %v1172_v4 }
 0x2c6   : > { %v4669_v39 = vmul.f32 0.5, %v11303_v28  ;;  %v3728_v61 = vadd.f32 1.0, %v8248_v59  ;;  %v4865_v51 = vmul.f32 %v4864_v15, %v11272_v22  ;;  %v11379_v55 = vpop.eup %8523  ;;  %v11382_v11 = vmul.f32 %v2946_v62, %v16892_v45  ;;  %v16894_v4 = vld [vmem:[#allocation64_spill] sm:$0xff] }
 0x2c7   : > { %v2948_v27 = vmul.f32 %v11326_v40, %v11281_v43  ;;  %v4853_v63 = vadd.f32 0.05243302, %v4852_v46  ;;  %v4940_v60 = vadd.f32 0.001143296, %v4939_v8  ;;  %vm2964_vm12 = vweird.f32 %v11237_v48 }
 0x2c8   : > { %16893 = vst [vmem:[#allocation78_spill] sm:$0xff] %v11382_v11  ;;  %v3744_v28 = vmul.f32 %v3728_v61, %v3056_v41  ;;  %v11387_v25 = vadd.f32 1e-05, %v969_v13  ;;  %v4866_v31 = vadd.f32 0.4994258, %v4865_v51  ;;  %v4930_v3 = vmul.f32 %v4929_v20, %v11330_v26 }
 0x2c9   : > { %v8526_v30 = vpop.eup %8525  ;;  %v11391_v19 = vmul.f32 %v1108_v56, %v16894_v4  ;;  %v11394_v62 = vmul.f32 %v11237_v48, %v2961_v5  ;;  %v4896_v59 = vmul.f32 %v4895_v1, %v11191_v14  ;;  %v4941_v46 = vmul.f32 %v4940_v60, %v11330_v26 }
 0x2ca   : > { %vm2963_vm13 = vweird.f32 %v11168_v57  ;;  %v4670_v15 = vsub.f32 1.5, %v4669_v39  ;;  %v3765_v41 = vmul.f32 %v11096_v52, %v3744_v28  ;;  %v4910_v13 = vmul.f32 %v8526_v30, %v11334_v53 }
 0x2cb   : > { %16895 = vst [vmem:[#allocation58_spill] sm:$0xff] %v11391_v19  ;;  %v11402_v20 = vmul.f32 0.70710677, %v11377_v54  ;;  %v2949_v56 = vmul.f32 %v11326_v40, %v2948_v27  ;;  %v4677_v5 = vmul.f32 %v11379_v55, %v11309_v9  ;;  %v4854_v8 = vmul.f32 %v4853_v63, %v11272_v22  ;;  %vm11438_vm3 = vmor %vm2963_vm13, %vm2964_vm12 }
 0x2cc   : > { %v4867_v14 = vmul.f32 %v4866_v31, %v11272_v22  ;;  %3782 = vadd.xlane.f32.xlu0 %v3765_v41  ;;  %8527 = vrsqrt.f32 %v11387_v25  ;;  %v4911_v1 = vsub.f32 1.0, %v4910_v13  ;;  %v4931_v39 = vadd.f32 0.0036580483, %v4930_v3 }
 0x2cd   : > { %v4942_v52 = vadd.f32 0.014752088, %v4941_v46  ;;  %v4897_v61 = vadd.f32 1.1283791, %v4896_v59  ;;  %v4918_v51 = vand.u32 2147483647, %v11334_v53  ;;  %vm4915_vm14 = vweird.f32 %v8526_v30 }
 0x2ce   : > { %v4920_v45 = vand.u32 2147483648, %v11334_v53  ;;  %v11412_v60 = vadd.f32 1.0, %v4867_v14  ;;  %v4912_v27 = vmul.f32 %v8526_v30, %v4911_v1  ;;  %v1357_v63 = vmul.f32 %v11402_v20, %v11402_v20  ;;  %v16896_v1 = vld [vmem:[#allocation53_spill] sm:$0xff] }
 0x2cf   : > { %v4943_v28 = vmul.f32 %v4942_v52, %v11330_v26  ;;  %vm4673_vm15 = vweird.f32 %v11263_v17  ;;  %v4678_v31 = vmul.f32 %v11379_v55, %v4677_v5  ;;  %v4855_v3 = vadd.f32 0.18741608, %v4854_v8 }
 0x2d0   : > { %8529 = vrcp.f32 %v11412_v60  ;;  %v11421_v4 = vmul.f32 %v11263_v17, %v4670_v15  ;;  %v4913_v59 = vadd.f32 %v8526_v30, %v4912_v27  ;;  %vm4914_vm0 = vweird.f32 %v11334_v53 }
 0x2d1   : > { %v4932_v46 = vmul.f32 %v4931_v39, %v11330_v26  ;;  %v11425_v41 = vmul.f32 0.5, %v2949_v56  ;;  %v4898_v13 = vmul.f32 %v4897_v61, %v11166_v23  ;;  %vm4916_vm1 = vmor %vm4914_vm0, %vm4915_vm14  ;;  %v4921_v14 = vor.u32 1.1754944e-38, %v4920_v45 }
 0x2d2   : > { %v1171_v5 = vmul.f32 %v11346_v34, %v16896_v1  ;;  %v11430_v8 = vpop.eup %8527  ;;  %v4917_v52 = vsel %vm4916_vm1, %v8526_v30, %v4913_v59  ;;  %vm4919_vm2 = vcmp.eq.f32.partialorder %v4918_v51, 8.507059e+37  ;;  %v4944_v15 = vadd.f32 0.112945676, %v4943_v28  ;;  %v4513_v51 = vpop.xlane.xlu0 %4512 }
 0x2d3   : > { %v11432_v19 = vmin.f32 %v1357_v63, 16.0  ;;  %vm4672_vm4 = vweird.f32 %v11211_v7  ;;  %v11443_v23 = vmul.f32 0.5, %v4678_v31  ;;  %v4922_v56 = vsel %vm4919_vm2, %v4921_v14, %v4917_v52 }
 0x2d4   : > { %v4856_v39 = vmul.f32 %v4855_v3, %v11272_v22  ;;  %v2966_v30 = vsel %vm11438_vm3, %v11237_v48, %v11394_v62  ;;  %vm11452_vm5 = vmor %vm4672_vm4, %vm4673_vm15  ;;  %v4923_v61 = vmul.f32 %v4922_v56, %v4898_v13  ;;  %v4933_v45 = vadd.f32 0.05243302, %v4932_v46 }
 0x2d5   : > { %v4945_v7 = vmul.f32 %v4944_v15, %v11330_v26  ;;  %v4675_v22 = vsel %vm11452_vm5, %v11263_v17, %v11421_v4  ;;  %v4776_v28 = vmul.f32 0.5, %v11121_v49  ;;  %v1359_v48 = vmul.f32 2.1237322e-06, %v11432_v19 }
 0x2d6   : > { %v8530_v27 = vpop.eup %8529  ;;  %v11464_v62 = vadd.f32 %v11374_v37, %v1171_v5  ;;  %v2951_v63 = vsub.f32 1.5, %v11425_v41  ;;  %v8267_v31 = vclamps-f32 %v4923_v61, 1.0  ;;  %v4680_v46 = vsub.f32 1.5, %v11443_v23  ;;  %v952_v5 = vpop.xlane.xlu2 %951 }
 0x2d7   : > { %v4870_v3 = vmul.f32 %v8530_v27, %v11412_v60  ;;  %v4946_v59 = vadd.f32 0.4994258, %v4945_v7  ;;  %v1110_v13 = vmul.f32 %v11430_v8, %v11387_v25  ;;  %v4857_v14 = vadd.f32 1.1283791, %v4856_v39 }
 0x2d8   : > { %v4534_v17 = vmul.f32 %v4513_v51, %v9810_v0  ;;  %v5448_v49 = vadd.f32 1.0, %v8267_v31  ;;  %v4880_v1 = vand.u32 2147483648, %v11412_v60  ;;  %v4934_v52 = vmul.f32 %v4933_v45, %v11330_v26 }
 0x2d9   : > { %v4871_v4 = vsub.f32 1.0, %v4870_v3  ;;  %v4947_v41 = vmul.f32 %v4946_v59, %v11330_v26  ;;  %v1360_v15 = vadd.f32 0.00028619796, %v1359_v48  ;;  %v1370_v53 = vmul.f32 3.8918573e-05, %v11432_v19 }
 0x2da   : > { %v11477_v23 = vmul.f32 0.70710677, %v11464_v62  ;;  %v5464_v56 = vmul.f32 %v5448_v49, %v4776_v28  ;;  %vm4875_vm6 = vweird.f32 %v8530_v27  ;;  %v4878_v39 = vand.u32 2147483647, %v11412_v60 }
 0x2db   : > { %v4872_v57 = vmul.f32 %v8530_v27, %v4871_v4  ;;  %v1111_v61 = vmul.f32 %v11430_v8, %v1110_v13  ;;  %vm4874_vm7 = vweird.f32 %v11412_v60  ;;  %v970_v51 = vmul.f32 %v952_v5, %v9810_v0  ;;  %v16901_v5 = vld [vmem:[#allocation65_spill] sm:$0xff] }
 0x2dc   : > { %v11483_v45 = vadd.f32 1.0, %v4947_v41  ;;  %v5485_v7 = vmul.f32 %v11041_v2, %v5464_v56  ;;  %v4881_v31 = vor.u32 1.1754944e-38, %v4880_v1  ;;  %v4935_v3 = vadd.f32 0.18741608, %v4934_v52  ;;  %vm4876_vm8 = vmor %vm4874_vm7, %vm4875_vm6  ;;  %v16903_v1 = vld [vmem:[#allocation66_spill] sm:$0xff] }
 0x2dd   : > { %v4873_v48 = vadd.f32 %v8530_v27, %v4872_v57  ;;  %v1361_v28 = vmul.f32 %v1360_v15, %v11432_v19  ;;  %v1371_v59 = vadd.f32 0.001143296, %v1370_v53  ;;  %v1317_v13 = vmul.f32 %v11477_v23, %v11477_v23 }
 0x2de   : > { %8531 = vrcp.f32 %v11483_v45  ;;  %5503 = vadd.xlane.f32.xlu2 %v5485_v7  ;;  %v4858_v60 = vmul.f32 %v4857_v14, %v11246_v50  ;;  %vm4879_vm9 = vcmp.eq.f32.partialorder %v4878_v39, 8.507059e+37  ;;  %v11491_v4 = vadd.f32 1e-05, %v4534_v17  ;;  %v11505_v50 = vld [vmem:[#allocation8 + $0x1] ss:$0 sm:$0xff] }
 0x2df   : > { %v4877_v49 = vsel %vm4876_vm8, %v8530_v27, %v4873_v48  ;;  %v11494_v41 = vmul.f32 %v2966_v30, %v16901_v5  ;;  %v11497_v52 = vmul.f32 %v4675_v22, %v16903_v1  ;;  %v4775_v56 = vmul.f32 0.5, %v11218_v38  ;;  %v16905_v27 = vld [vmem:[#allocation80_spill] sm:$0xff] }
 0x2e0   : > { %v4882_v15 = vsel %vm4879_vm9, %v4881_v31, %v4877_v49  ;;  %v11501_v53 = vmul.f32 %v11326_v40, %v2951_v63  ;;  %v11503_v7 = vadd.f32 1e-05, %v970_v51  ;;  %v3021_v14 = vmul.f32 %v11505_v50, %v16905_v27 }
 0x2e1   : > { %16902 = vst [vmem:[#allocation60_spill] sm:$0xff] %v11494_v41  ;;  %v4883_v57 = vmul.f32 %v4882_v15, %v4858_v60  ;;  %v4936_v30 = vmul.f32 %v4935_v3, %v11330_v26  ;;  %v1362_v17 = vadd.f32 0.0036580483, %v1361_v28  ;;  %v1372_v22 = vmul.f32 %v1371_v59, %v11432_v19  ;;  %v16906_v3 = vld [vmem:[#allocation83_spill] sm:$0xff] }
 0x2e2   : > { %16904 = vst [vmem:[#allocation62_spill] sm:$0xff] %v11497_v52  ;;  %v11511_v39 = vmin.f32 %v1317_v13, 16.0  ;;  %v11514_v38 = vmul.f32 %v11379_v55, %v4680_v46  ;;  %v11516_v63 = vmul.f32 0.5, %v1111_v61  ;;  %8533 = vrsqrt.f32 %v11491_v4  ;;  %v11526_v61 = vld [vmem:[#allocation10 + $0x1] ss:$0 sm:$0xff] }
 0x2e3   : > { %v8266_v48 = vclamps-f32 %v4883_v57, 1.0  ;;  %vm2954_vm10 = vweird.f32 %v11326_v40  ;;  %v1373_v31 = vadd.f32 0.014752088, %v1372_v22  ;;  %v1173_v28 = vmul.f32 %v11346_v34, %v16906_v3 }
 0x2e4   : > { %v8532_v51 = vpop.eup %8531  ;;  %v1319_v60 = vmul.f32 2.1237322e-06, %v11511_v39  ;;  %v1330_v26 = vmul.f32 3.8918573e-05, %v11511_v39  ;;  %8535 = vrsqrt.f32 %v11503_v7  ;;  %v11529_v13 = vadd.f32 %v11526_v61, %v3021_v14 }
 0x2e5   : > { %v5447_v59 = vadd.f32 1.0, %v8266_v48  ;;  %v4950_v46 = vmul.f32 %v8532_v51, %v11483_v45  ;;  %vm2953_vm11 = vweird.f32 %v11281_v43  ;;  %v4937_v49 = vadd.f32 1.1283791, %v4936_v30 }
 0x2e6   : > { %v1363_v5 = vmul.f32 %v1362_v17, %v11432_v19  ;;  %v1374_v1 = vmul.f32 %v1373_v31, %v11432_v19  ;;  %v1320_v15 = vadd.f32 0.00028619796, %v1319_v60  ;;  %v4958_v27 = vand.u32 2147483647, %v11483_v45  ;;  %v2800_v31 = vpop.xlane.xlu1 %2799  ;;  %vm11567_vm2 = vmor %vm2953_vm11, %vm2954_vm10 }
 0x2e7   : > { %v5463_v57 = vmul.f32 %v5447_v59, %v4775_v56  ;;  %v4951_v34 = vsub.f32 1.0, %v4950_v46  ;;  %v1331_v22 = vadd.f32 0.001143296, %v1330_v26  ;;  %v4960_v48 = vand.u32 2147483648, %v11483_v45 }
 0x2e8   : > { %v1375_v3 = vadd.f32 0.112945676, %v1374_v1  ;;  %v1321_v41 = vmul.f32 %v1320_v15, %v11511_v39  ;;  %v11538_v14 = vadd.f32 %v11374_v37, %v1173_v28  ;;  %v11540_v52 = vpop.eup %8533  ;;  %vm4955_vm12 = vweird.f32 %v8532_v51 }
 0x2e9   : > { %v5484_v30 = vmul.f32 %v11041_v2, %v5463_v57  ;;  %v4952_v17 = vmul.f32 %v8532_v51, %v4951_v34  ;;  %v1332_v56 = vmul.f32 %v1331_v22, %v11511_v39  ;;  %v4938_v60 = vmul.f32 %v4937_v49, %v11316_v44 }
 0x2ea   : > { %v1364_v26 = vadd.f32 0.05243302, %v1363_v5  ;;  %v1376_v59 = vmul.f32 %v1375_v3, %v11432_v19  ;;  %v1322_v46 = vadd.f32 0.0036580483, %v1321_v41  ;;  %v11546_v1 = vpop.eup %8535  ;;  %vm4954_vm13 = vweird.f32 %v11483_v45 }
 0x2eb   : > { %5501 = vadd.xlane.f32.xlu1 %v5484_v30  ;;  %v4953_v37 = vadd.f32 %v8532_v51, %v4952_v17  ;;  %v1333_v28 = vadd.f32 0.014752088, %v1332_v56  ;;  %v11550_v15 = vmul.f32 0.70710677, %v11538_v14  ;;  %vm4683_vm14 = vweird.f32 %v11379_v55  ;;  %vm4956_vm15 = vmor %vm4954_vm13, %vm4955_vm12 }
 0x2ec   : > { %v4961_v57 = vor.u32 1.1754944e-38, %v4960_v48  ;;  %v2818_v44 = vmul.f32 %v2800_v31, %v9810_v0  ;;  %v1377_v49 = vadd.f32 0.4994258, %v1376_v59  ;;  %v1323_v5 = vmul.f32 %v1322_v46, %v11511_v39 }
 0x2ed   : > { %v4957_v41 = vsel %vm4956_vm15, %v8532_v51, %v4953_v37  ;;  %vm4959_vm0 = vcmp.eq.f32.partialorder %v4958_v27, 8.507059e+37  ;;  %v1334_v34 = vmul.f32 %v1333_v28, %v11511_v39  ;;  %v1397_v45 = vmul.f32 %v11550_v15, %v11550_v15 }
 0x2ee   : > { %vm4682_vm1 = vweird.f32 %v11309_v9  ;;  %v4657_v22 = vmul.f32 %v11540_v52, %v11491_v4  ;;  %v4962_v3 = vsel %vm4959_vm0, %v4961_v57, %v4957_v41  ;;  %v1365_v48 = vmul.f32 %v1364_v26, %v11432_v19 }
 0x2ef   : > { %v1378_v30 = vmul.f32 %v1377_v49, %v11432_v19  ;;  %v1120_v27 = vmul.f32 %v11546_v1, %v11503_v7  ;;  %v4963_v17 = vmul.f32 %v4962_v3, %v4938_v60  ;;  %v1335_v31 = vadd.f32 0.112945676, %v1334_v34  ;;  %vm11610_vm4 = vmor %vm4682_vm1, %vm4683_vm14 }
 0x2f0   : > { %v11573_v56 = vmin.f32 %v1397_v45, 16.0  ;;  %v2956_v26 = vsel %vm11567_vm2, %v11326_v40, %v11501_v53  ;;  %v1324_v46 = vadd.f32 0.05243302, %v1323_v5  ;;  %v11582_v43 = vmul.f32 0.70710677, %v11529_v13 }
 0x2f1   : > { %v11579_v59 = vadd.f32 1.0, %v1378_v30  ;;  %v1113_v37 = vsub.f32 1.5, %v11516_v63  ;;  %v8268_v28 = vclamps-f32 %v4963_v17, 1.0  ;;  %v11585_v57 = vadd.f32 1e-05, %v2818_v44 }
 0x2f2   : > { %v1336_v60 = vmul.f32 %v1335_v31, %v11511_v39  ;;  %v4658_v49 = vmul.f32 %v11540_v52, %v4657_v22  ;;  %v1366_v41 = vadd.f32 0.18741608, %v1365_v48  ;;  %v1399_v40 = vmul.f32 2.1237322e-06, %v11573_v56 }
 0x2f3   : > { %8537 = vrcp.f32 %v11579_v59  ;;  %v1121_v53 = vmul.f32 %v11546_v1, %v1120_v27  ;;  %v4777_v5 = vmul.f32 0.5, %v11297_v33  ;;  %v5449_v34 = vadd.f32 1.0, %v8268_v28 }
 0x2f4   : > { %v1337_v45 = vadd.f32 0.4994258, %v1336_v60  ;;  %vm1116_vm3 = vweird.f32 %v11430_v8  ;;  %v1325_v63 = vmul.f32 %v1324_v46, %v11511_v39  ;;  %v1410_v44 = vmul.f32 3.8918573e-05, %v11573_v56 }
 0x2f5   : > { %v3207_v22 = vmul.f32 %v11582_v43, %v11582_v43  ;;  %v11599_v3 = vmul.f32 %v11430_v8, %v1113_v37  ;;  %v5465_v48 = vmul.f32 %v5449_v34, %v4777_v5  ;;  %8539 = vrsqrt.f32 %v11585_v57 }
 0x2f6   : > { %v1338_v30 = vmul.f32 %v1337_v45, %v11511_v39  ;;  %v11603_v33 = vmul.f32 0.5, %v4658_v49  ;;  %v1367_v51 = vmul.f32 %v1366_v41, %v11432_v19  ;;  %v1400_v27 = vadd.f32 0.00028619796, %v1399_v40  ;;  %v16911_v19 = vld [vmem:[#allocation37_spill] sm:$0xff]  ;;  %v954_v40 = vpop.xlane.xlu0 %953 }
 0x2f7   : > { %v1411_v17 = vadd.f32 0.001143296, %v1410_v44  ;;  %vm1115_vm5 = vweird.f32 %v11387_v25  ;;  %v11615_v46 = vmul.f32 0.5, %v1121_v53  ;;  %v5486_v37 = vmul.f32 %v11041_v2, %v5465_v48  ;;  %v2804_v44 = vpop.xlane.xlu2 %2803 }
 0x2f8   : > { %v11618_v28 = vadd.f32 1.0, %v1338_v30  ;;  %v11621_v49 = vmul.f32 %v2956_v26, %v16911_v19  ;;  %vm11625_vm6 = vmor %vm1115_vm5, %vm1116_vm3  ;;  %v1326_v41 = vadd.f32 0.18741608, %v1325_v63  ;;  %v11630_v53 = vmin.f32 %v3207_v22, 16.0 }
 0x2f9   : > { %v8538_v60 = vpop.eup %8537  ;;  %v1412_v25 = vmul.f32 %v1411_v17, %v11573_v56  ;;  %5505 = vadd.xlane.f32.xlu0 %v5486_v37  ;;  %v11644_v45 = vmul.f32 0.5, %v11377_v54  ;;  %v1368_v63 = vadd.f32 1.1283791, %v1367_v51  ;;  %v1401_v22 = vmul.f32 %v1400_v27, %v11573_v56 }
 0x2fa   : > { %16912 = vst [vmem:[#allocation61_spill] sm:$0xff] %v11621_v49  ;;  %v1381_v5 = vmul.f32 %v8538_v60, %v11579_v59  ;;  %8541 = vrcp.f32 %v11618_v28  ;;  %v1391_v37 = vand.u32 2147483648, %v11579_v59  ;;  %v971_v19 = vmul.f32 %v954_v40, %v9810_v0 }
 0x2fb   : > { %v11647_v48 = vpop.eup %8539  ;;  %v1389_v26 = vand.u32 2147483647, %v11579_v59  ;;  %v1327_v2 = vmul.f32 %v1326_v41, %v11511_v39  ;;  %v1413_v34 = vadd.f32 0.014752088, %v1412_v25  ;;  %v3209_v54 = vmul.f32 2.1237322e-06, %v11630_v53 }
 0x2fc   : > { %v1382_v17 = vsub.f32 1.0, %v1381_v5  ;;  %vm1386_vm7 = vweird.f32 %v8538_v60  ;;  %v2820_v27 = vmul.f32 %v2804_v44, %v9810_v0  ;;  %v3220_v49 = vmul.f32 3.8918573e-05, %v11630_v53 }
 0x2fd   : > { %v2968_v5 = vmul.f32 %v11647_v48, %v11585_v57  ;;  %v1369_v30 = vmul.f32 %v1368_v63, %v11402_v20  ;;  %v1402_v11 = vadd.f32 0.0036580483, %v1401_v22  ;;  %v1414_v40 = vmul.f32 %v1413_v34, %v11573_v56 }
 0x2fe   : > { %v1383_v51 = vmul.f32 %v8538_v60, %v1382_v17  ;;  %vm1385_vm8 = vweird.f32 %v11579_v59  ;;  %v1392_v39 = vor.u32 1.1754944e-38, %v1391_v37  ;;  %v11662_v41 = vadd.f32 1e-05, %v971_v19 }
 0x2ff   : > { %vm1387_vm9 = vmor %vm1385_vm8, %vm1386_vm7  ;;  %v1415_v44 = vadd.f32 0.112945676, %v1414_v40  ;;  %v3210_v17 = vadd.f32 0.00028619796, %v3209_v54  ;;  %v3221_v12 = vadd.f32 0.001143296, %v3220_v49  ;;  %vm4663_vm10 = vweird.f32 %v11540_v52 }
 0x300   : > { %v8542_v58 = vpop.eup %8541  ;;  %v1384_v29 = vadd.f32 %v8538_v60, %v1383_v51  ;;  %vm1390_vm11 = vcmp.eq.f32.partialorder %v1389_v26, 8.507059e+37  ;;  %v1328_v20 = vadd.f32 1.1283791, %v1327_v2  ;;  %v11666_v63 = vadd.f32 1e-05, %v2820_v27 }
 0x301   : > { %v1341_v25 = vmul.f32 %v8542_v58, %v11618_v28  ;;  %v1349_v59 = vand.u32 2147483647, %v11618_v28  ;;  %v1403_v37 = vmul.f32 %v1402_v11, %v11573_v56  ;;  %vm4662_vm12 = vweird.f32 %v11491_v4  ;;  %v16915_v11 = vld [vmem:[#allocation82_spill] sm:$0xff]  ;;  %v16923_v4 = vld [vmem:[#allocation39_spill] sm:$0xff] }
 0x302   : > { %v1388_v21 = vsel %vm1387_vm9, %v8538_v60, %v1384_v29  ;;  %v1351_v51 = vand.u32 2147483648, %v11618_v28  ;;  %8543 = vrsqrt.f32 %v11662_v41  ;;  %v1416_v49 = vmul.f32 %v1415_v44, %v11573_v56  ;;  %vm11712_vm2 = vmor %vm4662_vm12, %vm4663_vm10 }
 0x303   : > { %v1393_v34 = vsel %vm1390_vm11, %v1392_v39, %v1388_v21  ;;  %v1342_v22 = vsub.f32 1.0, %v1341_v25  ;;  %vm1346_vm13 = vweird.f32 %v8542_v58  ;;  %v3211_v60 = vmul.f32 %v3210_v17, %v11630_v53 }
 0x304   : > { %v1394_v19 = vmul.f32 %v1393_v34, %v1369_v30  ;;  %v3222_v21 = vmul.f32 %v3221_v12, %v11630_v53  ;;  %v2969_v2 = vmul.f32 %v11647_v48, %v2968_v5  ;;  %v1417_v54 = vadd.f32 0.4994258, %v1416_v49 }
 0x305   : > { %v1343_v29 = vmul.f32 %v8542_v58, %v1342_v22  ;;  %v3022_v27 = vmul.f32 %v11505_v50, %v16915_v11  ;;  %vm1345_vm14 = vweird.f32 %v11618_v28  ;;  %8545 = vrsqrt.f32 %v11666_v63  ;;  %v16921_v11 = vld [vmem:[#allocation42_spill] sm:$0xff] }
 0x306   : > { %v8234_v26 = vclamps-f32 %v1394_v19, 1.0  ;;  %v1404_v40 = vadd.f32 0.05243302, %v1403_v37  ;;  %vm1347_vm15 = vmor %vm1345_vm14, %vm1346_vm13  ;;  %v1352_v25 = vor.u32 1.1754944e-38, %v1351_v51  ;;  %v1418_v44 = vmul.f32 %v1417_v54, %v11573_v56 }
 0x307   : > { %v1344_v30 = vadd.f32 %v8542_v58, %v1343_v29  ;;  %v3223_v17 = vadd.f32 0.014752088, %v3222_v21  ;;  %v1329_v12 = vmul.f32 %v1328_v20, %v11477_v23  ;;  %vm1350_vm0 = vcmp.eq.f32.partialorder %v1349_v59, 8.507059e+37 }
 0x308   : > { %v1880_v39 = vadd.f32 1.0, %v8234_v26  ;;  %v3212_v34 = vadd.f32 0.0036580483, %v3211_v60  ;;  %v11683_v22 = vpop.eup %8543  ;;  %v16916_v19 = vsub.f32 1.5, %v11603_v33  ;;  %vm1126_vm1 = vweird.f32 %v11546_v1  ;;  %v11699_v33 = vld [vmem:[%s16493_s6] ss:$0 sm:$0xff] }
 0x309   : > { %v1348_v5 = vsel %vm1347_vm15, %v8542_v58, %v1344_v30  ;;  %v16917_v51 = vsub.f32 1.5, %v11615_v46  ;;  %v1405_v58 = vmul.f32 %v1404_v40, %v11573_v56  ;;  %v11694_v23 = vadd.f32 1.0, %v1418_v44 }
 0x30a   : > { %v4661_v28 = vmul.f32 %v11540_v52, %v16916_v19  ;;  %v1896_v37 = vmul.f32 %v1880_v39, %v11644_v45  ;;  %v1353_v49 = vsel %vm1350_vm0, %v1352_v25, %v1348_v5  ;;  %v2970_v20 = vmul.f32 0.5, %v2969_v2 }
 0x30b   : > { %v1124_v29 = vmul.f32 %v11546_v1, %v16917_v51  ;;  %v1354_v21 = vmul.f32 %v1353_v49, %v1329_v12  ;;  %v3224_v45 = vmul.f32 %v3223_v17, %v11630_v53  ;;  %v11704_v60 = vadd.f32 %v11526_v61, %v3022_v27  ;;  %v11706_v46 = vpop.eup %8545 }
 0x30c   : > { %v1916_v59 = vmul.f32 %v11699_v33, %v1896_v37  ;;  %16918 = vst [vmem:[#allocation63_spill] sm:$0xff] %v11706_v46  ;;  %vm1125_vm3 = vweird.f32 %v11503_v7  ;;  %8547 = vrcp.f32 %v11694_v23  ;;  %v3213_v54 = vmul.f32 %v3212_v34, %v11630_v53 }
 0x30d   : > { %v8233_v26 = vclamps-f32 %v1354_v21, 1.0  ;;  %v16922_v27 = vsel %vm11610_vm4, %v11379_v55, %v11514_v38  ;;  %v16924_v40 = vsel %vm11625_vm6, %v11430_v8, %v11599_v3  ;;  %vm11737_vm5 = vmor %vm1125_vm3, %vm1126_vm1  ;;  %v1207_v31 = vmul.f32 0.5, %v11464_v62  ;;  %v4521_v38 = vpop.xlane.xlu1 %4520  ;;  %v16928_v21 = vld [vmem:[#allocation46_spill] sm:$0xff] }
 0x30e   : > { %v11725_v30 = vmul.f32 %v16922_v27, %v16921_v11  ;;  %v11733_v7 = vmul.f32 %v16924_v40, %v16923_v4  ;;  %1935 = vadd.xlane.f32.xlu2 %v1916_v59  ;;  %v1130_v55 = vmul.f32 %v11683_v22, %v11662_v41  ;;  %v4665_v9 = vsel %vm11712_vm2, %v11540_v52, %v4661_v28 }
 0x30f   : > { %v1128_v8 = vsel %vm11737_vm5, %v11546_v1, %v1124_v29  ;;  %v1879_v3 = vadd.f32 1.0, %v8233_v26  ;;  %v1406_v25 = vadd.f32 0.18741608, %v1405_v58  ;;  %v2971_v44 = vsub.f32 1.5, %v2970_v20  ;;  %v16927_v1 = vld [vmem:[#allocation36_spill] sm:$0xff] }
 0x310   : > { %v2988_v17 = vmul.f32 %v11706_v46, %v11666_v63  ;;  %v3225_v12 = vadd.f32 0.112945676, %v3224_v45  ;;  %v11753_v62 = vmul.f32 0.70710677, %v11704_v60  ;;  %vm2973_vm4 = vweird.f32 %v11585_v57 }
 0x311   : > { %v1895_v5 = vmul.f32 %v1879_v3, %v1207_v31  ;;  %v4538_v34 = vmul.f32 %v4521_v38, %v9810_v0  ;;  %v3214_v52 = vadd.f32 0.05243302, %v3213_v54  ;;  %v3023_v19 = vmul.f32 %v11505_v50, %v10753_v36 }
 0x312   : > { %v11760_v28 = vmul.f32 %v4665_v9, %v16927_v1  ;;  %v1131_v37 = vmul.f32 %v11683_v22, %v1130_v55  ;;  %v3226_v49 = vmul.f32 %v3225_v12, %v11630_v53  ;;  %v3247_v51 = vmul.f32 %v11753_v62, %v11753_v62  ;;  %v8548_v29 = vpop.eup %8547 }
 0x313   : > { %v11767_v58 = vmul.f32 %v1128_v8, %v16928_v21  ;;  %v1915_v20 = vmul.f32 %v11699_v33, %v1895_v5  ;;  %v1407_v59 = vmul.f32 %v1406_v25, %v11573_v56  ;;  %v11772_v36 = vadd.f32 %v11526_v61, %v3023_v19  ;;  %v2802_v25 = vpop.xlane.xlu0 %2801 }
 0x314   : > { %vm2974_vm6 = vweird.f32 %v11647_v48  ;;  %v1421_v50 = vmul.f32 %v8548_v29, %v11694_v23  ;;  %v3227_v45 = vadd.f32 0.4994258, %v3226_v49  ;;  %v11776_v2 = vmin.f32 %v3247_v51, 16.0 }
 0x315   : > { %v2972_v26 = vmul.f32 %v11647_v48, %v2971_v44  ;;  %1933 = vadd.xlane.f32.xlu1 %v1915_v20  ;;  %v2989_v54 = vmul.f32 %v11706_v46, %v2988_v17  ;;  %v11780_v11 = vadd.f32 1e-05, %v4538_v34  ;;  %v3215_v27 = vmul.f32 %v3214_v52, %v11630_v53  ;;  %vm11800_vm9 = vmor %vm2973_vm4, %vm2974_vm6 }
 0x316   : > { %v1132_v56 = vmul.f32 0.5, %v1131_v37  ;;  %v1422_v4 = vsub.f32 1.0, %v1421_v50  ;;  %v3228_v61 = vmul.f32 %v3227_v45, %v11630_v53  ;;  %v11785_v40 = vmul.f32 0.70710677, %v11772_v36 }
 0x317   : > { %v1408_v39 = vadd.f32 1.1283791, %v1407_v59  ;;  %v1431_v31 = vand.u32 2147483648, %v11694_v23  ;;  %v3249_v55 = vmul.f32 2.1237322e-06, %v11776_v2  ;;  %v4743_v38 = vmul.f32 %v11274_v42, %v10790_v18 }
 0x318   : > { %v1423_v9 = vmul.f32 %v8548_v29, %v1422_v4  ;;  %vm1426_vm7 = vweird.f32 %v8548_v29  ;;  %v1429_v8 = vand.u32 2147483647, %v11694_v23  ;;  %v11792_v3 = vadd.f32 1.0, %v3228_v61 }
 0x319   : > { %vm1425_vm8 = vweird.f32 %v11694_v23  ;;  %8549 = vrsqrt.f32 %v11780_v11  ;;  %v3216_v44 = vadd.f32 0.18741608, %v3215_v27  ;;  %v3250_v17 = vadd.f32 0.00028619796, %v3249_v55  ;;  %v4523_v27 = vpop.xlane.xlu2 %4522 }
 0x31a   : > { %v1424_v18 = vadd.f32 %v8548_v29, %v1423_v9  ;;  %8551 = vrcp.f32 %v11792_v3  ;;  %v3260_v42 = vmul.f32 3.8918573e-05, %v11776_v2  ;;  %v3287_v23 = vmul.f32 %v11785_v40, %v11785_v40  ;;  %vm1427_vm10 = vmor %vm1425_vm8, %vm1426_vm7 }
 0x31b   : > { %v2976_v5 = vsel %vm11800_vm9, %v11647_v48, %v2972_v26  ;;  %v1432_v34 = vor.u32 1.1754944e-38, %v1431_v31  ;;  %v2819_v57 = vmul.f32 %v2802_v25, %v9810_v0  ;;  %v11813_v52 = vadd.f32 %v11294_v24, %v4743_v38  ;;  %v16931_v26 = vld [vmem:[#allocation47_spill] sm:$0xff] }
 0x31c   : > { %v11815_v19 = vmul.f32 0.5, %v2989_v54  ;;  %v1409_v1 = vmul.f32 %v1408_v39, %v11550_v15  ;;  %v1428_v37 = vsel %vm1427_vm10, %v8548_v29, %v1424_v18  ;;  %vm1430_vm11 = vcmp.eq.f32.partialorder %v1429_v8, 8.507059e+37 }
 0x31d   : > { %v1133_v49 = vsub.f32 1.5, %v1132_v56  ;;  %v1433_v51 = vsel %vm1430_vm11, %v1432_v34, %v1428_v37  ;;  %v3217_v21 = vmul.f32 %v3216_v44, %v11630_v53  ;;  %v3251_v20 = vmul.f32 %v3250_v17, %v11776_v2 }
 0x31e   : > { %v1209_v48 = vmul.f32 0.5, %v11538_v14  ;;  %v1434_v59 = vmul.f32 %v1433_v51, %v1409_v1  ;;  %v3261_v50 = vadd.f32 0.001143296, %v3260_v42  ;;  %v11821_v45 = vmin.f32 %v3287_v23, 16.0 }
 0x31f   : > { %v11823_v24 = vpop.eup %8549  ;;  %v11826_v54 = vmul.f32 %v2976_v5, %v16931_v26  ;;  %v11829_v15 = vmul.f32 0.5, %v11529_v13  ;;  %v11831_v29 = vadd.f32 1e-05, %v2819_v57  ;;  %v11834_v53 = vmul.f32 0.70710677, %v11813_v52 }
 0x320   : > { %v8552_v56 = vpop.eup %8551  ;;  %v8235_v14 = vclamps-f32 %v1434_v59, 1.0  ;;  %v3252_v4 = vadd.f32 0.0036580483, %v3251_v20  ;;  %v3262_v61 = vmul.f32 %v3261_v50, %v11776_v2  ;;  %v3289_v39 = vmul.f32 2.1237322e-06, %v11821_v45 }
 0x321   : > { %v11839_v31 = vmul.f32 %v11683_v22, %v1133_v49  ;;  %vm1136_vm12 = vweird.f32 %v11683_v22  ;;  %v2991_v13 = vsub.f32 1.5, %v11815_v19  ;;  %v3218_v55 = vadd.f32 1.1283791, %v3217_v21 }
 0x322   : > { %v3231_v38 = vmul.f32 %v8552_v56, %v11792_v3  ;;  %v1881_v9 = vadd.f32 1.0, %v8235_v14  ;;  %v4697_v8 = vmul.f32 %v11823_v24, %v11780_v11  ;;  %v4539_v25 = vmul.f32 %v4523_v27, %v9810_v0 }
 0x323   : > { %v3263_v44 = vadd.f32 0.014752088, %v3262_v61  ;;  %vm1135_vm13 = vweird.f32 %v11662_v41  ;;  %v3241_v12 = vand.u32 2147483648, %v11792_v3  ;;  %8553 = vrsqrt.f32 %v11831_v29 }
 0x324   : > { %v3232_v17 = vsub.f32 1.0, %v3231_v38  ;;  %v5046_v18 = vmul.f32 %v11834_v53, %v11834_v53  ;;  %v1897_v42 = vmul.f32 %v1881_v9, %v1209_v48  ;;  %v3253_v23 = vmul.f32 %v3252_v4, %v11776_v2  ;;  %vm11875_vm3 = vmor %vm1135_vm13, %vm1136_vm12 }
 0x325   : > { %v3264_v5 = vmul.f32 %v3263_v44, %v11776_v2  ;;  %v3290_v34 = vadd.f32 0.00028619796, %v3289_v39  ;;  %vm3236_vm14 = vweird.f32 %v8552_v56  ;;  %v3239_v19 = vand.u32 2147483647, %v11792_v3 }
 0x326   : > { %v3233_v57 = vmul.f32 %v8552_v56, %v3232_v17  ;;  %v3300_v1 = vmul.f32 3.8918573e-05, %v11821_v45  ;;  %v1917_v37 = vmul.f32 %v11699_v33, %v1897_v42  ;;  %v4698_v49 = vmul.f32 %v11823_v24, %v4697_v8 }
 0x327   : > { %v3265_v51 = vadd.f32 0.112945676, %v3264_v5  ;;  %v3291_v21 = vmul.f32 %v3290_v34, %v11821_v45  ;;  %vm3235_vm15 = vweird.f32 %v11792_v3  ;;  %v11860_v59 = vmin.f32 %v5046_v18, 16.0  ;;  %v11883_v18 = vld [vmem:[#allocation8 + $0x2] ss:$0 sm:$0xff] }
 0x328   : > { %v3234_v20 = vadd.f32 %v8552_v56, %v3233_v57  ;;  %v3301_v48 = vadd.f32 0.001143296, %v3300_v1  ;;  %1937 = vadd.xlane.f32.xlu0 %v1917_v37  ;;  %v3219_v50 = vmul.f32 %v3218_v55, %v11582_v43  ;;  %vm3237_vm0 = vmor %vm3235_vm15, %vm3236_vm14  ;;  %v3242_v26 = vor.u32 1.1754944e-38, %v3241_v12 }
 0x329   : > { %v3254_v27 = vadd.f32 0.05243302, %v3253_v23  ;;  %v3266_v14 = vmul.f32 %v3265_v51, %v11776_v2  ;;  %v11864_v33 = vpop.eup %8553  ;;  %vm3240_vm1 = vcmp.eq.f32.partialorder %v3239_v19, 8.507059e+37  ;;  %v11866_v61 = vadd.f32 1e-05, %v4539_v25  ;;  %v956_v19 = vpop.xlane.xlu1 %955 }
 0x32a   : > { %v3238_v4 = vsel %vm3237_vm0, %v8552_v56, %v3234_v20  ;;  %v3302_v39 = vmul.f32 %v3301_v48, %v11821_v45  ;;  %v4699_v3 = vmul.f32 0.5, %v4698_v49  ;;  %v3292_v8 = vadd.f32 0.0036580483, %v3291_v21  ;;  %v4519_v49 = vpop.xlane.xlu0 %4518  ;;  %v11911_v20 = vld [vmem:[#allocation10 + $0x2] ss:$0 sm:$0xff]  ;;  %v16939_v48 = vld [vmem:[#allocation67_spill] sm:$0xff] }
 0x32b   : > { %16932 = vst [vmem:[#allocation81_spill] sm:$0xff] %v11866_v61  ;;  %v3243_v38 = vsel %vm3240_vm1, %v3242_v26, %v3238_v4  ;;  %v3267_v9 = vadd.f32 0.4994258, %v3266_v14  ;;  %vm2993_vm2 = vweird.f32 %v11666_v63  ;;  %v5048_v44 = vmul.f32 2.1237322e-06, %v11860_v59 }
 0x32c   : > { %v3244_v43 = vmul.f32 %v3243_v38, %v3219_v50  ;;  %v3303_v55 = vadd.f32 0.014752088, %v3302_v39  ;;  %v2978_v25 = vmul.f32 %v11864_v33, %v11831_v29  ;;  %v3255_v17 = vmul.f32 %v3254_v27, %v11776_v2 }
 0x32d   : > { %v3268_v12 = vmul.f32 %v3267_v9, %v11776_v2  ;;  %v4742_v42 = vmul.f32 %v11883_v18, %v10781_v6  ;;  %v1138_v41 = vsel %vm11875_vm3, %v11683_v22, %v11839_v31  ;;  %v11892_v23 = vmul.f32 %v11706_v46, %v2991_v13 }
 0x32e   : > { %vm2994_vm5 = vweird.f32 %v11706_v46  ;;  %v8250_v5 = vclamps-f32 %v3244_v43, 1.0  ;;  %v4700_v34 = vsub.f32 1.5, %v4699_v3  ;;  %8555 = vrsqrt.f32 %v11866_v61  ;;  %v11933_v3 = vld [vmem:[%s16493_s6 + $0x1] ss:$0 sm:$0xff] }
 0x32f   : > { %16935 = vst [vmem:[#allocation32_spill] sm:$0xff] %v11892_v23  ;;  %v11896_v57 = vadd.f32 1.0, %v3268_v12  ;;  %v3293_v1 = vmul.f32 %v3292_v8, %v11821_v45  ;;  %v11900_v37 = vmul.f32 0.5, %v11704_v60  ;;  %v3304_v22 = vmul.f32 %v3303_v55, %v11821_v45  ;;  %vm11905_vm4 = vmor %vm2993_vm2, %vm2994_vm5 }
 0x330   : > { %v3730_v6 = vadd.f32 1.0, %v8250_v5  ;;  %v5049_v31 = vadd.f32 0.00028619796, %v5048_v44  ;;  %v16936_v13 = vmov 0  ;;  %v2979_v51 = vmul.f32 %v11864_v33, %v2978_v25 }
 0x331   : > { %v16937_v13 = vsel %vm11905_vm4, 4294967295, %v16936_v13  ;;  %v3256_v21 = vadd.f32 0.18741608, %v3255_v17  ;;  %8557 = vrcp.f32 %v11896_v57  ;;  %v11914_v60 = vadd.f32 %v11911_v20, %v4742_v42 }
 0x332   : > { %16938 = vst [vmem:[#allocation64_spill] sm:$0xff] %v16937_v13  ;;  %v11917_v50 = vmul.f32 %v1138_v41, %v16939_v48  ;;  %v3746_v26 = vmul.f32 %v3730_v6, %v11829_v15  ;;  %v972_v27 = vmul.f32 %v956_v19, %v9810_v0  ;;  %v11926_v14 = vmul.f32 %v11823_v24, %v4700_v34 }
 0x333   : > { %vm4703_vm6 = vweird.f32 %v11823_v24  ;;  %v4537_v4 = vmul.f32 %v4519_v49, %v9810_v0  ;;  %v3294_v39 = vadd.f32 0.05243302, %v3293_v1  ;;  %v3305_v9 = vadd.f32 0.112945676, %v3304_v22 }
 0x334   : > { %16940 = vst [vmem:[#allocation53_spill] sm:$0xff] %v11917_v50  ;;  %v3767_v38 = vmul.f32 %v11933_v3, %v3746_v26  ;;  %v5050_v15 = vmul.f32 %v5049_v31, %v11860_v59  ;;  %v5059_v8 = vmul.f32 3.8918573e-05, %v11860_v59  ;;  %v11938_v43 = vpop.eup %8555  ;;  %vm4702_vm7 = vweird.f32 %v11780_v11 }
 0x335   : > { %16941 = vst [vmem:[#allocation65_spill] sm:$0xff] %v11938_v43  ;;  %v2980_v55 = vmul.f32 0.5, %v2979_v51  ;;  %v3257_v44 = vmul.f32 %v3256_v21, %v11776_v2  ;;  %v11943_v56 = vmul.f32 0.70710677, %v11914_v60  ;;  %vm11945_vm8 = vmor %vm4702_vm7, %vm4703_vm6  ;;  %v11949_v17 = vadd.f32 1e-05, %v972_v27 }
 0x336   : > { %3786 = vadd.xlane.f32.xlu1 %v3767_v38  ;;  %v3306_v12 = vmul.f32 %v3305_v9, %v11821_v45  ;;  %v5051_v42 = vadd.f32 0.0036580483, %v5050_v15  ;;  %v5060_v41 = vadd.f32 0.001143296, %v5059_v8  ;;  %v4705_v2 = vsel %vm11945_vm8, %v11823_v24, %v11926_v14 }
 0x337   : > { %v8558_v5 = vpop.eup %8557  ;;  %v11956_v11 = vadd.f32 1e-05, %v4537_v4  ;;  %v11959_v34 = vmul.f32 0.5, %v11772_v36  ;;  %v3295_v19 = vmul.f32 %v3294_v39, %v11821_v45  ;;  %vm2983_vm9 = vweird.f32 %v11831_v29 }
 0x338   : > { %v4707_v1 = vmul.f32 %v11938_v43, %v11866_v61  ;;  %v3271_v6 = vmul.f32 %v8558_v5, %v11896_v57  ;;  %v3307_v49 = vadd.f32 0.4994258, %v3306_v12  ;;  %v5052_v22 = vmul.f32 %v5051_v42, %v11860_v59 }
 0x339   : > { %v2981_v31 = vsub.f32 1.5, %v2980_v55  ;;  %v3258_v51 = vadd.f32 1.1283791, %v3257_v44  ;;  %v5061_v24 = vmul.f32 %v5060_v41, %v11860_v59  ;;  %v5006_v36 = vmul.f32 %v11943_v56, %v11943_v56 }
 0x33a   : > { %v3272_v21 = vsub.f32 1.0, %v3271_v6  ;;  %v3279_v48 = vand.u32 2147483647, %v11896_v57  ;;  %8559 = vrsqrt.f32 %v11949_v17  ;;  %v3308_v26 = vmul.f32 %v3307_v49, %v11821_v45 }
 0x33b   : > { %v3281_v27 = vand.u32 2147483648, %v11896_v57  ;;  %8561 = vrsqrt.f32 %v11956_v11  ;;  %v3296_v14 = vadd.f32 0.18741608, %v3295_v19  ;;  %v5053_v4 = vadd.f32 0.05243302, %v5052_v22  ;;  %v16944_v22 = vld [vmem:[#allocation70_spill] sm:$0xff] }
 0x33c   : > { %v3273_v39 = vmul.f32 %v8558_v5, %v3272_v21  ;;  %vm3276_vm10 = vweird.f32 %v8558_v5  ;;  %v11975_v38 = vadd.f32 1.0, %v3308_v26  ;;  %v5062_v9 = vadd.f32 0.014752088, %v5061_v24 }
 0x33d   : > { %v11978_v15 = vmul.f32 %v11864_v33, %v2981_v31  ;;  %vm2984_vm11 = vweird.f32 %v11864_v33  ;;  %v4708_v8 = vmul.f32 %v11938_v43, %v4707_v1  ;;  %v11982_v55 = vmin.f32 %v5006_v36, 16.0 }
 0x33e   : > { %v3259_v44 = vmul.f32 %v3258_v51, %v11753_v62  ;;  %v3274_v25 = vadd.f32 %v8558_v5, %v3273_v39  ;;  %vm3275_vm12 = vweird.f32 %v11896_v57  ;;  %8563 = vrcp.f32 %v11975_v38  ;;  %vm12004_vm15 = vmor %vm2983_vm9, %vm2984_vm11 }
 0x33f   : > { %vm3277_vm13 = vmor %vm3275_vm12, %vm3276_vm10  ;;  %vm3280_vm14 = vcmp.eq.f32.partialorder %v3279_v48, 8.507059e+37  ;;  %v3282_v12 = vor.u32 1.1754944e-38, %v3281_v27  ;;  %v5054_v42 = vmul.f32 %v5053_v4, %v11860_v59  ;;  %v4741_v41 = vmul.f32 %v11883_v18, %v10798_v35 }
 0x340   : > { %v11990_v19 = vpop.eup %8559  ;;  %v3278_v1 = vsel %vm3277_vm13, %v8558_v5, %v3274_v25  ;;  %v3297_v6 = vmul.f32 %v3296_v14, %v11821_v45  ;;  %v5063_v62 = vmul.f32 %v5062_v9, %v11860_v59  ;;  %v5008_v49 = vmul.f32 2.1237322e-06, %v11982_v55  ;;  %v12024_v9 = vld [vmem:[#allocation8] ss:$0 sm:$0xff] }
 0x341   : > { %v11995_v57 = vpop.eup %8561  ;;  %v11998_v31 = vmul.f32 %v4705_v2, %v16944_v22  ;;  %v12008_v5 = vmul.f32 0.5, %v4708_v8  ;;  %v3283_v45 = vsel %vm3280_vm14, %v3282_v12, %v3278_v1  ;;  %v12011_v51 = vmul.f32 0.5, %v11813_v52  ;;  %v12040_v2 = vld [vmem:[#allocation10] ss:$0 sm:$0xff] }
 0x342   : > { %v3284_v24 = vmul.f32 %v3283_v45, %v3259_v44  ;;  %v5064_v36 = vadd.f32 0.112945676, %v5063_v62  ;;  %v12018_v21 = vmul.f32 0.5, %v11914_v60  ;;  %v5055_v29 = vadd.f32 0.18741608, %v5054_v42 }
 0x343   : > { %16947 = vst [vmem:[#allocation66_spill] sm:$0xff] %v12008_v5  ;;  %v5009_v48 = vadd.f32 0.00028619796, %v5008_v49  ;;  %v5019_v26 = vmul.f32 3.8918573e-05, %v11982_v55  ;;  %v4762_v27 = vadd.f32 %v11911_v20, %v4741_v41  ;;  %v1140_v52 = vmul.f32 %v11990_v19, %v11949_v17 }
 0x344   : > { %v8564_v14 = vpop.eup %8563  ;;  %v8251_v4 = vclamps-f32 %v3284_v24, 1.0  ;;  %v3298_v39 = vadd.f32 1.1283791, %v3297_v6  ;;  %v1176_v8 = vmul.f32 %v12024_v9, %v10924_v32  ;;  %v4687_v60 = vmul.f32 %v11995_v57, %v11956_v11 }
 0x345   : > { %v3311_v44 = vmul.f32 %v8564_v14, %v11975_v38  ;;  %v3319_v25 = vand.u32 2147483647, %v11975_v38  ;;  %v5065_v12 = vmul.f32 %v5064_v36, %v11860_v59  ;;  %v3321_v41 = vand.u32 2147483648, %v11975_v38 }
 0x346   : > { %v3731_v42 = vadd.f32 1.0, %v8251_v4  ;;  %v5010_v1 = vmul.f32 %v5009_v48, %v11982_v55  ;;  %v5020_v6 = vadd.f32 0.001143296, %v5019_v26  ;;  %v5056_v49 = vmul.f32 %v5055_v29, %v11860_v59 }
 0x347   : > { %v3312_v62 = vsub.f32 1.0, %v3311_v44  ;;  %v5066_v22 = vadd.f32 0.4994258, %v5065_v12  ;;  %v12036_v32 = vmul.f32 0.70710677, %v4762_v27  ;;  %v1196_v36 = vadd.f32 %v12040_v2, %v1176_v8 }
 0x348   : > { %v3747_v45 = vmul.f32 %v3731_v42, %v11900_v37  ;;  %v5011_v24 = vadd.f32 0.0036580483, %v5010_v1  ;;  %v5021_v63 = vmul.f32 %v5020_v6, %v11982_v55  ;;  %vm3316_vm0 = vweird.f32 %v8564_v14 }
 0x349   : > { %v3313_v4 = vmul.f32 %v8564_v14, %v3312_v62  ;;  %v5067_v48 = vmul.f32 %v5066_v22, %v11860_v59  ;;  %v4966_v26 = vmul.f32 %v12036_v32, %v12036_v32  ;;  %v3299_v44 = vmul.f32 %v3298_v39, %v11785_v40 }
 0x34a   : > { %v3768_v29 = vmul.f32 %v11933_v3, %v3747_v45  ;;  %v5012_v37 = vmul.f32 %v5011_v24, %v11982_v55  ;;  %v5022_v12 = vadd.f32 0.014752088, %v5021_v63  ;;  %vm3315_vm1 = vweird.f32 %v11975_v38 }
 0x34b   : > { %v3314_v42 = vadd.f32 %v8564_v14, %v3313_v4  ;;  %v12050_v1 = vadd.f32 1.0, %v5067_v48  ;;  %v12052_v8 = vmin.f32 %v4966_v26, 16.0  ;;  %vm3317_vm2 = vmor %vm3315_vm1, %vm3316_vm0  ;;  %v3322_v59 = vor.u32 1.1754944e-38, %v3321_v41 }
 0x34c   : > { %3788 = vadd.xlane.f32.xlu0 %v3768_v29  ;;  %v5013_v6 = vadd.f32 0.05243302, %v5012_v37  ;;  %v5023_v62 = vmul.f32 %v5022_v12, %v11982_v55  ;;  %v12055_v22 = vmul.f32 0.70710677, %v1196_v36  ;;  %vm3320_vm3 = vcmp.eq.f32.partialorder %v3319_v25, 8.507059e+37 }
 0x34d   : > { %v3318_v45 = vsel %vm3317_vm2, %v8564_v14, %v3314_v42  ;;  %v5057_v40 = vadd.f32 1.1283791, %v5056_v49  ;;  %8565 = vrcp.f32 %v12050_v1  ;;  %v12059_v63 = vmul.f32 %v11990_v19, %v1140_v52 }
 0x34e   : > { %v3323_v38 = vsel %vm3320_vm3, %v3322_v59, %v3318_v45  ;;  %v5024_v39 = vadd.f32 0.112945676, %v5023_v62  ;;  %v1175_v24 = vmul.f32 %v12024_v9, %v10793_v47  ;;  %v12064_v41 = vmul.f32 %v11995_v57, %v4687_v60 }
 0x34f   : > { %v3324_v4 = vmul.f32 %v3323_v38, %v3299_v44  ;;  %v4968_v48 = vmul.f32 2.1237322e-06, %v12052_v8  ;;  %v4979_v14 = vmul.f32 3.8918573e-05, %v12052_v8  ;;  %v5014_v25 = vmul.f32 %v5013_v6, %v11982_v55 }
 0x350   : > { %v5025_v49 = vmul.f32 %v5024_v39, %v11982_v55  ;;  %v12070_v26 = vmul.f32 0.5, %v4762_v27  ;;  %v1517_v52 = vmul.f32 %v12055_v22, %v12055_v22  ;;  %v5058_v47 = vmul.f32 %v5057_v40, %v11834_v53 }
 0x351   : > { %v8252_v29 = vclamps-f32 %v3324_v4, 1.0  ;;  %v4969_v37 = vadd.f32 0.00028619796, %v4968_v48  ;;  %v4980_v60 = vadd.f32 0.001143296, %v4979_v14  ;;  %v12075_v44 = vmul.f32 0.5, %v1196_v36 }
 0x352   : > { %v5026_v12 = vadd.f32 0.4994258, %v5025_v49  ;;  %v12077_v42 = vmin.f32 %v1517_v52, 16.0  ;;  %v12080_v59 = vadd.f32 %v12040_v2, %v1175_v24  ;;  %v5078_v27 = vand.u32 2147483647, %v12050_v1 }
 0x353   : > { %v8566_v6 = vpop.eup %8565  ;;  %v3732_v62 = vadd.f32 1.0, %v8252_v29  ;;  %v4970_v45 = vmul.f32 %v4969_v37, %v12052_v8  ;;  %v4981_v38 = vmul.f32 %v4980_v60, %v12052_v8  ;;  %v5080_v40 = vand.u32 2147483648, %v12050_v1 }
 0x354   : > { %v5070_v53 = vmul.f32 %v8566_v6, %v12050_v1  ;;  %v5015_v39 = vadd.f32 0.18741608, %v5014_v25  ;;  %v5027_v36 = vmul.f32 %v5026_v12, %v11982_v55  ;;  %v1519_v14 = vmul.f32 2.1237322e-06, %v12077_v42 }
 0x355   : > { %v3748_v4 = vmul.f32 %v3732_v62, %v11959_v34  ;;  %v4971_v48 = vadd.f32 0.0036580483, %v4970_v45  ;;  %v4982_v24 = vadd.f32 0.014752088, %v4981_v38  ;;  %v1530_v29 = vmul.f32 3.8918573e-05, %v12077_v42 }
 0x356   : > { %v5071_v49 = vsub.f32 1.0, %v5070_v53  ;;  %v12090_v52 = vadd.f32 1.0, %v5027_v36  ;;  %v12094_v37 = vmul.f32 0.70710677, %v12080_v59  ;;  %v1520_v0 = vadd.f32 0.00028619796, %v1519_v14 }
 0x357   : > { %v3769_v60 = vmul.f32 %v11933_v3, %v3748_v4  ;;  %v4972_v25 = vmul.f32 %v4971_v48, %v12052_v8  ;;  %v4983_v12 = vmul.f32 %v4982_v24, %v12052_v8  ;;  %vm5074_vm5 = vweird.f32 %v12050_v1 }
 0x358   : > { %v5072_v34 = vmul.f32 %v8566_v6, %v5071_v49  ;;  %vm5075_vm6 = vweird.f32 %v8566_v6  ;;  %8567 = vrcp.f32 %v12090_v52  ;;  %vm12101_vm7 = vcmp.eq.f32.partialorder %v5078_v27, 8.507059e+37 }
 0x359   : > { %3790 = vadd.xlane.f32.xlu2 %v3769_v60  ;;  %v4973_v45 = vadd.f32 0.05243302, %v4972_v25  ;;  %v4984_v38 = vadd.f32 0.112945676, %v4983_v12  ;;  %v1521_v53 = vmul.f32 %v1520_v0, %v12077_v42  ;;  %v5081_v4 = vor.u32 1.1754944e-38, %v5080_v40  ;;  %vm5076_vm8 = vmor %vm5074_vm5, %vm5075_vm6 }
 0x35a   : > { %v5073_v36 = vadd.f32 %v8566_v6, %v5072_v34  ;;  %v1531_v48 = vadd.f32 0.001143296, %v1530_v29  ;;  %v1477_v24 = vmul.f32 %v12094_v37, %v12094_v37  ;;  %v5016_v1 = vmul.f32 %v5015_v39, %v11982_v55 }
 0x35b   : > { %v4974_v14 = vmul.f32 %v4973_v45, %v12052_v8  ;;  %v4985_v27 = vmul.f32 %v4984_v38, %v12052_v8  ;;  %v1522_v49 = vadd.f32 0.0036580483, %v1521_v53  ;;  %v1174_v0 = vmul.f32 %v12024_v9, %v10733_v16 }
 0x35c   : > { %v5077_v60 = vsel %vm5076_vm8, %v8566_v6, %v5073_v36  ;;  %v1532_v25 = vmul.f32 %v1531_v48, %v12077_v42  ;;  %v12112_v12 = vmin.f32 %v1477_v24, 16.0  ;;  %v5017_v53 = vadd.f32 1.1283791, %v5016_v1 }
 0x35d   : > { %v5082_v40 = vsel %vm12101_vm7, %v5081_v4, %v5077_v60  ;;  %v4975_v29 = vadd.f32 0.18741608, %v4974_v14  ;;  %v4986_v34 = vadd.f32 0.4994258, %v4985_v27  ;;  %v1523_v55 = vmul.f32 %v1522_v49, %v12077_v42 }
 0x35e   : > { %v8568_v39 = vpop.eup %8567  ;;  %v5083_v45 = vmul.f32 %v5082_v40, %v5058_v47  ;;  %v1533_v50 = vadd.f32 0.014752088, %v1532_v25  ;;  %v1479_v38 = vmul.f32 2.1237322e-06, %v12112_v12  ;;  %v1490_v6 = vmul.f32 3.8918573e-05, %v12112_v12 }
 0x35f   : > { %v5030_v36 = vmul.f32 %v8568_v39, %v12090_v52  ;;  %v4976_v48 = vmul.f32 %v4975_v29, %v12052_v8  ;;  %v4987_v16 = vmul.f32 %v4986_v34, %v12052_v8  ;;  %v1524_v4 = vadd.f32 0.05243302, %v1523_v55 }
 0x360   : > { %v8271_v62 = vclamps-f32 %v5083_v45, 1.0  ;;  %v1534_v24 = vmul.f32 %v1533_v50, %v12077_v42  ;;  %v1480_v14 = vadd.f32 0.00028619796, %v1479_v38  ;;  %v5038_v47 = vand.u32 2147483647, %v12090_v52 }
 0x361   : > { %v5031_v27 = vsub.f32 1.0, %v5030_v36  ;;  %v12126_v49 = vadd.f32 1.0, %v4987_v16  ;;  %v1491_v60 = vadd.f32 0.001143296, %v1490_v6  ;;  %v5040_v1 = vand.u32 2147483648, %v12090_v52 }
 0x362   : > { %v5452_v25 = vadd.f32 1.0, %v8271_v62  ;;  %v1535_v40 = vadd.f32 0.112945676, %v1534_v24  ;;  %v1481_v61 = vmul.f32 %v1480_v14, %v12112_v12  ;;  %vm5035_vm9 = vweird.f32 %v8568_v39  ;;  %v12142_v16 = vld [vmem:[%s16493_s6 + $0x2] ss:$0 sm:$0xff] }
 0x363   : > { %v5032_v29 = vmul.f32 %v8568_v39, %v5031_v27  ;;  %8569 = vrcp.f32 %v12126_v49  ;;  %v12132_v8 = vadd.f32 %v12040_v2, %v1174_v0  ;;  %vm5034_vm10 = vweird.f32 %v12090_v52 }
 0x364   : > { %v5468_v50 = vmul.f32 %v5452_v25, %v12011_v51  ;;  %v4977_v34 = vadd.f32 1.1283791, %v4976_v48  ;;  %v1525_v55 = vmul.f32 %v1524_v4, %v12077_v42  ;;  %v1536_v38 = vmul.f32 %v1535_v40, %v12077_v42  ;;  %vm5036_vm11 = vmor %vm5034_vm10, %vm5035_vm9 }
 0x365   : > { %v5033_v45 = vadd.f32 %v8568_v39, %v5032_v29  ;;  %v1482_v6 = vadd.f32 0.0036580483, %v1481_v61  ;;  %v1492_v36 = vmul.f32 %v1491_v60, %v12112_v12  ;;  %v5018_v51 = vmul.f32 %v5017_v53, %v11943_v56  ;;  %v12157_v29 = vld [vmem:[#allocation8 + $0x1] ss:$0 sm:$0xff] }
 0x366   : > { %v5489_v0 = vmul.f32 %v12142_v16, %v5468_v50  ;;  %vm5039_vm12 = vcmp.eq.f32.partialorder %v5038_v47, 8.507059e+37  ;;  %v5041_v52 = vor.u32 1.1754944e-38, %v5040_v1  ;;  %v1537_v62 = vadd.f32 0.4994258, %v1536_v38 }
 0x367   : > { %v5037_v48 = vsel %vm5036_vm11, %v8568_v39, %v5033_v45  ;;  %v1483_v4 = vmul.f32 %v1482_v6, %v12112_v12  ;;  %v1493_v24 = vadd.f32 0.014752088, %v1492_v36  ;;  %v4978_v14 = vmul.f32 %v4977_v34, %v12036_v32 }
 0x368   : > { %5511 = vadd.xlane.f32.xlu0 %v5489_v0  ;;  %v5042_v61 = vsel %vm5039_vm12, %v5041_v52, %v5037_v48  ;;  %v1526_v27 = vadd.f32 0.18741608, %v1525_v55  ;;  %v12149_v60 = vmul.f32 0.70710677, %v12132_v8  ;;  %v1538_v56 = vmul.f32 %v1537_v62, %v12077_v42 }
 0x369   : > { %v8570_v25 = vpop.eup %8569  ;;  %v5043_v40 = vmul.f32 %v5042_v61, %v5018_v51  ;;  %v1484_v53 = vadd.f32 0.05243302, %v1483_v4  ;;  %v1494_v47 = vmul.f32 %v1493_v24, %v12112_v12  ;;  %vm4994_vm13 = vweird.f32 %v12126_v49  ;;  %v12171_v4 = vld [vmem:[#allocation10 + $0x1] ss:$0 sm:$0xff] }
 0x36a   : > { %v4990_v39 = vmul.f32 %v8570_v25, %v12126_v49  ;;  %v1437_v1 = vmul.f32 %v12149_v60, %v12149_v60  ;;  %v3025_v32 = vmul.f32 %v12157_v29, %v10948_v10  ;;  %v12161_v34 = vadd.f32 1.0, %v1538_v56 }
 0x36b   : > { %v8270_v50 = vclamps-f32 %v5043_v40, 1.0  ;;  %v1485_v55 = vmul.f32 %v1484_v53, %v12112_v12  ;;  %v1495_v45 = vadd.f32 0.112945676, %v1494_v47  ;;  %v4998_v6 = vand.u32 2147483647, %v12126_v49  ;;  %v16950_v53 = vld [vmem:[#allocation84_spill] sm:$0xff] }
 0x36c   : > { %v4991_v38 = vsub.f32 1.0, %v4990_v39  ;;  %v5000_v36 = vand.u32 2147483648, %v12126_v49  ;;  %v12166_v0 = vmin.f32 %v1437_v1, 16.0  ;;  %vm4995_vm14 = vweird.f32 %v8570_v25 }
 0x36d   : > { %v5451_v51 = vadd.f32 1.0, %v8270_v50  ;;  %v1527_v52 = vmul.f32 %v1526_v27, %v12077_v42  ;;  %8571 = vrcp.f32 %v12161_v34  ;;  %v1486_v48 = vadd.f32 0.18741608, %v1485_v55  ;;  %vm4996_vm1 = vmor %vm4994_vm13, %vm4995_vm14 }
 0x36e   : > { %v4992_v10 = vmul.f32 %v8570_v25, %v4991_v38  ;;  %v1496_v62 = vmul.f32 %v1495_v45, %v12112_v12  ;;  %v12174_v24 = vadd.f32 %v12171_v4, %v3025_v32  ;;  %v1439_v40 = vmul.f32 2.1237322e-06, %v12166_v0 }
 0x36f   : > { %v5467_v61 = vmul.f32 %v5451_v51, %v12018_v21  ;;  %v1450_v56 = vmul.f32 3.8918573e-05, %v12166_v0  ;;  %v3024_v42 = vmul.f32 %v12157_v29, %v16950_v53  ;;  %vm4999_vm0 = vcmp.eq.f32.partialorder %v4998_v6, 8.507059e+37 }
 0x370   : > { %v4993_v27 = vadd.f32 %v8570_v25, %v4992_v10  ;;  %v5001_v47 = vor.u32 1.1754944e-38, %v5000_v36  ;;  %v1497_v39 = vadd.f32 0.4994258, %v1496_v62  ;;  %v1528_v32 = vadd.f32 1.1283791, %v1527_v52 }
 0x371   : > { %v5488_v1 = vmul.f32 %v12142_v16, %v5467_v61  ;;  %v1440_v50 = vadd.f32 0.00028619796, %v1439_v40  ;;  %v1451_v21 = vadd.f32 0.001143296, %v1450_v56  ;;  %v1487_v45 = vmul.f32 %v1486_v48, %v12112_v12 }
 0x372   : > { %v4997_v55 = vsel %vm4996_vm1, %v8570_v25, %v4993_v27  ;;  %v1498_v38 = vmul.f32 %v1497_v39, %v12112_v12  ;;  %v12188_v51 = vmul.f32 0.70710677, %v12174_v24  ;;  %v12193_v49 = vadd.f32 %v12171_v4, %v3024_v42 }
 0x373   : > { %v8572_v6 = vpop.eup %8571  ;;  %5509 = vadd.xlane.f32.xlu2 %v5488_v1  ;;  %v5002_v36 = vsel %vm4999_vm0, %v5001_v47, %v4997_v55  ;;  %v1441_v10 = vmul.f32 %v1440_v50, %v12166_v0  ;;  %v1452_v62 = vmul.f32 %v1451_v21, %v12166_v0  ;;  %v1549_v48 = vand.u32 2147483647, %v12161_v34 }
 0x374   : > { %v5003_v52 = vmul.f32 %v5002_v36, %v4978_v14  ;;  %v1541_v25 = vmul.f32 %v8572_v6, %v12161_v34  ;;  %v1551_v12 = vand.u32 2147483648, %v12161_v34  ;;  %v12198_v61 = vadd.f32 1.0, %v1498_v38 }
 0x375   : > { %v1442_v40 = vadd.f32 0.0036580483, %v1441_v10  ;;  %v1453_v56 = vadd.f32 0.014752088, %v1452_v62  ;;  %v3367_v53 = vmul.f32 %v12188_v51, %v12188_v51  ;;  %v1529_v47 = vmul.f32 %v1528_v32, %v12055_v22 }
 0x376   : > { %v8269_v27 = vclamps-f32 %v5003_v52, 1.0  ;;  %v1542_v39 = vsub.f32 1.0, %v1541_v25  ;;  %v12204_v42 = vmul.f32 0.70710677, %v12193_v49  ;;  %vm1545_vm2 = vweird.f32 %v12161_v34 }
 0x377   : > { %vm1546_vm3 = vweird.f32 %v8572_v6  ;;  %v1488_v14 = vadd.f32 1.1283791, %v1487_v45  ;;  %8573 = vrcp.f32 %v12198_v61  ;;  %v1443_v21 = vmul.f32 %v1442_v40, %v12166_v0 }
 0x378   : > { %v5450_v1 = vadd.f32 1.0, %v8269_v27  ;;  %v1543_v50 = vmul.f32 %v8572_v6, %v1542_v39  ;;  %v1454_v55 = vmul.f32 %v1453_v56, %v12166_v0  ;;  %vm12210_vm5 = vcmp.eq.f32.partialorder %v1549_v48, 8.507059e+37  ;;  %vm1547_vm6 = vmor %vm1545_vm2, %vm1546_vm3 }
 0x379   : > { %v1552_v22 = vor.u32 1.1754944e-38, %v1551_v12  ;;  %v12214_v32 = vmin.f32 %v3367_v53, 16.0  ;;  %v3327_v36 = vmul.f32 %v12204_v42, %v12204_v42  ;;  %v1444_v62 = vadd.f32 0.05243302, %v1443_v21 }
 0x37a   : > { %v5466_v45 = vmul.f32 %v5450_v1, %v12070_v26  ;;  %v1544_v10 = vadd.f32 %v8572_v6, %v1543_v50  ;;  %v1455_v52 = vadd.f32 0.112945676, %v1454_v55  ;;  %v1489_v25 = vmul.f32 %v1488_v14, %v12094_v37 }
 0x37b   : > { %v3369_v48 = vmul.f32 2.1237322e-06, %v12214_v32  ;;  %v3380_v12 = vmul.f32 3.8918573e-05, %v12214_v32  ;;  %v12225_v40 = vmin.f32 %v3327_v36, 16.0  ;;  %vm1505_vm7 = vweird.f32 %v12198_v61 }
 0x37c   : > { %v5487_v56 = vmul.f32 %v12142_v16, %v5466_v45  ;;  %v1548_v53 = vsel %vm1547_vm6, %v8572_v6, %v1544_v10  ;;  %v1445_v26 = vmul.f32 %v1444_v62, %v12166_v0  ;;  %v1456_v27 = vmul.f32 %v1455_v52, %v12166_v0 }
 0x37d   : > { %v8574_v39 = vpop.eup %8573  ;;  %v1553_v34 = vsel %vm12210_vm5, %v1552_v22, %v1548_v53  ;;  %v3370_v37 = vadd.f32 0.00028619796, %v3369_v48  ;;  %v3381_v14 = vadd.f32 0.001143296, %v3380_v12  ;;  %v3329_v1 = vmul.f32 2.1237322e-06, %v12225_v40 }
 0x37e   : > { %5507 = vadd.xlane.f32.xlu1 %v5487_v56  ;;  %v1554_v50 = vmul.f32 %v1553_v34, %v1529_v47  ;;  %v1501_v21 = vmul.f32 %v8574_v39, %v12198_v61  ;;  %v1509_v6 = vand.u32 2147483647, %v12198_v61  ;;  %v1511_v55 = vand.u32 2147483648, %v12198_v61 }
 0x37f   : > { %v1457_v36 = vadd.f32 0.4994258, %v1456_v27  ;;  %v3371_v45 = vmul.f32 %v3370_v37, %v12214_v32  ;;  %v3382_v10 = vmul.f32 %v3381_v14, %v12214_v32  ;;  %v3330_v62 = vadd.f32 0.00028619796, %v3329_v1 }
 0x380   : > { %v8238_v38 = vclamps-f32 %v1554_v50, 1.0  ;;  %v1502_v22 = vsub.f32 1.0, %v1501_v21  ;;  %v1446_v52 = vadd.f32 0.18741608, %v1445_v26  ;;  %v3340_v48 = vmul.f32 3.8918573e-05, %v12225_v40 }
 0x381   : > { %v1458_v12 = vmul.f32 %v1457_v36, %v12166_v0  ;;  %v3372_v47 = vadd.f32 0.0036580483, %v3371_v45  ;;  %v3383_v56 = vadd.f32 0.014752088, %v3382_v10  ;;  %v3331_v53 = vmul.f32 %v3330_v62, %v12225_v40  ;;  %v16953_v10 = vld [vmem:[#allocation56_spill] sm:$0xff] }
 0x382   : > { %v1884_v34 = vadd.f32 1.0, %v8238_v38  ;;  %v1503_v43 = vmul.f32 %v8574_v39, %v1502_v22  ;;  %vm1506_vm8 = vweird.f32 %v8574_v39  ;;  %v3341_v27 = vadd.f32 0.001143296, %v3340_v48  ;;  %v12257_v38 = vld [vmem:[%s16493_s6] ss:$0 sm:$0xff] }
 0x383   : > { %v12242_v5 = vadd.f32 1.0, %v1458_v12  ;;  %v3373_v37 = vmul.f32 %v3372_v47, %v12214_v32  ;;  %v3384_v14 = vmul.f32 %v3383_v56, %v12214_v32  ;;  %v3332_v1 = vadd.f32 0.0036580483, %v3331_v53  ;;  %vm1507_vm10 = vmor %vm1505_vm7, %vm1506_vm8 }
 0x384   : > { %v1900_v26 = vmul.f32 %v1884_v34, %v12075_v44  ;;  %v1504_v50 = vadd.f32 %v8574_v39, %v1503_v43  ;;  %vm1510_vm9 = vcmp.eq.f32.partialorder %v1509_v6, 8.507059e+37  ;;  %v3342_v21 = vmul.f32 %v3341_v27, %v12225_v40  ;;  %v16954_v27 = vld [vmem:[#allocation79_spill] sm:$0xff] }
 0x385   : > { %v1512_v36 = vor.u32 1.1754944e-38, %v1511_v55  ;;  %v1447_v45 = vmul.f32 %v1446_v52, %v12166_v0  ;;  %8575 = vrcp.f32 %v12242_v5  ;;  %v3026_v62 = vmul.f32 %v12157_v29, %v16953_v10 }
 0x386   : > { %v1920_v43 = vmul.f32 %v12257_v38, %v1900_v26  ;;  %v1508_v44 = vsel %vm1507_vm10, %v8574_v39, %v1504_v50  ;;  %v3374_v6 = vadd.f32 0.05243302, %v3373_v37  ;;  %v3385_v22 = vadd.f32 0.112945676, %v3384_v14 }
 0x387   : > { %v1211_v61 = vmul.f32 0.5, %v12080_v59  ;;  %v1513_v55 = vsel %vm1510_vm9, %v1512_v36, %v1508_v44  ;;  %v12262_v0 = vmul.f32 0.5, %v12132_v8  ;;  %v3333_v52 = vmul.f32 %v3332_v1, %v12225_v40 }
 0x388   : > { %1943 = vadd.xlane.f32.xlu0 %v1920_v43  ;;  %v1514_v48 = vmul.f32 %v1513_v55, %v1489_v25  ;;  %v3375_v12 = vmul.f32 %v3374_v6, %v12214_v32  ;;  %v3386_v47 = vmul.f32 %v3385_v22, %v12214_v32  ;;  %v3343_v56 = vadd.f32 0.014752088, %v3342_v21 }
 0x389   : > { %v1448_v53 = vadd.f32 1.1283791, %v1447_v45  ;;  %v3334_v34 = vadd.f32 0.05243302, %v3333_v52  ;;  %v12268_v39 = vadd.f32 %v12171_v4, %v3026_v62  ;;  %v4746_v59 = vmul.f32 %v11883_v18, %v16954_v27 }
 0x38a   : > { %v8237_v37 = vclamps-f32 %v1514_v48, 1.0  ;;  %v3376_v8 = vadd.f32 0.18741608, %v3375_v12  ;;  %v3387_v14 = vadd.f32 0.4994258, %v3386_v47  ;;  %v3344_v1 = vmul.f32 %v3343_v56, %v12225_v40 }
 0x38b   : > { %v8576_v26 = vpop.eup %8575  ;;  %v1469_v25 = vand.u32 2147483647, %v12242_v5  ;;  %v12275_v50 = vmul.f32 0.5, %v12174_v24  ;;  %v3335_v21 = vmul.f32 %v3334_v34, %v12225_v40  ;;  %v12279_v36 = vmul.f32 0.70710677, %v12268_v39 }
 0x38c   : > { %v1883_v45 = vadd.f32 1.0, %v8237_v37  ;;  %v1461_v10 = vmul.f32 %v8576_v26, %v12242_v5  ;;  %v1471_v62 = vand.u32 2147483648, %v12242_v5  ;;  %v12284_v43 = vadd.f32 %v11911_v20, %v4746_v59 }
 0x38d   : > { %v3388_v44 = vmul.f32 %v3387_v14, %v12214_v32  ;;  %v3336_v6 = vadd.f32 0.18741608, %v3335_v21  ;;  %v3345_v22 = vadd.f32 0.112945676, %v3344_v1  ;;  %v3407_v24 = vmul.f32 %v12279_v36, %v12279_v36 }
 0x38e   : > { %v1899_v55 = vmul.f32 %v1883_v45, %v1211_v61  ;;  %v1449_v52 = vmul.f32 %v1448_v53, %v12149_v60  ;;  %v1462_v48 = vsub.f32 1.0, %v1461_v10  ;;  %v3377_v12 = vmul.f32 %v3376_v8, %v12214_v32  ;;  %v16957_v10 = vld [vmem:[#allocation54_spill] sm:$0xff] }
 0x38f   : > { %vm1465_vm11 = vweird.f32 %v12242_v5  ;;  %v12292_v47 = vadd.f32 1.0, %v3388_v44  ;;  %v3346_v56 = vmul.f32 %v3345_v22, %v12225_v40  ;;  %v12295_v34 = vmin.f32 %v3407_v24, 16.0 }
 0x390   : > { %v1919_v27 = vmul.f32 %v12257_v38, %v1899_v55  ;;  %v1463_v59 = vmul.f32 %v8576_v26, %v1462_v48  ;;  %vm1466_vm12 = vweird.f32 %v8576_v26  ;;  %v12299_v37 = vmul.f32 0.70710677, %v12284_v43 }
 0x391   : > { %vm12301_vm13 = vcmp.eq.f32.partialorder %v1469_v25, 8.507059e+37  ;;  %v1472_v32 = vor.u32 1.1754944e-38, %v1471_v62  ;;  %8577 = vrcp.f32 %v12292_v47  ;;  %v3337_v61 = vmul.f32 %v3336_v6, %v12225_v40  ;;  %vm1467_vm14 = vmor %vm1465_vm11, %vm1466_vm12 }
 0x392   : > { %1941 = vadd.xlane.f32.xlu2 %v1919_v27  ;;  %v1464_v53 = vadd.f32 %v8576_v26, %v1463_v59  ;;  %v3378_v8 = vadd.f32 1.1283791, %v3377_v12  ;;  %v3347_v14 = vadd.f32 0.4994258, %v3346_v56  ;;  %v3409_v1 = vmul.f32 2.1237322e-06, %v12295_v34 }
 0x393   : > { %v3399_v21 = vand.u32 2147483647, %v12292_v47  ;;  %v3420_v25 = vmul.f32 3.8918573e-05, %v12295_v34  ;;  %v5166_v45 = vmul.f32 %v12299_v37, %v12299_v37  ;;  %v4745_v62 = vmul.f32 %v11883_v18, %v16957_v10 }
 0x394   : > { %v1468_v44 = vsel %vm1467_vm14, %v8576_v26, %v1464_v53  ;;  %v3401_v6 = vand.u32 2147483648, %v12292_v47  ;;  %v3348_v22 = vmul.f32 %v3347_v14, %v12225_v40  ;;  %v3410_v24 = vadd.f32 0.00028619796, %v3409_v1 }
 0x395   : > { %v1473_v5 = vsel %vm12301_vm13, %v1472_v32, %v1468_v44  ;;  %v3338_v55 = vadd.f32 1.1283791, %v3337_v61  ;;  %v3421_v48 = vadd.f32 0.001143296, %v3420_v25  ;;  %v12320_v12 = vmin.f32 %v5166_v45, 16.0 }
 0x396   : > { %v1474_v56 = vmul.f32 %v1473_v5, %v1449_v52  ;;  %v3379_v27 = vmul.f32 %v3378_v8, %v12188_v51  ;;  %v12323_v59 = vadd.f32 1.0, %v3348_v22  ;;  %v3411_v10 = vmul.f32 %v3410_v24, %v12295_v34  ;;  %v16960_v5 = vld [vmem:[#allocation57_spill] sm:$0xff] }
 0x397   : > { %v8578_v26 = vpop.eup %8577  ;;  %vm3395_vm0 = vweird.f32 %v12292_v47  ;;  %v3422_v40 = vmul.f32 %v3421_v48, %v12295_v34  ;;  %v5168_v53 = vmul.f32 2.1237322e-06, %v12320_v12  ;;  %v5179_v60 = vmul.f32 3.8918573e-05, %v12320_v12 }
 0x398   : > { %v8236_v32 = vclamps-f32 %v1474_v56, 1.0  ;;  %v3391_v61 = vmul.f32 %v8578_v26, %v12292_v47  ;;  %vm12331_vm1 = vcmp.eq.f32.partialorder %v3399_v21, 8.507059e+37  ;;  %8579 = vrcp.f32 %v12323_v59 }
 0x399   : > { %v3402_v51 = vor.u32 1.1754944e-38, %v3401_v6  ;;  %v12337_v8 = vmul.f32 %v3338_v55, %v12204_v42  ;;  %v3412_v14 = vadd.f32 0.0036580483, %v3411_v10  ;;  %v12340_v1 = vadd.f32 %v11911_v20, %v4745_v62 }
 0x39a   : > { %v1882_v25 = vadd.f32 1.0, %v8236_v32  ;;  %v3392_v45 = vsub.f32 1.0, %v3391_v61  ;;  %v3423_v44 = vadd.f32 0.014752088, %v3422_v40  ;;  %v5169_v22 = vadd.f32 0.00028619796, %v5168_v53 }
 0x39b   : > { %vm3396_vm2 = vweird.f32 %v8578_v26  ;;  %v3413_v21 = vmul.f32 %v3412_v14, %v12295_v34  ;;  %v5180_v24 = vadd.f32 0.001143296, %v5179_v60  ;;  %v4744_v48 = vmul.f32 %v11883_v18, %v16960_v5 }
 0x39c   : > { %v1898_v6 = vmul.f32 %v1882_v25, %v12262_v0  ;;  %v3393_v56 = vmul.f32 %v8578_v26, %v3392_v45  ;;  %v3424_v42 = vmul.f32 %v3423_v44, %v12295_v34  ;;  %v5170_v55 = vmul.f32 %v5169_v22, %v12320_v12  ;;  %vm3397_vm5 = vmor %vm3395_vm0, %vm3396_vm2 }
 0x39d   : > { %vm3355_vm3 = vweird.f32 %v12323_v59  ;;  %v3414_v20 = vadd.f32 0.05243302, %v3413_v21  ;;  %v5181_v62 = vmul.f32 %v5180_v24, %v12320_v12  ;;  %v12351_v10 = vmul.f32 0.70710677, %v12340_v1 }
 0x39e   : > { %v8580_v40 = vpop.eup %8579  ;;  %v1918_v53 = vmul.f32 %v12257_v38, %v1898_v6  ;;  %v3394_v60 = vadd.f32 %v8578_v26, %v3393_v56  ;;  %v3425_v18 = vadd.f32 0.112945676, %v3424_v42  ;;  %v5171_v32 = vadd.f32 0.0036580483, %v5170_v55 }
 0x39f   : > { %v3351_v0 = vmul.f32 %v8580_v40, %v12323_v59  ;;  %v3361_v61 = vand.u32 2147483648, %v12323_v59  ;;  %v3415_v14 = vmul.f32 %v3414_v20, %v12295_v34  ;;  %v5182_v25 = vadd.f32 0.014752088, %v5181_v62 }
 0x3a0   : > { %1939 = vadd.xlane.f32.xlu1 %v1918_v53  ;;  %v3398_v45 = vsel %vm3397_vm5, %v8578_v26, %v3394_v60  ;;  %v3426_v44 = vmul.f32 %v3425_v18, %v12295_v34  ;;  %v5172_v22 = vmul.f32 %v5171_v32, %v12320_v12  ;;  %v5126_v21 = vmul.f32 %v12351_v10, %v12351_v10 }
 0x3a1   : > { %v3403_v47 = vsel %vm12331_vm1, %v3402_v51, %v3398_v45  ;;  %v3352_v24 = vsub.f32 1.0, %v3351_v0  ;;  %v3416_v5 = vadd.f32 0.18741608, %v3415_v14  ;;  %v5183_v6 = vmul.f32 %v5182_v25, %v12320_v12 }
 0x3a2   : > { %v3404_v56 = vmul.f32 %v3403_v47, %v3379_v27  ;;  %v3427_v42 = vadd.f32 0.4994258, %v3426_v44  ;;  %v5173_v55 = vadd.f32 0.05243302, %v5172_v22  ;;  %v12367_v20 = vmin.f32 %v5126_v21, 16.0 }
 0x3a3   : > { %v3353_v26 = vmul.f32 %v8580_v40, %v3352_v24  ;;  %vm3356_vm6 = vweird.f32 %v8580_v40  ;;  %v3359_v62 = vand.u32 2147483647, %v12323_v59  ;;  %v5184_v53 = vadd.f32 0.112945676, %v5183_v6 }
 0x3a4   : > { %v8254_v60 = vclamps-f32 %v3404_v56, 1.0  ;;  %v3428_v18 = vmul.f32 %v3427_v42, %v12295_v34  ;;  %v5174_v52 = vmul.f32 %v5173_v55, %v12320_v12  ;;  %v5128_v51 = vmul.f32 2.1237322e-06, %v12367_v20  ;;  %vm3357_vm7 = vmor %vm3355_vm3, %vm3356_vm6 }
 0x3a5   : > { %v3354_v32 = vadd.f32 %v8580_v40, %v3353_v26  ;;  %v3417_v0 = vmul.f32 %v3416_v5, %v12295_v34  ;;  %v5185_v27 = vmul.f32 %v5184_v53, %v12320_v12  ;;  %v5139_v14 = vmul.f32 3.8918573e-05, %v12367_v20 }
 0x3a6   : > { %v3734_v25 = vadd.f32 1.0, %v8254_v60  ;;  %v3362_v45 = vor.u32 1.1754944e-38, %v3361_v61  ;;  %v12378_v44 = vadd.f32 1.0, %v3428_v18  ;;  %v5129_v22 = vadd.f32 0.00028619796, %v5128_v51 }
 0x3a7   : > { %v3358_v21 = vsel %vm3357_vm7, %v8580_v40, %v3354_v32  ;;  %vm3360_vm8 = vcmp.eq.f32.partialorder %v3359_v62, 8.507059e+37  ;;  %v5186_v47 = vadd.f32 0.4994258, %v5185_v27  ;;  %v5140_v24 = vadd.f32 0.001143296, %v5139_v14 }
 0x3a8   : > { %v3750_v6 = vmul.f32 %v3734_v25, %v12275_v50  ;;  %v3363_v56 = vsel %vm3360_vm8, %v3362_v45, %v3358_v21  ;;  %8581 = vrcp.f32 %v12378_v44  ;;  %v5175_v34 = vadd.f32 0.18741608, %v5174_v52  ;;  %v12386_v61 = vld [vmem:[#allocation10 + $0x2] ss:$0 sm:$0xff] }
 0x3a9   : > { %v12383_v5 = vmul.f32 0.5, %v12059_v63  ;;  %v3364_v59 = vmul.f32 %v3363_v56, %v12337_v8  ;;  %v3418_v42 = vadd.f32 1.1283791, %v3417_v0  ;;  %v12389_v55 = vadd.f32 %v12386_v61, %v4744_v48  ;;  %v12429_v56 = vld [vmem:[%s16493_s6 + $0x1] ss:$0 sm:$0xff] }
 0x3aa   : > { %v3771_v40 = vmul.f32 %v11933_v3, %v3750_v6  ;;  %v5187_v26 = vmul.f32 %v5186_v47, %v12320_v12  ;;  %v5130_v50 = vmul.f32 %v5129_v22, %v12367_v20  ;;  %v5141_v62 = vmul.f32 %v5140_v24, %v12367_v20  ;;  %v16962_v22 = vld [vmem:[#allocation55_spill] sm:$0xff] }
 0x3ab   : > { %v12396_v53 = vmul.f32 0.5, %v12064_v41  ;;  %v3061_v63 = vmul.f32 0.5, %v12193_v49  ;;  %v8253_v8 = vclamps-f32 %v3364_v59, 1.0  ;;  %v3439_v60 = vand.u32 2147483647, %v12378_v44  ;;  %v16961_v41 = vld [vmem:[#allocation59_spill] sm:$0xff] }
 0x3ac   : > { %3794 = vadd.xlane.f32.xlu0 %v3771_v40  ;;  %v5176_v48 = vmul.f32 %v5175_v34, %v12320_v12  ;;  %v12401_v18 = vadd.f32 1.0, %v5187_v26  ;;  %v5131_v3 = vadd.f32 0.0036580483, %v5130_v50  ;;  %v5142_v52 = vadd.f32 0.014752088, %v5141_v62 }
 0x3ad   : > { %v3733_v51 = vadd.f32 1.0, %v8253_v8  ;;  %v12404_v32 = vmul.f32 0.5, %v12268_v39  ;;  %v12407_v0 = vmul.f32 0.70710677, %v12389_v55  ;;  %v1179_v49 = vmul.f32 %v12024_v9, %v16961_v41 }
 0x3ae   : > { %v8582_v27 = vpop.eup %8581  ;;  %v3419_v14 = vmul.f32 %v3418_v42, %v12279_v36  ;;  %vm3435_vm9 = vweird.f32 %v12378_v44  ;;  %v3441_v12 = vand.u32 2147483648, %v12378_v44  ;;  %8583 = vrcp.f32 %v12401_v18 }
 0x3af   : > { %v3749_v25 = vmul.f32 %v3733_v51, %v3061_v63  ;;  %v3431_v45 = vmul.f32 %v8582_v27, %v12378_v44  ;;  %v5132_v39 = vmul.f32 %v5131_v3, %v12367_v20  ;;  %v1178_v21 = vmul.f32 %v12024_v9, %v16962_v22 }
 0x3b0   : > { %vm12419_vm10 = vcmp.eq.f32.partialorder %v3439_v60, 8.507059e+37  ;;  %v5177_v24 = vadd.f32 1.1283791, %v5176_v48  ;;  %v5143_v36 = vmul.f32 %v5142_v52, %v12367_v20  ;;  %v5086_v6 = vmul.f32 %v12407_v0, %v12407_v0 }
 0x3b1   : > { %v3770_v34 = vmul.f32 %v12429_v56, %v3749_v25  ;;  %v3432_v59 = vsub.f32 1.0, %v3431_v45  ;;  %v5133_v42 = vadd.f32 0.05243302, %v5132_v39  ;;  %v12433_v9 = vadd.f32 %v12040_v2, %v1179_v49 }
 0x3b2   : > { %vm3436_vm11 = vweird.f32 %v8582_v27  ;;  %v3442_v40 = vor.u32 1.1754944e-38, %v3441_v12  ;;  %v5144_v26 = vadd.f32 0.112945676, %v5143_v36  ;;  %v12435_v50 = vmin.f32 %v5086_v6, 16.0 }
 0x3b3   : > { %3792 = vadd.xlane.f32.xlu1 %v3770_v34  ;;  %v3433_v62 = vmul.f32 %v8582_v27, %v3432_v59  ;;  %v5134_v63 = vmul.f32 %v5133_v42, %v12367_v20  ;;  %v12439_v8 = vmul.f32 0.70710677, %v12433_v9  ;;  %v12442_v60 = vadd.f32 %v12040_v2, %v1178_v21  ;;  %vm3437_vm12 = vmor %vm3435_vm9, %vm3436_vm11 }
 0x3b4   : > { %v8584_v48 = vpop.eup %8583  ;;  %v5178_v3 = vmul.f32 %v5177_v24, %v12299_v37  ;;  %v5145_v52 = vmul.f32 %v5144_v26, %v12367_v20  ;;  %v5088_v51 = vmul.f32 2.1237322e-06, %v12435_v50  ;;  %v5099_v41 = vmul.f32 3.8918573e-05, %v12435_v50 }
 0x3b5   : > { %v3434_v49 = vadd.f32 %v8582_v27, %v3433_v62  ;;  %v5190_v12 = vmul.f32 %v8584_v48, %v12401_v18  ;;  %v5198_v25 = vand.u32 2147483647, %v12401_v18  ;;  %v5200_v45 = vand.u32 2147483648, %v12401_v18 }
 0x3b6   : > { %v5146_v2 = vadd.f32 0.4994258, %v5145_v52  ;;  %v5089_v39 = vadd.f32 0.00028619796, %v5088_v51  ;;  %v5100_v37 = vadd.f32 0.001143296, %v5099_v41  ;;  %v1637_v22 = vmul.f32 %v12439_v8, %v12439_v8 }
 0x3b7   : > { %v3438_v21 = vsel %vm3437_vm12, %v8582_v27, %v3434_v49  ;;  %v5191_v24 = vsub.f32 1.0, %v5190_v12  ;;  %v5135_v36 = vadd.f32 0.18741608, %v5134_v63  ;;  %v12457_v6 = vmul.f32 0.70710677, %v12442_v60 }
 0x3b8   : > { %v3443_v34 = vsel %vm12419_vm10, %v3442_v40, %v3438_v21  ;;  %v5147_v59 = vmul.f32 %v5146_v2, %v12367_v20  ;;  %v5090_v44 = vmul.f32 %v5089_v39, %v12435_v50  ;;  %v5101_v42 = vmul.f32 %v5100_v37, %v12435_v50 }
 0x3b9   : > { %v3444_v26 = vmul.f32 %v3443_v34, %v3419_v14  ;;  %v5192_v62 = vmul.f32 %v8584_v48, %v5191_v24  ;;  %vm5195_vm13 = vweird.f32 %v8584_v48  ;;  %v12464_v52 = vmin.f32 %v1637_v22, 16.0 }
 0x3ba   : > { %vm5194_vm14 = vweird.f32 %v12401_v18  ;;  %v12467_v27 = vadd.f32 1.0, %v5147_v59  ;;  %v5091_v63 = vadd.f32 0.0036580483, %v5090_v44  ;;  %v5102_v51 = vadd.f32 0.014752088, %v5101_v42 }
 0x3bb   : > { %v8255_v41 = vclamps-f32 %v3444_v26, 1.0  ;;  %v5193_v47 = vadd.f32 %v8584_v48, %v5192_v62  ;;  %vm5199_vm0 = vcmp.eq.f32.partialorder %v5198_v25, 8.507059e+37  ;;  %v1639_v40 = vmul.f32 2.1237322e-06, %v12464_v52  ;;  %vm5196_vm1 = vmor %vm5194_vm14, %vm5195_vm13 }
 0x3bc   : > { %v5201_v49 = vor.u32 1.1754944e-38, %v5200_v45  ;;  %v5136_v12 = vmul.f32 %v5135_v36, %v12367_v20  ;;  %8585 = vrcp.f32 %v12467_v27  ;;  %v1597_v14 = vmul.f32 %v12457_v6, %v12457_v6 }
 0x3bd   : > { %v3735_v2 = vadd.f32 1.0, %v8255_v41  ;;  %v5197_v18 = vsel %vm5196_vm1, %v8584_v48, %v5193_v47  ;;  %v5092_v39 = vmul.f32 %v5091_v63, %v12435_v50  ;;  %v5103_v37 = vmul.f32 %v5102_v51, %v12435_v50  ;;  %v12489_v41 = vld [vmem:[#allocation8] ss:$0 sm:$0xff]  ;;  %v16965_v47 = vld [vmem:[#allocation76_spill] sm:$0xff] }
 0x3be   : > { %v4783_v22 = vmul.f32 0.5, %v12284_v43  ;;  %v5202_v25 = vsel %vm5199_vm0, %v5201_v49, %v5197_v18  ;;  %v12478_v21 = vmul.f32 0.5, %v12340_v1  ;;  %v1640_v45 = vadd.f32 0.00028619796, %v1639_v40 }
 0x3bf   : > { %v3751_v20 = vmul.f32 %v3735_v2, %v12404_v32  ;;  %v5203_v24 = vmul.f32 %v5202_v25, %v5178_v3  ;;  %v5093_v36 = vadd.f32 0.05243302, %v5092_v39  ;;  %v5104_v34 = vadd.f32 0.112945676, %v5103_v37 }
 0x3c0   : > { %v5137_v59 = vadd.f32 1.1283791, %v5136_v12  ;;  %v1641_v44 = vmul.f32 %v1640_v45, %v12464_v52  ;;  %v1650_v48 = vmul.f32 3.8918573e-05, %v12464_v52  ;;  %v12483_v42 = vmin.f32 %v1597_v14, 16.0 }
 0x3c1   : > { %v3772_v26 = vmul.f32 %v12429_v56, %v3751_v20  ;;  %v8274_v43 = vclamps-f32 %v5203_v24, 1.0  ;;  %v5094_v62 = vmul.f32 %v5093_v36, %v12435_v50  ;;  %v5105_v1 = vmul.f32 %v5104_v34, %v12435_v50 }
 0x3c2   : > { %v8586_v63 = vpop.eup %8585  ;;  %v1642_v51 = vadd.f32 0.0036580483, %v1641_v44  ;;  %v1651_v32 = vadd.f32 0.001143296, %v1650_v48  ;;  %v1599_v3 = vmul.f32 2.1237322e-06, %v12483_v42  ;;  %v1177_v40 = vmul.f32 %v12489_v41, %v16965_v47 }
 0x3c3   : > { %3796 = vadd.xlane.f32.xlu2 %v3772_v26  ;;  %v5455_v49 = vadd.f32 1.0, %v8274_v43  ;;  %v5150_v12 = vmul.f32 %v8586_v63, %v12467_v27  ;;  %v5158_v14 = vand.u32 2147483647, %v12467_v27  ;;  %v5095_v2 = vadd.f32 0.18741608, %v5094_v62 }
 0x3c4   : > { %v5106_v18 = vadd.f32 0.4994258, %v5105_v1  ;;  %v1643_v39 = vmul.f32 %v1642_v51, %v12464_v52  ;;  %v1652_v37 = vmul.f32 %v1651_v32, %v12464_v52  ;;  %v1600_v25 = vadd.f32 0.00028619796, %v1599_v3 }
 0x3c5   : > { %v5471_v45 = vmul.f32 %v5455_v49, %v4783_v22  ;;  %v5151_v20 = vsub.f32 1.0, %v5150_v12  ;;  %v5160_v24 = vand.u32 2147483648, %v12467_v27  ;;  %v1610_v36 = vmul.f32 3.8918573e-05, %v12483_v42 }
 0x3c6   : > { %v5107_v34 = vmul.f32 %v5106_v18, %v12435_v50  ;;  %v1644_v44 = vadd.f32 0.05243302, %v1643_v39  ;;  %v1653_v48 = vadd.f32 0.014752088, %v1652_v37  ;;  %v1601_v26 = vmul.f32 %v1600_v25, %v12483_v42 }
 0x3c7   : > { %v5492_v43 = vmul.f32 %v12142_v16, %v5471_v45  ;;  %v5152_v62 = vmul.f32 %v8586_v63, %v5151_v20  ;;  %vm5155_vm2 = vweird.f32 %v8586_v63  ;;  %v1611_v1 = vadd.f32 0.001143296, %v1610_v36 }
 0x3c8   : > { %v5096_v51 = vmul.f32 %v5095_v2, %v12435_v50  ;;  %v12503_v32 = vadd.f32 1.0, %v5107_v34  ;;  %v1654_v22 = vmul.f32 %v1653_v48, %v12464_v52  ;;  %v1602_v3 = vadd.f32 0.0036580483, %v1601_v26  ;;  %v12511_v50 = vld [vmem:[#allocation10] ss:$0 sm:$0xff] }
 0x3c9   : > { %5517 = vadd.xlane.f32.xlu0 %v5492_v43  ;;  %v5138_v47 = vmul.f32 %v5137_v59, %v12351_v10  ;;  %v5153_v49 = vadd.f32 %v8586_v63, %v5152_v62  ;;  %vm5154_vm3 = vweird.f32 %v12467_v27  ;;  %v1612_v12 = vmul.f32 %v1611_v1, %v12483_v42  ;;  %v16966_v48 = vld [vmem:[#allocation78_spill] sm:$0xff]  ;;  %v16967_v1 = vld [vmem:[#allocation77_spill] sm:$0xff] }
 0x3ca   : > { %vm5156_vm5 = vmor %vm5154_vm3, %vm5155_vm2  ;;  %v5161_v18 = vor.u32 1.1754944e-38, %v5160_v24  ;;  %8587 = vrcp.f32 %v12503_v32  ;;  %v1645_v39 = vmul.f32 %v1644_v44, %v12464_v52  ;;  %v12514_v2 = vadd.f32 %v12511_v50, %v1177_v40 }
 0x3cb   : > { %v5157_v37 = vsel %vm5156_vm5, %v8586_v63, %v5153_v49  ;;  %vm5159_vm6 = vcmp.eq.f32.partialorder %v5158_v14, 8.507059e+37  ;;  %v1655_v25 = vadd.f32 0.112945676, %v1654_v22  ;;  %v1603_v10 = vmul.f32 %v1602_v3, %v12483_v42 }
 0x3cc   : > { %v5162_v59 = vsel %vm5159_vm6, %v5161_v18, %v5157_v37  ;;  %v12518_v27 = vmul.f32 0.5, %v12389_v55  ;;  %v5097_v45 = vadd.f32 1.1283791, %v5096_v51  ;;  %v1613_v20 = vadd.f32 0.014752088, %v1612_v12 }
 0x3cd   : > { %v5163_v24 = vmul.f32 %v5162_v59, %v5138_v47  ;;  %v12521_v36 = vmul.f32 0.5, %v12433_v9  ;;  %v1656_v34 = vmul.f32 %v1655_v25, %v12464_v52  ;;  %v1604_v44 = vadd.f32 0.05243302, %v1603_v10 }
 0x3ce   : > { %v1646_v40 = vadd.f32 0.18741608, %v1645_v39  ;;  %v1614_v63 = vmul.f32 %v1613_v20, %v12483_v42  ;;  %v12526_v14 = vmul.f32 0.70710677, %v12514_v2  ;;  %v3028_v26 = vmul.f32 %v12157_v29, %v16966_v48 }
 0x3cf   : > { %v8273_v55 = vclamps-f32 %v5163_v24, 1.0  ;;  %v1657_v43 = vadd.f32 0.4994258, %v1656_v34  ;;  %v1605_v62 = vmul.f32 %v1604_v44, %v12483_v42  ;;  %v3027_v9 = vmul.f32 %v12157_v29, %v16967_v1 }
 0x3d0   : > { %v8588_v51 = vpop.eup %8587  ;;  %v5098_v22 = vmul.f32 %v5097_v45, %v12407_v0  ;;  %v1615_v3 = vadd.f32 0.112945676, %v1614_v63  ;;  %v1557_v47 = vmul.f32 %v12526_v14, %v12526_v14  ;;  %v12537_v49 = vadd.f32 %v12171_v4, %v3028_v26 }
 0x3d1   : > { %v5454_v12 = vadd.f32 1.0, %v8273_v55  ;;  %v5110_v18 = vmul.f32 %v8588_v51, %v12503_v32  ;;  %v5118_v39 = vand.u32 2147483647, %v12503_v32  ;;  %v5120_v37 = vand.u32 2147483648, %v12503_v32 }
 0x3d2   : > { %v1647_v25 = vmul.f32 %v1646_v40, %v12464_v52  ;;  %v1658_v29 = vmul.f32 %v1657_v43, %v12464_v52  ;;  %v1616_v0 = vmul.f32 %v1615_v3, %v12483_v42  ;;  %v12545_v10 = vmin.f32 %v1557_v47, 16.0 }
 0x3d3   : > { %v5470_v59 = vmul.f32 %v5454_v12, %v12478_v21  ;;  %v5111_v45 = vsub.f32 1.0, %v5110_v18  ;;  %v1606_v20 = vadd.f32 0.18741608, %v1605_v62  ;;  %v12549_v24 = vmul.f32 0.70710677, %v12537_v49 }
 0x3d4   : > { %vm5115_vm7 = vweird.f32 %v8588_v51  ;;  %v12551_v34 = vadd.f32 1.0, %v1658_v29  ;;  %v1617_v44 = vadd.f32 0.4994258, %v1616_v0  ;;  %v1559_v63 = vmul.f32 2.1237322e-06, %v12545_v10 }
 0x3d5   : > { %v5491_v40 = vmul.f32 %v12142_v16, %v5470_v59  ;;  %v5112_v52 = vmul.f32 %v8588_v51, %v5111_v45  ;;  %v1570_v48 = vmul.f32 3.8918573e-05, %v12545_v10  ;;  %v3487_v26 = vmul.f32 %v12549_v24, %v12549_v24 }
 0x3d6   : > { %vm5114_vm8 = vweird.f32 %v12503_v32  ;;  %vm12559_vm9 = vcmp.eq.f32.partialorder %v5118_v39, 8.507059e+37  ;;  %v5121_v55 = vor.u32 1.1754944e-38, %v5120_v37  ;;  %8589 = vrcp.f32 %v12551_v34 }
 0x3d7   : > { %5515 = vadd.xlane.f32.xlu2 %v5491_v40  ;;  %v5113_v43 = vadd.f32 %v8588_v51, %v5112_v52  ;;  %v1648_v62 = vadd.f32 1.1283791, %v1647_v25  ;;  %v1618_v16 = vmul.f32 %v1617_v44, %v12483_v42  ;;  %v1560_v1 = vadd.f32 0.00028619796, %v1559_v63  ;;  %vm5116_vm10 = vmor %vm5114_vm8, %vm5115_vm7 }
 0x3d8   : > { %v1669_v3 = vand.u32 2147483647, %v12551_v34  ;;  %v1607_v47 = vmul.f32 %v1606_v20, %v12483_v42  ;;  %v1571_v32 = vadd.f32 0.001143296, %v1570_v48  ;;  %v12568_v12 = vmin.f32 %v3487_v26, 16.0 }
 0x3d9   : > { %v5117_v18 = vsel %vm5116_vm10, %v8588_v51, %v5113_v43  ;;  %v1671_v39 = vand.u32 2147483648, %v12551_v34  ;;  %v12571_v37 = vadd.f32 1.0, %v1618_v16  ;;  %v1561_v29 = vmul.f32 %v1560_v1, %v12545_v10 }
 0x3da   : > { %v5122_v25 = vsel %vm12559_vm9, %v5121_v55, %v5117_v18  ;;  %v1572_v0 = vmul.f32 %v1571_v32, %v12545_v10  ;;  %v3489_v59 = vmul.f32 2.1237322e-06, %v12568_v12  ;;  %v12579_v45 = vadd.f32 %v12171_v4, %v3027_v9 }
 0x3db   : > { %v5123_v42 = vmul.f32 %v5122_v25, %v5098_v22  ;;  %v1649_v20 = vmul.f32 %v1648_v62, %v12439_v8  ;;  %8591 = vrcp.f32 %v12571_v37  ;;  %v3500_v51 = vmul.f32 3.8918573e-05, %v12568_v12 }
 0x3dc   : > { %v8590_v44 = vpop.eup %8589  ;;  %vm1665_vm11 = vweird.f32 %v12551_v34  ;;  %v12585_v63 = vadd.f32 1.1283791, %v1607_v47  ;;  %v1562_v40 = vadd.f32 0.0036580483, %v1561_v29  ;;  %v1573_v52 = vadd.f32 0.014752088, %v1572_v0 }
 0x3dd   : > { %v8272_v48 = vclamps-f32 %v5123_v42, 1.0  ;;  %v1661_v26 = vmul.f32 %v8590_v44, %v12551_v34  ;;  %vm12588_vm12 = vcmp.eq.f32.partialorder %v1669_v3, 8.507059e+37  ;;  %v1672_v9 = vor.u32 1.1754944e-38, %v1671_v39 }
 0x3de   : > { %v1629_v8 = vand.u32 2147483647, %v12571_v37  ;;  %v1631_v22 = vand.u32 2147483648, %v12571_v37  ;;  %v1563_v21 = vmul.f32 %v1562_v40, %v12545_v10  ;;  %v1574_v55 = vmul.f32 %v1573_v52, %v12545_v10  ;;  %v12608_v52 = vld [vmem:[#allocation8 + $0x1] ss:$0 sm:$0xff] }
 0x3df   : > { %v3490_v43 = vadd.f32 0.00028619796, %v3489_v59  ;;  %v5453_v62 = vadd.f32 1.0, %v8272_v48  ;;  %v1662_v16 = vsub.f32 1.0, %v1661_v26  ;;  %v3501_v1 = vadd.f32 0.001143296, %v3500_v51 }
 0x3e0   : > { %v12597_v47 = vmul.f32 0.70710677, %v12579_v45  ;;  %vm1666_vm13 = vweird.f32 %v8590_v44  ;;  %vm1625_vm14 = vweird.f32 %v12571_v37  ;;  %v1564_v3 = vadd.f32 0.05243302, %v1563_v21  ;;  %v16972_v48 = vld [vmem:[#allocation61_spill] sm:$0xff] }
 0x3e1   : > { %v1575_v32 = vadd.f32 0.112945676, %v1574_v55  ;;  %v3491_v18 = vmul.f32 %v3490_v43, %v12568_v12  ;;  %v8592_v39 = vpop.eup %8591  ;;  %v5469_v29 = vmul.f32 %v5453_v62, %v12518_v27  ;;  %v1663_v25 = vmul.f32 %v8590_v44, %v1662_v16  ;;  %v12615_v27 = vld [vmem:[%s16493_s6 + $0x2] ss:$0 sm:$0xff]  ;;  %vm1667_vm0 = vmor %vm1665_vm11, %vm1666_vm13 }
 0x3e2   : > { %v3502_v0 = vmul.f32 %v3501_v1, %v12568_v12  ;;  %v3447_v59 = vmul.f32 %v12597_v47, %v12597_v47  ;;  %v1621_v42 = vmul.f32 %v8592_v39, %v12571_v37  ;;  %v1565_v51 = vmul.f32 %v1564_v3, %v12545_v10 }
 0x3e3   : > { %v1576_v40 = vmul.f32 %v1575_v32, %v12545_v10  ;;  %v3029_v26 = vmul.f32 %v12608_v52, %v16972_v48  ;;  %v5490_v21 = vmul.f32 %v12615_v27, %v5469_v29  ;;  %v1664_v55 = vadd.f32 %v8590_v44, %v1663_v25 }
 0x3e4   : > { %v3492_v43 = vadd.f32 0.0036580483, %v3491_v18  ;;  %v3503_v62 = vadd.f32 0.014752088, %v3502_v0  ;;  %v1622_v16 = vsub.f32 1.0, %v1621_v42  ;;  %v12621_v32 = vmin.f32 %v3447_v59, 16.0 }
 0x3e5   : > { %v1566_v1 = vadd.f32 0.18741608, %v1565_v51  ;;  %v1577_v3 = vadd.f32 0.4994258, %v1576_v40  ;;  %5513 = vadd.xlane.f32.xlu1 %v5490_v21  ;;  %v1668_v48 = vsel %vm1667_vm0, %v8590_v44, %v1664_v55  ;;  %v1632_v23 = vor.u32 1.1754944e-38, %v1631_v22 }
 0x3e6   : > { %v3493_v46 = vmul.f32 %v3492_v43, %v12568_v12  ;;  %v3504_v13 = vmul.f32 %v3503_v62, %v12568_v12  ;;  %v1673_v18 = vsel %vm12588_vm12, %v1672_v9, %v1668_v48  ;;  %v1623_v29 = vmul.f32 %v8592_v39, %v1622_v16  ;;  %v12641_v62 = vld [vmem:[#allocation10 + $0x1] ss:$0 sm:$0xff] }
 0x3e7   : > { %vm1626_vm1 = vweird.f32 %v8592_v39  ;;  %v1578_v34 = vmul.f32 %v1577_v3, %v12545_v10  ;;  %v1674_v25 = vmul.f32 %v1673_v18, %v1649_v20  ;;  %v3449_v59 = vmul.f32 2.1237322e-06, %v12621_v32 }
 0x3e8   : > { %v3494_v0 = vadd.f32 0.05243302, %v3493_v46  ;;  %v3505_v42 = vadd.f32 0.112945676, %v3504_v13  ;;  %v1624_v51 = vadd.f32 %v8592_v39, %v1623_v29  ;;  %v1567_v44 = vmul.f32 %v1566_v1, %v12545_v10  ;;  %vm1627_vm2 = vmor %vm1625_vm14, %vm1626_vm1 }
 0x3e9   : > { %v12630_v22 = vadd.f32 1.0, %v1578_v34  ;;  %v3460_v40 = vmul.f32 3.8918573e-05, %v12621_v32  ;;  %v8241_v21 = vclamps-f32 %v1674_v25, 1.0  ;;  %v3450_v20 = vadd.f32 0.00028619796, %v3449_v59 }
 0x3ea   : > { %v3495_v4 = vmul.f32 %v3494_v0, %v12568_v12  ;;  %v3506_v9 = vmul.f32 %v3505_v42, %v12568_v12  ;;  %v1609_v46 = vmul.f32 %v12585_v63, %v12457_v6  ;;  %v1628_v13 = vsel %vm1627_vm2, %v8592_v39, %v1624_v51  ;;  %v12662_v51 = vld [vmem:[#allocation8 + $0x2] ss:$0 sm:$0xff] }
 0x3eb   : > { %vm1630_vm3 = vcmp.eq.f32.partialorder %v1629_v8, 8.507059e+37  ;;  %8593 = vrcp.f32 %v12630_v22  ;;  %v1887_v10 = vadd.f32 1.0, %v8241_v21  ;;  %v1214_v55 = vmul.f32 0.5, %v12442_v60 }
 0x3ec   : > { %v1633_v43 = vsel %vm1630_vm3, %v1632_v23, %v1628_v13  ;;  %v12644_v37 = vadd.f32 %v12641_v62, %v3029_v26  ;;  %v3496_v1 = vadd.f32 0.18741608, %v3495_v4  ;;  %v3507_v3 = vadd.f32 0.4994258, %v3506_v9 }
 0x3ed   : > { %v1634_v16 = vmul.f32 %v1633_v43, %v1609_v46  ;;  %v3451_v48 = vmul.f32 %v3450_v20, %v12621_v32  ;;  %v1903_v6 = vmul.f32 %v1887_v10, %v12521_v36  ;;  %v12649_v63 = vmul.f32 0.5, %v12514_v2 }
 0x3ee   : > { %v1568_v8 = vadd.f32 1.1283791, %v1567_v44  ;;  %v3461_v39 = vadd.f32 0.001143296, %v3460_v40  ;;  %v3497_v23 = vmul.f32 %v3496_v1, %v12568_v12  ;;  %v3508_v60 = vmul.f32 %v3507_v3, %v12568_v12 }
 0x3ef   : > { %v8240_v18 = vclamps-f32 %v1634_v16, 1.0  ;;  %v3452_v29 = vadd.f32 0.0036580483, %v3451_v48  ;;  %v1923_v26 = vmul.f32 %v12257_v38, %v1903_v6  ;;  %v1589_v34 = vand.u32 2147483647, %v12630_v22 }
 0x3f0   : > { %v3462_v25 = vmul.f32 %v3461_v39, %v12621_v32  ;;  %v12657_v0 = vmul.f32 0.70710677, %v12644_v37  ;;  %v12659_v42 = vadd.f32 1.0, %v3508_v60  ;;  %v4749_v12 = vmul.f32 %v12662_v51, %v11725_v30  ;;  %v16975_v60 = vld [vmem:[#allocation62_spill] sm:$0xff] }
 0x3f1   : > { %v8594_v36 = vpop.eup %8593  ;;  %v1886_v2 = vadd.f32 1.0, %v8240_v18  ;;  %v3453_v59 = vmul.f32 %v3452_v29, %v12621_v32  ;;  %1949 = vadd.xlane.f32.xlu0 %v1923_v26  ;;  %v1591_v40 = vand.u32 2147483648, %v12630_v22  ;;  %v1569_v20 = vmul.f32 %v1568_v8, %v12526_v14 }
 0x3f2   : > { %v1581_v44 = vmul.f32 %v8594_v36, %v12630_v22  ;;  %v3463_v21 = vadd.f32 0.014752088, %v3462_v25  ;;  %v3527_v4 = vmul.f32 %v12657_v0, %v12657_v0  ;;  %v3498_v46 = vadd.f32 1.1283791, %v3497_v23 }
 0x3f3   : > { %v1902_v9 = vmul.f32 %v1886_v2, %v1214_v55  ;;  %8595 = vrcp.f32 %v12659_v42  ;;  %vm1585_vm5 = vweird.f32 %v12630_v22  ;;  %vm12673_vm6 = vcmp.eq.f32.partialorder %v1589_v34, 8.507059e+37 }
 0x3f4   : > { %v1582_v13 = vsub.f32 1.0, %v1581_v44  ;;  %v3454_v10 = vadd.f32 0.05243302, %v3453_v59  ;;  %v3464_v16 = vmul.f32 %v3463_v21, %v12621_v32  ;;  %v12679_v1 = vmin.f32 %v3527_v4, 16.0 }
 0x3f5   : > { %v1922_v43 = vmul.f32 %v12257_v38, %v1902_v9  ;;  %v12682_v55 = vadd.f32 %v12386_v61, %v4749_v12  ;;  %vm1586_vm7 = vweird.f32 %v8594_v36  ;;  %v1592_v3 = vor.u32 1.1754944e-38, %v1591_v40 }
 0x3f6   : > { %v1583_v14 = vmul.f32 %v8594_v36, %v1582_v13  ;;  %v3455_v48 = vmul.f32 %v3454_v10, %v12621_v32  ;;  %v3499_v6 = vmul.f32 %v3498_v46, %v12549_v24  ;;  %v3465_v8 = vadd.f32 0.112945676, %v3464_v16  ;;  %vm1587_vm9 = vmor %vm1585_vm5, %vm1586_vm7 }
 0x3f7   : > { %1947 = vadd.xlane.f32.xlu2 %v1922_v43  ;;  %v3529_v39 = vmul.f32 2.1237322e-06, %v12679_v1  ;;  %v3540_v38 = vmul.f32 3.8918573e-05, %v12679_v1  ;;  %vm3515_vm8 = vweird.f32 %v12659_v42  ;;  %v12690_v23 = vmul.f32 0.70710677, %v12682_v55 }
 0x3f8   : > { %v1584_v18 = vadd.f32 %v8594_v36, %v1583_v14  ;;  %v4748_v29 = vmul.f32 %v12662_v51, %v16975_v60  ;;  %v3456_v34 = vadd.f32 0.18741608, %v3455_v48  ;;  %v3466_v24 = vmul.f32 %v3465_v8, %v12621_v32 }
 0x3f9   : > { %v8596_v26 = vpop.eup %8595  ;;  %v3530_v25 = vadd.f32 0.00028619796, %v3529_v39  ;;  %v3541_v2 = vadd.f32 0.001143296, %v3540_v38  ;;  %v3519_v44 = vand.u32 2147483647, %v12659_v42  ;;  %v5286_v10 = vmul.f32 %v12690_v23, %v12690_v23 }
 0x3fa   : > { %v1588_v59 = vsel %vm1587_vm9, %v8594_v36, %v1584_v18  ;;  %v3511_v12 = vmul.f32 %v8596_v26, %v12659_v42  ;;  %v3521_v40 = vand.u32 2147483648, %v12659_v42  ;;  %v3467_v4 = vadd.f32 0.4994258, %v3466_v24 }
 0x3fb   : > { %v1593_v21 = vsel %vm12673_vm6, %v1592_v3, %v1588_v59  ;;  %v3531_v9 = vmul.f32 %v3530_v25, %v12679_v1  ;;  %v3542_v22 = vmul.f32 %v3541_v2, %v12679_v1  ;;  %v12707_v36 = vadd.f32 %v12386_v61, %v4748_v29 }
 0x3fc   : > { %v1594_v46 = vmul.f32 %v1593_v21, %v1569_v20  ;;  %v3512_v13 = vsub.f32 1.0, %v3511_v12  ;;  %v3457_v43 = vmul.f32 %v3456_v34, %v12621_v32  ;;  %v3468_v16 = vmul.f32 %v3467_v4, %v12621_v32 }
 0x3fd   : > { %v3532_v14 = vadd.f32 0.0036580483, %v3531_v9  ;;  %v3543_v30 = vadd.f32 0.014752088, %v3542_v22  ;;  %vm3516_vm10 = vweird.f32 %v8596_v26  ;;  %v12711_v8 = vmin.f32 %v5286_v10, 16.0 }
 0x3fe   : > { %v8239_v3 = vclamps-f32 %v1594_v46, 1.0  ;;  %v3513_v48 = vmul.f32 %v8596_v26, %v3512_v13  ;;  %vm12713_vm11 = vcmp.eq.f32.partialorder %v3519_v44, 8.507059e+37  ;;  %v12717_v39 = vadd.f32 1.0, %v3468_v16  ;;  %vm3517_vm12 = vmor %vm3515_vm8, %vm3516_vm10  ;;  %v12739_v22 = vld [vmem:[%s16493_s6] ss:$0 sm:$0xff] }
 0x3ff   : > { %v3533_v38 = vmul.f32 %v3532_v14, %v12679_v1  ;;  %v3544_v18 = vmul.f32 %v3543_v30, %v12679_v1  ;;  %v3522_v32 = vor.u32 1.1754944e-38, %v3521_v40  ;;  %v5288_v34 = vmul.f32 2.1237322e-06, %v12711_v8 }
 0x400   : > { %v1885_v60 = vadd.f32 1.0, %v8239_v3  ;;  %v3514_v29 = vadd.f32 %v8596_v26, %v3513_v48  ;;  %v3458_v24 = vadd.f32 1.1283791, %v3457_v43  ;;  %8597 = vrcp.f32 %v12717_v39 }
 0x401   : > { %v5299_v25 = vmul.f32 3.8918573e-05, %v12711_v8  ;;  %v12727_v2 = vmul.f32 0.70710677, %v12707_v36  ;;  %v3534_v44 = vadd.f32 0.05243302, %v3533_v38  ;;  %vm3475_vm14 = vweird.f32 %v12717_v39 }
 0x402   : > { %v1901_v59 = vmul.f32 %v1885_v60, %v12649_v63  ;;  %v3518_v12 = vsel %vm3517_vm12, %v8596_v26, %v3514_v29  ;;  %v3545_v21 = vadd.f32 0.112945676, %v3544_v18  ;;  %v4690_v40 = vsub.f32 1.5, %v12396_v53 }
 0x403   : > { %v3523_v4 = vsel %vm12713_vm11, %v3522_v32, %v3518_v12  ;;  %v12734_v42 = vmul.f32 0.5, %v12579_v45  ;;  %v5289_v9 = vadd.f32 0.00028619796, %v5288_v34  ;;  %v3065_v63 = vmul.f32 0.5, %v12537_v49 }
 0x404   : > { %v1921_v46 = vmul.f32 %v12739_v22, %v1901_v59  ;;  %v3524_v26 = vmul.f32 %v3523_v4, %v3499_v6  ;;  %v3546_v13 = vmul.f32 %v3545_v21, %v12679_v1  ;;  %v12745_v10 = vmul.f32 0.5, %v12644_v37 }
 0x405   : > { %v5290_v43 = vmul.f32 %v5289_v9, %v12711_v8  ;;  %v5300_v45 = vadd.f32 0.001143296, %v5299_v25  ;;  %v5246_v16 = vmul.f32 %v12727_v2, %v12727_v2  ;;  %v3459_v30 = vmul.f32 %v3458_v24, %v12597_v47 }
 0x406   : > { %1945 = vadd.xlane.f32.xlu1 %v1921_v46  ;;  %v8257_v14 = vclamps-f32 %v3524_v26, 1.0  ;;  %v3535_v3 = vmul.f32 %v3534_v44, %v12679_v1  ;;  %v3547_v48 = vadd.f32 0.4994258, %v3546_v13  ;;  %v8598_v49 = vpop.eup %8597  ;;  %v3479_v6 = vand.u32 2147483647, %v12717_v39 }
 0x407   : > { %v5291_v20 = vadd.f32 0.0036580483, %v5290_v43  ;;  %v5301_v37 = vmul.f32 %v5300_v45, %v12711_v8  ;;  %v12754_v38 = vmin.f32 %v5246_v16, 16.0  ;;  %v3471_v60 = vmul.f32 %v8598_v49, %v12717_v39 }
 0x408   : > { %v3737_v18 = vadd.f32 1.0, %v8257_v14  ;;  %v3481_v29 = vand.u32 2147483648, %v12717_v39  ;;  %v4747_v32 = vmul.f32 %v12662_v51, %v11760_v28  ;;  %v3548_v47 = vmul.f32 %v3547_v48, %v12679_v1 }
 0x409   : > { %v5292_v34 = vmul.f32 %v5291_v20, %v12711_v8  ;;  %v5302_v24 = vadd.f32 0.014752088, %v5301_v37  ;;  %v5248_v25 = vmul.f32 2.1237322e-06, %v12754_v38  ;;  %v3472_v12 = vsub.f32 1.0, %v3471_v60 }
 0x40a   : > { %v3753_v59 = vmul.f32 %v3737_v18, %v3065_v63  ;;  %v3536_v44 = vadd.f32 0.18741608, %v3535_v3  ;;  %v5259_v21 = vmul.f32 3.8918573e-05, %v12754_v38  ;;  %v12764_v4 = vadd.f32 1.0, %v3548_v47 }
 0x40b   : > { %v5293_v9 = vadd.f32 0.05243302, %v5292_v34  ;;  %v5303_v46 = vmul.f32 %v5302_v24, %v12711_v8  ;;  %v5249_v26 = vadd.f32 0.00028619796, %v5248_v25  ;;  %v3473_v13 = vmul.f32 %v8598_v49, %v3472_v12 }
 0x40c   : > { %v3774_v28 = vmul.f32 %v12429_v56, %v3753_v59  ;;  %vm3476_vm13 = vweird.f32 %v8598_v49  ;;  %v5260_v43 = vadd.f32 0.001143296, %v5259_v21  ;;  %8599 = vrcp.f32 %v12764_v4 }
 0x40d   : > { %v12771_v63 = vadd.f32 %v12386_v61, %v4747_v32  ;;  %v1182_v45 = vmul.f32 %v12489_v41, %v11767_v58  ;;  %v3474_v16 = vadd.f32 %v8598_v49, %v3473_v13  ;;  %v5294_v14 = vmul.f32 %v5293_v9, %v12711_v8  ;;  %vm3477_vm0 = vmor %vm3475_vm14, %vm3476_vm13 }
 0x40e   : > { %3800 = vadd.xlane.f32.xlu0 %v3774_v28  ;;  %v5304_v3 = vadd.f32 0.112945676, %v5303_v46  ;;  %v5250_v48 = vmul.f32 %v5249_v26, %v12754_v38  ;;  %vm3480_vm1 = vcmp.eq.f32.partialorder %v3479_v6, 8.507059e+37  ;;  %v3482_v20 = vor.u32 1.1754944e-38, %v3481_v29 }
 0x40f   : > { %v3537_v39 = vmul.f32 %v3536_v44, %v12679_v1  ;;  %v5261_v37 = vmul.f32 %v5260_v43, %v12754_v38  ;;  %v3478_v18 = vsel %vm3477_vm0, %v8598_v49, %v3474_v16  ;;  %v5295_v61 = vadd.f32 0.18741608, %v5294_v14 }
 0x410   : > { %v5305_v60 = vmul.f32 %v5304_v3, %v12711_v8  ;;  %v5251_v32 = vadd.f32 0.0036580483, %v5250_v48  ;;  %v3483_v58 = vsel %vm3480_vm1, %v3482_v20, %v3478_v18  ;;  %v12781_v34 = vmul.f32 0.70710677, %v12771_v63 }
 0x411   : > { %v5262_v47 = vadd.f32 0.014752088, %v5261_v37  ;;  %v12784_v24 = vadd.f32 %v12511_v50, %v1182_v45  ;;  %v3484_v25 = vmul.f32 %v3483_v58, %v3459_v30  ;;  %v12787_v6 = vmul.f32 0.5, %v12682_v55 }
 0x412   : > { %v5306_v1 = vadd.f32 0.4994258, %v5305_v60  ;;  %v5252_v29 = vmul.f32 %v5251_v32, %v12754_v38  ;;  %v8600_v49 = vpop.eup %8599  ;;  %v3538_v59 = vadd.f32 1.1283791, %v3537_v39  ;;  %v5206_v44 = vmul.f32 %v12781_v34, %v12781_v34 }
 0x413   : > { %v5263_v12 = vmul.f32 %v5262_v47, %v12754_v38  ;;  %v12794_v21 = vmul.f32 0.70710677, %v12784_v24  ;;  %v8256_v9 = vclamps-f32 %v3484_v25, 1.0  ;;  %v3551_v46 = vmul.f32 %v8600_v49, %v12764_v4 }
 0x414   : > { %v3559_v30 = vand.u32 2147483647, %v12764_v4  ;;  %v3561_v55 = vand.u32 2147483648, %v12764_v4  ;;  %v5296_v26 = vmul.f32 %v5295_v61, %v12711_v8  ;;  %v5307_v28 = vmul.f32 %v5306_v1, %v12711_v8 }
 0x415   : > { %v5264_v13 = vadd.f32 0.112945676, %v5263_v12  ;;  %v12801_v43 = vmin.f32 %v5206_v44, 16.0  ;;  %v3736_v45 = vadd.f32 1.0, %v8256_v9  ;;  %v3552_v16 = vsub.f32 1.0, %v3551_v46 }
 0x416   : > { %v5253_v14 = vadd.f32 0.05243302, %v5252_v29  ;;  %v1757_v3 = vmul.f32 %v12794_v21, %v12794_v21  ;;  %vm3556_vm2 = vweird.f32 %v8600_v49  ;;  %v12805_v48 = vadd.f32 1.0, %v5307_v28 }
 0x417   : > { %v5265_v20 = vmul.f32 %v5264_v13, %v12754_v38  ;;  %v5208_v39 = vmul.f32 2.1237322e-06, %v12801_v43  ;;  %v3752_v37 = vmul.f32 %v3736_v45, %v12734_v42  ;;  %v3553_v18 = vmul.f32 %v8600_v49, %v3552_v16 }
 0x418   : > { %v5219_v8 = vmul.f32 3.8918573e-05, %v12801_v43  ;;  %v12811_v61 = vmin.f32 %v1757_v3, 16.0  ;;  %v3539_v60 = vmul.f32 %v3538_v59, %v12657_v0  ;;  %vm3555_vm3 = vweird.f32 %v12764_v4 }
 0x419   : > { %8601 = vrcp.f32 %v12805_v48  ;;  %v12817_v32 = vmul.f32 0.5, %v12707_v36  ;;  %v3773_v58 = vmul.f32 %v12429_v56, %v3752_v37  ;;  %v3554_v47 = vadd.f32 %v8600_v49, %v3553_v18  ;;  %vm3557_vm5 = vmor %vm3555_vm3, %vm3556_vm2 }
 0x41a   : > { %v5254_v25 = vmul.f32 %v5253_v14, %v12754_v38  ;;  %v5266_v42 = vadd.f32 0.4994258, %v5265_v20  ;;  %vm3560_vm6 = vcmp.eq.f32.partialorder %v3559_v30, 8.507059e+37  ;;  %v3562_v1 = vor.u32 1.1754944e-38, %v3561_v55 }
 0x41b   : > { %v5209_v29 = vadd.f32 0.00028619796, %v5208_v39  ;;  %v5220_v12 = vadd.f32 0.001143296, %v5219_v8  ;;  %3798 = vadd.xlane.f32.xlu1 %v3773_v58  ;;  %v3558_v0 = vsel %vm3557_vm5, %v8600_v49, %v3554_v47  ;;  %v5297_v4 = vadd.f32 1.1283791, %v5296_v26 }
 0x41c   : > { %v5267_v59 = vmul.f32 %v5266_v42, %v12754_v38  ;;  %v1759_v36 = vmul.f32 2.1237322e-06, %v12811_v61  ;;  %v3563_v44 = vsel %vm3560_vm6, %v3562_v1, %v3558_v0  ;;  %v1770_v28 = vmul.f32 3.8918573e-05, %v12811_v61 }
 0x41d   : > { %v5210_v9 = vmul.f32 %v5209_v29, %v12801_v43  ;;  %v5221_v46 = vmul.f32 %v5220_v12, %v12801_v43  ;;  %v3564_v13 = vmul.f32 %v3563_v44, %v3539_v60  ;;  %v5255_v45 = vadd.f32 0.18741608, %v5254_v25 }
 0x41e   : > { %v12827_v30 = vadd.f32 1.0, %v5267_v59  ;;  %v1760_v55 = vadd.f32 0.00028619796, %v1759_v36  ;;  %v12832_v49 = vmul.f32 %v11995_v57, %v4690_v40  ;;  %v1771_v3 = vadd.f32 0.001143296, %v1770_v28 }
 0x41f   : > { %v8602_v16 = vpop.eup %8601  ;;  %v5211_v26 = vadd.f32 0.0036580483, %v5210_v9  ;;  %v5222_v14 = vadd.f32 0.014752088, %v5221_v46  ;;  %v8258_v20 = vclamps-f32 %v3564_v13, 1.0  ;;  %v5298_v39 = vmul.f32 %v5297_v4, %v12690_v23 }
 0x420   : > { %v5310_v37 = vmul.f32 %v8602_v16, %v12805_v48  ;;  %vm5314_vm7 = vweird.f32 %v12805_v48  ;;  %v5318_v18 = vand.u32 2147483647, %v12805_v48  ;;  %v5320_v8 = vand.u32 2147483648, %v12805_v48 }
 0x421   : > { %8603 = vrcp.f32 %v12827_v30  ;;  %v1181_v53 = vmul.f32 %v12489_v41, %v11733_v7  ;;  %v3738_v40 = vadd.f32 1.0, %v8258_v20  ;;  %v5212_v58 = vmul.f32 %v5211_v26, %v12801_v43 }
 0x422   : > { %v5311_v60 = vsub.f32 1.0, %v5310_v37  ;;  %v5223_v47 = vmul.f32 %v5222_v14, %v12801_v43  ;;  %vm5315_vm8 = vweird.f32 %v8602_v16  ;;  %v5256_v23 = vmul.f32 %v5255_v45, %v12754_v38 }
 0x423   : > { %v1761_v25 = vmul.f32 %v1760_v55, %v12811_v61  ;;  %v1772_v42 = vmul.f32 %v1771_v3, %v12811_v61  ;;  %v3754_v1 = vmul.f32 %v3738_v40, %v12745_v10  ;;  %v5213_v12 = vadd.f32 0.05243302, %v5212_v58  ;;  %vm5316_vm10 = vmor %vm5314_vm7, %vm5315_vm8 }
 0x424   : > { %v5312_v29 = vmul.f32 %v8602_v16, %v5311_v60  ;;  %v5224_v0 = vadd.f32 0.112945676, %v5223_v47  ;;  %vm12848_vm9 = vcmp.eq.f32.partialorder %v5318_v18, 8.507059e+37  ;;  %v12853_v36 = vadd.f32 %v12511_v50, %v1181_v53 }
 0x425   : > { %v1762_v4 = vadd.f32 0.0036580483, %v1761_v25  ;;  %v1773_v59 = vadd.f32 0.014752088, %v1772_v42  ;;  %v3775_v38 = vmul.f32 %v12429_v56, %v3754_v1  ;;  %v5214_v9 = vmul.f32 %v5213_v12, %v12801_v43 }
 0x426   : > { %v5313_v44 = vadd.f32 %v8602_v16, %v5312_v29  ;;  %v5225_v46 = vmul.f32 %v5224_v0, %v12801_v43  ;;  %v5321_v28 = vor.u32 1.1754944e-38, %v5320_v8  ;;  %v12864_v55 = vmul.f32 0.70710677, %v12853_v36 }
 0x427   : > { %v8604_v10 = vpop.eup %8603  ;;  %v1763_v13 = vmul.f32 %v1762_v4, %v12811_v61  ;;  %v1774_v45 = vmul.f32 %v1773_v59, %v12811_v61  ;;  %3802 = vadd.xlane.f32.xlu2 %v3775_v38  ;;  %v5257_v26 = vadd.f32 1.1283791, %v5256_v23  ;;  %v5215_v3 = vadd.f32 0.18741608, %v5214_v9  ;;  %v16980_v9 = vld [vmem:[#allocation58_spill] sm:$0xff] }
 0x428   : > { %v5317_v56 = vsel %vm5316_vm10, %v8602_v16, %v5313_v44  ;;  %v5270_v14 = vmul.f32 %v8604_v10, %v12827_v30  ;;  %v5226_v37 = vadd.f32 0.4994258, %v5225_v46  ;;  %v5278_v40 = vand.u32 2147483647, %v12827_v30 }
 0x429   : > { %v5322_v20 = vsel %vm12848_vm9, %v5321_v28, %v5317_v56  ;;  %v1764_v48 = vadd.f32 0.05243302, %v1763_v13  ;;  %v1775_v18 = vadd.f32 0.112945676, %v1774_v45  ;;  %v1717_v60 = vmul.f32 %v12864_v55, %v12864_v55 }
 0x42a   : > { %v5323_v8 = vmul.f32 %v5322_v20, %v5298_v39  ;;  %v5271_v53 = vsub.f32 1.0, %v5270_v14  ;;  %v5280_v58 = vand.u32 2147483648, %v12827_v30  ;;  %v5227_v16 = vmul.f32 %v5226_v37, %v12801_v43 }
 0x42b   : > { %v1765_v47 = vmul.f32 %v1764_v48, %v12811_v61  ;;  %v1776_v23 = vmul.f32 %v1775_v18, %v12811_v61  ;;  %vm5275_vm11 = vweird.f32 %v8604_v10  ;;  %v12876_v1 = vmin.f32 %v1717_v60, 16.0 }
 0x42c   : > { %v8277_v25 = vclamps-f32 %v5323_v8, 1.0  ;;  %v5272_v42 = vmul.f32 %v8604_v10, %v5271_v53  ;;  %v5216_v39 = vmul.f32 %v5215_v3, %v12801_v43  ;;  %v12879_v29 = vadd.f32 1.0, %v5227_v16 }
 0x42d   : > { %v1766_v12 = vadd.f32 0.18741608, %v1765_v47  ;;  %v1777_v0 = vadd.f32 0.4994258, %v1776_v23  ;;  %vm5274_vm12 = vweird.f32 %v12827_v30  ;;  %v1719_v59 = vmul.f32 2.1237322e-06, %v12876_v1 }
 0x42e   : > { %v5458_v7 = vadd.f32 1.0, %v8277_v25  ;;  %v5273_v4 = vadd.f32 %v8604_v10, %v5272_v42  ;;  %v5258_v38 = vmul.f32 %v5257_v26, %v12727_v2  ;;  %vm5276_vm13 = vmor %vm5274_vm12, %vm5275_vm11  ;;  %v5281_v44 = vor.u32 1.1754944e-38, %v5280_v58 }
 0x42f   : > { %8605 = vrcp.f32 %v12879_v29  ;;  %v1180_v46 = vmul.f32 %v12489_v41, %v16980_v9  ;;  %vm5279_vm14 = vcmp.eq.f32.partialorder %v5278_v40, 8.507059e+37  ;;  %v1778_v13 = vmul.f32 %v1777_v0, %v12811_v61 }
 0x430   : > { %v5474_v43 = vmul.f32 %v5458_v7, %v12787_v6  ;;  %v5277_v28 = vsel %vm5276_vm13, %v8604_v10, %v5273_v4  ;;  %v5217_v56 = vadd.f32 1.1283791, %v5216_v39  ;;  %v1767_v30 = vmul.f32 %v1766_v12, %v12811_v61 }
 0x431   : > { %v5282_v45 = vsel %vm5279_vm14, %v5281_v44, %v5277_v28  ;;  %v1720_v14 = vadd.f32 0.00028619796, %v1719_v59  ;;  %v5238_v3 = vand.u32 2147483647, %v12879_v29  ;;  %v12892_v20 = vadd.f32 1.0, %v1778_v13 }
 0x432   : > { %v5495_v2 = vmul.f32 %v12615_v27, %v5474_v43  ;;  %v5283_v26 = vmul.f32 %v5282_v45, %v5258_v38  ;;  %v5240_v41 = vand.u32 2147483648, %v12879_v29  ;;  %v1730_v10 = vmul.f32 3.8918573e-05, %v12876_v1 }
 0x433   : > { %v1721_v6 = vmul.f32 %v1720_v14, %v12876_v1  ;;  %v12898_v37 = vadd.f32 %v12511_v50, %v1180_v46  ;;  %v12901_v61 = vmul.f32 0.5, %v12771_v63  ;;  %8607 = vrcp.f32 %v12892_v20 }
 0x434   : > { %5523 = vadd.xlane.f32.xlu0 %v5495_v2  ;;  %v8276_v48 = vclamps-f32 %v5283_v26, 1.0  ;;  %v3031_v18 = vmul.f32 %v12608_v52, %v11826_v54  ;;  %v5218_v53 = vmul.f32 %v5217_v56, %v12781_v34  ;;  %vm5234_vm0 = vweird.f32 %v12879_v29  ;;  %v16985_v2 = vld [vmem:[#allocation60_spill] sm:$0xff] }
 0x435   : > { %v8606_v8 = vpop.eup %8605  ;;  %v1768_v40 = vadd.f32 1.1283791, %v1767_v30  ;;  %v1722_v60 = vadd.f32 0.0036580483, %v1721_v6  ;;  %vm12909_vm1 = vcmp.eq.f32.partialorder %v5238_v3, 8.507059e+37  ;;  %v5241_v47 = vor.u32 1.1754944e-38, %v5240_v41 }
 0x436   : > { %v5457_v58 = vadd.f32 1.0, %v8276_v48  ;;  %v5230_v50 = vmul.f32 %v8606_v8, %v12879_v29  ;;  %v1731_v63 = vadd.f32 0.001143296, %v1730_v10  ;;  %v1789_v23 = vand.u32 2147483647, %v12892_v20 }
 0x437   : > { %v1723_v54 = vmul.f32 %v1722_v60, %v12876_v1  ;;  %v12916_v25 = vmul.f32 0.70710677, %v12898_v37  ;;  %v12921_v12 = vadd.f32 %v12641_v62, %v3031_v18  ;;  %v1769_v0 = vmul.f32 %v1768_v40, %v12794_v21 }
 0x438   : > { %v5473_v34 = vmul.f32 %v5457_v58, %v12817_v32  ;;  %v5231_v42 = vsub.f32 1.0, %v5230_v50  ;;  %v1732_v39 = vmul.f32 %v1731_v63, %v12876_v1  ;;  %vm1785_vm2 = vweird.f32 %v12892_v20 }
 0x439   : > { %v1724_v7 = vadd.f32 0.05243302, %v1723_v54  ;;  %v1677_v4 = vmul.f32 %v12916_v25, %v12916_v25  ;;  %v8608_v59 = vpop.eup %8607  ;;  %vm5235_vm3 = vweird.f32 %v8606_v8  ;;  %v1791_v46 = vand.u32 2147483648, %v12892_v20 }
 0x43a   : > { %v5494_v38 = vmul.f32 %v12615_v27, %v5473_v34  ;;  %v5232_v44 = vmul.f32 %v8606_v8, %v5231_v42  ;;  %v1733_v32 = vadd.f32 0.014752088, %v1732_v39  ;;  %v1781_v9 = vmul.f32 %v8608_v59, %v12892_v20  ;;  %vm5236_vm6 = vmor %vm5234_vm0, %vm5235_vm3 }
 0x43b   : > { %v1725_v43 = vmul.f32 %v1724_v7, %v12876_v1  ;;  %v12931_v28 = vmin.f32 %v1677_v4, 16.0  ;;  %vm12933_vm5 = vcmp.eq.f32.partialorder %v1789_v23, 8.507059e+37  ;;  %v12939_v56 = vmul.f32 0.70710677, %v12921_v12 }
 0x43c   : > { %5521 = vadd.xlane.f32.xlu2 %v5494_v38  ;;  %v5233_v21 = vadd.f32 %v8606_v8, %v5232_v44  ;;  %v1734_v45 = vmul.f32 %v1733_v32, %v12876_v1  ;;  %v1782_v30 = vsub.f32 1.0, %v1781_v9  ;;  %vm1786_vm7 = vweird.f32 %v8608_v59 }
 0x43d   : > { %v1679_v14 = vmul.f32 2.1237322e-06, %v12931_v28  ;;  %v3030_v26 = vmul.f32 %v12608_v52, %v16985_v2  ;;  %v1690_v6 = vmul.f32 3.8918573e-05, %v12931_v28  ;;  %v3607_v10 = vmul.f32 %v12939_v56, %v12939_v56  ;;  %vm1787_vm9 = vmor %vm1785_vm2, %vm1786_vm7 }
 0x43e   : > { %v5237_v3 = vsel %vm5236_vm6, %v8606_v8, %v5233_v21  ;;  %v1735_v41 = vadd.f32 0.112945676, %v1734_v45  ;;  %vm4693_vm8 = vweird.f32 %v11995_v57  ;;  %v1783_v48 = vmul.f32 %v8608_v59, %v1782_v30 }
 0x43f   : > { %v5242_v29 = vsel %vm12909_vm1, %v5241_v47, %v5237_v3  ;;  %v1726_v18 = vadd.f32 0.18741608, %v1725_v43  ;;  %v1680_v40 = vadd.f32 0.00028619796, %v1679_v14  ;;  %v1691_v50 = vadd.f32 0.001143296, %v1690_v6 }
 0x440   : > { %v5243_v60 = vmul.f32 %v5242_v29, %v5218_v53  ;;  %v1736_v58 = vmul.f32 %v1735_v41, %v12876_v1  ;;  %v12953_v63 = vmin.f32 %v3607_v10, 16.0  ;;  %v1784_v8 = vadd.f32 %v8608_v59, %v1783_v48  ;;  %v16986_v48 = vld [vmem:[#allocation69_spill] sm:$0xff] }
 0x441   : > { %v1792_v23 = vor.u32 1.1754944e-38, %v1791_v46  ;;  %v1681_v54 = vmul.f32 %v1680_v40, %v12931_v28  ;;  %v12957_v34 = vadd.f32 %v12641_v62, %v3030_v26  ;;  %v1692_v53 = vmul.f32 %v1691_v50, %v12931_v28 }
 0x442   : > { %v8275_v42 = vclamps-f32 %v5243_v60, 1.0  ;;  %v1737_v16 = vadd.f32 0.4994258, %v1736_v58  ;;  %v3609_v47 = vmul.f32 2.1237322e-06, %v12953_v63  ;;  %v1788_v39 = vsel %vm1787_vm9, %v8608_v59, %v1784_v8 }
 0x443   : > { %v1727_v7 = vmul.f32 %v1726_v18, %v12876_v1  ;;  %v1682_v4 = vadd.f32 0.0036580483, %v1681_v54  ;;  %v3620_v38 = vmul.f32 3.8918573e-05, %v12953_v63  ;;  %v1793_v32 = vsel %vm12933_vm5, %v1792_v23, %v1788_v39 }
 0x444   : > { %v5456_v44 = vadd.f32 1.0, %v8275_v42  ;;  %v1738_v9 = vmul.f32 %v1737_v16, %v12876_v1  ;;  %v1693_v46 = vadd.f32 0.014752088, %v1692_v53  ;;  %v1794_v20 = vmul.f32 %v1793_v32, %v1769_v0  ;;  %v16990_v53 = vld [vmem:[#allocation51_spill] sm:$0xff] }
 0x445   : > { %v1683_v43 = vmul.f32 %v1682_v4, %v12931_v28  ;;  %v3610_v21 = vadd.f32 0.00028619796, %v3609_v47  ;;  %v3621_v45 = vadd.f32 0.001143296, %v3620_v38  ;;  %v12975_v2 = vmul.f32 0.70710677, %v12957_v34 }
 0x446   : > { %v5472_v30 = vmul.f32 %v5456_v44, %v12901_v61  ;;  %v12971_v59 = vadd.f32 1.0, %v1738_v9  ;;  %v1694_v14 = vmul.f32 %v1693_v46, %v12931_v28  ;;  %v8244_v26 = vclamps-f32 %v1794_v20, 1.0 }
 0x447   : > { %v1684_v13 = vadd.f32 0.05243302, %v1683_v43  ;;  %v3611_v3 = vmul.f32 %v3610_v21, %v12953_v63  ;;  %v3622_v1 = vmul.f32 %v3621_v45, %v12953_v63  ;;  %v1143_v0 = vsub.f32 1.5, %v12383_v5 }
 0x448   : > { %vm4692_vm10 = vweird.f32 %v11956_v11  ;;  %v5493_v41 = vmul.f32 %v12615_v27, %v5472_v30  ;;  %8609 = vrcp.f32 %v12971_v59  ;;  %v1218_v61 = vmul.f32 0.5, %v12784_v24 }
 0x449   : > { %v1890_v6 = vadd.f32 1.0, %v8244_v26  ;;  %v1685_v10 = vmul.f32 %v1684_v13, %v12931_v28  ;;  %v1695_v29 = vadd.f32 0.112945676, %v1694_v14  ;;  %v16987_v18 = vsel %vm12004_vm15, %v11864_v33, %v11978_v15  ;;  %vm12993_vm11 = vmor %vm4692_vm10, %vm4693_vm8 }
 0x44a   : > { %v3011_v40 = vmul.f32 %v16987_v18, %v16986_v48  ;;  %5519 = vadd.xlane.f32.xlu1 %v5493_v41  ;;  %v3612_v5 = vadd.f32 0.0036580483, %v3611_v3  ;;  %v3623_v27 = vadd.f32 0.014752088, %v3622_v1  ;;  %v3567_v24 = vmul.f32 %v12975_v2, %v12975_v2 }
 0x44b   : > { %v4695_v35 = vsel %vm12993_vm11, %v11995_v57, %v12832_v49  ;;  %v1906_v60 = vmul.f32 %v1890_v6, %v1218_v61  ;;  %v1728_v33 = vadd.f32 1.1283791, %v1727_v7  ;;  %v1696_v15 = vmul.f32 %v1695_v29, %v12931_v28 }
 0x44c   : > { %v1686_v58 = vadd.f32 0.18741608, %v1685_v10  ;;  %v3613_v50 = vmul.f32 %v3612_v5, %v12953_v63  ;;  %v3624_v8 = vmul.f32 %v3623_v27, %v12953_v63  ;;  %v13006_v23 = vmin.f32 %v3567_v24, 16.0 }
 0x44d   : > { %v13009_v54 = vmul.f32 %v11990_v19, %v1143_v0  ;;  %v1926_v42 = vmul.f32 %v12739_v22, %v1906_v60  ;;  %v13013_v16 = vmul.f32 0.5, %v12853_v36  ;;  %v1697_v57 = vadd.f32 0.4994258, %v1696_v15 }
 0x44e   : > { %v8610_v49 = vpop.eup %8609  ;;  %v13016_v47 = vmul.f32 %v4695_v35, %v16990_v53  ;;  %v3614_v39 = vadd.f32 0.05243302, %v3613_v50  ;;  %v3625_v7 = vadd.f32 0.112945676, %v3624_v8  ;;  %v3569_v4 = vmul.f32 2.1237322e-06, %v13006_v23 }
 0x44f   : > { %1955 = vadd.xlane.f32.xlu0 %v1926_v42  ;;  %v1729_v38 = vmul.f32 %v1728_v33, %v12864_v55  ;;  %v1741_v44 = vmul.f32 %v8610_v49, %v12971_v59  ;;  %v1698_v32 = vmul.f32 %v1697_v57, %v12931_v28  ;;  %v3032_v9 = vmul.f32 %v12608_v52, %v3011_v40  ;;  %v13053_v33 = vld [vmem:[#allocation10 + $0x2] ss:$0 sm:$0xff] }
 0x450   : > { %v1687_v36 = vmul.f32 %v1686_v58, %v12931_v28  ;;  %v3615_v46 = vmul.f32 %v3614_v39, %v12953_v63  ;;  %v3626_v20 = vmul.f32 %v3625_v7, %v12953_v63  ;;  %v3570_v43 = vadd.f32 0.00028619796, %v3569_v4 }
 0x451   : > { %v1742_v21 = vsub.f32 1.0, %v1741_v44  ;;  %v1749_v45 = vand.u32 2147483647, %v12971_v59  ;;  %v13027_v30 = vadd.f32 1.0, %v1698_v32  ;;  %v3580_v55 = vmul.f32 3.8918573e-05, %v13006_v23 }
 0x452   : > { %v1751_v14 = vand.u32 2147483648, %v12971_v59  ;;  %v3616_v26 = vadd.f32 0.18741608, %v3615_v46  ;;  %v3627_v13 = vadd.f32 0.4994258, %v3626_v20  ;;  %v3571_v52 = vmul.f32 %v3570_v43, %v13006_v23 }
 0x453   : > { %v1743_v3 = vmul.f32 %v8610_v49, %v1742_v21  ;;  %vm1746_vm15 = vweird.f32 %v8610_v49  ;;  %8611 = vrcp.f32 %v13027_v30  ;;  %v13034_v28 = vadd.f32 %v12641_v62, %v3032_v9 }
 0x454   : > { %vm1745_vm12 = vweird.f32 %v12971_v59  ;;  %v1688_v1 = vadd.f32 1.1283791, %v1687_v36  ;;  %v3617_v0 = vmul.f32 %v3616_v26, %v12953_v63  ;;  %v3628_v41 = vmul.f32 %v3627_v13, %v12953_v63 }
 0x455   : > { %v1744_v61 = vadd.f32 %v8610_v49, %v1743_v3  ;;  %v3572_v6 = vadd.f32 0.0036580483, %v3571_v52  ;;  %v3581_v10 = vadd.f32 0.001143296, %v3580_v55  ;;  %v4751_v29 = vmul.f32 %v12662_v51, %v11998_v31  ;;  %vm1747_vm13 = vmor %vm1745_vm12, %vm1746_vm15 }
 0x456   : > { %vm1750_vm14 = vcmp.eq.f32.partialorder %v1749_v45, 8.507059e+37  ;;  %v1752_v48 = vor.u32 1.1754944e-38, %v1751_v14  ;;  %v1709_v18 = vand.u32 2147483647, %v13027_v30  ;;  %v13042_v62 = vadd.f32 1.0, %v3628_v41 }
 0x457   : > { %v1748_v40 = vsel %vm1747_vm13, %v8610_v49, %v1744_v61  ;;  %v1711_v59 = vand.u32 2147483648, %v13027_v30  ;;  %v3582_v11 = vmul.f32 %v3581_v10, %v13006_v23  ;;  %v13047_v63 = vmul.f32 0.70710677, %v13034_v28 }
 0x458   : > { %v1753_v5 = vsel %vm1750_vm14, %v1752_v48, %v1748_v40  ;;  %v1689_v27 = vmul.f32 %v1688_v1, %v12916_v25  ;;  %v3618_v24 = vadd.f32 1.1283791, %v3617_v0  ;;  %8613 = vrcp.f32 %v13042_v62 }
 0x459   : > { %v8612_v31 = vpop.eup %8611  ;;  %v1754_v35 = vmul.f32 %v1753_v5, %v1729_v38  ;;  %vm1705_vm0 = vweird.f32 %v13027_v30  ;;  %v3573_v60 = vmul.f32 %v3572_v6, %v13006_v23  ;;  %v13056_v15 = vadd.f32 %v13053_v33, %v4751_v29 }
 0x45a   : > { %v1701_v58 = vmul.f32 %v8612_v31, %v13027_v30  ;;  %vm13059_vm1 = vcmp.eq.f32.partialorder %v1709_v18, 8.507059e+37  ;;  %v3583_v25 = vadd.f32 0.014752088, %v3582_v11  ;;  %v3647_v8 = vmul.f32 %v13047_v63, %v13047_v63 }
 0x45b   : > { %v8243_v42 = vclamps-f32 %v1754_v35, 1.0  ;;  %v1712_v57 = vor.u32 1.1754944e-38, %v1711_v59  ;;  %v3639_v49 = vand.u32 2147483647, %v13042_v62  ;;  %v3641_v53 = vand.u32 2147483648, %v13042_v62 }
 0x45c   : > { %v1702_v39 = vsub.f32 1.0, %v1701_v58  ;;  %v3619_v7 = vmul.f32 %v3618_v24, %v12939_v56  ;;  %v3584_v4 = vmul.f32 %v3583_v25, %v13006_v23  ;;  %v13069_v38 = vmin.f32 %v3647_v8, 16.0 }
 0x45d   : > { %vm1146_vm2 = vweird.f32 %v11990_v19  ;;  %v1889_v44 = vadd.f32 1.0, %v8243_v42  ;;  %vm1706_vm3 = vweird.f32 %v8612_v31  ;;  %vm3635_vm5 = vweird.f32 %v13042_v62 }
 0x45e   : > { %v3574_v32 = vadd.f32 0.05243302, %v3573_v60  ;;  %v13074_v9 = vmul.f32 0.70710677, %v13056_v15  ;;  %v8614_v36 = vpop.eup %8613  ;;  %v1703_v46 = vmul.f32 %v8612_v31, %v1702_v39  ;;  %v3585_v20 = vadd.f32 0.112945676, %v3584_v4  ;;  %vm1707_vm8 = vmor %vm1705_vm0, %vm1706_vm3 }
 0x45f   : > { %v3649_v43 = vmul.f32 2.1237322e-06, %v13069_v38  ;;  %v3660_v56 = vmul.f32 3.8918573e-05, %v13069_v38  ;;  %vm1145_vm6 = vweird.f32 %v11949_v17  ;;  %v1905_v21 = vmul.f32 %v1889_v44, %v13013_v16  ;;  %v16997_v44 = vld [vmem:[#allocation68_spill] sm:$0xff] }
 0x460   : > { %v3631_v45 = vmul.f32 %v8614_v36, %v13042_v62  ;;  %vm13081_vm7 = vcmp.eq.f32.partialorder %v3639_v49, 8.507059e+37  ;;  %v3642_v14 = vor.u32 1.1754944e-38, %v3641_v53  ;;  %v1704_v26 = vadd.f32 %v8612_v31, %v1703_v46  ;;  %vm13114_vm11 = vmor %vm1145_vm6, %vm1146_vm2  ;;  %v8914_v53 = vld [vmem:[#allocation8] ss:$0 sm:$0xff] }
 0x461   : > { %v3586_v13 = vmul.f32 %v3585_v20, %v13006_v23  ;;  %v3650_v52 = vadd.f32 0.00028619796, %v3649_v43  ;;  %v3661_v3 = vadd.f32 0.001143296, %v3660_v56  ;;  %v1925_v1 = vmul.f32 %v12739_v22, %v1905_v21 }
 0x462   : > { %v3632_v0 = vsub.f32 1.0, %v3631_v45  ;;  %v3575_v16 = vmul.f32 %v3574_v32, %v13006_v23  ;;  %v5366_v41 = vmul.f32 %v13074_v9, %v13074_v9  ;;  %v1708_v61 = vsel %vm1707_vm8, %v8612_v31, %v1704_v26 }
 0x463   : > { %v3587_v6 = vadd.f32 0.4994258, %v3586_v13  ;;  %v3651_v10 = vmul.f32 %v3650_v52, %v13069_v38  ;;  %v3662_v29 = vmul.f32 %v3661_v3, %v13069_v38  ;;  %1953 = vadd.xlane.f32.xlu2 %v1925_v1  ;;  %v1713_v48 = vsel %vm13059_vm1, %v1712_v57, %v1708_v61 }
 0x464   : > { %v3633_v18 = vmul.f32 %v8614_v36, %v3632_v0  ;;  %vm3636_vm9 = vweird.f32 %v8614_v36  ;;  %v13097_v30 = vmin.f32 %v5366_v41, 16.0  ;;  %v1714_v40 = vmul.f32 %v1713_v48, %v1689_v27  ;;  %v17003_v0 = vld [vmem:[#allocation65_spill] sm:$0xff] }
 0x465   : > { %v3588_v59 = vmul.f32 %v3587_v6, %v13006_v23  ;;  %v3652_v11 = vadd.f32 0.0036580483, %v3651_v10  ;;  %v3663_v5 = vadd.f32 0.014752088, %v3662_v29  ;;  %v3576_v31 = vadd.f32 0.18741608, %v3575_v16  ;;  %vm3637_vm10 = vmor %vm3635_vm5, %vm3636_vm9 }
 0x466   : > { %v3634_v24 = vadd.f32 %v8614_v36, %v3633_v18  ;;  %v5368_v35 = vmul.f32 2.1237322e-06, %v13097_v30  ;;  %v5379_v60 = vmul.f32 3.8918573e-05, %v13097_v30  ;;  %v8242_v58 = vclamps-f32 %v1714_v40, 1.0  ;;  %v17004_v16 = vld [vmem:[#allocation72_spill] sm:$0xff] }
 0x467   : > { %v13104_v50 = vadd.f32 1.0, %v3588_v59  ;;  %v3653_v25 = vmul.f32 %v3652_v11, %v13069_v38  ;;  %v3664_v27 = vmul.f32 %v3663_v5, %v13069_v38  ;;  %v4750_v49 = vmul.f32 %v12662_v51, %v13016_v47  ;;  %v16999_v51 = vld [vmem:[#allocation63_spill] sm:$0xff]  ;;  %v17000_v47 = vld [vmem:[#allocation32_spill] sm:$0xff]  ;;  %v17005_v40 = vld [vmem:[#allocation81_spill] sm:$0xff] }
 0x468   : > { %v3638_v8 = vsel %vm3637_vm10, %v8614_v36, %v3634_v24  ;;  %v5369_v42 = vadd.f32 0.00028619796, %v5368_v35  ;;  %v5380_v57 = vadd.f32 0.001143296, %v5379_v60  ;;  %v1216_v62 = vmul.f32 0.5, %v12898_v37  ;;  %v13134_v37 = vpop.xlane.xlu2 %6133 }
 0x469   : > { %v1888_v39 = vadd.f32 1.0, %v8242_v58  ;;  %v3643_v4 = vsel %vm13081_vm7, %v3642_v14, %v3638_v8  ;;  %8615 = vrcp.f32 %v13104_v50  ;;  %v17001_v36 = vsel %vm11905_vm4, %v16999_v51, %v17000_v47  ;;  %v17002_v14 = vld [vmem:[#allocation66_spill] sm:$0xff]  ;;  %v13164_v58 = vld [vmem:[%s16493_s6 + $0x1] ss:$0 sm:$0xff]  ;;  %v17007_v47 = vld [vmem:[#allocation41_spill] sm:$0xff] }
 0x46a   : > { %v13128_v46 = vmul.f32 %v17001_v36, %v16997_v44  ;;  %v1148_v17 = vsel %vm13114_vm11, %v11990_v19, %v13009_v54  ;;  %v3644_v20 = vmul.f32 %v3643_v4, %v3619_v7  ;;  %v3654_v43 = vadd.f32 0.05243302, %v3653_v25 }
 0x46b   : > { %v1904_v56 = vmul.f32 %v1888_v39, %v1216_v62  ;;  %v3665_v21 = vadd.f32 0.112945676, %v3664_v27  ;;  %v5370_v45 = vmul.f32 %v5369_v42, %v13097_v30  ;;  %v5381_v55 = vmul.f32 %v5380_v57, %v13097_v30  ;;  %v17006_v39 = vld [vmem:[#allocation53_spill] sm:$0xff] }
 0x46c   : > { %v4710_v26 = vsub.f32 1.5, %v17002_v14  ;;  %v8260_v13 = vclamps-f32 %v3644_v20, 1.0  ;;  %v3577_v52 = vmul.f32 %v3576_v31, %v13006_v23  ;;  %v13141_v3 = vadd.f32 %v13053_v33, %v4750_v49 }
 0x46d   : > { %v1924_v19 = vmul.f32 %v12739_v22, %v1904_v56  ;;  %v3666_v54 = vmul.f32 %v3665_v21, %v13069_v38  ;;  %v5371_v7 = vadd.f32 0.0036580483, %v5370_v45  ;;  %v5382_v1 = vadd.f32 0.014752088, %v5381_v55  ;;  %v8915_v55 = vld [vmem:[#allocation10] ss:$0 sm:$0xff] }
 0x46e   : > { %vm4713_vm4 = vweird.f32 %v17003_v0  ;;  %v1164_v41 = vmul.f32 %v1148_v17, %v17004_v16  ;;  %v3068_v61 = vmul.f32 0.5, %v12921_v12  ;;  %v3740_v6 = vadd.f32 1.0, %v8260_v13 }
 0x46f   : > { %v8616_v10 = vpop.eup %8615  ;;  %1951 = vadd.xlane.f32.xlu1 %v1924_v19  ;;  %v3655_v23 = vmul.f32 %v3654_v43, %v13069_v38  ;;  %v3667_v29 = vadd.f32 0.4994258, %v3666_v54  ;;  %v5372_v48 = vmul.f32 %v5371_v7, %v13097_v30  ;;  %v5383_v22 = vmul.f32 %v5382_v1, %v13097_v30 }
 0x470   : > { %v13152_v18 = vmul.f32 %v17003_v0, %v4710_v26  ;;  %vm4712_vm15 = vweird.f32 %v17005_v40  ;;  %v3756_v59 = vmul.f32 %v3740_v6, %v3068_v61  ;;  %v3591_v11 = vmul.f32 %v8616_v10, %v13104_v50  ;;  %v1930_v60 = vpop.xlane.xlu2 %1929 }
 0x471   : > { %v13157_v12 = vmul.f32 0.70710677, %v13141_v3  ;;  %v3578_v5 = vadd.f32 1.1283791, %v3577_v52  ;;  %v3599_v24 = vand.u32 2147483647, %v13104_v50  ;;  %v3668_v31 = vmul.f32 %v3667_v29, %v13069_v38  ;;  %vm13192_vm1 = vmor %vm4712_vm15, %vm4713_vm4 }
 0x472   : > { %v5373_v35 = vadd.f32 0.05243302, %v5372_v48  ;;  %v3777_v25 = vmul.f32 %v13164_v58, %v3756_v59  ;;  %v3592_v27 = vsub.f32 1.0, %v3591_v11  ;;  %v3601_v8 = vand.u32 2147483648, %v13104_v50 }
 0x473   : > { %v5384_v42 = vadd.f32 0.112945676, %v5383_v22  ;;  %v3656_v57 = vadd.f32 0.18741608, %v3655_v23  ;;  %v13168_v49 = vadd.f32 1.0, %v3668_v31  ;;  %v1184_v62 = vmul.f32 %v8914_v53, %v1164_v41  ;;  %v17010_v23 = vld [vmem:[#allocation26_spill] sm:$0xff] }
 0x474   : > { %v1183_v4 = vmul.f32 %v8914_v53, %v17006_v39  ;;  %3806 = vadd.xlane.f32.xlu0 %v3777_v25  ;;  %v3593_v44 = vmul.f32 %v8616_v10, %v3592_v27  ;;  %vm3596_vm12 = vweird.f32 %v8616_v10  ;;  %v5326_v51 = vmul.f32 %v13157_v12, %v13157_v12 }
 0x475   : > { %v5385_v32 = vmul.f32 %v5384_v42, %v13097_v30  ;;  %v1968_v36 = vadd.f32 %v17007_v47, %v1930_v60  ;;  %v3579_v17 = vmul.f32 %v3578_v5, %v12975_v2  ;;  %8617 = vrcp.f32 %v13168_v49 }
 0x476   : > { %v5374_v20 = vmul.f32 %v5373_v35, %v13097_v30  ;;  %v3594_v43 = vadd.f32 %v8616_v10, %v3593_v44  ;;  %vm3595_vm13 = vweird.f32 %v13104_v50  ;;  %v13179_v21 = vmin.f32 %v5326_v51, 16.0 }
 0x477   : > { %v5386_v56 = vadd.f32 0.4994258, %v5385_v32  ;;  %vm3597_vm14 = vmor %vm3595_vm13, %vm3596_vm12  ;;  %vm3600_vm0 = vcmp.eq.f32.partialorder %v3599_v24, 8.507059e+37  ;;  %v3602_v45 = vor.u32 1.1754944e-38, %v3601_v8  ;;  %v13181_v14 = vadd.f32 %v8915_v55, %v1184_v62 }
 0x478   : > { %v13183_v26 = vadd.f32 %v8915_v55, %v1183_v4  ;;  %v3598_v13 = vsel %vm3597_vm14, %v8616_v10, %v3594_v43  ;;  %v3657_v2 = vmul.f32 %v3656_v57, %v13069_v38  ;;  %v5328_v19 = vmul.f32 2.1237322e-06, %v13179_v21 }
 0x479   : > { %v5387_v52 = vmul.f32 %v5386_v56, %v13097_v30  ;;  %v3603_v54 = vsel %vm3600_vm0, %v3602_v45, %v3598_v13  ;;  %v5375_v7 = vadd.f32 0.18741608, %v5374_v20  ;;  %v5339_v1 = vmul.f32 3.8918573e-05, %v13179_v21 }
 0x47a   : > { %v13198_v16 = vmul.f32 0.70710677, %v13181_v14  ;;  %v4715_v38 = vsel %vm13192_vm1, %v17003_v0, %v13152_v18  ;;  %v3604_v41 = vmul.f32 %v3603_v54, %v3579_v17  ;;  %v5329_v6 = vadd.f32 0.00028619796, %v5328_v19 }
 0x47b   : > { %v13204_v61 = vadd.f32 1.0, %v5387_v52  ;;  %v8618_v10 = vpop.eup %8617  ;;  %v13207_v29 = vadd.f32 %v17010_v23, %v1968_v36  ;;  %v5340_v48 = vadd.f32 0.001143296, %v5339_v1  ;;  %v13212_v40 = vmul.f32 0.70710677, %v13183_v26 }
 0x47c   : > { %v1837_v22 = vmul.f32 %v13198_v16, %v13198_v16  ;;  %v3067_v59 = vmul.f32 0.5, %v12957_v34  ;;  %v8259_v11 = vclamps-f32 %v3604_v41, 1.0  ;;  %v13216_v5 = vmul.f32 0.5, %v13034_v28 }
 0x47d   : > { %17011 = vst [vmem:[#allocation80_spill] sm:$0xff] %v13207_v29  ;;  %v3671_v24 = vmul.f32 %v8618_v10, %v13168_v49  ;;  %v3658_v31 = vadd.f32 1.1283791, %v3657_v2  ;;  %v3679_v35 = vand.u32 2147483647, %v13168_v49  ;;  %v5376_v60 = vmul.f32 %v5375_v7, %v13097_v30 }
 0x47e   : > { %8619 = vrcp.f32 %v13204_v61  ;;  %v3739_v25 = vadd.f32 1.0, %v8259_v11  ;;  %v5330_v8 = vmul.f32 %v5329_v6, %v13179_v21  ;;  %v5341_v42 = vmul.f32 %v5340_v48, %v13179_v21 }
 0x47f   : > { %v3672_v27 = vsub.f32 1.0, %v3671_v24  ;;  %vm3676_vm2 = vweird.f32 %v8618_v10  ;;  %v3681_v34 = vand.u32 2147483648, %v13168_v49  ;;  %v13225_v28 = vmin.f32 %v1837_v22, 16.0 }
 0x480   : > { %v1797_v57 = vmul.f32 %v13212_v40, %v13212_v40  ;;  %v3755_v53 = vmul.f32 %v3739_v25, %v3067_v59  ;;  %v5331_v39 = vadd.f32 0.0036580483, %v5330_v8  ;;  %v5342_v30 = vadd.f32 0.014752088, %v5341_v42 }
 0x481   : > { %v3673_v62 = vmul.f32 %v8618_v10, %v3672_v27  ;;  %v3659_v4 = vmul.f32 %v3658_v31, %v13047_v63  ;;  %vm3675_vm3 = vweird.f32 %v13168_v49  ;;  %v1839_v44 = vmul.f32 2.1237322e-06, %v13225_v28 }
 0x482   : > { %v1850_v32 = vmul.f32 3.8918573e-05, %v13225_v28  ;;  %v3776_v51 = vmul.f32 %v13164_v58, %v3755_v53  ;;  %v5377_v17 = vadd.f32 1.1283791, %v5376_v60  ;;  %v5343_v20 = vmul.f32 %v5342_v30, %v13179_v21  ;;  %vm3677_vm5 = vmor %vm3675_vm3, %vm3676_vm2 }
 0x483   : > { %v3674_v36 = vadd.f32 %v8618_v10, %v3673_v62  ;;  %v3682_v56 = vor.u32 1.1754944e-38, %v3681_v34  ;;  %v5332_v45 = vmul.f32 %v5331_v39, %v13179_v21  ;;  %v1840_v55 = vadd.f32 0.00028619796, %v1839_v44  ;;  %v8916_v62 = vld [vmem:[#allocation8 + $0x1] ss:$0 sm:$0xff] }
 0x484   : > { %v8620_v43 = vpop.eup %8619  ;;  %v1851_v63 = vadd.f32 0.001143296, %v1850_v32  ;;  %3804 = vadd.xlane.f32.xlu1 %v3776_v51  ;;  %vm3680_vm6 = vcmp.eq.f32.partialorder %v3679_v35, 8.507059e+37  ;;  %v13238_v2 = vmin.f32 %v1797_v57, 16.0  ;;  %v5344_v19 = vadd.f32 0.112945676, %v5343_v20  ;;  %v13258_v20 = vpop.xlane.xlu0 %6135 }
 0x485   : > { %v3678_v49 = vsel %vm3677_vm5, %v8618_v10, %v3674_v36  ;;  %v5390_v13 = vmul.f32 %v8620_v43, %v13204_v61  ;;  %v1841_v54 = vmul.f32 %v1840_v55, %v13225_v28  ;;  %v5378_v41 = vmul.f32 %v5377_v17, %v13074_v9  ;;  %v17012_v55 = vld [vmem:[#allocation71_spill] sm:$0xff] }
 0x486   : > { %v3683_v52 = vsel %vm3680_vm6, %v3682_v56, %v3678_v49  ;;  %v1852_v7 = vmul.f32 %v1851_v63, %v13225_v28  ;;  %v5398_v48 = vand.u32 2147483647, %v13204_v61  ;;  %v5400_v22 = vand.u32 2147483648, %v13204_v61 }
 0x487   : > { %v3684_v1 = vmul.f32 %v3683_v52, %v3659_v4  ;;  %v5391_v6 = vsub.f32 1.0, %v5390_v13  ;;  %v5333_v10 = vadd.f32 0.05243302, %v5332_v45  ;;  %v5345_v59 = vmul.f32 %v5344_v19, %v13179_v21 }
 0x488   : > { %v1853_v11 = vadd.f32 0.014752088, %v1852_v7  ;;  %vm5395_vm7 = vweird.f32 %v8620_v43  ;;  %v1799_v35 = vmul.f32 2.1237322e-06, %v13238_v2  ;;  %2138 = vperm.xlu0 %8415, %v13207_v29   ;;  %v1842_v25 = vadd.f32 0.0036580483, %v1841_v54 }
 0x489   : > { %v8261_v24 = vclamps-f32 %v3684_v1, 1.0  ;;  %v5392_v31 = vmul.f32 %v8620_v43, %v5391_v6  ;;  %v5346_v60 = vadd.f32 0.4994258, %v5345_v59  ;;  %v1810_v27 = vmul.f32 3.8918573e-05, %v13238_v2  ;;  %v13277_v6 = vpop.permute.xlu1 %5536 }
 0x48a   : > { %v1854_v9 = vmul.f32 %v1853_v11, %v13225_v28  ;;  %vm5394_vm8 = vweird.f32 %v13204_v61  ;;  %vm5399_vm9 = vcmp.eq.f32.partialorder %v5398_v48, 8.507059e+37  ;;  %v5401_v34 = vor.u32 1.1754944e-38, %v5400_v22  ;;  %v8918_v1 = vld [vmem:[#allocation8 + $0x2] ss:$0 sm:$0xff] }
 0x48b   : > { %v3741_v8 = vadd.f32 1.0, %v8261_v24  ;;  %v5393_v42 = vadd.f32 %v8620_v43, %v5392_v31  ;;  %vm5396_vm10 = vmor %vm5394_vm8, %vm5395_vm7  ;;  %v5334_v57 = vmul.f32 %v5333_v10, %v13179_v21  ;;  %v5347_v53 = vmul.f32 %v5346_v60, %v13179_v21 }
 0x48c   : > { %v3033_v39 = vmul.f32 %v8916_v62, %v13128_v46  ;;  %v1855_v44 = vadd.f32 0.112945676, %v1854_v9  ;;  %v1800_v32 = vadd.f32 0.00028619796, %v1799_v35  ;;  %v1843_v61 = vmul.f32 %v1842_v25, %v13225_v28  ;;  %v13288_v60 = vpop.xlane.xlu0 %5499 }
 0x48d   : > { %v3757_v30 = vmul.f32 %v3741_v8, %v13216_v5  ;;  %v5397_v4 = vsel %vm5396_vm10, %v8620_v43, %v5393_v42  ;;  %v13255_v36 = vadd.f32 1.0, %v5347_v53  ;;  %v1811_v17 = vadd.f32 0.001143296, %v1810_v27  ;;  %v8917_v5 = vld [vmem:[#allocation10 + $0x1] ss:$0 sm:$0xff] }
 0x48e   : > { %v5402_v51 = vsel %vm5399_vm9, %v5401_v34, %v5397_v4  ;;  %v4731_v46 = vmul.f32 %v4715_v38, %v17012_v55  ;;  %v13268_v43 = vadd.f32 %v8917_v5, %v3033_v39  ;;  %v5335_v49 = vadd.f32 0.18741608, %v5334_v57 }
 0x48f   : > { %v3778_v56 = vmul.f32 %v13164_v58, %v3757_v30  ;;  %v5403_v45 = vmul.f32 %v5402_v51, %v5378_v41  ;;  %8621 = vrcp.f32 %v13255_v36  ;;  %v1856_v13 = vmul.f32 %v1855_v44, %v13225_v28 }
 0x490   : > { %v1801_v52 = vmul.f32 %v1800_v32, %v13238_v2  ;;  %v1844_v19 = vadd.f32 0.05243302, %v1843_v61  ;;  %v1812_v54 = vmul.f32 %v1811_v17, %v13238_v2  ;;  %v4788_v50 = vmul.f32 0.5, %v13056_v15 }
 0x491   : > { %3808 = vadd.xlane.f32.xlu2 %v3778_v56  ;;  %v8279_v63 = vclamps-f32 %v5403_v45, 1.0  ;;  %v1857_v0 = vadd.f32 0.4994258, %v1856_v13  ;;  %v13275_v38 = vmul.f32 0.70710677, %v13268_v43  ;;  %v4752_v41 = vmul.f32 %v8918_v1, %v4731_v46  ;;  %v13315_v5 = vpop.xlane.xlu1 %6131 }
 0x492   : > { %v1813_v18 = vadd.f32 0.014752088, %v1812_v54  ;;  %v5336_v22 = vmul.f32 %v5335_v49, %v13179_v21  ;;  %v1802_v59 = vadd.f32 0.0036580483, %v1801_v52  ;;  %v1845_v24 = vmul.f32 %v1844_v19, %v13225_v28  ;;  %v13293_v21 = vld [vmem:[%s16493_s6 + $0x2] ss:$0 sm:$0xff] }
 0x493   : > { %v5460_v7 = vadd.f32 1.0, %v8279_v63  ;;  %v1858_v10 = vmul.f32 %v1857_v0, %v13225_v28  ;;  %v3687_v31 = vmul.f32 %v13275_v38, %v13275_v38  ;;  %v13286_v35 = vadd.f32 %v13053_v33, %v4752_v41 }
 0x494   : > { %v1814_v15 = vmul.f32 %v1813_v18, %v13238_v2  ;;  %v5337_v34 = vadd.f32 1.1283791, %v5336_v22  ;;  %v5360_v53 = vand.u32 2147483648, %v13255_v36  ;;  %v1846_v62 = vadd.f32 0.18741608, %v1845_v24 }
 0x495   : > { %v5476_v48 = vmul.f32 %v5460_v7, %v4788_v50  ;;  %v8622_v11 = vpop.eup %8621  ;;  %v13297_v27 = vadd.f32 1.0, %v1858_v10  ;;  %v13299_v42 = vmin.f32 %v3687_v31, 16.0  ;;  %v13302_v57 = vmul.f32 0.70710677, %v13286_v35  ;;  %v13319_v7 = vpop.xlane.xlu0 %1931 }
 0x496   : > { %v5350_v9 = vmul.f32 %v8622_v11, %v13255_v36  ;;  %v1815_v8 = vadd.f32 0.112945676, %v1814_v15  ;;  %v1803_v39 = vmul.f32 %v1802_v59, %v13238_v2  ;;  %vm5355_vm11 = vweird.f32 %v8622_v11 }
 0x497   : > { %v5497_v25 = vmul.f32 %v13293_v21, %v5476_v48  ;;  %8623 = vrcp.f32 %v13297_v27  ;;  %v5358_v4 = vand.u32 2147483647, %v13255_v36  ;;  %v3689_v32 = vmul.f32 2.1237322e-06, %v13299_v42 }
 0x498   : > { %v5351_v33 = vsub.f32 1.0, %v5350_v9  ;;  %v1816_v44 = vmul.f32 %v1815_v8, %v13238_v2  ;;  %v3700_v51 = vmul.f32 3.8918573e-05, %v13299_v42  ;;  %vm5354_vm4 = vweird.f32 %v13255_v36 }
 0x499   : > { %5527 = vadd.xlane.f32.xlu2 %v5497_v25  ;;  %v5406_v56 = vmul.f32 %v13302_v57, %v13302_v57  ;;  %vm5356_vm15 = vmor %vm5354_vm4, %vm5355_vm11  ;;  %v5361_v45 = vor.u32 1.1754944e-38, %v5360_v53  ;;  %v1847_v55 = vmul.f32 %v1846_v62, %v13225_v28  ;;  %v1804_v46 = vadd.f32 0.05243302, %v1803_v39 }
 0x49a   : > { %v5352_v30 = vmul.f32 %v8622_v11, %v5351_v33  ;;  %v1817_v17 = vadd.f32 0.4994258, %v1816_v44  ;;  %v5338_v63 = vmul.f32 %v5337_v34, %v13157_v12  ;;  %vm5359_vm12 = vcmp.eq.f32.partialorder %v5358_v4, 8.507059e+37 }
 0x49b   : > { %v3690_v36 = vadd.f32 0.00028619796, %v3689_v32  ;;  %v3701_v54 = vadd.f32 0.001143296, %v3700_v51  ;;  %v13324_v28 = vmin.f32 %v5406_v56, 16.0  ;;  %v4787_v1 = vmul.f32 0.5, %v13141_v3  ;;  %v13339_v51 = vpop.xlane.xlu1 %3780 }
 0x49c   : > { %v5353_v61 = vadd.f32 %v8622_v11, %v5352_v30  ;;  %v1818_v13 = vmul.f32 %v1817_v17, %v13238_v2  ;;  %v1848_v12 = vadd.f32 1.1283791, %v1847_v55  ;;  %v1805_v41 = vmul.f32 %v1804_v46, %v13238_v2 }
 0x49d   : > { %v8624_v52 = vpop.eup %8623  ;;  %v1869_v10 = vand.u32 2147483647, %v13297_v27  ;;  %v1871_v59 = vand.u32 2147483648, %v13297_v27  ;;  %v3702_v24 = vmul.f32 %v3701_v54, %v13299_v42  ;;  %v5408_v3 = vmul.f32 2.1237322e-06, %v13324_v28  ;;  %v13345_v46 = vpop.xlane.xlu0 %3782 }
 0x49e   : > { %v5357_v49 = vsel %vm5356_vm15, %v8622_v11, %v5353_v61  ;;  %v1861_v0 = vmul.f32 %v8624_v52, %v13297_v27  ;;  %v13322_v18 = vadd.f32 1.0, %v1818_v13  ;;  %vm1866_vm13 = vweird.f32 %v8624_v52 }
 0x49f   : > { %v5362_v19 = vsel %vm5359_vm12, %v5361_v45, %v5357_v49  ;;  %v3691_v11 = vmul.f32 %v3690_v36, %v13299_v42  ;;  %v5419_v25 = vmul.f32 3.8918573e-05, %v13324_v28  ;;  %vm1865_vm14 = vweird.f32 %v13297_v27 }
 0x4a0   : > { %v5363_v50 = vmul.f32 %v5362_v19, %v5338_v63  ;;  %v1862_v22 = vsub.f32 1.0, %v1861_v0  ;;  %8625 = vrcp.f32 %v13322_v18  ;;  %v1806_v9 = vadd.f32 0.18741608, %v1805_v41  ;;  %vm1867_vm0 = vmor %vm1865_vm14, %vm1866_vm13 }
 0x4a1   : > { %v3703_v8 = vadd.f32 0.014752088, %v3702_v24  ;;  %v5409_v53 = vadd.f32 0.00028619796, %v5408_v3  ;;  %v5420_v62 = vadd.f32 0.001143296, %v5419_v25  ;;  %v1849_v39 = vmul.f32 %v1848_v12, %v13198_v16 }
 0x4a2   : > { %v8278_v48 = vclamps-f32 %v5363_v50, 1.0  ;;  %v1863_v31 = vmul.f32 %v8624_v52, %v1862_v22  ;;  %v1872_v30 = vor.u32 1.1754944e-38, %v1871_v59  ;;  %v3692_v4 = vadd.f32 0.0036580483, %v3691_v11 }
 0x4a3   : > { %v3704_v44 = vmul.f32 %v3703_v8, %v13299_v42  ;;  %vm1870_vm1 = vcmp.eq.f32.partialorder %v1869_v10, 8.507059e+37  ;;  %v5421_v17 = vmul.f32 %v5420_v62, %v13324_v28  ;;  %v1807_v45 = vmul.f32 %v1806_v9, %v13238_v2  ;;  %v13357_v25 = vpop.xlane.xlu1 %5501 }
 0x4a4   : > { %v5459_v15 = vadd.f32 1.0, %v8278_v48  ;;  %v1864_v33 = vadd.f32 %v8624_v52, %v1863_v31  ;;  %v5410_v49 = vmul.f32 %v5409_v53, %v13324_v28  ;;  %v3693_v36 = vmul.f32 %v3692_v4, %v13299_v42 }
 0x4a5   : > { %v3705_v63 = vadd.f32 0.112945676, %v3704_v44  ;;  %v5422_v13 = vadd.f32 0.014752088, %v5421_v17  ;;  %v1831_v50 = vand.u32 2147483648, %v13322_v18  ;;  %v1220_v48 = vmul.f32 0.5, %v13181_v14  ;;  %v13367_v44 = vpop.xlane.xlu0 %5505 }
 0x4a6   : > { %v5475_v34 = vmul.f32 %v5459_v15, %v4787_v1  ;;  %v8626_v32 = vpop.eup %8625  ;;  %v1868_v27 = vsel %vm1867_vm0, %v8624_v52, %v1864_v33  ;;  %v13349_v52 = vpop.xlane.xlu2 %3784  ;;  %v1808_v1 = vadd.f32 1.1283791, %v1807_v45  ;;  %v1829_v41 = vand.u32 2147483647, %v13322_v18  ;;  %v8920_v33 = vld [vmem:[%s16493_s6] ss:$0 sm:$0xff] }
 0x4a7   : > { %v1873_v56 = vsel %vm1870_vm1, %v1872_v30, %v1868_v27  ;;  %v1821_v16 = vmul.f32 %v8626_v32, %v13322_v18  ;;  %v3706_v2 = vmul.f32 %v3705_v63, %v13299_v42  ;;  %v5423_v0 = vmul.f32 %v5422_v13, %v13324_v28 }
 0x4a8   : > { %v5496_v61 = vmul.f32 %v13293_v21, %v5475_v34  ;;  %v1874_v55 = vmul.f32 %v1873_v56, %v1849_v39  ;;  %vm1826_vm2 = vweird.f32 %v8626_v32  ;;  %v5411_v59 = vadd.f32 0.0036580483, %v5410_v49 }
 0x4a9   : > { %v1822_v19 = vsub.f32 1.0, %v1821_v16  ;;  %v3707_v10 = vadd.f32 0.4994258, %v3706_v2  ;;  %vm1825_vm3 = vweird.f32 %v13322_v18  ;;  %v3694_v24 = vadd.f32 0.05243302, %v3693_v36 }
 0x4aa   : > { %5525 = vadd.xlane.f32.xlu1 %v5496_v61  ;;  %v8246_v54 = vclamps-f32 %v1874_v55, 1.0  ;;  %v5424_v15 = vadd.f32 0.112945676, %v5423_v0  ;;  %vm1827_vm5 = vmor %vm1825_vm3, %vm1826_vm2  ;;  %v1832_v3 = vor.u32 1.1754944e-38, %v1831_v50  ;;  %v1809_v8 = vmul.f32 %v1808_v1, %v13212_v40 }
 0x4ab   : > { %v1823_v12 = vmul.f32 %v8626_v32, %v1822_v19  ;;  %v3708_v9 = vmul.f32 %v3707_v10, %v13299_v42  ;;  %vm1830_vm6 = vcmp.eq.f32.partialorder %v1829_v41, 8.507059e+37  ;;  %v5412_v39 = vmul.f32 %v5411_v59, %v13324_v28  ;;  %v13373_v13 = vpop.xlane.xlu1 %1933 }
 0x4ac   : > { %v1892_v22 = vadd.f32 1.0, %v8246_v54  ;;  %v5425_v14 = vmul.f32 %v5424_v15, %v13324_v28  ;;  %v3695_v4 = vmul.f32 %v3694_v24, %v13299_v42  ;;  %v1219_v17 = vmul.f32 0.5, %v13183_v26 }
 0x4ad   : > { %v1824_v11 = vadd.f32 %v8626_v32, %v1823_v12  ;;  %v3709_v62 = vadd.f32 1.0, %v3708_v9  ;;  %v5413_v27 = vadd.f32 0.05243302, %v5412_v39  ;;  %v13377_v26 = vpop.xlane.xlu0 %1937  ;;  %vm16698_vm13 = vcmask 130112  }
 0x4ae   : > { %v1908_v31 = vmul.f32 %v1892_v22, %v1220_v48  ;;  %v13369_v61 = vpop.xlane.xlu2 %5503  ;;  %v3696_v45 = vadd.f32 0.18741608, %v3695_v4  ;;  %vm2213_vm14 = vcmask 1041409   ;;  %vm2215_vm0 = vcmask 1042434  }
 0x4af   : > { %v1828_v34 = vsel %vm1827_vm5, %v8626_v32, %v1824_v11  ;;  %8627 = vrcp.f32 %v3709_v62  ;;  %v5426_v32 = vadd.f32 0.4994258, %v5425_v14  ;;  %v5414_v19 = vmul.f32 %v5413_v27, %v13324_v28  ;;  %v17013_v14 = vld [vmem:[#allocation45_spill] sm:$0xff] }
 0x4b0   : > { %v1928_v18 = vmul.f32 %v8920_v33, %v1908_v31  ;;  %v1833_v53 = vsel %vm1830_vm6, %v1832_v3, %v1828_v34  ;;  %v3697_v54 = vmul.f32 %v3696_v45, %v13299_v42  ;;  %v3721_v0 = vand.u32 2147483648, %v3709_v62 }
 0x4b1   : > { %v1834_v30 = vmul.f32 %v1833_v53, %v1809_v8  ;;  %v5427_v16 = vmul.f32 %v5426_v32, %v13324_v28  ;;  %v5415_v1 = vadd.f32 0.18741608, %v5414_v19  ;;  %v3719_v48 = vand.u32 2147483647, %v3709_v62 }
 0x4b2   : > { %1959 = vadd.xlane.f32.xlu2 %v1928_v18  ;;  %v3698_v12 = vadd.f32 1.1283791, %v3697_v54  ;;  %vm3715_vm8 = vweird.f32 %v3709_v62  ;;  %v3722_v11 = vor.u32 1.1754944e-38, %v3721_v0  ;;  %vm2217_vm1 = vcmask 1043459  }
 0x4b3   : > { %v8245_v40 = vclamps-f32 %v1834_v30, 1.0  ;;  %v5428_v63 = vadd.f32 1.0, %v5427_v16  ;;  %v5416_v42 = vmul.f32 %v5415_v1, %v13324_v28  ;;  %vm3720_vm10 = vcmp.eq.f32.partialorder %v3719_v48, 8.507059e+37  ;;  %v3787_v9 = vpop.xlane.xlu1 %3786 }
 0x4b4   : > { %v3699_v24 = vmul.f32 %v3698_v12, %v13275_v38  ;;  %v3070_v38 = vmul.f32 0.5, %v13268_v43  ;;  %v17017_v12 = vld [vmem:[#allocation27_spill] sm:$0xff]  ;;  %vm2219_vm2 = vcmask 1044484   ;;  %vm16699_vm3 = vcmask 1045509  }
 0x4b5   : > { %v1891_v56 = vadd.f32 1.0, %v8245_v40  ;;  %v8628_v49 = vpop.eup %8627  ;;  %8629 = vrcp.f32 %v5428_v63  ;;  %v5417_v18 = vadd.f32 1.1283791, %v5416_v42  ;;  %v5440_v53 = vand.u32 2147483648, %v5428_v63  ;;  %v13383_v4 = vpop.xlane.xlu0 %3788 }
 0x4b6   : > { %v3711_v50 = vmul.f32 %v8628_v49, %v3709_v62  ;;  %vm3716_vm7 = vweird.f32 %v8628_v49  ;;  %v1936_v22 = vpop.xlane.xlu2 %1935  ;;  %v5438_v30 = vand.u32 2147483647, %v5428_v63  ;;  %vm5434_vm4 = vweird.f32 %v5428_v63 }
 0x4b7   : > { %v1907_v55 = vmul.f32 %v1891_v56, %v1219_v17  ;;  %vm3717_vm9 = vmor %vm3715_vm8, %vm3716_vm7  ;;  %v5418_v56 = vmul.f32 %v5417_v18, %v13302_v57  ;;  %vm16700_vm5 = vcmask 1046534   ;;  %vm2225_vm6 = vcmask 1047559  }
 0x4b8   : > { %v3712_v2 = vsub.f32 1.0, %v3711_v50  ;;  %vm5439_vm12 = vcmp.eq.f32.partialorder %v5438_v30, 8.507059e+37  ;;  %vm2228_vm7 = vcmask 130048  }
 0x4b9   : > { %v1927_v36 = vmul.f32 %v8920_v33, %v1907_v55  ;;  %v3820_v33 = vadd.f32 %v17013_v14, %v13339_v51  ;;  %v5441_v51 = vor.u32 1.1754944e-38, %v5440_v53 }
 0x4ba   : > { %v3713_v41 = vmul.f32 %v8628_v49, %v3712_v2 }
 0x4bb   : > { %1957 = vadd.xlane.f32.xlu1 %v1927_v36  ;;  %v8630_v59 = vpop.eup %8629  ;;  %v13389_v27 = vadd.f32 %v3820_v33, %v17010_v23  ;;  %v5508_v16 = vpop.xlane.xlu1 %5507  ;;  %v4789_v36 = vmul.f32 0.5, %v13286_v35 }
 0x4bc   : > { %v3714_v10 = vadd.f32 %v8628_v49, %v3713_v41  ;;  %v5430_v31 = vmul.f32 %v8630_v59, %v5428_v63  ;;  %vm5435_vm11 = vweird.f32 %v8630_v59  ;;  %v5539_v63 = vadd.f32 %v13277_v6, %v13288_v60 }
 0x4bd   : > { %17014 = vst [vmem:[#allocation83_spill] sm:$0xff] %v13389_v27  ;;  %vm5436_vm15 = vmor %vm5434_vm4, %vm5435_vm11  ;;  %v13400_v57 = vpop.xlane.xlu0 %5511  ;;  %v1969_v60 = vadd.f32 %v17007_v47, %v13319_v7  ;;  %v5540_v7 = vadd.f32 %v13277_v6, %v13357_v25  ;;  %v5543_v18 = vadd.f32 %v13277_v6, %v5508_v16 }
 0x4be   : > { %v3718_v15 = vsel %vm3717_vm9, %v8628_v49, %v3714_v10  ;;  %v5431_v34 = vsub.f32 1.0, %v5430_v31  ;;  %v13385_v28 = vpop.xlane.xlu2 %3790  ;;  %v13398_v50 = vadd.f32 %v5539_v63, %v17010_v23  ;;  %v1971_v10 = vadd.f32 %v17007_v47, %v1936_v22 }
 0x4bf   : > { %v3723_v3 = vsel %vm3720_vm10, %v3722_v11, %v3718_v15  ;;  %v13409_v35 = vadd.f32 %v17017_v12, %v1969_v60  ;;  %v3821_v11 = vadd.f32 %v17013_v14, %v13345_v46  ;;  %v3823_v15 = vadd.f32 %v17013_v14, %v3787_v9  ;;  %v17036_v60 = vld [vmem:[#allocation38_spill] sm:$0xff] }
 0x4c0   : > { %v3724_v8 = vmul.f32 %v3723_v3, %v3699_v24  ;;  %v5432_v39 = vmul.f32 %v8630_v59, %v5431_v34  ;;  %17015 = vst [vmem:[#allocation37_spill] sm:$0xff] %v13398_v50  ;;  %v13431_v46 = vadd.f32 %v5540_v7, %v17017_v12  ;;  %v1970_v22 = vadd.f32 %v17007_v47, %v13373_v13  ;;  %v17024_v34 = vld [vmem:[#allocation29_spill] sm:$0xff] }
 0x4c1   : > { %17018 = vst [vmem:[#allocation42_spill] sm:$0xff] %v13409_v35  ;;  %v13424_v24 = vadd.f32 %v3821_v11, %v17017_v12  ;;  %v3822_v9 = vadd.f32 %v17013_v14, %v13349_v52  ;;  %v17049_v12 = vld [vmem:[#allocation35_spill] sm:$0xff] }
 0x4c2   : > { %v8262_v62 = vclamps-f32 %v3724_v8, 1.0  ;;  %v5433_v32 = vadd.f32 %v8630_v59, %v5432_v39  ;;  %17022 = vst [vmem:[#allocation46_spill] sm:$0xff] %v13431_v46  ;;  %v13443_v33 = vadd.f32 %v17024_v34, %v1970_v22  ;;  %v17028_v39 = vld [vmem:[#allocation33_spill] sm:$0xff]  ;;  %v17043_v22 = vld [vmem:[#allocation43_spill] sm:$0xff] }
 0x4c3   : > { %v1940_v1 = vpop.xlane.xlu1 %1939  ;;  %17021 = vst [vmem:[#allocation36_spill] sm:$0xff] %v13424_v24  ;;  %v13455_v30 = vadd.f32 %v5543_v18, %v17028_v39  ;;  %v799_v18 = vpop.f32.mrf.mxu3 }
 0x4c4   : > { %v3742_v40 = vadd.f32 1.0, %v8262_v62  ;;  %v5437_v45 = vsel %vm5436_vm15, %v8630_v59, %v5433_v32  ;;  %17025 = vst [vmem:[#allocation67_spill] sm:$0xff] %v13443_v33  ;;  %v13452_v62 = vadd.f32 %v3822_v9, %v17024_v34  ;;  %v1973_v16 = vadd.f32 %v17007_v47, %v1940_v1 }
 0x4c5   : > { %v5442_v55 = vsel %vm5439_vm12, %v5441_v51, %v5437_v45  ;;  %v13412_v41 = vpop.xlane.xlu0 %1943  ;;  %17029 = vst [vmem:[#allocation56_spill] sm:$0xff] %v13455_v30  ;;  %v17031_v51 = vld [vmem:[#allocation30_spill] sm:$0xff] }
 0x4c6   : > { %v3758_v17 = vmul.f32 %v3742_v40, %v3070_v38  ;;  %v5443_v43 = vmul.f32 %v5442_v55, %v5418_v56  ;;  %v13402_v2 = vpop.xlane.xlu2 %5509  ;;  %17027 = vst [vmem:[#allocation84_spill] sm:$0xff] %v13452_v62  ;;  %v3824_v38 = vadd.f32 %v17013_v14, %v13383_v4 }
 0x4c7   : > { %17016 = vst [vmem:[#allocation82_spill] sm:$0xff] %v13402_v2 }
 0x4c8   : > { %v3779_v49 = vmul.f32 %v13164_v58, %v3758_v17  ;;  %v8280_v19 = vclamps-f32 %v5443_v43, 1.0  ;;  %v13463_v32 = vadd.f32 %v3824_v38, %v17028_v39 }
 0x4ca   : > { %3869 = vperm.xlu2 %8419, %v13389_v27   ;;  %3810 = vadd.xlane.f32.xlu1 %v3779_v49  ;;  %v5461_v54 = vadd.f32 1.0, %v8280_v19  ;;  %17030 = vst [vmem:[#allocation79_spill] sm:$0xff] %v13463_v32  ;;  %v17033_v49 = vld [vmem:[#allocation31_spill] sm:$0xff] }
 0x4cb   : > { %v3793_v59 = vpop.xlane.xlu1 %3792  ;;  %v13475_v43 = vadd.f32 %v17033_v49, %v1973_v16 }
 0x4cc   : > { %v5477_v0 = vmul.f32 %v5461_v54, %v4789_v36  ;;  %v3826_v55 = vadd.f32 %v17013_v14, %v3793_v59 }
 0x4cd   : > { %v3795_v31 = vpop.xlane.xlu0 %3794  ;;  %17034 = vst [vmem:[#allocation57_spill] sm:$0xff] %v13475_v43 }
 0x4ce   : > { %v5498_v58 = vmul.f32 %v13293_v21, %v5477_v0  ;;  %v1942_v48 = vpop.xlane.xlu2 %1941  ;;  %v17019_v21 = vld [vmem:[#allocation28_spill] sm:$0xff]  ;;  %v13478_v63 = vadd.f32 %v3826_v55, %v17031_v51  ;;  %v3827_v54 = vadd.f32 %v17013_v14, %v3795_v31 }
 0x4cf   : > { %v13418_v42 = vadd.f32 %v17019_v21, %v1971_v10  ;;  %v13436_v8 = vadd.f32 %v3823_v15, %v17019_v21  ;;  %v1974_v40 = vadd.f32 %v17007_v47, %v1942_v48  ;;  %v17041_v15 = vld [vmem:[#allocation34_spill] sm:$0xff] }
 0x4d0   : > { %5529 = vadd.xlane.f32.xlu0 %v5498_v58  ;;  %17035 = vst [vmem:[#allocation59_spill] sm:$0xff] %v13478_v63  ;;  %v13487_v1 = vadd.f32 %v3827_v54, %v17036_v60  ;;  %v17046_v54 = vld [vmem:[#allocation40_spill] sm:$0xff] }
 0x4d1   : > { %17020 = vst [vmem:[#allocation39_spill] sm:$0xff] %v13418_v42  ;;  %v13466_v17 = vadd.f32 %v17031_v51, %v1974_v40  ;;  %v17045_v40 = vld [vmem:[#allocation25_spill] sm:$0xff] }
 0x4d2   : > { %5588 = vperm.xlu2 %8419, %v13398_v50   ;;  %17023 = vst [vmem:[#allocation47_spill] sm:$0xff] %v13436_v8 }
 0x4d3   : > { %v5514_v25 = vpop.xlane.xlu1 %5513  ;;  %17032 = vst [vmem:[#allocation54_spill] sm:$0xff] %v13466_v17 }
 0x4d4   : > { %v5546_v0 = vadd.f32 %v13277_v6, %v5514_v25  ;;  %17037 = vst [vmem:[#allocation55_spill] sm:$0xff] %v13487_v1 }
 0x4d5   : > { %v13447_v53 = vpop.xlane.xlu0 %5517 }
 0x4d6   : > { %v13427_v3 = vpop.xlane.xlu2 %3796  ;;  %v13490_v48 = vadd.f32 %v5546_v0, %v17036_v60 }
 0x4d8   : > { %17038 = vst [vmem:[#allocation76_spill] sm:$0xff] %v13490_v48 }
 0x4da   : > { %2141 = vperm.xlu2 %8419, %v13409_v35  }
 0x4db   : > { %v1946_v52 = vpop.xlane.xlu1 %1945 }
 0x4dc   : > { %v1976_v10 = vadd.f32 %v17007_v47, %v1946_v52 }
 0x4dd   : > { %v13468_v56 = vpop.xlane.xlu0 %1949 }
 0x4de   : > { %v13449_v13 = vpop.xlane.xlu2 %5515  ;;  %v13501_v31 = vadd.f32 %v17041_v15, %v1976_v10 }
 0x4df   : > { %17026 = vst [vmem:[#allocation70_spill] sm:$0xff] %v13449_v13 }
 0x4e0   : > { %17042 = vst [vmem:[#allocation61_spill] sm:$0xff] %v13501_v31 }
 0x4e2   : > { %2147 = vperm.xlu2 %8419, %v13418_v42  }
 0x4e3   : > { %3872 = vperm.xlu1 %8418, %v13424_v24   ;;  %v3799_v4 = vpop.xlane.xlu1 %3798 }
 0x4e4   : > { %5591 = vperm.xlu0 %8415, %v13431_v46   ;;  %v3829_v38 = vadd.f32 %v17013_v14, %v3799_v4 }
 0x4e5   : > { %v3801_v19 = vpop.xlane.xlu0 %3800 }
 0x4e6   : > { %v1948_v45 = vpop.xlane.xlu2 %1947  ;;  %v3830_v52 = vadd.f32 %v17013_v14, %v3801_v19  ;;  %v13519_v10 = vadd.f32 %v3829_v38, %v17043_v22 }
 0x4e7   : > { %v1977_v59 = vadd.f32 %v17007_v47, %v1948_v45  ;;  %v13511_v45 = vadd.f32 %v799_v18, %v17045_v40 }
 0x4e8   : > { %v13516_v0 = vadd.f32 %v3830_v52, %v17046_v54  ;;  %17048 = vst [vmem:[#allocation60_spill] sm:$0xff] %v13519_v10 }
 0x4e9   : > { %v13504_v25 = vadd.f32 %v17043_v22, %v1977_v59  ;;  %v13523_v59 = vpop.f32.mrf.mxu3 }
 0x4ea   : > { %3878 = vperm.xlu2 %8419, %v13436_v8   ;;  %17047 = vst [vmem:[#allocation58_spill] sm:$0xff] %v13516_v0 }
 0x4eb   : > { %2144 = vperm.xlu1 %8418, %v13443_v33   ;;  %v5520_v58 = vpop.xlane.xlu1 %5519  ;;  %17044 = vst [vmem:[#allocation62_spill] sm:$0xff] %v13504_v25 }
 0x4ec   : > { %3875 = vperm.xlu0 %8415, %v13452_v62   ;;  %v5549_v18 = vadd.f32 %v13277_v6, %v5520_v58  ;;  %v17052_v58 = vld [vmem:[#allocation44_spill] sm:$0xff] }
 0x4ed   : > { %v13496_v11 = vpop.xlane.xlu0 %5523 }
 0x4ee   : > { %v13481_v36 = vpop.xlane.xlu2 %3802  ;;  %17039 = vst [vmem:[#allocation78_spill] sm:$0xff] %v13496_v11  ;;  %v13532_v52 = vadd.f32 %v5549_v18, %v17046_v54 }
 0x4f0   : > { %17051 = vst [vmem:[#allocation51_spill] sm:$0xff] %v13532_v52 }
 0x4f1   : > { %v805_v46 = vpop.f32.mrf.mxu3 }
 0x4f2   : > { %5600 = vperm.xlu2 %8419, %v13455_v30   ;;  %v13624_v35 = vadd.f32 %v805_v46, %v17045_v40 }
 0x4f3   : > { %v1952_v9 = vpop.xlane.xlu1 %1951 }
 0x4f4   : > { %3881 = vperm.xlu0 %8415, %v13463_v32   ;;  %v1979_v4 = vadd.f32 %v17007_v47, %v1952_v9 }
 0x4f5   : > { %v13513_v16 = vpop.xlane.xlu0 %1955 }
 0x4f6   : > { %v13498_v7 = vpop.xlane.xlu2 %5521  ;;  %v13529_v23 = vadd.f32 %v17049_v12, %v1979_v4  ;;  %v17054_v4 = vld [vmem:[#allocation48_spill] sm:$0xff] }
 0x4f7   : > { %17040 = vst [vmem:[#allocation77_spill] sm:$0xff] %v13498_v7 }
 0x4f8   : > { %17050 = vst [vmem:[#allocation69_spill] sm:$0xff] %v13529_v23 }
 0x4fa   : > { %2156 = vperm.xlu2 %8419, %v13466_v17  }
 0x4fb   : > { %v3805_v19 = vpop.xlane.xlu1 %3804 }
 0x4fc   : > { %2153 = vperm.xlu0 %8415, %v13475_v43  }
 0x4fd   : > { %v3807_v38 = vpop.xlane.xlu0 %3806 }
 0x4fe   : > { %v1954_v55 = vpop.xlane.xlu2 %1953  ;;  %v3833_v30 = vadd.f32 %v17013_v14, %v3807_v38  ;;  %v13552_v38 = vpop.f32.mrf.mxu3 }
 0x4ff   : > { %v1980_v9 = vadd.f32 %v17007_v47, %v1954_v55  ;;  %v3832_v55 = vadd.f32 %v17013_v14, %v3805_v19 }
 0x501   : > { %v13560_v24 = vadd.f32 %v3832_v55, %v17054_v4 }
 0x502   : > { %3887 = vperm.xlu2 %8419, %v13478_v63  }
 0x503   : > { %17058 = vst [vmem:[#allocation66_spill] sm:$0xff] %v13560_v24 }
 0x504   : > { %3890 = vperm.xlu0 %8415, %v13487_v1   ;;  %v13544_v1 = vadd.f32 %v17054_v4, %v1980_v9 }
 0x506   : > { %17055 = vst [vmem:[#allocation64_spill] sm:$0xff] %v13544_v1  ;;  %v811_v19 = vpop.f32.mrf.mxu3 }
 0x50a   : > { %5609 = vperm.xlu2 %8419, %v13490_v48   ;;  %v13534_v48 = vpop.xlane.xlu2 %3808 }
 0x50c   : > { %2162 = vperm.xlu0 %8415, %v13501_v31  }
 0x512   : > { %2165 = vperm.xlu2 %8419, %v13504_v25   ;;  %v13547_v18 = vpop.xlane.xlu2 %5527  ;;  %v17059_v25 = vld [vmem:[#allocation52_spill] sm:$0xff] }
 0x513   : > { %17056 = vst [vmem:[#allocation63_spill] sm:$0xff] %v13547_v18 }
 0x514   : > { %3899 = vperm.xlu0 %8415, %v13516_v0  }
 0x515   : > { %6137 = vadd.xlane.f32.xlu1 %v13511_v45 }
 0x51a   : > { %3896 = vperm.xlu2 %8419, %v13519_v10   ;;  %v13541_v10 = vadd.f32 %v3833_v30, %v17052_v58 }
 0x51c   : > { %2171 = vperm.xlu0 %8415, %v13529_v23   ;;  %17053 = vst [vmem:[#allocation68_spill] sm:$0xff] %v13541_v10 }
 0x51d   : > { %v5526_v50 = vpop.xlane.xlu1 %5525 }
 0x522   : > { %5618 = vperm.xlu2 %8419, %v13532_v52   ;;  %v1972_v52 = vadd.f32 %v17007_v47, %v13377_v26  ;;  %v3825_v26 = vadd.f32 %v17013_v14, %v13385_v28  ;;  %v814_v28 = vpop.f32.mrf.mxu3 }
 0x524   : > { %3908 = vperm.xlu0 %8415, %v13541_v10   ;;  %v13556_v30 = vadd.f32 %v17028_v39, %v1972_v52  ;;  %v5552_v52 = vadd.f32 %v13277_v6, %v5526_v50 }
 0x525   : > { %v1960_v39 = vpop.xlane.xlu2 %1959 }
 0x526   : > { %17057 = vst [vmem:[#allocation32_spill] sm:$0xff] %v13556_v30  ;;  %v13575_v55 = vadd.f32 %v5552_v52, %v17052_v58 }
 0x528   : > { %17062 = vst [vmem:[#allocation81_spill] sm:$0xff] %v13575_v55 }
 0x52a   : > { %2174 = vperm.xlu2 %8419, %v13544_v1  }
 0x52e   : > { %v1958_v8 = vpop.xlane.xlu1 %1957  ;;  %2150 = vperm.xlu1 %8418, %v13556_v30  }
 0x52f   : > { %v1982_v9 = vadd.f32 %v17007_v47, %v1958_v8  ;;  %v13572_v8 = vadd.f32 %v3825_v26, %v17033_v49  ;;  %v17064_v26 = vld [vmem:[#allocation49_spill] sm:$0xff]  ;;  %v17087_v49 = vlaneseq }
 0x531   : > { %v13564_v1 = vadd.f32 %v17059_v25, %v1982_v9  ;;  %17061 = vst [vmem:[#allocation72_spill] sm:$0xff] %v13572_v8  ;;  %v1975_v9 = vadd.f32 %v17007_v47, %v13412_v41 }
 0x532   : > { %3905 = vperm.xlu2 %8419, %v13560_v24   ;;  %v1983_v24 = vadd.f32 %v17007_v47, %v1960_v39 }
 0x533   : > { %17060 = vst [vmem:[#allocation65_spill] sm:$0xff] %v13564_v1  ;;  %2180 = vperm.xlu0 %8415, %v13564_v1   ;;  %v13582_v1 = vpop.permute.xlu2 %3869  ;;  %v13585_v50 = vadd.f32 %v17036_v60, %v1975_v9  ;;  %v1978_v60 = vadd.f32 %v17007_v47, %v13468_v56  ;;  %v1981_v56 = vadd.f32 %v17007_v47, %v13513_v16 }
 0x534   : > { %v13588_v43 = vadd.f32 %v17064_v26, %v1983_v24  ;;  %v13638_v47 = vadd.f32 %v814_v28, %v17045_v40 }
 0x535   : > { %17063 = vst [vmem:[#allocation53_spill] sm:$0xff] %v13585_v50 }
 0x536   : > { %3884 = vperm.xlu1 %8418, %v13572_v8   ;;  %17065 = vst [vmem:[#allocation41_spill] sm:$0xff] %v13588_v43  ;;  %v13595_v8 = vpop.f32.mrf.mxu3 }
 0x53a   : > { %5627 = vperm.xlu2 %8419, %v13575_v55   ;;  %v3828_v55 = vadd.f32 %v17013_v14, %v13427_v3 }
 0x53b   : > { %v13603_v24 = vpop.permute.xlu2 %5588 }
 0x53c   : > { %v13598_v39 = vadd.f32 %v3828_v55, %v17041_v15  ;;  %17068 = vst [vmem:[#allocation25_spill] sm:$0xff] %v13603_v24 }
 0x53d   : > { %v3811_v52 = vpop.xlane.xlu1 %3810 }
 0x53e   : > { %2159 = vperm.xlu1 %8418, %v13585_v50   ;;  %v3835_v41 = vadd.f32 %v17013_v14, %v3811_v52  ;;  %17066 = vst [vmem:[#allocation71_spill] sm:$0xff] %v13598_v39  ;;  %v820_v3 = vpop.f32.mrf.mxu3  ;;  %v13610_v52 = vadd.f32 %v17046_v54, %v1978_v60 }
 0x53f   : > { %v13684_v63 = vadd.f32 %v820_v3, %v17045_v40  ;;  %v17078_v3 = vld [vmem:[#allocation75_spill] sm:$0xff] }
 0x540   : > { %v13601_v9 = vadd.f32 %v3835_v41, %v17064_v26  ;;  %17069 = vst [vmem:[#allocation85_spill] sm:$0xff] %v13610_v52  ;;  %v3831_v41 = vadd.f32 %v17013_v14, %v13481_v36  ;;  %v13632_v36 = vadd.f32 %v17052_v58, %v1981_v56  ;;  %v13659_v58 = vadd.f32 %v13523_v59, %v17045_v40 }
 0x542   : > { %2183 = vperm.xlu2 %8419, %v13588_v43   ;;  %17067 = vst [vmem:[#allocation45_spill] sm:$0xff] %v13601_v9  ;;  %v13618_v42 = vadd.f32 %v3831_v41, %v17049_v12  ;;  %v3834_v41 = vadd.f32 %v17013_v14, %v13534_v48 }
 0x543   : > { %v13613_v55 = vpop.permute.xlu2 %2141  ;;  %17071 = vst [vmem:[#allocation87_spill] sm:$0xff] %v13632_v36 }
 0x544   : > { %17070 = vst [vmem:[#allocation86_spill] sm:$0xff] %v13618_v42  ;;  %v13646_v0 = vadd.f32 %v3834_v41, %v17059_v25  ;;  %v17076_v41 = vld [vmem:[#allocation50_spill] sm:$0xff] }
 0x545   : > { %v6163_v32 = vmul.f32 %v13315_v5, %v17076_v41 }
 0x546   : > { %3893 = vperm.xlu1 %8418, %v13598_v39   ;;  %v823_v50 = vpop.f32.mrf.mxu3  ;;  %17073 = vst [vmem:[#allocation89_spill] sm:$0xff] %v13646_v0 }
 0x547   : > { %v13650_v56 = vadd.f32 %v823_v50, %v17045_v40  ;;  %v17077_v50 = vld [vmem:[#allocation73_spill] sm:$0xff] }
 0x54a   : > { %3914 = vperm.xlu2 %8419, %v13601_v9   ;;  %v13629_v9 = vpop.permute.xlu0 %2138 }
 0x54b   : > { %v13626_v60 = vpop.permute.xlu2 %2147 }
 0x54e   : > { %2168 = vperm.xlu1 %8418, %v13610_v52   ;;  %v826_v54 = vpop.f32.mrf.mxu3 }
 0x552   : > { %v13643_v10 = vpop.xlane.xlu0 %5529 }
 0x553   : > { %v13641_v16 = vpop.permute.xlu2 %3878  ;;  %17072 = vst [vmem:[#allocation88_spill] sm:$0xff] %v13643_v10 }
 0x556   : > { %3902 = vperm.xlu1 %8418, %v13618_v42   ;;  %v829_v46 = vpop.f32.mrf.mxu3  ;;  %v13702_v42 = vsub.f32 %v17078_v3, %v6163_v32 }
 0x557   : > { %v13696_v62 = vadd.f32 %v829_v46, %v17045_v40 }
 0x558   : > { %v6195_v5 = vmul.f32 %v13702_v42, %v13702_v42 }
 0x55a   : > { %v13653_v14 = vpop.permute.xlu0 %5591 }
 0x55b   : > { %17074 = vst [vmem:[#allocation90_spill] sm:$0xff] %v13653_v14  ;;  %v13655_v28 = vpop.permute.xlu2 %5600 }
 0x55c   : > { %17075 = vst [vmem:[#allocation91_spill] sm:$0xff] %v13655_v28  ;;  %v13674_v28 = vadd.f32 %v811_v19, %v17045_v40 }
 0x55d   : > { %6141 = vadd.xlane.f32.xlu0 %v13624_v35 }
 0x55e   : > { %2177 = vperm.xlu1 %8418, %v13632_v36   ;;  %v832_v48 = vpop.f32.mrf.mxu3  ;;  %v13708_v36 = vadd.f32 %v13552_v38, %v17045_v40 }
 0x55f   : > { %v13662_v24 = vadd.f32 %v832_v48, %v17045_v40 }
 0x562   : > { %v13671_v14 = vpop.permute.xlu0 %3875 }
 0x563   : > { %v13676_v59 = vpop.permute.xlu2 %2156 }
 0x565   : > { %6147 = vadd.xlane.f32.xlu0 %v13638_v47 }
 0x566   : > { %3911 = vperm.xlu1 %8418, %v13646_v0   ;;  %v6164_v0 = vmul.f32 %v13134_v37, %v17076_v41  ;;  %v13681_v37 = vpop.permute.xlu1 %3872 }
 0x568   : > { %v13669_v39 = vsub.f32 %v17077_v50, %v6164_v0 }
 0x56a   : > { %v6196_v48 = vmul.f32 %v13669_v39, %v13669_v39  ;;  %v13686_v0 = vpop.permute.xlu0 %3881 }
 0x56b   : > { %v13689_v50 = vpop.permute.xlu2 %3887 }
 0x56d   : > { %6153 = vadd.xlane.f32.xlu0 %v13650_v56 }
 0x56e   : > { %v13691_v19 = vpop.permute.xlu1 %2144 }
 0x573   : > { %6139 = vadd.xlane.f32.xlu2 %v13659_v58  ;;  %v13704_v27 = vpop.permute.xlu2 %5609 }
 0x574   : > { %17079 = vst [vmem:[#allocation50_spill] sm:$0xff] %v13704_v27  ;;  %v13723_v27 = vadd.f32 %v13595_v8, %v17045_v40  ;;  %v6165_v8 = vmul.f32 %v13258_v20, %v17076_v41 }
 0x575   : > { %6159 = vadd.xlane.f32.xlu0 %v13662_v24 }
 0x57b   : > { %6145 = vadd.xlane.f32.xlu2 %v13674_v28  ;;  %v13719_v3 = vpop.permute.xlu2 %2165 }
 0x57d   : > { %6213 = vadd.xlane.f32.xlu0 %v6196_v48  ;;  %v13699_v48 = vpop.permute.xlu0 %2153 }
 0x583   : > { %6151 = vadd.xlane.f32.xlu2 %v13684_v63 }
 0x585   : > { %v13717_v32 = vpop.permute.xlu0 %3890 }
 0x588   : > { %v6138_v43 = vpop.xlane.xlu1 %6137 }
 0x589   : > { %v6166_v23 = vmul.f32 %v6138_v43, %v17076_v41 }
 0x58b   : > { %6157 = vadd.xlane.f32.xlu2 %v13696_v62  ;;  %v13715_v46 = vsub.f32 %v13511_v45, %v6166_v23  ;;  %v13733_v23 = vpop.permute.xlu2 %3896  ;;  %v835_v45 = vpop.f32.mrf.mxu3 }
 0x58c   : > { %v13737_v31 = vadd.f32 %v835_v45, %v17045_v40 }
 0x58d   : > { %17080 = vst [vmem:[#allocation73_spill] sm:$0xff] %v13715_v46  ;;  %v6198_v43 = vmul.f32 %v13715_v46, %v13715_v46  ;;  %v13728_v38 = vpop.permute.xlu0 %2162 }
 0x590   : > { %6143 = vadd.xlane.f32.xlu1 %v13708_v36 }
 0x593   : > { %6211 = vadd.xlane.f32.xlu2 %v6195_v5  ;;  %v13731_v5 = vadd.f32 %v826_v54, %v17045_v40  ;;  %v17082_v54 = vld [vmem:[#allocation74_spill] sm:$0xff] }
 0x594   : > { %v13747_v30 = vsub.f32 %v17082_v54, %v6165_v8 }
 0x595   : > { %v13741_v46 = vpop.permute.xlu0 %3899 }
 0x596   : > { %17083 = vst [vmem:[#allocation74_spill] sm:$0xff] %v13747_v30  ;;  %v6197_v33 = vmul.f32 %v13747_v30, %v13747_v30 }
 0x598   : > { %6149 = vadd.xlane.f32.xlu1 %v13723_v27 }
 0x59b   : > { %6217 = vadd.xlane.f32.xlu2 %v6198_v43  ;;  %v13744_v43 = vpop.permute.xlu2 %5618 }
 0x59c   : > { %17081 = vst [vmem:[#allocation75_spill] sm:$0xff] %v13744_v43 }
 0x59d   : > { %v13753_v40 = vpop.permute.xlu0 %2171 }
 0x5a0   : > { %6155 = vadd.xlane.f32.xlu1 %v13731_v5  ;;  %v2151_v17 = vpop.permute.xlu1 %2150 }
 0x5a3   : > { %v13755_v45 = vpop.permute.xlu2 %2174 }
 0x5a5   : > { %v13757_v18 = vpop.permute.xlu0 %3908 }
 0x5a8   : > { %6161 = vadd.xlane.f32.xlu1 %v13737_v31  ;;  %v13751_v25 = vpop.permute.xlu1 %3884 }
 0x5ab   : > { %v13759_v29 = vpop.permute.xlu2 %3905 }
 0x5ad   : > { %v13763_v43 = vpop.permute.xlu0 %2180 }
 0x5b0   : > { %6215 = vadd.xlane.f32.xlu1 %v6197_v33  ;;  %v2160_v20 = vpop.permute.xlu1 %2159 }
 0x5b3   : > { %v13765_v8 = vpop.permute.xlu2 %5627 }
 0x5b4   : > { %17084 = vst [vmem:[#allocation92_spill] sm:$0xff] %v13765_v8 }
 0x5b8   : > { %v13761_v12 = vpop.permute.xlu1 %3893 }
 0x5bb   : > { %v13771_v15 = vpop.permute.xlu2 %2183 }
 0x5c0   : > { %v2169_v30 = vpop.permute.xlu1 %2168 }
 0x5c8   : > { %v13779_v8 = vpop.permute.xlu1 %3902 }
 0x5d0   : > { %v6142_v54 = vpop.xlane.xlu0 %6141 }
 0x5d1   : > { %v6168_v33 = vmul.f32 %v6142_v54, %v17076_v41  ;;  %v13782_v54 = vand.u32 127, %v17087_v49 }
 0x5d3   : > { %v13769_v7 = vsub.f32 %v13624_v35, %v6168_v33  ;;  %v13786_v33 = vpop.permute.xlu2 %3914  ;;  %v13789_v4 = vadd.s32 4294967288, %v13782_v54  ;;  %v2201_v11 = vperm.slane %v13728_v38, %v13782_v54 }
 0x5d5   : > { %17085 = vst [vmem:[#allocation93_spill] sm:$0xff] %v13769_v7  ;;  %v6200_v26 = vmul.f32 %v13769_v7, %v13769_v7  ;;  %v2193_v49 = vperm.slane %v13626_v60, %v13789_v4  ;;  %v2195_v7 = vperm.slane %v2151_v17, %v13782_v54  ;;  %v2199_v2 = vperm.slane %v2160_v20, %v13789_v4 }
 0x5d6   : > { %v2198_v17 = vperm.slane %v13676_v59, %v13782_v54 }
 0x5d7   : > { %6221 = vadd.xlane.f32.xlu1 %v6200_v26 }
 0x5d8   : > { %v6148_v13 = vpop.xlane.xlu0 %6147 }
 0x5d9   : > { %v6171_v10 = vmul.f32 %v6148_v13, %v17076_v41  ;;  %v2192_v13 = vperm.slane %v13691_v19, %v13782_v54 }
 0x5db   : > { %v13777_v52 = vsub.f32 %v13638_v47, %v6171_v10  ;;  %v2189_v47 = vperm.slane %v13613_v55, %v13789_v4  ;;  %v2194_v19 = vsel %vm16698_vm13, %v2193_v49, %v2192_v13  ;;  %v2196_v55 = vperm.slane %v13699_v48, %v13789_v4 }
 0x5dc   : > { %v2202_v48 = vperm.slane %v13719_v3, %v13789_v4  ;;  %v2200_v49 = vsel %vm16698_vm13, %v2199_v2, %v2198_v17  ;;  %v2205_v2 = vperm.slane %v13753_v40, %v13789_v4  ;;  %v2210_v17 = vperm.slane %v13763_v43, %v13782_v54 }
 0x5dd   : > { %17086 = vst [vmem:[#allocation94_spill] sm:$0xff] %v13777_v52  ;;  %v6203_v35 = vmul.f32 %v13777_v52, %v13777_v52 }
 0x5df   : > { %6227 = vadd.xlane.f32.xlu1 %v6203_v35  ;;  %v2187_v35 = vperm.slane %v13629_v9, %v13782_v54  ;;  %v2197_v9 = vsel %vm16698_vm13, %v2196_v55, %v2195_v7 }
 0x5e0   : > { %v6154_v26 = vpop.xlane.xlu0 %6153 }
 0x5e1   : > { %v6174_v10 = vmul.f32 %v6154_v26, %v17076_v41 }
 0x5e3   : > { %v13800_v52 = vsub.f32 %v13650_v56, %v6174_v10  ;;  %v2178_v56 = vpop.permute.xlu1 %2177  ;;  %v2191_v10 = vsel %vm16698_vm13, %v2189_v47, %v2187_v35 }
 0x5e4   : > { %v2214_v13 = vsel %vm2213_vm14, %v2194_v19, %v2191_v10  ;;  %v2208_v47 = vperm.slane %v2178_v56, %v13789_v4  ;;  %v2207_v19 = vperm.slane %v13755_v45, %v13782_v54  ;;  %v2203_v45 = vsel %vm16698_vm13, %v2202_v48, %v2201_v11 }
 0x5e5   : > { %17088 = vst [vmem:[#allocation95_spill] sm:$0xff] %v13800_v52  ;;  %v6206_v60 = vmul.f32 %v13800_v52, %v13800_v52  ;;  %v2204_v52 = vperm.slane %v2169_v30, %v13782_v54  ;;  %v2216_v3 = vsel %vm2215_vm0, %v2197_v9, %v2214_v13  ;;  %v2211_v11 = vperm.slane %v13771_v15, %v13789_v4 }
 0x5e6   : > { %v6140_v26 = vpop.xlane.xlu2 %6139  ;;  %v2218_v30 = vsel %vm2217_vm1, %v2200_v49, %v2216_v3 }
 0x5e7   : > { %v6167_v20 = vmul.f32 %v6140_v26, %v17076_v41  ;;  %6233 = vadd.xlane.f32.xlu1 %v6206_v60  ;;  %v2206_v55 = vsel %vm16698_vm13, %v2205_v2, %v2204_v52  ;;  %v2209_v60 = vsel %vm16698_vm13, %v2208_v47, %v2207_v19  ;;  %v2220_v26 = vsel %vm2219_vm2, %v2203_v45, %v2218_v30 }
 0x5e8   : > { %v6160_v59 = vpop.xlane.xlu0 %6159  ;;  %v2222_v52 = vsel %vm16699_vm3, %v2206_v55, %v2220_v26  ;;  %v2212_v13 = vsel %vm16698_vm13, %v2211_v11, %v2210_v17 }
 0x5e9   : > { %v13824_v7 = vsub.f32 %v13659_v58, %v6167_v20  ;;  %v6177_v35 = vmul.f32 %v6160_v59, %v17076_v41  ;;  %v2224_v9 = vsel %vm16700_vm5, %v2209_v60, %v2222_v52 }
 0x5ea   : > { %v2226_v49 = vsel %vm2225_vm6, %v2212_v13, %v2224_v9 }
 0x5eb   : > { %v6199_v38 = vmul.f32 %v13824_v7, %v13824_v7  ;;  %v13836_v58 = vsub.f32 %v13662_v24, %v6177_v35  ;;  %v2229_v47 = vsel %vm2228_vm7, %v2226_v49, -inf  ;;  %v13866_v3 = vpop.permute.xlu1 %3911 }
 0x5ed   : > { %17089 = vst [vmem:[#allocation96_spill] sm:$0xff] %v13836_v58  ;;  %6219 = vadd.xlane.f32.xlu0 %v6199_v38  ;;  %v6209_v40 = vmul.f32 %v13836_v58, %v13836_v58 }
 0x5ee   : > { %v6146_v56 = vpop.xlane.xlu2 %6145 }
 0x5ef   : > { %v6170_v24 = vmul.f32 %v6146_v56, %v17076_v41  ;;  %6239 = vadd.xlane.f32.xlu1 %v6209_v40 }
 0x5f0   : > { %v6214_v10 = vpop.xlane.xlu0 %6213 }
 0x5f1   : > { %v13852_v20 = vsub.f32 %v13674_v28, %v6170_v24  ;;  %v6244_v43 = vmul.f32 %v6214_v10, %v17076_v41 }
 0x5f3   : > { %v6202_v48 = vmul.f32 %v13852_v20, %v13852_v20  ;;  %v6260_v15 = vadd.f32 1e-05, %v6244_v43 }
 0x5f5   : > { %6225 = vadd.xlane.f32.xlu0 %v6202_v48  ;;  %8631 = vrsqrt.f32 %v6260_v15  ;;  %vm6291_vm9 = vweird.f32 %v6260_v15 }
 0x5f6   : > { %v6152_v59 = vpop.xlane.xlu2 %6151 }
 0x5f7   : > { %v6173_v35 = vmul.f32 %v6152_v59, %v17076_v41  ;;  %2230 = vmax.xlane.f32.xlu1 %v2229_v47 }
 0x5f9   : > { %v13862_v28 = vsub.f32 %v13684_v63, %v6173_v35 }
 0x5fb   : > { %17090 = vst [vmem:[#allocation97_spill] sm:$0xff] %v13862_v28  ;;  %v6205_v19 = vmul.f32 %v13862_v28, %v13862_v28  ;;  %v8632_v38 = vpop.eup %8631 }
 0x5fc   : > { %v6286_v45 = vmul.f32 %v8632_v38, %v6260_v15  ;;  %vm6292_vm8 = vweird.f32 %v8632_v38  ;;  %v13896_v15 = vld [vmem:[#allocation10 + $0x3] ss:$0 sm:$0xff] }
 0x5fd   : > { %6231 = vadd.xlane.f32.xlu0 %v6205_v19  ;;  %vm6293_vm10 = vmor %vm6291_vm9, %vm6292_vm8 }
 0x5fe   : > { %v6158_v2 = vpop.xlane.xlu2 %6157  ;;  %v6287_v56 = vmul.f32 %v8632_v38, %v6286_v45 }
 0x5ff   : > { %v6176_v30 = vmul.f32 %v6158_v2, %v17076_v41 }
 0x600   : > { %v6288_v11 = vmul.f32 0.5, %v6287_v56 }
 0x601   : > { %v13870_v55 = vsub.f32 %v13696_v62, %v6176_v30 }
 0x602   : > { %v6289_v9 = vsub.f32 1.5, %v6288_v11 }
 0x603   : > { %17091 = vst [vmem:[#allocation98_spill] sm:$0xff] %v13870_v55  ;;  %v6208_v60 = vmul.f32 %v13870_v55, %v13870_v55  ;;  %v6144_v63 = vpop.xlane.xlu1 %6143 }
 0x604   : > { %v6169_v17 = vmul.f32 %v6144_v63, %v17076_v41  ;;  %v6290_v59 = vmul.f32 %v8632_v38, %v6289_v9  ;;  %v13894_v63 = vld [vmem:[#allocation8 + $0x3] ss:$0 sm:$0xff] }
 0x605   : > { %6237 = vadd.xlane.f32.xlu0 %v6208_v60 }
 0x606   : > { %v6212_v40 = vpop.xlane.xlu2 %6211  ;;  %v13877_v24 = vsub.f32 %v13708_v36, %v6169_v17  ;;  %v6294_v19 = vsel %vm6293_vm10, %v8632_v38, %v6290_v59 }
 0x607   : > { %v6243_v26 = vmul.f32 %v6212_v40, %v17076_v41 }
 0x608   : > { %v6201_v62 = vmul.f32 %v13877_v24, %v13877_v24 }
 0x609   : > { %v6259_v52 = vadd.f32 1e-05, %v6243_v26 }
 0x60a   : > { %6223 = vadd.xlane.f32.xlu2 %v6201_v62 }
 0x60b   : > { %8633 = vrsqrt.f32 %v6259_v52  ;;  %v6150_v10 = vpop.xlane.xlu1 %6149  ;;  %vm6281_vm4 = vweird.f32 %v6259_v52 }
 0x60c   : > { %v6172_v43 = vmul.f32 %v6150_v10, %v17076_v41 }
 0x60e   : > { %v13883_v48 = vsub.f32 %v13723_v27, %v6172_v43  ;;  %v6436_v27 = vmul.f32 %v6294_v19, %v13669_v39 }
 0x610   : > { %v6204_v36 = vmul.f32 %v13883_v48, %v13883_v48  ;;  %v6457_v38 = vmul.f32 %v13894_v63, %v6436_v27 }
 0x611   : > { %v8634_v13 = vpop.eup %8633 }
 0x612   : > { %v6276_v49 = vmul.f32 %v8634_v13, %v6259_v52  ;;  %6229 = vadd.xlane.f32.xlu2 %v6204_v36  ;;  %vm6282_vm11 = vweird.f32 %v8634_v13 }
 0x613   : > { %v6156_v47 = vpop.xlane.xlu1 %6155  ;;  %vm6283_vm15 = vmor %vm6281_vm4, %vm6282_vm11 }
 0x614   : > { %v6277_v35 = vmul.f32 %v8634_v13, %v6276_v49  ;;  %v6175_v2 = vmul.f32 %v6156_v47, %v17076_v41 }
 0x616   : > { %v13889_v30 = vsub.f32 %v13731_v5, %v6175_v2  ;;  %v6278_v45 = vmul.f32 0.5, %v6277_v35  ;;  %v13901_v5 = vadd.f32 %v13896_v15, %v6457_v38 }
 0x618   : > { %v6207_v60 = vmul.f32 %v13889_v30, %v13889_v30  ;;  %v6279_v40 = vsub.f32 1.5, %v6278_v45  ;;  %v6510_v11 = vmul.f32 0.70710677, %v13901_v5 }
 0x61a   : > { %6235 = vadd.xlane.f32.xlu2 %v6207_v60  ;;  %v6280_v26 = vmul.f32 %v8634_v13, %v6279_v40  ;;  %v6565_v10 = vmul.f32 %v6510_v11, %v6510_v11 }
 0x61b   : > { %v6162_v17 = vpop.xlane.xlu1 %6161 }
 0x61c   : > { %v6178_v56 = vmul.f32 %v6162_v17, %v17076_v41  ;;  %v6284_v9 = vsel %vm6283_vm15, %v8634_v13, %v6280_v26  ;;  %v6566_v43 = vmin.f32 %v6565_v10, 16.0 }
 0x61d   : > { %v6435_v36 = vmul.f32 %v6284_v9, %v13702_v42 }
 0x61e   : > { %v13904_v39 = vsub.f32 %v13737_v31, %v6178_v56  ;;  %v6567_v49 = vmul.f32 2.1237322e-06, %v6566_v43  ;;  %v6578_v59 = vmul.f32 3.8918573e-05, %v6566_v43 }
 0x61f   : > { %v6456_v2 = vmul.f32 %v13894_v63, %v6435_v36 }
 0x620   : > { %17092 = vst [vmem:[#allocation99_spill] sm:$0xff] %v13904_v39  ;;  %v6210_v62 = vmul.f32 %v13904_v39, %v13904_v39  ;;  %v6568_v47 = vadd.f32 0.00028619796, %v6567_v49  ;;  %v6579_v31 = vadd.f32 0.001143296, %v6578_v59 }
 0x621   : > { %v13912_v60 = vadd.f32 %v13896_v15, %v6456_v2 }
 0x622   : > { %6241 = vadd.xlane.f32.xlu2 %v6210_v62  ;;  %v6569_v35 = vmul.f32 %v6568_v47, %v6566_v43  ;;  %v6580_v19 = vmul.f32 %v6579_v31, %v6566_v43 }
 0x623   : > { %v13915_v40 = vmul.f32 0.70710677, %v13912_v60 }
 0x624   : > { %v6570_v27 = vadd.f32 0.0036580483, %v6569_v35  ;;  %v6581_v45 = vadd.f32 0.014752088, %v6580_v19 }
 0x625   : > { %v6525_v42 = vmul.f32 %v13915_v40, %v13915_v40 }
 0x626   : > { %v6582_v52 = vmul.f32 %v6581_v45, %v6566_v43  ;;  %v6571_v13 = vmul.f32 %v6570_v27, %v6566_v43 }
 0x627   : > { %v6526_v56 = vmin.f32 %v6525_v42, 16.0 }
 0x628   : > { %v6583_v17 = vadd.f32 0.112945676, %v6582_v52  ;;  %v6572_v26 = vadd.f32 0.05243302, %v6571_v13 }
 0x629   : > { %v6527_v10 = vmul.f32 2.1237322e-06, %v6526_v56  ;;  %v6538_v9 = vmul.f32 3.8918573e-05, %v6526_v56 }
 0x62a   : > { %v6584_v38 = vmul.f32 %v6583_v17, %v6566_v43  ;;  %v6573_v47 = vmul.f32 %v6572_v26, %v6566_v43 }
 0x62b   : > { %v6528_v59 = vadd.f32 0.00028619796, %v6527_v10  ;;  %v6539_v36 = vadd.f32 0.001143296, %v6538_v9 }
 0x62c   : > { %v6585_v62 = vadd.f32 0.4994258, %v6584_v38  ;;  %v6574_v2 = vadd.f32 0.18741608, %v6573_v47 }
 0x62d   : > { %v6529_v35 = vmul.f32 %v6528_v59, %v6526_v56  ;;  %v6540_v19 = vmul.f32 %v6539_v36, %v6526_v56 }
 0x62e   : > { %v6586_v49 = vmul.f32 %v6585_v62, %v6566_v43  ;;  %v6575_v39 = vmul.f32 %v6574_v2, %v6566_v43 }
 0x62f   : > { %v6541_v27 = vadd.f32 0.014752088, %v6540_v19  ;;  %v6530_v45 = vadd.f32 0.0036580483, %v6529_v35 }
 0x630   : > { %v6587_v31 = vadd.f32 1.0, %v6586_v49  ;;  %v6576_v58 = vadd.f32 1.1283791, %v6575_v39 }
 0x631   : > { %v6542_v52 = vmul.f32 %v6541_v27, %v6526_v56  ;;  %v6531_v13 = vmul.f32 %v6530_v45, %v6526_v56 }
 0x632   : > { %8635 = vrcp.f32 %v6587_v31  ;;  %v6599_v62 = vand.u32 2147483648, %v6587_v31  ;;  %v6597_v26 = vand.u32 2147483647, %v6587_v31  ;;  %vm6593_vm8 = vweird.f32 %v6587_v31 }
 0x633   : > { %v6543_v17 = vadd.f32 0.112945676, %v6542_v52  ;;  %v6532_v49 = vadd.f32 0.05243302, %v6531_v13  ;;  %v6577_v19 = vmul.f32 %v6576_v58, %v6510_v11  ;;  %v13925_v13 = vpop.xlane.xlu1 %6215 }
 0x634   : > { %v6600_v47 = vor.u32 1.1754944e-38, %v6599_v62  ;;  %vm6598_vm10 = vcmp.eq.f32.partialorder %v6597_v26, 8.507059e+37 }
 0x635   : > { %v6544_v38 = vmul.f32 %v6543_v17, %v6526_v56  ;;  %v6533_v2 = vmul.f32 %v6532_v49, %v6526_v56 }
 0x637   : > { %v6545_v10 = vadd.f32 0.4994258, %v6544_v38  ;;  %v6534_v52 = vadd.f32 0.18741608, %v6533_v2  ;;  %v3917_v2 = vperm.slane %v13681_v37, %v13789_v4 }
 0x638   : > { %v8636_v28 = vpop.eup %8635 }
 0x639   : > { %v6589_v42 = vmul.f32 %v8636_v28, %v6587_v31  ;;  %vm6594_vm12 = vweird.f32 %v8636_v28  ;;  %v6546_v59 = vmul.f32 %v6545_v10, %v6526_v56 }
 0x63a   : > { %vm6595_vm9 = vmor %vm6593_vm8, %vm6594_vm12 }
 0x63b   : > { %v6590_v55 = vsub.f32 1.0, %v6589_v42  ;;  %v6547_v35 = vadd.f32 1.0, %v6546_v59  ;;  %v13923_v42 = vld [vmem:[%s16493_s6 + $0x3] ss:$0 sm:$0xff]  ;;  %v3919_v59 = vperm.slane %v13671_v14, %v13782_v54  ;;  %v3922_v14 = vperm.slane %v13686_v0, %v13782_v54 }
 0x63c   : > { %v3932_v0 = vperm.slane %v13779_v8, %v13789_v4 }
 0x63d   : > { %v6591_v9 = vmul.f32 %v8636_v28, %v6590_v55  ;;  %8637 = vrcp.f32 %v6547_v35  ;;  %v6494_v55 = vmul.f32 0.5, %v13901_v5  ;;  %v6559_v10 = vand.u32 2147483648, %v6547_v35 }
 0x63e   : > { %v6557_v5 = vand.u32 2147483647, %v6547_v35  ;;  %vm6553_vm4 = vweird.f32 %v6547_v35 }
 0x63f   : > { %v6592_v36 = vadd.f32 %v8636_v28, %v6591_v9 }
 0x640   : > { %vm6558_vm12 = vcmp.eq.f32.partialorder %v6557_v5, 8.507059e+37  ;;  %v3934_v5 = vperm.slane %v13759_v29, %v13782_v54 }
 0x641   : > { %v6596_v43 = vsel %vm6595_vm9, %v8636_v28, %v6592_v36  ;;  %v6535_v28 = vmul.f32 %v6534_v52, %v6526_v56  ;;  %v3923_v56 = vperm.slane %v13751_v25, %v13789_v4  ;;  %v3928_v52 = vperm.slane %v13761_v12, %v13782_v54 }
 0x642   : > { %v6601_v27 = vsel %vm6598_vm10, %v6600_v47, %v6596_v43  ;;  %v6560_v47 = vor.u32 1.1754944e-38, %v6559_v10  ;;  %v3925_v12 = vperm.slane %v13689_v50, %v13782_v54  ;;  %v3935_v50 = vperm.slane %v13757_v18, %v13789_v4 }
 0x643   : > { %v6602_v45 = vmul.f32 %v6601_v27, %v6577_v19  ;;  %v8638_v31 = vpop.eup %8637  ;;  %v6536_v9 = vadd.f32 1.1283791, %v6535_v28  ;;  %v3931_v28 = vperm.slane %v13741_v46, %v13782_v54  ;;  %v5542_v18 = vadd.f32 %v13277_v6, %v13367_v44 }
 0x644   : > { %v6549_v11 = vmul.f32 %v8638_v31, %v6547_v35  ;;  %vm6554_vm11 = vweird.f32 %v8638_v31  ;;  %v3920_v35 = vperm.slane %v13641_v16, %v13789_v4  ;;  %v3926_v16 = vperm.slane %v13717_v32, %v13789_v4 }
 0x645   : > { %v8284_v39 = vclamps-f32 %v6602_v45, 1.0  ;;  %vm6555_vm15 = vmor %vm6553_vm4, %vm6554_vm11  ;;  %v6537_v19 = vmul.f32 %v6536_v9, %v13915_v40  ;;  %v3924_v40 = vsel %vm16698_vm13, %v3923_v56, %v3922_v14 }
 0x646   : > { %v6550_v62 = vsub.f32 1.0, %v6549_v11  ;;  %v3921_v25 = vsel %vm16698_vm13, %v3920_v35, %v3919_v59  ;;  %v3927_v8 = vsel %vm16698_vm13, %v3926_v16, %v3925_v12  ;;  %v3936_v59 = vsel %vm16698_vm13, %v3935_v50, %v3934_v5  ;;  %v17098_v12 = vld [vmem:[#allocation88_spill] sm:$0xff] }
 0x647   : > { %v7166_v17 = vadd.f32 1.0, %v8284_v39  ;;  %v3916_v39 = vperm.slane %v13582_v1, %v13782_v54  ;;  %v3929_v1 = vperm.slane %v13733_v23, %v13789_v4  ;;  %v3937_v23 = vperm.slane %v13866_v3, %v13782_v54 }
 0x648   : > { %v6551_v26 = vmul.f32 %v8638_v31, %v6550_v62  ;;  %v3933_v62 = vsel %vm16698_vm13, %v3932_v0, %v3931_v28  ;;  %v5548_v35 = vadd.f32 %v13277_v6, %v13447_v53  ;;  %v17094_v53 = vld [vmem:[#allocation82_spill] sm:$0xff]  ;;  %v17096_v0 = vld [vmem:[#allocation31_spill] sm:$0xff]  ;;  %v5554_v28 = vadd.f32 %v13277_v6, %v17098_v12 }
 0x649   : > { %v7182_v58 = vmul.f32 %v7166_v17, %v6494_v55  ;;  %v3918_v37 = vsel %vm16698_vm13, %v3917_v2, %v3916_v39  ;;  %v3930_v32 = vsel %vm16698_vm13, %v3929_v1, %v3928_v52  ;;  %v5544_v52 = vadd.f32 %v13277_v6, %v17094_v53 }
 0x64a   : > { %v6552_v49 = vadd.f32 %v8638_v31, %v6551_v26  ;;  %v13930_v36 = vpop.xlane.xlu1 %6221  ;;  %v3940_v17 = vsel %vm2213_vm14, %v3921_v25, %v3918_v37  ;;  %v3938_v26 = vperm.slane %v13786_v33, %v13789_v4  ;;  %v14004_v14 = vadd.f32 %v5548_v35, %v17043_v22  ;;  %v6218_v25 = vpop.xlane.xlu2 %6217  ;;  %v17095_v37 = vld [vmem:[#allocation48_spill] sm:$0xff] }
 0x64b   : > { %v7203_v38 = vmul.f32 %v13923_v42, %v7182_v58  ;;  %v3941_v11 = vsel %vm2215_vm0, %v3924_v40, %v3940_v17  ;;  %v14024_v17 = vadd.f32 %v5544_v52, %v17096_v0  ;;  %v17108_v52 = vld [vmem:[#allocation67_spill] sm:$0xff] }
 0x64c   : > { %v6556_v43 = vsel %vm6555_vm15, %v8638_v31, %v6552_v49  ;;  %v6493_v31 = vmul.f32 0.5, %v13912_v60  ;;  %v3942_v10 = vsel %vm2217_vm1, %v3927_v8, %v3941_v11  ;;  %v3939_v49 = vsel %vm16698_vm13, %v3938_v26, %v3937_v23  ;;  %v17099_v11 = vld [vmem:[#allocation70_spill] sm:$0xff]  ;;  %v17100_v8 = vld [vmem:[#allocation49_spill] sm:$0xff] }
 0x64d   : > { %7220 = vadd.xlane.f32.xlu1 %v7203_v38  ;;  %v6561_v27 = vsel %vm6558_vm12, %v6560_v47, %v6556_v43  ;;  %v3943_v9 = vsel %vm2219_vm2, %v3930_v32, %v3942_v10  ;;  %v5545_v43 = vadd.f32 %v13277_v6, %v13400_v57  ;;  %v5547_v32 = vadd.f32 %v13277_v6, %v17099_v11  ;;  %v17101_v23 = vld [vmem:[#allocation34_spill] sm:$0xff]  ;;  %v17110_v11 = vld [vmem:[#allocation32_spill] sm:$0xff] }
 0x64e   : > { %v6562_v45 = vmul.f32 %v6561_v27, %v6537_v19  ;;  %v3944_v3 = vsel %vm16699_vm3, %v3933_v62, %v3943_v9  ;;  %v13985_v19 = vadd.f32 %v5542_v18, %v17019_v21  ;;  %v5541_v27 = vadd.f32 %v13277_v6, %v13369_v61 }
 0x64f   : > { %v3945_v47 = vsel %vm16700_vm5, %v3936_v59, %v3944_v3  ;;  %v13994_v2 = vadd.f32 %v5545_v43, %v17031_v51  ;;  %v6246_v61 = vmul.f32 %v6218_v25, %v17076_v41  ;;  %v14035_v62 = vadd.f32 %v5554_v28, %v17100_v8 }
 0x650   : > { %v8283_v55 = vclamps-f32 %v6562_v45, 1.0  ;;  %v3946_v56 = vsel %vm2225_vm6, %v3939_v49, %v3945_v47  ;;  %v14008_v57 = vadd.f32 %v5541_v27, %v17024_v34  ;;  %v17093_v45 = vld [vmem:[#allocation78_spill] sm:$0xff]  ;;  %v14039_v50 = vadd.f32 %v5547_v32, %v17101_v23  ;;  %v17104_v49 = vld [vmem:[#allocation35_spill] sm:$0xff]  ;;  %v17105_v47 = vld [vmem:[#allocation80_spill] sm:$0xff] }
 0x651   : > { %v3948_v33 = vsel %vm2228_vm7, %v3946_v56, -inf  ;;  %v5551_v39 = vadd.f32 %v13277_v6, %v17093_v45  ;;  %v6262_v1 = vadd.f32 1e-05, %v6246_v61 }
 0x652   : > { %v7165_v58 = vadd.f32 1.0, %v8283_v55  ;;  %v13966_v60 = vpop.xlane.xlu1 %6227 }
 0x653   : > { %v14020_v16 = vadd.f32 %v5551_v39, %v17095_v37  ;;  %8639 = vrsqrt.f32 %v6262_v1  ;;  %v17107_v39 = vld [vmem:[#allocation52_spill] sm:$0xff]  ;;  %vm6311_vm9 = vweird.f32 %v6262_v1 }
 0x654   : > { %v7181_v38 = vmul.f32 %v7165_v58, %v6493_v31  ;;  %v17097_v31 = vld [vmem:[#allocation85_spill] sm:$0xff] }
 0x656   : > { %v7202_v46 = vmul.f32 %v13923_v42, %v7181_v38 }
 0x658   : > { %7218 = vadd.xlane.f32.xlu0 %v7202_v46  ;;  %v17102_v46 = vld [vmem:[#allocation77_spill] sm:$0xff] }
 0x659   : > { %v8640_v10 = vpop.eup %8639  ;;  %v5550_v9 = vadd.f32 %v13277_v6, %v17102_v46 }
 0x65a   : > { %v13988_v29 = vpop.xlane.xlu1 %6233  ;;  %v6306_v26 = vmul.f32 %v8640_v10, %v6262_v1  ;;  %vm6312_vm8 = vweird.f32 %v8640_v10 }
 0x65b   : > { %v14049_v59 = vadd.f32 %v5550_v9, %v17104_v49  ;;  %vm6313_vm10 = vmor %vm6311_vm9, %vm6312_vm8 }
 0x65c   : > { %v6307_v18 = vmul.f32 %v8640_v10, %v6306_v26 }
 0x65e   : > { %v6308_v35 = vmul.f32 0.5, %v6307_v18 }
 0x660   : > { %3949 = vmax.xlane.f32.xlu0 %v3948_v33  ;;  %v17106_v33 = vld [vmem:[#allocation63_spill] sm:$0xff]  ;;  %v6309_v53 = vsub.f32 1.5, %v6308_v35 }
 0x661   : > { %v5553_v43 = vadd.f32 %v13277_v6, %v17106_v33 }
 0x662   : > { %v13996_v44 = vpop.xlane.xlu1 %6239 }
 0x663   : > { %v14059_v25 = vadd.f32 %v5553_v43, %v17107_v39 }
 0x666   : > { %5597 = vperm.xlu1 %8418, %v13985_v19  }
 0x66a   : > { %v14012_v40 = vpop.xlane.xlu1 %2230 }
 0x66b   : > { %v2238_v55 = vperm.slane %v14012_v40, 5  ;;  %v16639_v3 = vperm.slane %v14012_v40, 0  ;;  %v16638_v27 = vperm.slane %v14012_v40, 1  ;;  %v16637_v6 = vperm.slane %v14012_v40, 2 }
 0x66c   : > { %v16636_v9 = vperm.slane %v14012_v40, 3  ;;  %v16635_v43 = vperm.slane %v14012_v40, 4 }
 0x66d   : > { %v2259_v58 = vsub.f32 %v17097_v31, %v2238_v55  ;;  %v2249_v56 = vsub.f32 %v17105_v47, %v16639_v3  ;;  %v2251_v61 = vsub.f32 %v17108_v52, %v16638_v27  ;;  %v6310_v31 = vmul.f32 %v8640_v10, %v6309_v53  ;;  %v6220_v47 = vpop.xlane.xlu0 %6219 }
 0x66e   : > { %5606 = vperm.xlu1 %8418, %v13994_v2   ;;  %v2253_v32 = vsub.f32 %v17110_v11, %v16637_v6  ;;  %v6247_v52 = vmul.f32 %v6220_v47, %v17076_v41  ;;  %v17117_v47 = vld [vmem:[#allocation69_spill] sm:$0xff] }
 0x66f   : > { %v2285_v38 = vmul.f32 1.442695, %v2259_v58  ;;  %v2265_v45 = vmul.f32 1.442695, %v2249_v56  ;;  %v2269_v58 = vmul.f32 1.442695, %v2251_v61  ;;  %v6314_v28 = vsel %vm6313_vm10, %v8640_v10, %v6310_v31 }
 0x670   : > { %v2273_v26 = vmul.f32 1.442695, %v2253_v32  ;;  %v17113_v10 = vld [vmem:[#allocation54_spill] sm:$0xff]  ;;  %v17115_v61 = vld [vmem:[#allocation61_spill] sm:$0xff] }
 0x671   : > { %8641 = vpow2.f32 %v2285_v38  ;;  %v17111_v38 = vld [vmem:[#allocation73_spill] sm:$0xff]  ;;  %v2255_v56 = vsub.f32 %v17113_v10, %v16636_v9  ;;  %v2257_v31 = vsub.f32 %v17115_v61, %v16635_v43  ;;  %v2260_v10 = vsub.f32 %v17117_v47, %v2238_v55  ;;  %v17120_v55 = vld [vmem:[#allocation87_spill] sm:$0xff] }
 0x672   : > { %8643 = vpow2.f32 %v2265_v45  ;;  %v6438_v46 = vmul.f32 %v6314_v28, %v17111_v38  ;;  %v6263_v28 = vadd.f32 1e-05, %v6247_v52 }
 0x673   : > { %8645 = vpow2.f32 %v2269_v58  ;;  %v2277_v35 = vmul.f32 1.442695, %v2255_v56  ;;  %v2281_v38 = vmul.f32 1.442695, %v2257_v31  ;;  %v16640_v31 = vperm.slane %v14012_v40, 6 }
 0x674   : > { %5594 = vperm.xlu0 %8415, %v14008_v57   ;;  %v6459_v1 = vmul.f32 %v13894_v63, %v6438_v46  ;;  %8647 = vpow2.f32 %v2273_v26  ;;  %vm6321_vm4 = vweird.f32 %v6263_v28 }
 0x675   : > { %8649 = vpow2.f32 %v2277_v35  ;;  %v14097_v11 = vpop.xlane.xlu0 %6225 }
 0x676   : > { %5615 = vperm.xlu1 %8418, %v14004_v14   ;;  %v14082_v33 = vadd.f32 %v13896_v15, %v6459_v1  ;;  %8651 = vrsqrt.f32 %v6263_v28 }
 0x677   : > { %v14044_v5 = vpop.eup %8641  ;;  %8653 = vpow2.f32 %v2281_v38  ;;  %v2262_v38 = vsub.f32 %v17120_v55, %v16640_v31 }
 0x678   : > { %17103 = vst [vmem:[#allocation78_spill] sm:$0xff] %v14044_v5  ;;  %v14066_v12 = vpop.eup %8643  ;;  %v14086_v45 = vmul.f32 0.70710677, %v14082_v33 }
 0x679   : > { %17109 = vst [vmem:[#allocation82_spill] sm:$0xff] %v14066_v12  ;;  %v14075_v18 = vpop.eup %8645  ;;  %v2291_v27 = vmul.f32 1.442695, %v2262_v38 }
 0x67a   : > { %17112 = vst [vmem:[#allocation85_spill] sm:$0xff] %v14075_v18  ;;  %v14088_v53 = vpop.eup %8647  ;;  %v6645_v58 = vmul.f32 %v14086_v45, %v14086_v45 }
 0x67b   : > { %17114 = vst [vmem:[#allocation88_spill] sm:$0xff] %v14088_v53  ;;  %v14101_v26 = vpop.eup %8649 }
 0x67c   : > { %5603 = vperm.xlu0 %8415, %v14024_v17   ;;  %v14099_v46 = vmin.f32 %v6645_v58, 16.0  ;;  %17116 = vst [vmem:[#allocation70_spill] sm:$0xff] %v14101_v26  ;;  %v8652_v52 = vpop.eup %8651  ;;  %v2287_v58 = vmul.f32 1.442695, %v2260_v10 }
 0x67d   : > { %v6224_v32 = vpop.xlane.xlu2 %6223  ;;  %v14111_v61 = vpop.xlane.xlu0 %6231  ;;  %v6316_v6 = vmul.f32 %v8652_v52, %v6263_v28  ;;  %vm6322_vm11 = vweird.f32 %v8652_v52 }
 0x67e   : > { %5624 = vperm.xlu1 %8418, %v14020_v16   ;;  %v6249_v1 = vmul.f32 %v6224_v32, %v17076_v41  ;;  %v6658_v56 = vmul.f32 3.8918573e-05, %v14099_v46  ;;  %17118 = vst [vmem:[#allocation77_spill] sm:$0xff] %v14111_v61  ;;  %v14114_v9 = vpop.eup %8653  ;;  %v6251_v32 = vmul.f32 %v13966_v60, %v17076_v41  ;;  %vm6323_vm15 = vmor %vm6321_vm4, %vm6322_vm11  ;;  %v6647_v0 = vmul.f32 2.1237322e-06, %v14099_v46 }
 0x67f   : > { %17119 = vst [vmem:[#allocation80_spill] sm:$0xff] %v14114_v9  ;;  %v6317_v10 = vmul.f32 %v8652_v52, %v6316_v6 }
 0x680   : > { %v14109_v35 = vadd.f32 1e-05, %v6249_v1  ;;  %v6659_v43 = vadd.f32 0.001143296, %v6658_v56  ;;  %v14124_v47 = vadd.f32 1e-05, %v6251_v32 }
 0x681   : > { %v16642_v56 = vperm.slane %v14012_v40, 7  ;;  %v6318_v49 = vmul.f32 0.5, %v6317_v10 }
 0x682   : > { %8655 = vrsqrt.f32 %v14109_v35  ;;  %v6660_v1 = vmul.f32 %v6659_v43, %v14099_v46  ;;  %v17122_v43 = vld [vmem:[#allocation41_spill] sm:$0xff]  ;;  %vm6341_vm8 = vweird.f32 %v14109_v35  ;;  %vm6361_vm11 = vweird.f32 %v14124_v47 }
 0x683   : > { %8657 = vpow2.f32 %v2287_v58  ;;  %v2264_v6 = vsub.f32 %v17122_v43, %v16642_v56  ;;  %v6319_v55 = vsub.f32 1.5, %v6318_v49 }
 0x684   : > { %5612 = vperm.xlu0 %8415, %v14039_v50   ;;  %v6661_v60 = vadd.f32 0.014752088, %v6660_v1  ;;  %8659 = vrsqrt.f32 %v14124_v47 }
 0x685   : > { %v14129_v39 = vpop.xlane.xlu0 %6237  ;;  %8661 = vpow2.f32 %v2291_v27  ;;  %v2295_v1 = vmul.f32 1.442695, %v2264_v6  ;;  %v6320_v37 = vmul.f32 %v8652_v52, %v6319_v55 }
 0x686   : > { %5633 = vperm.xlu1 %8418, %v14035_v62   ;;  %v6662_v32 = vmul.f32 %v6661_v60, %v14099_v46 }
 0x687   : > { %8663 = vpow2.f32 %v2295_v1  ;;  %v6324_v60 = vsel %vm6323_vm15, %v8652_v52, %v6320_v37 }
 0x688   : > { %v8656_v3 = vpop.eup %8655  ;;  %v6663_v23 = vadd.f32 0.112945676, %v6662_v32  ;;  %v6439_v55 = vmul.f32 %v6324_v60, %v13824_v7 }
 0x689   : > { %v14127_v8 = vpop.eup %8657  ;;  %v6336_v58 = vmul.f32 %v8656_v3, %v14109_v35  ;;  %vm6342_vm12 = vweird.f32 %v8656_v3 }
 0x68a   : > { %17121 = vst [vmem:[#allocation63_spill] sm:$0xff] %v14127_v8  ;;  %v14138_v31 = vpop.eup %8659  ;;  %v6664_v49 = vmul.f32 %v6663_v23, %v14099_v46  ;;  %vm6343_vm9 = vmor %vm6341_vm8, %vm6342_vm12 }
 0x68b   : > { %v6337_v38 = vmul.f32 %v8656_v3, %v6336_v58  ;;  %v14140_v21 = vpop.eup %8661  ;;  %v6356_v43 = vmul.f32 %v14138_v31, %v14124_v47  ;;  %vm6362_vm10 = vweird.f32 %v14138_v31 }
 0x68c   : > { %5621 = vperm.xlu0 %8415, %v14049_v59   ;;  %17123 = vst [vmem:[#allocation67_spill] sm:$0xff] %v14140_v21  ;;  %v6665_v32 = vadd.f32 0.4994258, %v6664_v49  ;;  %vm6363_vm4 = vmor %vm6361_vm11, %vm6362_vm10 }
 0x68d   : > { %v6338_v27 = vmul.f32 0.5, %v6337_v38  ;;  %v6357_v58 = vmul.f32 %v14138_v31, %v6356_v43  ;;  %v14149_v56 = vpop.eup %8663  ;;  %v17127_v38 = vld [vmem:[#allocation83_spill] sm:$0xff]  ;;  %v6648_v43 = vadd.f32 0.00028619796, %v6647_v0 }
 0x68e   : > { %2344 = vperm.xlu1 %8418, %v14044_v5   ;;  %17125 = vst [vmem:[#allocation73_spill] sm:$0xff] %v14149_v56  ;;  %v6666_v7 = vmul.f32 %v6665_v32, %v14099_v46 }
 0x68f   : > { %v6339_v6 = vsub.f32 1.5, %v6338_v27  ;;  %v6358_v23 = vmul.f32 0.5, %v6357_v58  ;;  %v6460_v27 = vmul.f32 %v13894_v63, %v6439_v55  ;;  %v17129_v55 = vld [vmem:[#allocation84_spill] sm:$0xff] }
 0x691   : > { %v6340_v37 = vmul.f32 %v8656_v3, %v6339_v6  ;;  %v6359_v49 = vsub.f32 1.5, %v6358_v23  ;;  %v17128_v6 = vld [vmem:[#allocation86_spill] sm:$0xff]  ;;  %v14174_v32 = vadd.f32 %v13896_v15, %v6460_v27 }
 0x693   : > { %v6344_v60 = vsel %vm6343_vm9, %v8656_v3, %v6340_v37  ;;  %v6360_v3 = vmul.f32 %v14138_v31, %v6359_v49 }
 0x694   : > { %5630 = vperm.xlu0 %8415, %v14059_v25   ;;  %v6441_v0 = vmul.f32 %v6344_v60, %v13877_v24 }
 0x696   : > { %v6462_v24 = vmul.f32 %v13894_v63, %v6441_v0 }
 0x698   : > { %v14202_v0 = vadd.f32 %v13896_v15, %v6462_v24 }
 0x69c   : > { %2314 = vperm.xlu0 %8415, %v14066_v12  }
 0x6a4   : > { %2320 = vperm.xlu0 %8415, %v14075_v18  }
 0x6ac   : > { %2326 = vperm.xlu0 %8415, %v14088_v53  }
 0x6b4   : > { %2332 = vperm.xlu0 %8415, %v14101_v26  }
 0x6bc   : > { %2338 = vperm.xlu0 %8415, %v14114_v9  }
 0x6c0   : > { %v14155_v51 = vpop.xlane.xlu1 %7220 }
 0x6c1   : > { %17126 = vst [vmem:[#allocation54_spill] sm:$0xff] %v14155_v51 }
 0x6c4   : > { %2347 = vperm.xlu0 %8415, %v14127_v8  }
 0x6cb   : > { %v14142_v10 = vpop.xlane.xlu0 %7218 }
 0x6cc   : > { %17124 = vst [vmem:[#allocation32_spill] sm:$0xff] %v14142_v10  ;;  %2353 = vperm.xlu0 %8415, %v14140_v21   ;;  %v14170_v10 = vadd.f32 1.0, %v6666_v7  ;;  %v14187_v7 = vmul.f32 0.70710677, %v14174_v32 }
 0x6ce   : > { %vm6673_vm12 = vweird.f32 %v14170_v10 }
 0x6d3   : > { %v14152_v22 = vpop.xlane.xlu0 %3949 }
 0x6d4   : > { %v16648_v28 = vperm.slane %v14152_v22, 0  ;;  %2359 = vperm.xlu0 %8415, %v14149_v56   ;;  %v16649_v52 = vperm.slane %v14152_v22, 5  ;;  %v16646_v58 = vperm.slane %v14152_v22, 1  ;;  %v16647_v27 = vperm.slane %v14152_v22, 2 }
 0x6d6   : > { %v3968_v1 = vsub.f32 %v17127_v38, %v16648_v28  ;;  %v3979_v51 = vsub.f32 %v17128_v6, %v16649_v52  ;;  %v6649_v38 = vmul.f32 %v6648_v43, %v14099_v46  ;;  %v3970_v23 = vsub.f32 %v17129_v55, %v16646_v58  ;;  %v17131_v6 = vld [vmem:[#allocation94_spill] sm:$0xff] }
 0x6d7   : > { %v6364_v43 = vsel %vm6363_vm4, %v14138_v31, %v6360_v3  ;;  %v17133_v3 = vld [vmem:[#allocation79_spill] sm:$0xff] }
 0x6d8   : > { %v3984_v34 = vmul.f32 1.442695, %v3968_v1  ;;  %v14178_v35 = vpop.permute.xlu1 %5597  ;;  %v4006_v37 = vmul.f32 1.442695, %v3979_v51  ;;  %v6650_v1 = vadd.f32 0.0036580483, %v6649_v38  ;;  %v6685_v51 = vmul.f32 %v14187_v7, %v14187_v7 }
 0x6d9   : > { %v3988_v49 = vmul.f32 1.442695, %v3970_v23  ;;  %v6443_v38 = vmul.f32 %v6364_v43, %v17131_v6  ;;  %v3972_v55 = vsub.f32 %v17133_v3, %v16647_v27  ;;  %v14219_v6 = vmul.f32 0.70710677, %v14202_v0 }
 0x6da   : > { %8665 = vpow2.f32 %v3984_v34  ;;  %v6651_v34 = vmul.f32 %v6650_v1, %v14099_v46  ;;  %v14214_v43 = vmin.f32 %v6685_v51, 16.0  ;;  %v16655_v3 = vperm.slane %v14152_v22, 3 }
 0x6db   : > { %8667 = vrcp.f32 %v14170_v10  ;;  %v6464_v58 = vmul.f32 %v13894_v63, %v6443_v38  ;;  %v6765_v51 = vmul.f32 %v14219_v6, %v14219_v6  ;;  %v17135_v63 = vld [vmem:[#allocation59_spill] sm:$0xff] }
 0x6dc   : > { %8669 = vpow2.f32 %v4006_v37  ;;  %v6652_v1 = vadd.f32 0.05243302, %v6651_v34  ;;  %v6698_v52 = vmul.f32 3.8918573e-05, %v14214_v43  ;;  %v3974_v38 = vsub.f32 %v17135_v63, %v16655_v3 }
 0x6dd   : > { %8671 = vpow2.f32 %v3988_v49  ;;  %v3992_v49 = vmul.f32 1.442695, %v3972_v55 }
 0x6de   : > { %v6653_v28 = vmul.f32 %v6652_v1, %v14099_v46  ;;  %v6699_v56 = vadd.f32 0.001143296, %v6698_v52 }
 0x6df   : > { %8673 = vpow2.f32 %v3992_v49 }
 0x6e0   : > { %v14192_v60 = vpop.eup %8665  ;;  %v14209_v23 = vpop.permute.xlu1 %5606  ;;  %v6700_v49 = vmul.f32 %v6699_v56, %v14214_v43  ;;  %v6677_v56 = vand.u32 2147483647, %v14170_v10 }
 0x6e1   : > { %17130 = vst [vmem:[#allocation61_spill] sm:$0xff] %v14192_v60  ;;  %v14197_v47 = vpop.eup %8667  ;;  %4033 = vperm.xlu1 %8418, %v14192_v60   ;;  %v6654_v60 = vadd.f32 0.18741608, %v6653_v28 }
 0x6e2   : > { %v14204_v31 = vpop.eup %8669  ;;  %v6669_v24 = vmul.f32 %v14197_v47, %v14170_v10  ;;  %vm6674_vm15 = vweird.f32 %v14197_v47  ;;  %v6701_v3 = vadd.f32 0.014752088, %v6700_v49  ;;  %vm6678_vm9 = vcmp.eq.f32.partialorder %v6677_v56, 8.507059e+37  ;;  %v17142_v49 = vld [vmem:[#allocation25_spill] sm:$0xff] }
 0x6e3   : > { %17132 = vst [vmem:[#allocation69_spill] sm:$0xff] %v14204_v31  ;;  %4066 = vperm.xlu0 %8415, %v14204_v31   ;;  %v14223_v27 = vpop.eup %8671  ;;  %v14231_v31 = vadd.f32 %v13896_v15, %v6464_v58  ;;  %v16659_v15 = vperm.slane %v14152_v22, 4  ;;  %v3996_v58 = vmul.f32 1.442695, %v3974_v38  ;;  %v6655_v63 = vmul.f32 %v6654_v60, %v14099_v46  ;;  %vm14261_vm8 = vmor %vm6673_vm12, %vm6674_vm15 }
 0x6e4   : > { %17134 = vst [vmem:[#allocation87_spill] sm:$0xff] %v14223_v27  ;;  %v6670_v34 = vsub.f32 1.0, %v6669_v24  ;;  %v6679_v46 = vand.u32 2147483648, %v14170_v10  ;;  %v17140_v10 = vld [vmem:[#allocation90_spill] sm:$0xff] }
 0x6e5   : > { %v14242_v24 = vmul.f32 0.70710677, %v14231_v31  ;;  %v14245_v21 = vpop.eup %8673  ;;  %8675 = vpow2.f32 %v3996_v58  ;;  %v5636_v53 = vperm.slane %v17140_v10, %v13789_v4  ;;  %v17145_v10 = vld [vmem:[#allocation58_spill] sm:$0xff] }
 0x6e6   : > { %v14212_v37 = vpop.permute.xlu0 %5594  ;;  %v6671_v61 = vmul.f32 %v14197_v47, %v6670_v34  ;;  %17136 = vst [vmem:[#allocation41_spill] sm:$0xff] %v14245_v21  ;;  %v6680_v26 = vor.u32 1.1754944e-38, %v6679_v46 }
 0x6e7   : > { %v6845_v34 = vmul.f32 %v14242_v24, %v14242_v24 }
 0x6e8   : > { %v14236_v1 = vpop.permute.xlu1 %5615  ;;  %v6672_v28 = vadd.f32 %v14197_v47, %v6671_v61  ;;  %v17144_v61 = vperm.slane %v14152_v22, 5 }
 0x6e9   : > { %4039 = vperm.xlu1 %8418, %v14223_v27   ;;  %v14239_v27 = vmin.f32 %v6765_v51, 16.0  ;;  %v17137_v51 = vld [vmem:[#allocation71_spill] sm:$0xff] }
 0x6ea   : > { %v3976_v38 = vsub.f32 %v17137_v51, %v16659_v15  ;;  %v6676_v8 = vsel %vm14261_vm8, %v14197_v47, %v6672_v28  ;;  %v14268_v51 = vmin.f32 %v6845_v34, 16.0  ;;  %v5638_v15 = vperm.slane %v14212_v37, %v13782_v54  ;;  %v17143_v37 = vld [vmem:[#allocation91_spill] sm:$0xff] }
 0x6eb   : > { %v6778_v52 = vmul.f32 3.8918573e-05, %v14239_v27  ;;  %v5635_v47 = vperm.slane %v17142_v49, %v13782_v54  ;;  %v5639_v28 = vperm.slane %v14178_v35, %v13789_v4  ;;  %v6702_v34 = vmul.f32 %v6701_v3, %v14214_v43 }
 0x6ec   : > { %v4000_v58 = vmul.f32 1.442695, %v3976_v38  ;;  %v5641_v38 = vperm.slane %v17143_v37, %v13782_v54  ;;  %v6858_v56 = vmul.f32 3.8918573e-05, %v14268_v51  ;;  %v3978_v49 = vsub.f32 %v17145_v10, %v17144_v61 }
 0x6ed   : > { %v6779_v9 = vadd.f32 0.001143296, %v6778_v52  ;;  %v6681_v52 = vsel %vm6678_vm9, %v6680_v26, %v6676_v8  ;;  %v5640_v35 = vsel %vm16698_vm13, %v5639_v28, %v5638_v15  ;;  %v5637_v8 = vsel %vm16698_vm13, %v5636_v53, %v5635_v47 }
 0x6ee   : > { %v5604_v55 = vpop.permute.xlu0 %5603  ;;  %8677 = vpow2.f32 %v4000_v58  ;;  %v6703_v61 = vadd.f32 0.112945676, %v6702_v34  ;;  %v5648_v15 = vperm.slane %v14236_v1, %v13789_v4  ;;  %v5659_v53 = vsel %vm2213_vm14, %v5640_v35, %v5637_v8 }
 0x6ef   : > { %v5642_v5 = vperm.slane %v5604_v55, %v13789_v4  ;;  %v6780_v55 = vmul.f32 %v6779_v9, %v14239_v27  ;;  %v16667_v28 = vperm.slane %v14152_v22, 6 }
 0x6f0   : > { %v5625_v18 = vpop.permute.xlu1 %5624 }
 0x6f1   : > { %4045 = vperm.xlu1 %8418, %v14245_v21   ;;  %v6656_v21 = vadd.f32 1.1283791, %v6655_v63  ;;  %v14275_v63 = vpop.eup %8675  ;;  %v5643_v26 = vsel %vm16698_vm13, %v5642_v5, %v5641_v38  ;;  %v6781_v58 = vadd.f32 0.014752088, %v6780_v55  ;;  %v6859_v5 = vadd.f32 0.001143296, %v6858_v56 }
 0x6f2   : > { %17141 = vst [vmem:[#allocation83_spill] sm:$0xff] %v14275_v63  ;;  %v5660_v38 = vsel %vm2215_vm0, %v5643_v26, %v5659_v53  ;;  %v6704_v55 = vmul.f32 %v6703_v61, %v14214_v43  ;;  %v5653_v56 = vperm.slane %v5625_v18, %v13782_v54  ;;  %v6496_v53 = vmul.f32 0.5, %v14082_v33 }
 0x6f3   : > { %v6657_v46 = vmul.f32 %v6656_v21, %v14086_v45  ;;  %v17146_v21 = vld [vmem:[#allocation50_spill] sm:$0xff]  ;;  %v5644_v45 = vperm.slane %v14209_v23, %v13782_v54  ;;  %v6860_v26 = vmul.f32 %v6859_v5, %v14268_v51 }
 0x6f4   : > { %v5645_v9 = vperm.slane %v17146_v21, %v13789_v4  ;;  %v14308_v10 = vpop.eup %8677 }
 0x6f5   : > { %17148 = vst [vmem:[#allocation86_spill] sm:$0xff] %v14308_v10 }
 0x6f6   : > { %v5613_v60 = vpop.permute.xlu0 %5612  ;;  %v5646_v34 = vsel %vm16698_vm13, %v5645_v9, %v5644_v45 }
 0x6f7   : > { %v5647_v3 = vperm.slane %v5613_v60, %v13782_v54  ;;  %v17147_v60 = vld [vmem:[#allocation75_spill] sm:$0xff]  ;;  %v5661_v8 = vsel %vm2217_vm1, %v5646_v34, %v5660_v38  ;;  %v16666_v38 = vperm.slane %v14152_v22, 7 }
 0x6f8   : > { %v5650_v47 = vperm.slane %v17147_v60, %v13782_v54  ;;  %v5634_v35 = vpop.permute.xlu1 %5633  ;;  %v6705_v60 = vadd.f32 0.4994258, %v6704_v55 }
 0x6f9   : > { %4051 = vperm.xlu1 %8418, %v14275_v63   ;;  %v6682_v63 = vmul.f32 %v6681_v52, %v6657_v46  ;;  %v4004_v52 = vmul.f32 1.442695, %v3978_v49  ;;  %v5649_v23 = vsel %vm16698_vm13, %v5648_v15, %v5647_v3  ;;  %v6782_v49 = vmul.f32 %v6781_v58, %v14239_v27 }
 0x6fa   : > { %v5657_v61 = vperm.slane %v5634_v35, %v13789_v4  ;;  %v6687_v58 = vmul.f32 2.1237322e-06, %v14214_v43 }
 0x6fb   : > { %v8286_v46 = vclamps-f32 %v6682_v63, 1.0  ;;  %v17149_v63 = vld [vmem:[#allocation68_spill] sm:$0xff]  ;;  %8679 = vpow2.f32 %v4004_v52  ;;  %v6861_v52 = vadd.f32 0.014752088, %v6860_v26 }
 0x6fc   : > { %v3981_v3 = vsub.f32 %v17149_v63, %v16667_v28  ;;  %v6688_v55 = vadd.f32 0.00028619796, %v6687_v58  ;;  %v17154_v58 = vld [vmem:[#allocation42_spill] sm:$0xff] }
 0x6fd   : > { %v7168_v9 = vadd.f32 1.0, %v8286_v46 }
 0x6fe   : > { %v5622_v37 = vpop.permute.xlu0 %5621 }
 0x6ff   : > { %v5651_v12 = vperm.slane %v5622_v37, %v13789_v4  ;;  %v5662_v37 = vsel %vm2219_vm2, %v5649_v23, %v5661_v8  ;;  %v4010_v23 = vmul.f32 1.442695, %v3981_v3  ;;  %v6862_v3 = vmul.f32 %v6861_v52, %v14268_v51 }
 0x701   : > { %v5652_v1 = vsel %vm16698_vm13, %v5651_v12, %v5650_v47  ;;  %4057 = vperm.xlu1 %8418, %v14308_v10   ;;  %v17150_v12 = vld [vmem:[#allocation92_spill] sm:$0xff]  ;;  %v6783_v47 = vadd.f32 0.112945676, %v6782_v49  ;;  %v14334_v8 = vpop.eup %8679  ;;  %v17151_v49 = vld [vmem:[#allocation45_spill] sm:$0xff]  ;;  %8681 = vpow2.f32 %v4010_v23 }
 0x702   : > { %v5654_v21 = vperm.slane %v17150_v12, %v13789_v4  ;;  %v5663_v45 = vsel %vm16699_vm3, %v5652_v1, %v5662_v37  ;;  %v7184_v1 = vmul.f32 %v7168_v9, %v6496_v53  ;;  %v3983_v26 = vsub.f32 %v17151_v49, %v16666_v38 }
 0x703   : > { %v6784_v63 = vmul.f32 %v6783_v47, %v14239_v27  ;;  %v17153_v53 = vperm.slane %v14012_v40, 0 }
 0x704   : > { %v5655_v5 = vsel %vm16698_vm13, %v5654_v21, %v5653_v56  ;;  %v6706_v56 = vmul.f32 %v6705_v60, %v14214_v43  ;;  %v7205_v37 = vmul.f32 %v13923_v42, %v7184_v1  ;;  %v4014_v21 = vmul.f32 1.442695, %v3983_v26 }
 0x705   : > { %v5664_v34 = vsel %vm16700_vm5, %v5655_v5, %v5663_v45  ;;  %v6785_v9 = vadd.f32 0.4994258, %v6784_v63  ;;  %v6863_v45 = vadd.f32 0.112945676, %v6862_v3  ;;  %v2250_v5 = vsub.f32 %v17154_v58, %v17153_v53  ;;  %v17157_v63 = vld [vmem:[#allocation39_spill] sm:$0xff] }
 0x706   : > { %v5631_v18 = vpop.permute.xlu0 %5630  ;;  %v14345_v12 = vadd.f32 1.0, %v6706_v56  ;;  %v6847_v1 = vmul.f32 2.1237322e-06, %v14268_v51  ;;  %v17156_v26 = vperm.slane %v14012_v40, 1 }
 0x707   : > { %v5656_v15 = vperm.slane %v5631_v18, %v13782_v54  ;;  %v6689_v18 = vmul.f32 %v6688_v55, %v14214_v43  ;;  %v6786_v60 = vmul.f32 %v6785_v9, %v14239_v27  ;;  %v6864_v47 = vmul.f32 %v6863_v45, %v14268_v51 }
 0x708   : > { %8683 = vrcp.f32 %v14345_v12  ;;  %v2267_v23 = vmul.f32 1.442695, %v2250_v5  ;;  %v6245_v55 = vmul.f32 %v13925_v13, %v17076_v41  ;;  %v2252_v3 = vsub.f32 %v17157_v63, %v17156_v26 }
 0x709   : > { %v5658_v46 = vsel %vm16698_vm13, %v5657_v61, %v5656_v15  ;;  %4063 = vperm.xlu1 %8418, %v14334_v8   ;;  %v6767_v61 = vmul.f32 2.1237322e-06, %v14239_v27  ;;  %v14349_v15 = vpop.eup %8681  ;;  %8685 = vpow2.f32 %v4014_v21  ;;  %v6690_v42 = vadd.f32 0.0036580483, %v6689_v18 }
 0x70a   : > { %v5665_v35 = vsel %vm2225_vm6, %v5658_v46, %v5664_v34  ;;  %17152 = vst [vmem:[#allocation84_spill] sm:$0xff] %v14349_v15  ;;  %v14359_v34 = vadd.f32 1.0, %v6786_v60  ;;  %8687 = vpow2.f32 %v2267_v23  ;;  %v6848_v21 = vadd.f32 0.00028619796, %v6847_v1  ;;  %v17160_v1 = vld [vmem:[#allocation57_spill] sm:$0xff] }
 0x70b   : > { %v5667_v33 = vsel %vm2228_vm7, %v5665_v35, -inf  ;;  %v6768_v52 = vadd.f32 0.00028619796, %v6767_v61  ;;  %v6691_v46 = vmul.f32 %v6690_v42, %v14214_v43  ;;  %v6865_v35 = vadd.f32 0.4994258, %v6864_v47 }
 0x70c   : > { %5668 = vmax.xlane.f32.xlu2 %v5667_v33  ;;  %8689 = vrcp.f32 %v14359_v34  ;;  %v14375_v9 = vadd.f32 1e-05, %v6245_v55  ;;  %v2271_v61 = vmul.f32 1.442695, %v2252_v3  ;;  %v6849_v58 = vmul.f32 %v6848_v21, %v14268_v51 }
 0x70d   : > { %7224 = vadd.xlane.f32.xlu0 %v7205_v37  ;;  %v6769_v56 = vmul.f32 %v6768_v52, %v14239_v27  ;;  %v6692_v37 = vadd.f32 0.05243302, %v6691_v46  ;;  %v6866_v18 = vmul.f32 %v6865_v35, %v14268_v51  ;;  %v6248_v23 = vmul.f32 %v13930_v36, %v17076_v41 }
 0x70e   : > { %v14362_v33 = vpop.eup %8683  ;;  %8691 = vrsqrt.f32 %v14375_v9  ;;  %v17159_v46 = vperm.slane %v14012_v40, 2  ;;  %vm6713_vm11 = vweird.f32 %v14345_v12  ;;  %vm6793_vm8 = vweird.f32 %v14359_v34 }
 0x70f   : > { %v14367_v49 = vpop.eup %8685  ;;  %v6709_v13 = vmul.f32 %v14362_v33, %v14345_v12  ;;  %v6770_v45 = vadd.f32 0.0036580483, %v6769_v56  ;;  %v6693_v53 = vmul.f32 %v6692_v37, %v14214_v43  ;;  %v14381_v5 = vadd.f32 1.0, %v6866_v18 }
 0x710   : > { %17155 = vst [vmem:[#allocation94_spill] sm:$0xff] %v14367_v49  ;;  %v14383_v42 = vpop.eup %8687  ;;  %8693 = vpow2.f32 %v2271_v61  ;;  %v2254_v35 = vsub.f32 %v17160_v1, %v17159_v46  ;;  %v6850_v56 = vadd.f32 0.0036580483, %v6849_v58  ;;  %v14401_v36 = vadd.f32 1e-05, %v6248_v23 }
 0x711   : > { %4072 = vperm.xlu1 %8418, %v14349_v15   ;;  %17158 = vst [vmem:[#allocation79_spill] sm:$0xff] %v14383_v42  ;;  %v6710_v60 = vsub.f32 1.0, %v6709_v13  ;;  %v6771_v47 = vmul.f32 %v6770_v45, %v14239_v27  ;;  %v6694_v55 = vadd.f32 0.18741608, %v6693_v53  ;;  %8695 = vrcp.f32 %v14381_v5 }
 0x712   : > { %v14387_v52 = vpop.eup %8689  ;;  %v2275_v21 = vmul.f32 1.442695, %v2254_v35  ;;  %v6851_v13 = vmul.f32 %v6850_v56, %v14268_v51  ;;  %vm6714_vm10 = vweird.f32 %v14362_v33  ;;  %v6719_v23 = vand.u32 2147483648, %v14345_v12  ;;  %v17163_v35 = vld [vmem:[#allocation53_spill] sm:$0xff] }
 0x713   : > { %v6711_v26 = vmul.f32 %v14362_v33, %v6710_v60  ;;  %v6772_v63 = vadd.f32 0.05243302, %v6771_v47  ;;  %v6789_v3 = vmul.f32 %v14387_v52, %v14359_v34  ;;  %v6695_v18 = vmul.f32 %v6694_v55, %v14214_v43  ;;  %vm6715_vm4 = vmor %vm6713_vm11, %vm6714_vm10 }
 0x714   : > { %v14399_v37 = vpop.eup %8691  ;;  %8697 = vrsqrt.f32 %v14401_v36  ;;  %v6250_v43 = vmul.f32 %v14097_v11, %v17076_v41  ;;  %v6717_v46 = vand.u32 2147483647, %v14345_v12  ;;  %v17162_v1 = vperm.slane %v14012_v40, 3 }
 0x715   : > { %v6712_v61 = vadd.f32 %v14362_v33, %v6711_v26  ;;  %v6773_v53 = vmul.f32 %v6772_v63, %v14239_v27  ;;  %v6790_v58 = vsub.f32 1.0, %v6789_v3  ;;  %v6296_v47 = vmul.f32 %v14399_v37, %v14375_v9 }
 0x716   : > { %v14405_v45 = vpop.eup %8693  ;;  %v2256_v55 = vsub.f32 %v17163_v35, %v17162_v1  ;;  %8699 = vpow2.f32 %v2275_v21  ;;  %v6696_v56 = vadd.f32 1.1283791, %v6695_v18  ;;  %v6852_v26 = vadd.f32 0.05243302, %v6851_v13 }
 0x717   : > { %17161 = vst [vmem:[#allocation59_spill] sm:$0xff] %v14405_v45  ;;  %v14410_v60 = vpop.eup %8695  ;;  %v6716_v63 = vsel %vm6715_vm4, %v14362_v33, %v6712_v61  ;;  %v6774_v3 = vadd.f32 0.18741608, %v6773_v53  ;;  %v6791_v38 = vmul.f32 %v14387_v52, %v6790_v58  ;;  %v6297_v28 = vmul.f32 %v14399_v37, %v6296_v47 }
 0x718   : > { %v6869_v11 = vmul.f32 %v14410_v60, %v14381_v5  ;;  %v14429_v12 = vadd.f32 1e-05, %v6250_v43  ;;  %vm6718_vm15 = vcmp.eq.f32.partialorder %v6717_v46, 8.507059e+37  ;;  %v2279_v15 = vmul.f32 1.442695, %v2256_v55  ;;  %v17166_v43 = vld [vmem:[#allocation62_spill] sm:$0xff] }
 0x719   : > { %4078 = vperm.xlu1 %8418, %v14367_v49   ;;  %v6720_v49 = vor.u32 1.1754944e-38, %v6719_v23  ;;  %v6697_v21 = vmul.f32 %v6696_v56, %v14187_v7  ;;  %v6853_v13 = vmul.f32 %v6852_v26, %v14268_v51  ;;  %v6775_v33 = vmul.f32 %v6774_v3, %v14239_v27 }
 0x71a   : > { %v14433_v1 = vpop.eup %8697  ;;  %v6792_v61 = vadd.f32 %v14387_v52, %v6791_v38  ;;  %vm6794_vm12 = vweird.f32 %v14387_v52  ;;  %v6870_v53 = vsub.f32 1.0, %v6869_v11  ;;  %v6298_v47 = vmul.f32 0.5, %v6297_v28 }
 0x71b   : > { %v6721_v18 = vsel %vm6718_vm15, %v6720_v49, %v6716_v63  ;;  %v6799_v23 = vand.u32 2147483648, %v14359_v34  ;;  %8701 = vrsqrt.f32 %v14429_v12  ;;  %v6797_v49 = vand.u32 2147483647, %v14359_v34  ;;  %vm6795_vm9 = vmor %vm6793_vm8, %vm6794_vm12 }
 0x71c   : > { %v14438_v58 = vpop.eup %8699  ;;  %v6722_v7 = vmul.f32 %v6721_v18, %v6697_v21  ;;  %v6326_v27 = vmul.f32 %v14433_v1, %v14401_v36  ;;  %v17165_v38 = vperm.slane %v14012_v40, 4  ;;  %8703 = vpow2.f32 %v2279_v15 }
 0x71d   : > { %17164 = vst [vmem:[#allocation71_spill] sm:$0xff] %v14438_v58  ;;  %v6776_v28 = vadd.f32 1.1283791, %v6775_v33  ;;  %v6796_v35 = vsel %vm6795_vm9, %v14387_v52, %v6792_v61  ;;  %v6854_v55 = vadd.f32 0.18741608, %v6853_v13  ;;  %v6871_v56 = vmul.f32 %v14410_v60, %v6870_v53 }
 0x71e   : > { %v2258_v46 = vsub.f32 %v17166_v43, %v17165_v38  ;;  %v6299_v26 = vsub.f32 1.5, %v6298_v47  ;;  %v6800_v63 = vor.u32 1.1754944e-38, %v6799_v23  ;;  %v8287_v3 = vclamps-f32 %v6722_v7, 1.0 }
 0x71f   : > { %vm6798_vm10 = vcmp.eq.f32.partialorder %v6797_v49, 8.507059e+37  ;;  %v6327_v34 = vmul.f32 %v14433_v1, %v6326_v27  ;;  %v6777_v38 = vmul.f32 %v6776_v28, %v14219_v6  ;;  %v6855_v15 = vmul.f32 %v6854_v55, %v14268_v51  ;;  %v17169_v49 = vld [vmem:[#allocation64_spill] sm:$0xff] }
 0x720   : > { %v2283_v11 = vmul.f32 1.442695, %v2258_v46  ;;  %v6801_v21 = vsel %vm6798_vm10, %v6800_v63, %v6796_v35  ;;  %v6872_v33 = vadd.f32 %v14410_v60, %v6871_v56  ;;  %vm6874_vm11 = vweird.f32 %v14410_v60 }
 0x721   : > { %v14453_v18 = vpop.eup %8701  ;;  %v6300_v13 = vmul.f32 %v14399_v37, %v6299_v26  ;;  %vm6301_vm4 = vweird.f32 %v14375_v9  ;;  %vm6302_vm15 = vweird.f32 %v14399_v37  ;;  %v6879_v61 = vand.u32 2147483648, %v14381_v5 }
 0x722   : > { %v14459_v52 = vpop.eup %8703  ;;  %v7169_v53 = vadd.f32 1.0, %v8287_v3  ;;  %v6802_v6 = vmul.f32 %v6801_v21, %v6777_v38  ;;  %vm6873_vm12 = vweird.f32 %v14381_v5  ;;  %v6877_v51 = vand.u32 2147483647, %v14381_v5  ;;  %vm6303_vm9 = vmor %vm6301_vm4, %vm6302_vm15 }
 0x723   : > { %17167 = vst [vmem:[#allocation90_spill] sm:$0xff] %v14459_v52  ;;  %v6328_v47 = vmul.f32 0.5, %v6327_v34  ;;  %v6346_v23 = vmul.f32 %v14453_v18, %v14429_v12  ;;  %v17168_v7 = vperm.slane %v14012_v40, 6  ;;  %8705 = vpow2.f32 %v2283_v11  ;;  %vm6875_vm8 = vmor %vm6873_vm12, %vm6874_vm11  ;;  %v17170_v34 = vld [vmem:[#allocation74_spill] sm:$0xff] }
 0x724   : > { %2317 = vperm.xlu2 %8419, %v14383_v42   ;;  %v6497_v27 = vmul.f32 0.5, %v14174_v32  ;;  %v6856_v43 = vadd.f32 1.1283791, %v6855_v15  ;;  %v6876_v46 = vsel %vm6875_vm8, %v14410_v60, %v6872_v33  ;;  %v6304_v5 = vsel %vm6303_vm9, %v14399_v37, %v6300_v13  ;;  %v14487_v32 = vld [vmem:[%s16493_s6 + $0x3] ss:$0 sm:$0xff]  ;;  %v14736_v42 = vpop.permute.xlu1 %2344 }
 0x725   : > { %v2261_v9 = vsub.f32 %v17169_v49, %v17168_v7  ;;  %v6880_v28 = vor.u32 1.1754944e-38, %v6879_v61  ;;  %v8289_v55 = vclamps-f32 %v6802_v6, 1.0  ;;  %vm6878_vm10 = vcmp.eq.f32.partialorder %v6877_v51, 8.507059e+37  ;;  %v17173_v61 = vld [vmem:[#allocation65_spill] sm:$0xff]  ;;  %v14496_v51 = vld [vmem:[#allocation8 + $0x3] ss:$0 sm:$0xff] }
 0x726   : > { %v7185_v35 = vmul.f32 %v7169_v53, %v6497_v27  ;;  %v6329_v56 = vsub.f32 1.5, %v6328_v47  ;;  %v6347_v26 = vmul.f32 %v14453_v18, %v6346_v23  ;;  %v6437_v11 = vmul.f32 %v6304_v5, %v17170_v34  ;;  %v14503_v27 = vld [vmem:[#allocation10 + $0x3] ss:$0 sm:$0xff] }
 0x727   : > { %v2289_v63 = vmul.f32 1.442695, %v2261_v9  ;;  %v6881_v3 = vsel %vm6878_vm10, %v6880_v28, %v6876_v46  ;;  %v6857_v21 = vmul.f32 %v6856_v43, %v14242_v24  ;;  %vm6332_vm11 = vweird.f32 %v14433_v1  ;;  %v17175_v46 = vld [vmem:[#allocation93_spill] sm:$0xff] }
 0x728   : > { %v7206_v37 = vmul.f32 %v14487_v32, %v7185_v35  ;;  %v7171_v60 = vadd.f32 1.0, %v8289_v55  ;;  %v6330_v33 = vmul.f32 %v14433_v1, %v6329_v56  ;;  %v6348_v13 = vmul.f32 0.5, %v6347_v26  ;;  %v17177_v55 = vld [vmem:[#allocation36_spill] sm:$0xff] }
 0x729   : > { %v14481_v38 = vpop.eup %8705  ;;  %v6882_v15 = vmul.f32 %v6881_v3, %v6857_v21  ;;  %v17172_v24 = vperm.slane %v14012_v40, 7  ;;  %8707 = vpow2.f32 %v2289_v63  ;;  %v6499_v6 = vmul.f32 0.5, %v14202_v0 }
 0x72a   : > { %17171 = vst [vmem:[#allocation25_spill] sm:$0xff] %v14481_v38  ;;  %v6458_v47 = vmul.f32 %v14496_v51, %v6437_v11  ;;  %vm6331_vm4 = vweird.f32 %v14401_v36  ;;  %v6349_v40 = vsub.f32 1.5, %v6348_v13  ;;  %vm6352_vm12 = vweird.f32 %v14453_v18  ;;  %v17180_v13 = vld [vmem:[#allocation47_spill] sm:$0xff] }
 0x72b   : > { %v2263_v53 = vsub.f32 %v17173_v61, %v17172_v24  ;;  %vm6333_vm15 = vmor %vm6331_vm4, %vm6332_vm11  ;;  %v7187_v23 = vmul.f32 %v7171_v60, %v6499_v6  ;;  %v8291_v7 = vclamps-f32 %v6882_v15, 1.0  ;;  %v6501_v26 = vmul.f32 0.5, %v14231_v31 }
 0x72c   : > { %2323 = vperm.xlu2 %8419, %v14405_v45   ;;  %v6334_v49 = vsel %vm6333_vm15, %v14433_v1, %v6330_v33  ;;  %v14506_v43 = vadd.f32 %v14503_v27, %v6458_v47  ;;  %v6350_v35 = vmul.f32 %v14453_v18, %v6349_v40  ;;  %v17176_v1 = vperm.slane %v14152_v22, 0  ;;  %v17183_v40 = vld [vmem:[#allocation72_spill] sm:$0xff] }
 0x72d   : > { %v2293_v9 = vmul.f32 1.442695, %v2263_v53  ;;  %v6440_v5 = vmul.f32 %v6334_v49, %v17175_v46  ;;  %v7208_v36 = vmul.f32 %v14487_v32, %v7187_v23  ;;  %v7173_v28 = vadd.f32 1.0, %v8291_v7 }
 0x72e   : > { %v3969_v56 = vsub.f32 %v17177_v55, %v17176_v1  ;;  %v14520_v63 = vmul.f32 0.70710677, %v14506_v43  ;;  %vm6351_vm8 = vweird.f32 %v14429_v12  ;;  %v17179_v33 = vperm.slane %v14152_v22, 1 }
 0x72f   : > { %v14508_v0 = vpop.eup %8707  ;;  %8709 = vpow2.f32 %v2293_v9  ;;  %vm6353_vm9 = vmor %vm6351_vm8, %vm6352_vm12  ;;  %v7189_v3 = vmul.f32 %v7173_v28, %v6501_v26  ;;  %v6461_v34 = vmul.f32 %v14496_v51, %v6440_v5  ;;  %v17182_v49 = vperm.slane %v14152_v22, 2  ;;  %v6230_v5 = vpop.xlane.xlu2 %6229 }
 0x730   : > { %17174 = vst [vmem:[#allocation91_spill] sm:$0xff] %v14508_v0  ;;  %v6354_v11 = vsel %vm6353_vm9, %v14453_v18, %v6350_v35  ;;  %v3986_v21 = vmul.f32 1.442695, %v3969_v56  ;;  %v3971_v24 = vsub.f32 %v17180_v13, %v17179_v33  ;;  %v6252_v1 = vmul.f32 %v6230_v5, %v17076_v41 }
 0x731   : > { %v6442_v15 = vmul.f32 %v6354_v11, %v13852_v20  ;;  %v7210_v31 = vmul.f32 %v14487_v32, %v7189_v3  ;;  %v14533_v12 = vadd.f32 %v14503_v27, %v6461_v34  ;;  %v3973_v9 = vsub.f32 %v17183_v40, %v17182_v49  ;;  %v17186_v11 = vld [vmem:[#allocation55_spill] sm:$0xff]  ;;  %v17189_v40 = vld [vmem:[#allocation60_spill] sm:$0xff] }
 0x732   : > { %8711 = vpow2.f32 %v3986_v21  ;;  %v3990_v53 = vmul.f32 1.442695, %v3971_v24  ;;  %v17185_v34 = vperm.slane %v14152_v22, 3  ;;  %v17188_v49 = vperm.slane %v14152_v22, 4 }
 0x733   : > { %v14541_v61 = vmul.f32 0.70710677, %v14533_v12  ;;  %v6463_v20 = vmul.f32 %v14496_v51, %v6442_v15  ;;  %v3994_v35 = vmul.f32 1.442695, %v3973_v9 }
 0x734   : > { %2329 = vperm.xlu2 %8419, %v14438_v58   ;;  %8713 = vpow2.f32 %v3990_v53  ;;  %v3975_v21 = vsub.f32 %v17186_v11, %v17185_v34  ;;  %v3977_v9 = vsub.f32 %v17189_v40, %v17188_v49 }
 0x735   : > { %v14527_v60 = vpop.eup %8709  ;;  %v6725_v23 = vmul.f32 %v14541_v61, %v14541_v61  ;;  %v14551_v7 = vadd.f32 %v14503_v27, %v6463_v20  ;;  %8715 = vpow2.f32 %v3994_v35 }
 0x736   : > { %17178 = vst [vmem:[#allocation58_spill] sm:$0xff] %v14527_v60  ;;  %v3998_v13 = vmul.f32 1.442695, %v3975_v21 }
 0x737   : > { %v14559_v28 = vmul.f32 0.70710677, %v14551_v7 }
 0x738   : > { %v14545_v47 = vpop.eup %8711 }
 0x739   : > { %17181 = vst [vmem:[#allocation50_spill] sm:$0xff] %v14545_v47  ;;  %v6805_v3 = vmul.f32 %v14559_v28, %v14559_v28 }
 0x73a   : > { %v14563_v56 = vpop.eup %8713 }
 0x73b   : > { %17184 = vst [vmem:[#allocation75_spill] sm:$0xff] %v14563_v56  ;;  %v14574_v33 = vmin.f32 %v6805_v3, 16.0  ;;  %v14578_v20 = vpop.eup %8715 }
 0x73c   : > { %2335 = vperm.xlu2 %8419, %v14459_v52   ;;  %17187 = vst [vmem:[#allocation68_spill] sm:$0xff] %v14578_v20 }
 0x743   : > { %7226 = vadd.xlane.f32.xlu1 %v7206_v37  ;;  %v6605_v37 = vmul.f32 %v14520_v63, %v14520_v63 }
 0x744   : > { %2341 = vperm.xlu2 %8419, %v14481_v38  }
 0x745   : > { %v14538_v18 = vmin.f32 %v6605_v37, 16.0  ;;  %v14572_v37 = vadd.f32 1e-05, %v6252_v1 }
 0x747   : > { %v6618_v6 = vmul.f32 3.8918573e-05, %v14538_v18  ;;  %8717 = vrsqrt.f32 %v14572_v37  ;;  %vm6371_vm11 = vweird.f32 %v14572_v37 }
 0x748   : > { %8719 = vpow2.f32 %v3998_v13 }
 0x749   : > { %v6619_v46 = vadd.f32 0.001143296, %v6618_v6  ;;  %v6818_v6 = vmul.f32 3.8918573e-05, %v14574_v33 }
 0x74b   : > { %7230 = vadd.xlane.f32.xlu1 %v7208_v36  ;;  %v14556_v36 = vmin.f32 %v6725_v23, 16.0  ;;  %v6620_v55 = vmul.f32 %v6619_v46, %v14538_v18  ;;  %v14583_v23 = vpop.xlane.xlu2 %6235  ;;  %v6819_v1 = vadd.f32 0.001143296, %v6818_v6 }
 0x74c   : > { %2350 = vperm.xlu2 %8419, %v14508_v0   ;;  %v14608_v0 = vpop.permute.xlu0 %2314 }
 0x74d   : > { %v6738_v26 = vmul.f32 3.8918573e-05, %v14556_v36  ;;  %v6621_v15 = vadd.f32 0.014752088, %v6620_v55  ;;  %v14588_v5 = vpop.eup %8717  ;;  %v4002_v55 = vmul.f32 1.442695, %v3977_v9  ;;  %v6820_v21 = vmul.f32 %v6819_v1, %v14574_v33 }
 0x74e   : > { %v14591_v3 = vpop.eup %8719  ;;  %v6366_v34 = vmul.f32 %v14588_v5, %v14572_v37  ;;  %vm6372_vm10 = vweird.f32 %v14588_v5  ;;  %v6807_v37 = vmul.f32 2.1237322e-06, %v14574_v33 }
 0x74f   : > { %v6622_v24 = vmul.f32 %v6621_v15, %v14538_v18  ;;  %17190 = vst [vmem:[#allocation92_spill] sm:$0xff] %v14591_v3  ;;  %v17191_v15 = vperm.slane %v14152_v22, 6  ;;  %8721 = vpow2.f32 %v4002_v55  ;;  %v6821_v9 = vadd.f32 0.014752088, %v6820_v21  ;;  %vm14637_vm4 = vmor %vm6371_vm11, %vm6372_vm10 }
 0x750   : > { %v6367_v6 = vmul.f32 %v14588_v5, %v6366_v34  ;;  %v17194_v34 = vperm.slane %v14152_v22, 7  ;;  %v17197_v22 = vld [vmem:[#allocation46_spill] sm:$0xff] }
 0x751   : > { %v6623_v46 = vadd.f32 0.112945676, %v6622_v24  ;;  %v6607_v24 = vmul.f32 2.1237322e-06, %v14538_v18 }
 0x752   : > { %v6368_v1 = vmul.f32 0.5, %v6367_v6 }
 0x753   : > { %7234 = vadd.xlane.f32.xlu1 %v7210_v31  ;;  %v6739_v31 = vadd.f32 0.001143296, %v6738_v26  ;;  %v6624_v26 = vmul.f32 %v6623_v46, %v14538_v18  ;;  %v14603_v49 = vpop.xlane.xlu2 %6241  ;;  %v6608_v10 = vadd.f32 0.00028619796, %v6607_v24 }
 0x754   : > { %2356 = vperm.xlu2 %8419, %v14527_v60  }
 0x755   : > { %v6740_v53 = vmul.f32 %v6739_v31, %v14556_v36  ;;  %v17192_v31 = vld [vmem:[#allocation66_spill] sm:$0xff]  ;;  %v14606_v60 = vpop.eup %8721  ;;  %v6609_v21 = vmul.f32 %v6608_v10, %v14538_v18 }
 0x756   : > { %v3980_v13 = vsub.f32 %v17192_v31, %v17191_v15  ;;  %17193 = vst [vmem:[#allocation45_spill] sm:$0xff] %v14606_v60  ;;  %v17195_v15 = vld [vmem:[#allocation89_spill] sm:$0xff] }
 0x757   : > { %v6741_v35 = vadd.f32 0.014752088, %v6740_v53  ;;  %v6625_v53 = vadd.f32 0.4994258, %v6624_v26  ;;  %v6822_v26 = vmul.f32 %v6821_v9, %v14574_v33  ;;  %v17196_v9 = vld [vmem:[#allocation37_spill] sm:$0xff] }
 0x758   : > { %v4008_v46 = vmul.f32 1.442695, %v3980_v13  ;;  %v6369_v13 = vsub.f32 1.5, %v6368_v1 }
 0x759   : > { %v6742_v11 = vmul.f32 %v6741_v35, %v14556_v36  ;;  %v6626_v35 = vmul.f32 %v6625_v53, %v14538_v18  ;;  %v6727_v53 = vmul.f32 2.1237322e-06, %v14556_v36 }
 0x75a   : > { %8723 = vpow2.f32 %v4008_v46  ;;  %v6370_v46 = vmul.f32 %v14588_v5, %v6369_v13 }
 0x75b   : > { %v6743_v40 = vadd.f32 0.112945676, %v6742_v11  ;;  %v3982_v11 = vsub.f32 %v17195_v15, %v17194_v34  ;;  %v14617_v31 = vadd.f32 1.0, %v6626_v35  ;;  %v6610_v34 = vadd.f32 0.0036580483, %v6609_v21  ;;  %v14635_v15 = vpop.permute.xlu0 %2320 }
 0x75c   : > { %4036 = vperm.xlu2 %8419, %v14545_v47   ;;  %v6728_v35 = vadd.f32 0.00028619796, %v6727_v53 }
 0x75d   : > { %v6744_v55 = vmul.f32 %v6743_v40, %v14556_v36  ;;  %v6823_v40 = vadd.f32 0.112945676, %v6822_v26  ;;  %v4012_v38 = vmul.f32 1.442695, %v3982_v11  ;;  %8725 = vrcp.f32 %v14617_v31 }
 0x75e   : > { %v6611_v53 = vmul.f32 %v6610_v34, %v14538_v18  ;;  %vm6633_vm12 = vweird.f32 %v14617_v31 }
 0x75f   : > { %v6824_v26 = vmul.f32 %v6823_v40, %v14574_v33  ;;  %8727 = vpow2.f32 %v4012_v38  ;;  %v6729_v40 = vmul.f32 %v6728_v35, %v14556_v36 }
 0x760   : > { %v14626_v10 = vpop.eup %8723  ;;  %v6612_v34 = vadd.f32 0.05243302, %v6611_v53 }
 0x761   : > { %17198 = vst [vmem:[#allocation42_spill] sm:$0xff] %v14626_v10  ;;  %v6730_v35 = vadd.f32 0.0036580483, %v6729_v40 }
 0x764   : > { %4042 = vperm.xlu2 %8419, %v14563_v56  }
 0x76c   : > { %4048 = vperm.xlu2 %8419, %v14578_v20  }
 0x774   : > { %4054 = vperm.xlu2 %8419, %v14591_v3  }
 0x77c   : > { %4060 = vperm.xlu2 %8419, %v14606_v60   ;;  %v6745_v60 = vadd.f32 0.4994258, %v6744_v55 }
 0x77e   : > { %v6746_v55 = vmul.f32 %v6745_v60, %v14556_v36 }
 0x77f   : > { %v14619_v24 = vpop.xlane.xlu2 %5668 }
 0x780   : > { %v5671_v6 = vperm.slane %v14619_v24, 0  ;;  %v5672_v1 = vperm.slane %v14619_v24, 1  ;;  %v5673_v20 = vperm.slane %v14619_v24, 2 }
 0x782   : > { %v5687_v3 = vsub.f32 %v17196_v9, %v5671_v6  ;;  %v5688_v52 = vsub.f32 %v17197_v22, %v5671_v6  ;;  %v6374_v6 = vsel %vm14637_vm4, %v14588_v5, %v6370_v46  ;;  %v14649_v9 = vpop.eup %8725  ;;  %v5689_v38 = vsub.f32 %v14008_v57, %v5672_v1 }
 0x783   : > { %v14652_v22 = vadd.f32 1.0, %v6746_v55  ;;  %v14655_v11 = vpop.eup %8727  ;;  %v6444_v5 = vmul.f32 %v6374_v6, %v13883_v48  ;;  %v6629_v46 = vmul.f32 %v14649_v9, %v14617_v31  ;;  %v14668_v48 = vpop.permute.xlu0 %2326  ;;  %v6731_v6 = vmul.f32 %v6730_v35, %v14556_v36 }
 0x784   : > { %4069 = vperm.xlu2 %8419, %v14626_v10   ;;  %v5703_v21 = vmul.f32 1.442695, %v5687_v3  ;;  %v5705_v13 = vmul.f32 1.442695, %v5688_v52  ;;  %v6825_v52 = vadd.f32 0.4994258, %v6824_v26  ;;  %v5690_v3 = vsub.f32 %v13985_v19, %v5672_v1 }
 0x785   : > { %17201 = vst [vmem:[#allocation39_spill] sm:$0xff] %v14655_v11  ;;  %v6808_v10 = vadd.f32 0.00028619796, %v6807_v37  ;;  %v5707_v57 = vmul.f32 1.442695, %v5689_v38  ;;  %v6630_v53 = vsub.f32 1.0, %v6629_v46  ;;  %v6465_v40 = vmul.f32 %v14496_v51, %v6444_v5 }
 0x786   : > { %8729 = vpow2.f32 %v5703_v21  ;;  %v6826_v19 = vmul.f32 %v6825_v52, %v14574_v33  ;;  %v5709_v1 = vmul.f32 1.442695, %v5690_v3  ;;  %v17204_v37 = vld [vmem:[#allocation56_spill] sm:$0xff]  ;;  %v6732_v35 = vadd.f32 0.05243302, %v6731_v6 }
 0x787   : > { %v14645_v60 = vpop.permute.xlu2 %2317  ;;  %8731 = vpow2.f32 %v5705_v13  ;;  %v6613_v13 = vmul.f32 %v6612_v34, %v14538_v18  ;;  %v5691_v38 = vsub.f32 %v17204_v37, %v5673_v20  ;;  %v6809_v52 = vmul.f32 %v6808_v10, %v14574_v33 }
 0x788   : > { %8733 = vrcp.f32 %v14652_v22  ;;  %v14679_v3 = vadd.f32 1.0, %v6826_v19  ;;  %v6631_v46 = vmul.f32 %v14649_v9, %v6630_v53  ;;  %v14686_v5 = vadd.f32 %v14503_v27, %v6465_v40 }
 0x789   : > { %8735 = vpow2.f32 %v5707_v57  ;;  %v6614_v34 = vadd.f32 0.18741608, %v6613_v13  ;;  %v5674_v57 = vperm.slane %v14619_v24, 3  ;;  %v5711_v37 = vmul.f32 1.442695, %v5691_v38 }
 0x78a   : > { %8737 = vpow2.f32 %v5709_v1  ;;  %vm6634_vm15 = vweird.f32 %v14649_v9  ;;  %v6733_v53 = vmul.f32 %v6732_v35, %v14556_v36  ;;  %v14703_v6 = vmul.f32 0.70710677, %v14686_v5 }
 0x78b   : > { %8739 = vrcp.f32 %v14679_v3  ;;  %v6615_v13 = vmul.f32 %v6614_v34, %v14538_v18  ;;  %v6632_v40 = vadd.f32 %v14649_v9, %v6631_v46  ;;  %v6639_v34 = vand.u32 2147483648, %v14617_v31  ;;  %vm14719_vm8 = vmor %vm6633_vm12, %vm6634_vm15 }
 0x78c   : > { %4075 = vperm.xlu2 %8419, %v14655_v11   ;;  %v14664_v55 = vpop.eup %8729  ;;  %8741 = vpow2.f32 %v5711_v37  ;;  %vm6753_vm11 = vweird.f32 %v14652_v22 }
 0x78d   : > { %17202 = vst [vmem:[#allocation57_spill] sm:$0xff] %v14664_v55  ;;  %v14666_v26 = vpop.eup %8731  ;;  %5752 = vperm.xlu0 %8415, %v14664_v55   ;;  %v5692_v55 = vsub.f32 %v14024_v17, %v5673_v20  ;;  %v6616_v37 = vadd.f32 1.1283791, %v6615_v13  ;;  %v6640_v13 = vor.u32 1.1754944e-38, %v6639_v34 }
 0x78e   : > { %17203 = vst [vmem:[#allocation53_spill] sm:$0xff] %v14666_v26  ;;  %5755 = vperm.xlu1 %8418, %v14666_v26   ;;  %v14682_v11 = vpop.eup %8733  ;;  %v6810_v26 = vadd.f32 0.0036580483, %v6809_v52  ;;  %v14709_v52 = vpop.permute.xlu0 %2332 }
 0x78f   : > { %v14671_v21 = vpop.permute.xlu2 %2323  ;;  %v5713_v10 = vmul.f32 1.442695, %v5692_v55  ;;  %v6749_v17 = vmul.f32 %v14682_v11, %v14652_v22  ;;  %v14692_v20 = vpop.eup %8735  ;;  %v5693_v55 = vsub.f32 %v13994_v2, %v5674_v57  ;;  %v6637_v2 = vand.u32 2147483647, %v14617_v31 }
 0x790   : > { %17205 = vst [vmem:[#allocation62_spill] sm:$0xff] %v14692_v20  ;;  %v14694_v19 = vpop.eup %8737  ;;  %v6811_v38 = vmul.f32 %v6810_v26, %v14574_v33  ;;  %v6734_v26 = vadd.f32 0.18741608, %v6733_v53  ;;  %vm6754_vm10 = vweird.f32 %v14682_v11 }
 0x791   : > { %17206 = vst [vmem:[#allocation64_spill] sm:$0xff] %v14694_v19  ;;  %8743 = vpow2.f32 %v5713_v10  ;;  %v6750_v35 = vsub.f32 1.0, %v6749_v17  ;;  %v14713_v58 = vpop.eup %8739  ;;  %v5675_v10 = vperm.slane %v14619_v24, 4  ;;  %v5715_v17 = vmul.f32 1.442695, %v5693_v55  ;;  %vm14760_vm4 = vmor %vm6753_vm11, %vm6754_vm10 }
 0x792   : > { %v6829_v45 = vmul.f32 %v14713_v58, %v14679_v3  ;;  %v14732_v47 = vpop.eup %8741  ;;  %vm6638_vm9 = vcmp.eq.f32.partialorder %v6637_v2, 8.507059e+37  ;;  %vm6834_vm12 = vweird.f32 %v14713_v58 }
 0x793   : > { %v6751_v56 = vmul.f32 %v14682_v11, %v6750_v35  ;;  %v5695_v34 = vsub.f32 %v14039_v50, %v5675_v10  ;;  %8745 = vpow2.f32 %v5715_v17  ;;  %v5696_v2 = vsub.f32 %v14004_v14, %v5675_v10 }
 0x794   : > { %v6757_v50 = vand.u32 2147483647, %v14652_v22 }
 0x795   : > { %5758 = vperm.xlu0 %8415, %v14692_v20   ;;  %v17207_v20 = vld [vmem:[#allocation76_spill] sm:$0xff]  ;;  %v6752_v46 = vadd.f32 %v14682_v11, %v6751_v56  ;;  %v5677_v56 = vperm.slane %v14619_v24, 6  ;;  %v5721_v10 = vmul.f32 1.442695, %v5696_v2 }
 0x796   : > { %5761 = vperm.xlu1 %8418, %v14694_v19   ;;  %v5694_v18 = vsub.f32 %v17207_v20, %v5674_v57  ;;  %v6885_v57 = vmul.f32 %v14703_v6, %v14703_v6  ;;  %v6636_v20 = vsel %vm14719_vm8, %v14649_v9, %v6632_v40  ;;  %v6812_v19 = vadd.f32 0.05243302, %v6811_v38 }
 0x797   : > { %v14697_v1 = vpop.permute.xlu2 %2329  ;;  %v14734_v53 = vpop.eup %8743  ;;  %v6617_v9 = vmul.f32 %v6616_v37, %v14520_v63  ;;  %v6641_v40 = vsel %vm6638_vm9, %v6640_v13, %v6636_v20  ;;  %v6735_v38 = vmul.f32 %v6734_v26, %v14556_v36  ;;  %v6830_v63 = vsub.f32 1.0, %v6829_v45 }
 0x798   : > { %v5717_v31 = vmul.f32 1.442695, %v5694_v18  ;;  %v14743_v18 = vmin.f32 %v6885_v57, 16.0  ;;  %v6813_v35 = vmul.f32 %v6812_v19, %v14574_v33  ;;  %v6759_v36 = vand.u32 2147483648, %v14652_v22  ;;  %v14752_v26 = vpop.permute.xlu0 %2338 }
 0x799   : > { %v6642_v37 = vmul.f32 %v6641_v40, %v6617_v9  ;;  %v6736_v57 = vadd.f32 1.1283791, %v6735_v38  ;;  %v5719_v20 = vmul.f32 1.442695, %v5695_v34  ;;  %v6831_v22 = vmul.f32 %v14713_v58, %v6830_v63  ;;  %v14769_v13 = vpop.eup %8745  ;;  %v14773_v34 = vpop.permute.xlu1 %4033 }
 0x79a   : > { %8747 = vpow2.f32 %v5717_v31  ;;  %v6898_v17 = vmul.f32 3.8918573e-05, %v14743_v18  ;;  %v6814_v45 = vadd.f32 0.18741608, %v6813_v35  ;;  %v6756_v31 = vsel %vm14760_vm4, %v14682_v11, %v6752_v46  ;;  %17212 = vst [vmem:[#allocation74_spill] sm:$0xff] %v14769_v13 }
 0x79b   : > { %v8285_v9 = vclamps-f32 %v6642_v37, 1.0  ;;  %v6760_v40 = vor.u32 1.1754944e-38, %v6759_v36  ;;  %v6737_v2 = vmul.f32 %v6736_v57, %v14541_v61  ;;  %vm6758_vm15 = vcmp.eq.f32.partialorder %v6757_v50, 8.507059e+37 }
 0x79c   : > { %v6899_v19 = vadd.f32 0.001143296, %v6898_v17  ;;  %v17213_v11 = vperm.slane %v14619_v24, 5  ;;  %8749 = vpow2.f32 %v5719_v20  ;;  %v6815_v37 = vmul.f32 %v6814_v45, %v14574_v33 }
 0x79d   : > { %5764 = vperm.xlu0 %8415, %v14732_v47   ;;  %v6761_v63 = vsel %vm6758_vm15, %v6760_v40, %v6756_v31  ;;  %v5699_v36 = vsub.f32 %v14020_v16, %v5677_v56  ;;  %8751 = vpow2.f32 %v5721_v10  ;;  %v6832_v14 = vadd.f32 %v14713_v58, %v6831_v22 }
 0x79e   : > { %5767 = vperm.xlu1 %8418, %v14734_v53   ;;  %v5698_v46 = vsub.f32 %v14049_v59, %v17213_v11  ;;  %v7167_v61 = vadd.f32 1.0, %v8285_v9  ;;  %v6839_v57 = vand.u32 2147483648, %v14679_v3  ;;  %v6762_v50 = vmul.f32 %v6761_v63, %v6737_v2  ;;  %v17218_v63 = vld [vmem:[#allocation81_spill] sm:$0xff] }
 0x79f   : > { %v14739_v55 = vpop.permute.xlu2 %2335  ;;  %vm6833_vm8 = vweird.f32 %v14679_v3  ;;  %v6837_v59 = vand.u32 2147483647, %v14679_v3  ;;  %v6900_v17 = vmul.f32 %v6899_v19, %v14743_v18  ;;  %v6495_v33 = vmul.f32 0.5, %v14506_v43 }
 0x7a0   : > { %v14771_v38 = vpop.eup %8747  ;;  %v5725_v20 = vmul.f32 1.442695, %v5698_v46  ;;  %vm14792_vm9 = vmor %vm6833_vm8, %vm6834_vm12  ;;  %v14796_v45 = vpop.permute.xlu0 %2347  ;;  %v5678_v10 = vperm.slane %v14619_v24, 7  ;;  %v5727_v31 = vmul.f32 1.442695, %v5699_v36  ;;  %v6840_v19 = vor.u32 1.1754944e-38, %v6839_v57 }
 0x7a1   : > { %v6816_v22 = vadd.f32 1.1283791, %v6815_v37  ;;  %v6836_v9 = vsel %vm14792_vm9, %v14713_v58, %v6832_v14  ;;  %v7183_v2 = vmul.f32 %v7167_v61, %v6495_v33  ;;  %v8288_v11 = vclamps-f32 %v6762_v50, 1.0  ;;  %v14811_v58 = vpop.permute.xlu1 %4039 }
 0x7a2   : > { %v14802_v3 = vpop.eup %8749  ;;  %vm6838_vm10 = vcmp.eq.f32.partialorder %v6837_v59, 8.507059e+37  ;;  %v6901_v46 = vadd.f32 0.014752088, %v6900_v17  ;;  %v5700_v36 = vsub.f32 %v17218_v63, %v5677_v56  ;;  %8753 = vpow2.f32 %v5725_v20 }
 0x7a3   : > { %17216 = vst [vmem:[#allocation65_spill] sm:$0xff] %v14802_v3  ;;  %v14804_v40 = vpop.eup %8751  ;;  %v6841_v37 = vsel %vm6838_vm10, %v6840_v19, %v6836_v9  ;;  %v5701_v14 = vsub.f32 %v14059_v25, %v5678_v10  ;;  %8755 = vpow2.f32 %v5727_v31  ;;  %v6817_v57 = vmul.f32 %v6816_v22, %v14559_v28 }
 0x7a4   : > { %17217 = vst [vmem:[#allocation93_spill] sm:$0xff] %v14804_v40  ;;  %v7204_v16 = vmul.f32 %v14487_v32, %v7183_v2  ;;  %v6902_v50 = vmul.f32 %v6901_v46, %v14743_v18  ;;  %v5729_v59 = vmul.f32 1.442695, %v5700_v36  ;;  %v6498_v56 = vmul.f32 0.5, %v14533_v12 }
 0x7a5   : > { %5770 = vperm.xlu0 %8415, %v14769_v13   ;;  %v6842_v61 = vmul.f32 %v6841_v37, %v6817_v57  ;;  %v5731_v17 = vmul.f32 1.442695, %v5701_v14  ;;  %v5702_v19 = vsub.f32 %v14035_v62, %v5678_v10  ;;  %v2365_v12 = vperm.slane %v14671_v21, %v13789_v4 }
 0x7a6   : > { %5773 = vperm.xlu1 %8418, %v14771_v38   ;;  %v6903_v22 = vadd.f32 0.112945676, %v6902_v50  ;;  %8757 = vpow2.f32 %v5729_v59  ;;  %v2364_v62 = vperm.slane %v14635_v15, %v13782_v54  ;;  %v2362_v36 = vperm.slane %v14645_v60, %v13789_v4 }
 0x7a7   : > { %v14776_v35 = vpop.permute.xlu2 %2341  ;;  %v8290_v31 = vclamps-f32 %v6842_v61, 1.0  ;;  %8759 = vpow2.f32 %v5731_v17  ;;  %v5733_v10 = vmul.f32 1.442695, %v5702_v19  ;;  %v2371_v21 = vperm.slane %v14739_v55, %v13789_v4 }
 0x7a8   : > { %v14818_v20 = vpop.eup %8753  ;;  %v2354_v9 = vpop.permute.xlu0 %2353  ;;  %v2367_v37 = vperm.slane %v14668_v48, %v13782_v54  ;;  %v6500_v14 = vmul.f32 0.5, %v14551_v7  ;;  %v2361_v15 = vperm.slane %v14608_v0, %v13782_v54  ;;  %v2370_v60 = vperm.slane %v14709_v52, %v13782_v54 }
 0x7a9   : > { %17219 = vst [vmem:[#allocation36_spill] sm:$0xff] %v14818_v20  ;;  %v14820_v33 = vpop.eup %8755  ;;  %v14827_v2 = vpop.permute.xlu1 %4045  ;;  %v7172_v63 = vadd.f32 1.0, %v8290_v31  ;;  %v2373_v48 = vperm.slane %v14752_v26, %v13782_v54  ;;  %8761 = vpow2.f32 %v5733_v10  ;;  %v2377_v31 = vperm.slane %v14796_v45, %v13789_v4 }
 0x7aa   : > { %17220 = vst [vmem:[#allocation47_spill] sm:$0xff] %v14820_v33  ;;  %v2363_v0 = vsel %vm16698_vm13, %v2362_v36, %v2361_v15  ;;  %v2372_v50 = vsel %vm16698_vm13, %v2371_v21, %v2370_v60 }
 0x7ab   : > { %v7188_v61 = vmul.f32 %v7172_v63, %v6500_v14  ;;  %v2376_v63 = vperm.slane %v14736_v42, %v13782_v54 }
 0x7ac   : > { %v14844_v57 = vpop.eup %8757 }
 0x7ad   : > { %5776 = vperm.xlu0 %8415, %v14802_v3   ;;  %v7170_v3 = vadd.f32 1.0, %v8288_v11  ;;  %v2368_v11 = vperm.slane %v14697_v1, %v13789_v4  ;;  %v2374_v1 = vperm.slane %v14776_v35, %v13789_v4  ;;  %17221 = vst [vmem:[#allocation72_spill] sm:$0xff] %v14844_v57  ;;  %v14851_v55 = vpop.eup %8759  ;;  %v2378_v36 = vsel %vm16698_vm13, %v2377_v31, %v2376_v63 }
 0x7ae   : > { %5779 = vperm.xlu1 %8418, %v14804_v40   ;;  %17222 = vst [vmem:[#allocation55_spill] sm:$0xff] %v14851_v55 }
 0x7af   : > { %v14807_v43 = vpop.permute.xlu2 %2350  ;;  %v7186_v28 = vmul.f32 %v7170_v3, %v6498_v56  ;;  %v6904_v3 = vmul.f32 %v6903_v22, %v14743_v18  ;;  %v2369_v35 = vsel %vm16698_vm13, %v2368_v11, %v2367_v37  ;;  %v2375_v26 = vsel %vm16698_vm13, %v2374_v1, %v2373_v48 }
 0x7b0   : > { %v2360_v59 = vpop.permute.xlu0 %2359  ;;  %v2379_v56 = vperm.slane %v14807_v43, %v13782_v54 }
 0x7b1   : > { %v7207_v46 = vmul.f32 %v14487_v32, %v7186_v28  ;;  %v6905_v52 = vadd.f32 0.4994258, %v6904_v3  ;;  %v6887_v28 = vmul.f32 2.1237322e-06, %v14743_v18  ;;  %v2383_v43 = vperm.slane %v2360_v59, %v13789_v4  ;;  %v14879_v45 = vpop.permute.xlu1 %4051 }
 0x7b5   : > { %7222 = vadd.xlane.f32.xlu2 %v7204_v16  ;;  %5785 = vperm.xlu0 %8415, %v14818_v20   ;;  %v2366_v16 = vsel %vm16698_vm13, %v2365_v12, %v2364_v62  ;;  %v2380_v12 = vperm.slane %v2354_v9, %v13789_v4  ;;  %v6906_v62 = vmul.f32 %v6905_v52, %v14743_v18  ;;  %v14882_v9 = vpop.eup %8761 }
 0x7b6   : > { %5788 = vperm.xlu1 %8418, %v14820_v33   ;;  %v2385_v17 = vsel %vm2213_vm14, %v2366_v16, %v2363_v0  ;;  %17223 = vst [vmem:[#allocation60_spill] sm:$0xff] %v14882_v9  ;;  %v8435_v16 = vld [vmem:[%s16494_s7 + $0x3] ss:$0 sm:$0xff] }
 0x7b7   : > { %v2357_v25 = vpop.permute.xlu2 %2356  ;;  %v2386_v22 = vsel %vm2215_vm0, %v2369_v35, %v2385_v17  ;;  %v2381_v10 = vsel %vm16698_vm13, %v2380_v12, %v2379_v56  ;;  %v6907_v14 = vadd.f32 1.0, %v6906_v62 }
 0x7b8   : > { %v2382_v19 = vperm.slane %v2357_v25, %v13782_v54  ;;  %v2387_v11 = vsel %vm2217_vm1, %v2372_v50, %v2386_v22  ;;  %v6888_v25 = vadd.f32 0.00028619796, %v6887_v28 }
 0x7b9   : > { %v2388_v3 = vsel %vm2219_vm2, %v2375_v26, %v2387_v11  ;;  %8763 = vrcp.f32 %v6907_v14  ;;  %v6919_v63 = vand.u32 2147483648, %v6907_v14  ;;  %vm6913_vm4 = vweird.f32 %v6907_v14 }
 0x7ba   : > { %v2384_v21 = vsel %vm16698_vm13, %v2383_v43, %v2382_v19  ;;  %v2389_v37 = vsel %vm16699_vm3, %v2378_v36, %v2388_v3  ;;  %v6889_v60 = vmul.f32 %v6888_v25, %v14743_v18  ;;  %v6917_v3 = vand.u32 2147483647, %v6907_v14 }
 0x7bb   : > { %v2390_v1 = vsel %vm16700_vm5, %v2381_v10, %v2389_v37 }
 0x7bc   : > { %v2391_v15 = vsel %vm2225_vm6, %v2384_v21, %v2390_v1  ;;  %v6890_v35 = vadd.f32 0.0036580483, %v6889_v60  ;;  %vm6918_vm12 = vcmp.eq.f32.partialorder %v6917_v3, 8.507059e+37 }
 0x7bd   : > { %7228 = vadd.xlane.f32.xlu2 %v7207_v46  ;;  %5791 = vperm.xlu0 %8415, %v14844_v57   ;;  %v7209_v46 = vmul.f32 %v14487_v32, %v7188_v61  ;;  %v2393_v48 = vsel %vm2228_vm7, %v2391_v15, 0.0  ;;  %v4058_v61 = vpop.permute.xlu1 %4057 }
 0x7be   : > { %5794 = vperm.xlu1 %8418, %v14851_v55   ;;  %v6891_v50 = vmul.f32 %v6890_v35, %v14743_v18 }
 0x7bf   : > { %v14857_v7 = vpop.permute.xlu2 %4036  ;;  %v8764_v52 = vpop.eup %8763 }
 0x7c0   : > { %v6892_v59 = vadd.f32 0.05243302, %v6891_v50  ;;  %v6909_v17 = vmul.f32 %v8764_v52, %v6907_v14  ;;  %vm6914_vm11 = vweird.f32 %v8764_v52  ;;  %v4081_v37 = vperm.slane %v14857_v7, %v13789_v4 }
 0x7c1   : > { %vm14899_vm15 = vmor %vm6913_vm4, %vm6914_vm11  ;;  %v6920_v14 = vor.u32 1.1754944e-38, %v6919_v63  ;;  %v4092_v7 = vperm.slane %v4058_v61, %v13782_v54 }
 0x7c2   : > { %v6893_v28 = vmul.f32 %v6892_v59, %v14743_v18  ;;  %v6910_v31 = vsub.f32 1.0, %v6909_v17  ;;  %v4067_v59 = vpop.permute.xlu0 %4066 }
 0x7c4   : > { %v6894_v22 = vadd.f32 0.18741608, %v6893_v28  ;;  %v6911_v19 = vmul.f32 %v8764_v52, %v6910_v31 }
 0x7c5   : > { %7232 = vadd.xlane.f32.xlu2 %v7209_v46  ;;  %5797 = vperm.xlu0 %8415, %v14882_v9   ;;  %v4064_v56 = vpop.permute.xlu1 %4063 }
 0x7c6   : > { %v6895_v11 = vmul.f32 %v6894_v22, %v14743_v18  ;;  %v6912_v46 = vadd.f32 %v8764_v52, %v6911_v19  ;;  %v4083_v18 = vperm.slane %v14811_v58, %v13782_v54  ;;  %v4095_v28 = vperm.slane %v4064_v56, %v13782_v54 }
 0x7c7   : > { %v4043_v42 = vpop.permute.xlu2 %4042  ;;  %v4096_v19 = vperm.slane %v4067_v59, %v13789_v4 }
 0x7c8   : > { %v4084_v62 = vperm.slane %v4043_v42, %v13789_v4  ;;  %v6896_v36 = vadd.f32 1.1283791, %v6895_v11  ;;  %v6916_v21 = vsel %vm14899_vm15, %v8764_v52, %v6912_v46  ;;  %v4086_v42 = vperm.slane %v14827_v2, %v13782_v54 }
 0x7c9   : > { %v6921_v35 = vsel %vm6918_vm12, %v6920_v14, %v6916_v21  ;;  %v4097_v3 = vsel %vm16698_vm13, %v4096_v19, %v4095_v28 }
 0x7ca   : > { %v4085_v58 = vsel %vm16698_vm13, %v4084_v62, %v4083_v18  ;;  %v6897_v50 = vmul.f32 %v6896_v36, %v14703_v6  ;;  %v14956_v59 = vpop.xlane.xlu0 %7224 }
 0x7cb   : > { %17230 = vst [vmem:[#allocation37_spill] sm:$0xff] %v14956_v59 }
 0x7cd   : > { %2394 = vadd.xlane.f32.xlu2 %v2393_v48  ;;  %7255 = vperm.xlu0 %8415, %v8435_v16   ;;  %v4073_v43 = vpop.permute.xlu1 %4072  ;;  %v4080_v16 = vperm.slane %v14773_v34, %v13782_v54  ;;  %v4089_v48 = vperm.slane %v14879_v45, %v13782_v54 }
 0x7ce   : > { %v4099_v31 = vperm.slane %v4073_v43, %v13789_v4 }
 0x7cf   : > { %v4049_v0 = vpop.permute.xlu2 %4048  ;;  %v4082_v2 = vsel %vm16698_vm13, %v4081_v37, %v4080_v16  ;;  %v6502_v37 = vmul.f32 0.5, %v14686_v5  ;;  %v6255_v16 = vmul.f32 %v14583_v23, %v17076_v41 }
 0x7d0   : > { %v4087_v25 = vperm.slane %v4049_v0, %v13789_v4  ;;  %v4104_v17 = vsel %vm2213_vm14, %v4085_v58, %v4082_v2 }
 0x7d1   : > { %v6271_v58 = vadd.f32 1e-05, %v6255_v16 }
 0x7d2   : > { %v4088_v0 = vsel %vm16698_vm13, %v4087_v25, %v4086_v42  ;;  %v17226_v42 = vperm.slane %v14619_v24, 5 }
 0x7d3   : > { %v4105_v61 = vsel %vm2215_vm0, %v4088_v0, %v4104_v17  ;;  %vm6401_vm9 = vweird.f32 %v6271_v58 }
 0x7d5   : > { %v4079_v22 = vpop.permute.xlu1 %4078 }
 0x7d6   : > { %v4102_v62 = vperm.slane %v4079_v22, %v13789_v4 }
 0x7d7   : > { %v4055_v26 = vpop.permute.xlu2 %4054 }
 0x7d8   : > { %v4090_v1 = vperm.slane %v4055_v26, %v13789_v4  ;;  %v6922_v26 = vmul.f32 %v6921_v35, %v6897_v50  ;;  %v6257_v35 = vmul.f32 %v13996_v44, %v17076_v41 }
 0x7da   : > { %v4091_v52 = vsel %vm16698_vm13, %v4090_v1, %v4089_v48  ;;  %v8292_v63 = vclamps-f32 %v6922_v26, 1.0 }
 0x7db   : > { %v4106_v6 = vsel %vm2217_vm1, %v4091_v52, %v4105_v61 }
 0x7dc   : > { %v7174_v21 = vadd.f32 1.0, %v8292_v63 }
 0x7dd   : > { %v14954_v24 = vpop.xlane.xlu1 %7226 }
 0x7de   : > { %v7190_v1 = vmul.f32 %v7174_v21, %v6502_v37  ;;  %17229 = vst [vmem:[#allocation89_spill] sm:$0xff] %v14954_v24 }
 0x7df   : > { %v4061_v12 = vpop.permute.xlu2 %4060 }
 0x7e0   : > { %v4093_v15 = vperm.slane %v4061_v12, %v13789_v4  ;;  %v7211_v14 = vmul.f32 %v14487_v32, %v7190_v1 }
 0x7e2   : > { %v4094_v34 = vsel %vm16698_vm13, %v4093_v15, %v4092_v7  ;;  %v17227_v15 = vld [vmem:[#allocation51_spill] sm:$0xff]  ;;  %v6273_v7 = vadd.f32 1e-05, %v6257_v35 }
 0x7e3   : > { %v4107_v12 = vsel %vm2219_vm2, %v4094_v34, %v4106_v6 }
 0x7e4   : > { %v4108_v10 = vsel %vm16699_vm3, %v4097_v3, %v4107_v12  ;;  %vm6421_vm4 = vweird.f32 %v6273_v7 }
 0x7e5   : > { %v14958_v44 = vpop.xlane.xlu1 %7230 }
 0x7e6   : > { %17231 = vst [vmem:[#allocation46_spill] sm:$0xff] %v14958_v44 }
 0x7e7   : > { %v4070_v60 = vpop.permute.xlu2 %4069 }
 0x7e8   : > { %v4098_v45 = vperm.slane %v4070_v60, %v13782_v54  ;;  %v5697_v60 = vsub.f32 %v17227_v15, %v17226_v42 }
 0x7ea   : > { %v4100_v11 = vsel %vm16698_vm13, %v4099_v31, %v4098_v45  ;;  %v5723_v48 = vmul.f32 1.442695, %v5697_v60 }
 0x7eb   : > { %v4109_v25 = vsel %vm16700_vm5, %v4100_v11, %v4108_v10  ;;  %v17235_v10 = vld [vmem:[#allocation96_spill] sm:$0xff] }
 0x7ec   : > { %8765 = vpow2.f32 %v5723_v48 }
 0x7ed   : > { %8767 = vrsqrt.f32 %v6271_v58  ;;  %v14965_v19 = vpop.xlane.xlu1 %7234 }
 0x7ee   : > { %8769 = vrsqrt.f32 %v6273_v7  ;;  %17233 = vst [vmem:[#allocation76_spill] sm:$0xff] %v14965_v19 }
 0x7ef   : > { %v4076_v46 = vpop.permute.xlu2 %4075 }
 0x7f0   : > { %v4101_v56 = vperm.slane %v4076_v46, %v13782_v54  ;;  %v6254_v46 = vmul.f32 %v13988_v29, %v17076_v41  ;;  %v6256_v29 = vmul.f32 %v14129_v39, %v17076_v41 }
 0x7f2   : > { %v4103_v43 = vsel %vm16698_vm13, %v4102_v62, %v4101_v56  ;;  %v14951_v5 = vpop.eup %8765  ;;  %v14974_v56 = vadd.f32 1e-05, %v6254_v46  ;;  %v14991_v37 = vadd.f32 1e-05, %v6256_v29 }
 0x7f3   : > { %v4110_v36 = vsel %vm2225_vm6, %v4103_v43, %v4109_v25  ;;  %17228 = vst [vmem:[#allocation66_spill] sm:$0xff] %v14951_v5  ;;  %v8768_v0 = vpop.eup %8767 }
 0x7f4   : > { %v4112_v18 = vsel %vm2228_vm7, %v4110_v36, 0.0  ;;  %v6396_v32 = vmul.f32 %v8768_v0, %v6271_v58  ;;  %v8770_v2 = vpop.eup %8769  ;;  %vm6402_vm8 = vweird.f32 %v8768_v0  ;;  %8771 = vrsqrt.f32 %v14974_v56 }
 0x7f5   : > { %4113 = vadd.xlane.f32.xlu2 %v4112_v18  ;;  %v6416_v23 = vmul.f32 %v8770_v2, %v6273_v7  ;;  %vm6403_vm10 = vmor %vm6401_vm9, %vm6402_vm8  ;;  %vm6422_vm11 = vweird.f32 %v8770_v2  ;;  %8773 = vrsqrt.f32 %v14991_v37 }
 0x7f6   : > { %v6397_v50 = vmul.f32 %v8768_v0, %v6396_v32  ;;  %vm6423_vm15 = vmor %vm6421_vm4, %vm6422_vm11 }
 0x7f7   : > { %v6417_v17 = vmul.f32 %v8770_v2, %v6416_v23 }
 0x7f8   : > { %v6398_v52 = vmul.f32 0.5, %v6397_v50 }
 0x7f9   : > { %v6418_v45 = vmul.f32 0.5, %v6417_v17 }
 0x7fa   : > { %v6399_v34 = vsub.f32 1.5, %v6398_v52  ;;  %v15002_v39 = vpop.eup %8771 }
 0x7fb   : > { %v6419_v31 = vsub.f32 1.5, %v6418_v45  ;;  %v6386_v35 = vmul.f32 %v15002_v39, %v14974_v56 }
 0x7fc   : > { %v6400_v26 = vmul.f32 %v8768_v0, %v6399_v34 }
 0x7fd   : > { %7236 = vadd.xlane.f32.xlu2 %v7211_v14  ;;  %v6420_v12 = vmul.f32 %v8770_v2, %v6419_v31  ;;  %v6387_v23 = vmul.f32 %v15002_v39, %v6386_v35 }
 0x7fe   : > { %v6404_v22 = vsel %vm6403_vm10, %v8768_v0, %v6400_v26  ;;  %v6258_v0 = vmul.f32 %v14603_v49, %v17076_v41 }
 0x7ff   : > { %v14962_v61 = vpop.permute.xlu0 %5752  ;;  %v6447_v6 = vmul.f32 %v6404_v22, %v13889_v30  ;;  %v6424_v3 = vsel %vm6423_vm15, %v8770_v2, %v6420_v12  ;;  %v15031_v2 = vpop.eup %8773 }
 0x800   : > { %v6449_v30 = vmul.f32 %v6424_v3, %v17235_v10  ;;  %v14977_v43 = vpop.permute.xlu1 %5755  ;;  %v15042_v49 = vadd.f32 1e-05, %v6258_v0  ;;  %v6406_v3 = vmul.f32 %v15031_v2, %v14991_v37 }
 0x801   : > { %v6468_v63 = vmul.f32 %v14496_v51, %v6447_v6 }
 0x802   : > { %v6470_v18 = vmul.f32 %v14496_v51, %v6449_v30 }
 0x803   : > { %v14980_v25 = vadd.f32 %v14503_v27, %v6468_v63  ;;  %v15052_v63 = vmul.f32 0.5, %v6387_v23 }
 0x804   : > { %v14998_v42 = vadd.f32 %v14503_v27, %v6470_v18 }
 0x805   : > { %v14988_v21 = vmul.f32 0.70710677, %v14980_v25 }
 0x806   : > { %v15017_v27 = vmul.f32 0.70710677, %v14998_v42 }
 0x807   : > { %v14972_v62 = vpop.permute.xlu0 %5758  ;;  %v7005_v14 = vmul.f32 %v14988_v21, %v14988_v21 }
 0x808   : > { %v15004_v60 = vpop.permute.xlu1 %5761  ;;  %v7085_v50 = vmul.f32 %v15017_v27, %v15017_v27 }
 0x809   : > { %v15014_v58 = vmin.f32 %v7005_v14, 16.0 }
 0x80a   : > { %v15050_v46 = vmin.f32 %v7085_v50, 16.0 }
 0x80b   : > { %v7018_v32 = vmul.f32 3.8918573e-05, %v15014_v58 }
 0x80d   : > { %v7019_v12 = vadd.f32 0.001143296, %v7018_v32 }
 0x80f   : > { %v14993_v1 = vpop.permute.xlu0 %5764  ;;  %v7020_v23 = vmul.f32 %v7019_v12, %v15014_v58 }
 0x810   : > { %v15046_v22 = vpop.permute.xlu1 %5767 }
 0x815   : > { %5782 = vperm.xlu2 %8419, %v14951_v5  }
 0x817   : > { %v15035_v17 = vpop.permute.xlu0 %5770 }
 0x81f   : > { %v15073_v9 = vpop.permute.xlu0 %5776 }
 0x828   : > { %v14960_v28 = vpop.xlane.xlu2 %7222 }
 0x829   : > { %17232 = vst [vmem:[#allocation56_spill] sm:$0xff] %v14960_v28 }
 0x830   : > { %v14967_v11 = vpop.xlane.xlu2 %7228 }
 0x831   : > { %17234 = vst [vmem:[#allocation81_spill] sm:$0xff] %v14967_v11 }
 0x838   : > { %v14982_v36 = vpop.xlane.xlu2 %7232 }
 0x839   : > { %17236 = vst [vmem:[#allocation51_spill] sm:$0xff] %v14982_v36 }
 0x840   : > { %v15000_v15 = vpop.xlane.xlu2 %2394 }
 0x841   : > { %v2397_v16 = vperm.slane %v15000_v15, 0  ;;  %v15008_v51 = vperm.slane %v15000_v15, 1  ;;  %v15011_v48 = vperm.slane %v15000_v15, 2  ;;  %v15022_v7 = vperm.slane %v15000_v15, 5 }
 0x842   : > { %v15038_v34 = vperm.slane %v15000_v15, 3  ;;  %v15065_v55 = vperm.slane %v15000_v15, 4 }
 0x843   : > { %8775 = vrcp.f32 %v2397_v16  ;;  %v2422_v30 = vand.u32 2147483647, %v2397_v16  ;;  %v2424_v29 = vand.u32 2147483648, %v2397_v16  ;;  %vm2418_vm8 = vweird.f32 %v2397_v16 }
 0x844   : > { %8777 = vrcp.f32 %v15008_v51  ;;  %v2502_v57 = vand.u32 2147483647, %v15022_v7  ;;  %v2504_v5 = vand.u32 2147483648, %v15022_v7  ;;  %vm2434_vm15 = vweird.f32 %v15008_v51 }
 0x845   : > { %8779 = vrcp.f32 %v15011_v48  ;;  %vm2423_vm10 = vcmp.eq.f32.partialorder %v2422_v30, 8.507059e+37  ;;  %v2440_v30 = vand.u32 2147483648, %v15008_v51 }
 0x846   : > { %8781 = vrcp.f32 %v15022_v7 }
 0x847   : > { %8783 = vrcp.f32 %v15038_v34  ;;  %v2441_v59 = vor.u32 1.1754944e-38, %v2440_v30 }
 0x848   : > { %8785 = vrsqrt.f32 %v15042_v49 }
 0x849   : > { %v8776_v52 = vpop.eup %8775  ;;  %8787 = vrcp.f32 %v15065_v55 }
 0x84a   : > { %v15040_v45 = vpop.eup %8777  ;;  %v2414_v26 = vmul.f32 %v8776_v52, %v2397_v16  ;;  %vm2419_vm12 = vweird.f32 %v8776_v52 }
 0x84b   : > { %v15044_v31 = vpop.eup %8779  ;;  %v2430_v6 = vmul.f32 %v15040_v45, %v15008_v51  ;;  %vm2420_vm9 = vmor %vm2418_vm8, %vm2419_vm12  ;;  %vm2435_vm11 = vweird.f32 %v15040_v45  ;;  %vm2498_vm12 = vweird.f32 %v15022_v7 }
 0x84c   : > { %v2415_v10 = vsub.f32 1.0, %v2414_v26  ;;  %v8782_v14 = vpop.eup %8781  ;;  %v2446_v0 = vmul.f32 %v15044_v31, %v15011_v48  ;;  %v7098_v26 = vmul.f32 3.8918573e-05, %v15050_v46  ;;  %vm15090_vm8 = vmor %vm2434_vm15, %vm2435_vm11  ;;  %vm2450_vm15 = vweird.f32 %v15011_v48 }
 0x84d   : > { %v2431_v18 = vsub.f32 1.0, %v2430_v6  ;;  %v2494_v32 = vmul.f32 %v8782_v14, %v15022_v7  ;;  %v15071_v40 = vpop.eup %8783  ;;  %vm2499_vm4 = vweird.f32 %v8782_v14  ;;  %v6407_v7 = vmul.f32 %v15031_v2, %v6406_v3 }
 0x84e   : > { %v2416_v35 = vmul.f32 %v8776_v52, %v2415_v10  ;;  %v2425_v10 = vor.u32 1.1754944e-38, %v2424_v29  ;;  %v2447_v12 = vsub.f32 1.0, %v2446_v0  ;;  %v15078_v29 = vpop.eup %8785  ;;  %v7021_v0 = vadd.f32 0.014752088, %v7020_v23 }
 0x84f   : > { %v2432_v50 = vmul.f32 %v15040_v45, %v2431_v18  ;;  %v2495_v33 = vsub.f32 1.0, %v2494_v32  ;;  %v17237_v32 = vld [vmem:[#allocation82_spill] sm:$0xff]  ;;  %v15114_v30 = vpop.eup %8787 }
 0x850   : > { %v2417_v6 = vadd.f32 %v8776_v52, %v2416_v35  ;;  %v2448_v23 = vmul.f32 %v15044_v31, %v2447_v12 }
 0x851   : > { %v2433_v18 = vadd.f32 %v15040_v45, %v2432_v50  ;;  %v2496_v16 = vmul.f32 %v8782_v14, %v2495_v33  ;;  %v2438_v50 = vand.u32 2147483647, %v15008_v51 }
 0x852   : > { %v2421_v20 = vsel %vm2420_vm9, %v8776_v52, %v2417_v6  ;;  %v15084_v6 = vpop.permute.xlu1 %5773  ;;  %vm2500_vm9 = vmor %vm2498_vm12, %vm2499_vm4  ;;  %v2449_v3 = vadd.f32 %v15044_v31, %v2448_v23  ;;  %vm2451_vm4 = vweird.f32 %v15044_v31  ;;  %v15123_v23 = vpop.permute.xlu0 %5785 }
 0x853   : > { %v15075_v35 = vsel %vm2423_vm10, %v2425_v10, %v2421_v20  ;;  %v2497_v20 = vadd.f32 %v8782_v14, %v2496_v16  ;;  %v7099_v10 = vadd.f32 0.001143296, %v7098_v26  ;;  %v2437_v51 = vsel %vm15090_vm8, %v15040_v45, %v2433_v18  ;;  %vm15125_vm12 = vmor %vm2450_vm15, %vm2451_vm4 }
 0x854   : > { %v2427_v52 = vmul.f32 %v17237_v32, %v15075_v35  ;;  %v2505_v32 = vor.u32 1.1754944e-38, %v2504_v5  ;;  %v2462_v16 = vmul.f32 %v15071_v40, %v15038_v34  ;;  %vm2503_vm10 = vcmp.eq.f32.partialorder %v2502_v57, 8.507059e+37  ;;  %v17240_v5 = vld [vmem:[#allocation78_spill] sm:$0xff] }
 0x855   : > { %v2501_v19 = vsel %vm2500_vm9, %v8782_v14, %v2497_v20  ;;  %v6426_v26 = vmul.f32 %v15078_v29, %v15042_v49  ;;  %vm2439_vm11 = vcmp.eq.f32.partialorder %v2438_v50, 8.507059e+37  ;;  %v7007_v18 = vmul.f32 2.1237322e-06, %v15014_v58 }
 0x856   : > { %2543 = vperm.xlu1 %8418, %v2427_v52   ;;  %v15103_v52 = vsel %vm2503_vm10, %v2505_v32, %v2501_v19  ;;  %v15107_v45 = vsel %vm2439_vm11, %v2441_v59, %v2437_v51  ;;  %v7100_v12 = vmul.f32 %v7099_v10, %v15050_v46  ;;  %v2463_v57 = vsub.f32 1.0, %v2462_v16  ;;  %v17241_v32 = vld [vmem:[#allocation85_spill] sm:$0xff] }
 0x857   : > { %v2507_v33 = vmul.f32 %v17240_v5, %v15103_v52  ;;  %v7022_v14 = vmul.f32 %v7021_v0, %v15014_v58  ;;  %v6389_v19 = vsub.f32 1.5, %v15052_v63  ;;  %v6408_v50 = vmul.f32 0.5, %v6407_v7 }
 0x858   : > { %v2456_v59 = vand.u32 2147483648, %v15011_v48  ;;  %v6427_v20 = vmul.f32 %v15078_v29, %v6426_v26  ;;  %v2443_v10 = vmul.f32 %v17241_v32, %v15107_v45  ;;  %v2454_v51 = vand.u32 2147483647, %v15011_v48 }
 0x859   : > { %2593 = vperm.xlu2 %8419, %v2507_v33   ;;  %v7008_v63 = vadd.f32 0.00028619796, %v7007_v18  ;;  %v7101_v16 = vadd.f32 0.014752088, %v7100_v12  ;;  %v2453_v7 = vsel %vm15125_vm12, %v15044_v31, %v2449_v3  ;;  %v2464_v26 = vmul.f32 %v15071_v40, %v2463_v57 }
 0x85a   : > { %v2478_v5 = vmul.f32 %v15114_v30, %v15065_v55  ;;  %v7023_v33 = vadd.f32 0.112945676, %v7022_v14  ;;  %v6390_v48 = vmul.f32 %v15002_v39, %v6389_v19  ;;  %vm6392_vm8 = vweird.f32 %v15002_v39  ;;  %v15137_v32 = vpop.permute.xlu1 %5779 }
 0x85b   : > { %v2457_v36 = vor.u32 1.1754944e-38, %v2456_v59  ;;  %vm6391_vm9 = vweird.f32 %v14974_v56  ;;  %v6409_v18 = vsub.f32 1.5, %v6408_v50  ;;  %v6428_v12 = vmul.f32 0.5, %v6427_v20 }
 0x85c   : > { %vm2455_vm10 = vcmp.eq.f32.partialorder %v2454_v51, 8.507059e+37  ;;  %v15141_v31 = vperm.slane %v15000_v15, 6  ;;  %v7009_v57 = vmul.f32 %v7008_v63, %v15014_v58  ;;  %v7102_v14 = vmul.f32 %v7101_v16, %v15050_v46  ;;  %vm15147_vm11 = vmor %vm6391_vm9, %vm6392_vm8  ;;  %v17246_v51 = vld [vmem:[#allocation88_spill] sm:$0xff] }
 0x85d   : > { %v15143_v3 = vsel %vm2455_vm10, %v2457_v36, %v2453_v7  ;;  %v2465_v59 = vadd.f32 %v15071_v40, %v2464_v26  ;;  %vm2467_vm4 = vweird.f32 %v15071_v40  ;;  %v2479_v56 = vsub.f32 1.0, %v2478_v5 }
 0x85e   : > { %2553 = vperm.xlu1 %8418, %v2443_v10   ;;  %v7024_v50 = vmul.f32 %v7023_v33, %v15014_v58  ;;  %v6394_v36 = vsel %vm15147_vm11, %v15002_v39, %v6390_v48  ;;  %vm6411_vm15 = vweird.f32 %v14991_v37  ;;  %vm6412_vm12 = vweird.f32 %v15031_v2 }
 0x85f   : > { %v2472_v20 = vand.u32 2147483648, %v15038_v34  ;;  %v15161_v10 = vmul.f32 %v15031_v2, %v6409_v18  ;;  %v2459_v0 = vmul.f32 %v17246_v51, %v15143_v3  ;;  %vm2466_vm8 = vweird.f32 %v15038_v34  ;;  %vm15181_vm10 = vmor %vm6411_vm15, %vm6412_vm12  ;;  %v17251_v51 = vld [vmem:[#allocation95_spill] sm:$0xff] }
 0x860   : > { %v2470_v63 = vand.u32 2147483647, %v15038_v34  ;;  %v6429_v16 = vsub.f32 1.5, %v6428_v12  ;;  %8789 = vrcp.f32 %v15141_v31  ;;  %vm15168_vm9 = vmor %vm2466_vm8, %vm2467_vm4  ;;  %v7087_v7 = vmul.f32 2.1237322e-06, %v15050_v46  ;;  %v15185_v12 = vpop.permute.xlu0 %5791 }
 0x861   : > { %v7103_v26 = vadd.f32 0.112945676, %v7102_v14  ;;  %v2469_v5 = vsel %vm15168_vm9, %v15071_v40, %v2465_v59  ;;  %v2480_v33 = vmul.f32 %v15114_v30, %v2479_v56  ;;  %v7010_v48 = vadd.f32 0.0036580483, %v7009_v57 }
 0x862   : > { %v7025_v18 = vadd.f32 0.4994258, %v7024_v50  ;;  %v15188_v14 = vperm.slane %v15000_v15, 7  ;;  %v2473_v19 = vor.u32 1.1754944e-38, %v2472_v20  ;;  %v6446_v40 = vmul.f32 %v6394_v36, %v17251_v51  ;;  %v15200_v56 = vpop.permute.xlu1 %5788 }
 0x863   : > { %vm2471_vm11 = vcmp.eq.f32.partialorder %v2470_v63, 8.507059e+37  ;;  %v15198_v37 = vmul.f32 %v15078_v29, %v6429_v16  ;;  %v7088_v15 = vadd.f32 0.00028619796, %v7087_v7  ;;  %v7104_v20 = vmul.f32 %v7103_v26, %v15050_v46 }
 0x864   : > { %v15202_v50 = vsel %vm2471_vm11, %v2473_v19, %v2469_v5  ;;  %v2481_v36 = vadd.f32 %v15114_v30, %v2480_v33  ;;  %vm2483_vm4 = vweird.f32 %v15114_v30  ;;  %v7026_v39 = vmul.f32 %v7025_v18, %v15014_v58  ;;  %v17252_v5 = vld [vmem:[#allocation70_spill] sm:$0xff] }
 0x865   : > { %v5803_v63 = vperm.slane %v15004_v60, %v13789_v4  ;;  %v5802_v16 = vperm.slane %v14972_v62, %v13782_v54  ;;  %8791 = vrcp.f32 %v15188_v14  ;;  %v2488_v7 = vand.u32 2147483648, %v15065_v55 }
 0x866   : > { %2563 = vperm.xlu1 %8418, %v2459_v0   ;;  %v7011_v0 = vmul.f32 %v7010_v48, %v15014_v58  ;;  %v15209_v51 = vpop.eup %8789  ;;  %v2475_v33 = vmul.f32 %v17252_v5, %v15202_v50  ;;  %vm2482_vm15 = vweird.f32 %v15065_v55  ;;  %v2486_v48 = vand.u32 2147483647, %v15065_v55 }
 0x867   : > { %v5800_v60 = vperm.slane %v14977_v43, %v13789_v4  ;;  %v5799_v62 = vperm.slane %v14962_v61, %v13782_v54  ;;  %v5805_v18 = vperm.slane %v14993_v1, %v13782_v54  ;;  %vm15232_vm12 = vmor %vm2482_vm15, %vm2483_vm4  ;;  %v7105_v5 = vadd.f32 0.4994258, %v7104_v20 }
 0x868   : > { %v15195_v59 = vpop.xlane.xlu2 %4113  ;;  %v5806_v57 = vperm.slane %v15046_v22, %v13789_v4  ;;  %v5808_v55 = vperm.slane %v15035_v17, %v13782_v54  ;;  %v2485_v61 = vsel %vm15232_vm12, %v15114_v30, %v2481_v36  ;;  %v2510_v43 = vmul.f32 %v15209_v51, %v15141_v31  ;;  %v15255_v30 = vld [vmem:[#allocation8 + $0x3] ss:$0 sm:$0xff]  ;;  %v5798_v19 = vpop.permute.xlu0 %5797 }
 0x869   : > { %v15218_v26 = vperm.slane %v15195_v59, 5  ;;  %v5809_v1 = vperm.slane %v15084_v6, %v13789_v4  ;;  %v5812_v20 = vperm.slane %v15137_v32, %v13789_v4  ;;  %v5811_v22 = vperm.slane %v15073_v9, %v13782_v54 }
 0x86a   : > { %v2489_v11 = vor.u32 1.1754944e-38, %v2488_v7  ;;  %v5804_v17 = vsel %vm16698_vm13, %v5803_v63, %v5802_v16  ;;  %vm2487_vm8 = vcmp.eq.f32.partialorder %v2486_v48, 8.507059e+37  ;;  %v15258_v36 = vmul.f32 %v15255_v30, %v6446_v40  ;;  %v5795_v28 = vpop.permute.xlu1 %5794 }
 0x86b   : > { %8793 = vrcp.f32 %v15218_v26  ;;  %v15260_v6 = vpop.eup %8791  ;;  %v15263_v32 = vperm.slane %v15195_v59, 0  ;;  %v7012_v7 = vadd.f32 0.05243302, %v7011_v0  ;;  %v7089_v63 = vmul.f32 %v7088_v15, %v15050_v46 }
 0x86c   : > { %v15265_v9 = vsel %vm2487_vm8, %v2489_v11, %v2485_v61  ;;  %v5801_v16 = vsel %vm16698_vm13, %v5800_v60, %v5799_v62  ;;  %v5807_v48 = vsel %vm16698_vm13, %v5806_v57, %v5805_v18  ;;  %v15270_v44 = vadd.f32 1.0, %v7026_v39  ;;  %v17256_v60 = vld [vmem:[#allocation80_spill] sm:$0xff] }
 0x86d   : > { %v5823_v40 = vsel %vm2213_vm14, %v5804_v17, %v5801_v16  ;;  %v5810_v24 = vsel %vm16698_vm13, %v5809_v1, %v5808_v55  ;;  %v5813_v13 = vsel %vm16698_vm13, %v5812_v20, %v5811_v22  ;;  %v7106_v11 = vmul.f32 %v7105_v5, %v15050_v46 }
 0x86e   : > { %2573 = vperm.xlu1 %8418, %v2475_v33   ;;  %v5818_v0 = vperm.slane %v15185_v12, %v13789_v4  ;;  %v5821_v15 = vperm.slane %v5798_v19, %v13789_v4  ;;  %v2491_v57 = vmul.f32 %v17256_v60, %v15265_v9  ;;  %v2526_v39 = vmul.f32 %v15260_v6, %v15188_v14 }
 0x86f   : > { %vm6431_vm9 = vweird.f32 %v15042_v49  ;;  %vm6432_vm11 = vweird.f32 %v15078_v29  ;;  %v5824_v62 = vsel %vm2215_vm0, %v5807_v48, %v5823_v40  ;;  %8795 = vrcp.f32 %v15263_v32 }
 0x870   : > { %v15253_v33 = vpop.xlane.xlu2 %7236  ;;  %v7013_v18 = vmul.f32 %v7012_v7, %v15014_v58  ;;  %v7090_v5 = vadd.f32 0.0036580483, %v7089_v63  ;;  %v5825_v55 = vsel %vm2217_vm1, %v5810_v24, %v5824_v62  ;;  %v5817_v61 = vperm.slane %v15200_v56, %v13782_v54 }
 0x871   : > { %17255 = vst [vmem:[#allocation96_spill] sm:$0xff] %v15253_v33  ;;  %v2511_v33 = vsub.f32 1.0, %v2510_v43  ;;  %v8794_v12 = vpop.eup %8793  ;;  %v5820_v43 = vperm.slane %v5795_v28, %v13782_v54  ;;  %v5826_v20 = vsel %vm2219_vm2, %v5813_v13, %v5825_v55  ;;  %8797 = vrcp.f32 %v15270_v44 }
 0x872   : > { %v4213_v22 = vmul.f32 %v8794_v12, %v15218_v26  ;;  %v15296_v17 = vadd.f32 1.0, %v7106_v11  ;;  %v5815_v19 = vperm.slane %v15123_v23, %v13789_v4  ;;  %v5819_v24 = vsel %vm16698_vm13, %v5818_v0, %v5817_v61 }
 0x873   : > { %v2512_v1 = vmul.f32 %v15209_v51, %v2511_v33  ;;  %v5822_v56 = vsel %vm16698_vm13, %v5821_v15, %v5820_v43  ;;  %v2527_v28 = vsub.f32 1.0, %v2526_v39  ;;  %v15303_v63 = vperm.slane %v15195_v59, 1  ;;  %v17257_v33 = vld [vmem:[#allocation63_spill] sm:$0xff] }
 0x874   : > { %v2508_v16 = vmul.f32 %v17257_v33, %v15103_v52  ;;  %v4214_v48 = vsub.f32 1.0, %v4213_v22  ;;  %v4223_v40 = vand.u32 2147483648, %v15218_v26  ;;  %vm2515_vm4 = vweird.f32 %v15209_v51 }
 0x875   : > { %v2513_v11 = vadd.f32 %v15209_v51, %v2512_v1  ;;  %v2520_v23 = vand.u32 2147483648, %v15141_v31  ;;  %v15312_v0 = vpop.eup %8795  ;;  %vm4218_vm15 = vweird.f32 %v8794_v12  ;;  %vm2514_vm12 = vweird.f32 %v15141_v31 }
 0x876   : > { %2583 = vperm.xlu1 %8418, %v2491_v57   ;;  %v4215_v60 = vmul.f32 %v8794_v12, %v4214_v48  ;;  %v4221_v57 = vand.u32 2147483647, %v15218_v26  ;;  %v2518_v52 = vand.u32 2147483647, %v15141_v31  ;;  %v2528_v62 = vmul.f32 %v15260_v6, %v2527_v28 }
 0x877   : > { %v15320_v55 = vpop.eup %8797  ;;  %8799 = vrcp.f32 %v15303_v63  ;;  %vm4217_vm8 = vweird.f32 %v15218_v26  ;;  %v4224_v31 = vor.u32 1.1754944e-38, %v4223_v40  ;;  %v4133_v26 = vmul.f32 %v15312_v0, %v15263_v32 }
 0x878   : > { %v5783_v7 = vpop.permute.xlu2 %5782  ;;  %v4216_v61 = vadd.f32 %v8794_v12, %v4215_v60  ;;  %v15355_v33 = vperm.slane %v15195_v59, 2  ;;  %v7091_v48 = vmul.f32 %v7090_v5, %v15050_v46  ;;  %v2529_v40 = vadd.f32 %v15260_v6, %v2528_v62 }
 0x879   : > { %v5814_v13 = vperm.slane %v5783_v7, %v13782_v54  ;;  %v2521_v7 = vor.u32 1.1754944e-38, %v2520_v23  ;;  %8801 = vrcp.f32 %v15296_v17  ;;  %v17263_v23 = vsel %vm15181_vm10, %v15031_v2, %v15161_v10 }
 0x87a   : > { %v7029_v60 = vmul.f32 %v15320_v55, %v15270_v44  ;;  %v2534_v34 = vand.u32 2147483647, %v15188_v14  ;;  %8803 = vrcp.f32 %v15355_v33 }
 0x87b   : > { %v5816_v15 = vsel %vm16698_vm13, %v5815_v19, %v5814_v13  ;;  %vm15327_vm13 = vmor %vm2514_vm12, %vm2515_vm4  ;;  %v15348_v13 = vld [vmem:[#allocation10 + $0x3] ss:$0 sm:$0xff] }
 0x87c   : > { %v5827_v39 = vsel %vm16699_vm3, %v5816_v15, %v5826_v20  ;;  %vm4219_vm3 = vmor %vm4217_vm8, %vm4218_vm15  ;;  %v2517_v22 = vsel %vm15327_vm13, %v15209_v51, %v2513_v11  ;;  %vm2519_vm13 = vcmp.eq.f32.partialorder %v2518_v52, 8.507059e+37  ;;  %v7014_v51 = vadd.f32 0.18741608, %v7013_v18 }
 0x87d   : > { %v5828_v43 = vsel %vm16700_vm5, %v5819_v24, %v5827_v39  ;;  %v4220_v19 = vsel %vm4219_vm3, %v8794_v12, %v4216_v61  ;;  %vm4222_vm5 = vcmp.eq.f32.partialorder %v4221_v57, 8.507059e+37  ;;  %vm15342_vm4 = vmor %vm6431_vm9, %vm6432_vm11  ;;  %v15352_v12 = vadd.f32 %v15348_v13, %v15258_v36  ;;  %v15365_v11 = vpop.eup %8799  ;;  %v17262_v36 = vld [vmem:[#allocation98_spill] sm:$0xff]  ;;  %v17264_v57 = vld [vmem:[#allocation67_spill] sm:$0xff] }
 0x87e   : > { %2598 = vperm.xlu1 %8418, %v2508_v16   ;;  %v5829_v20 = vsel %vm2225_vm6, %v5822_v56, %v5828_v43  ;;  %v15346_v56 = vsel %vm4222_vm5, %v4224_v31, %v4220_v19  ;;  %v15359_v16 = vsel %vm2519_vm13, %v2521_v7, %v2517_v22  ;;  %vm2531_vm3 = vweird.f32 %v15260_v6  ;;  %v17268_v7 = vld [vmem:[#allocation77_spill] sm:$0xff] }
 0x87f   : > { %v5831_v24 = vsel %vm2228_vm7, %v5829_v20, 0.0  ;;  %v4226_v49 = vmul.f32 %v14334_v8, %v15346_v56  ;;  %v4134_v18 = vsub.f32 1.0, %v4133_v26  ;;  %v6448_v8 = vmul.f32 %v17263_v23, %v17262_v36  ;;  %v15400_v31 = vpop.eup %8801 }
 0x880   : > { %5832 = vadd.xlane.f32.xlu0 %v5831_v24  ;;  %v6434_v5 = vsel %vm15342_vm4, %v15078_v29, %v15198_v37  ;;  %v2536_v15 = vand.u32 2147483648, %v15188_v14  ;;  %v2524_v39 = vmul.f32 %v17264_v57, %v15359_v16  ;;  %vm2530_vm5 = vweird.f32 %v15188_v14  ;;  %v17267_v14 = vld [vmem:[#allocation99_spill] sm:$0xff] }
 0x881   : > { %4312 = vperm.xlu2 %8419, %v4226_v49   ;;  %v7015_v2 = vmul.f32 %v7014_v51, %v15014_v58  ;;  %vm15386_vm10 = vmor %vm2530_vm5, %vm2531_vm3  ;;  %v7092_v29 = vadd.f32 0.05243302, %v7091_v48  ;;  %v15391_v37 = vmul.f32 0.70710677, %v15352_v12  ;;  %v4135_v62 = vmul.f32 %v15312_v0, %v4134_v18  ;;  %v15417_v48 = vpop.eup %8803 }
 0x882   : > { %v2533_v52 = vsel %vm15386_vm10, %v15260_v6, %v2529_v40  ;;  %v4149_v58 = vmul.f32 %v15365_v11, %v15303_v63  ;;  %v6450_v61 = vmul.f32 %v6434_v5, %v17267_v14  ;;  %v2537_v43 = vor.u32 1.1754944e-38, %v2536_v15 }
 0x883   : > { %v7030_v1 = vsub.f32 1.0, %v7029_v60  ;;  %vm2535_vm9 = vcmp.eq.f32.partialorder %v2534_v34, 8.507059e+37  ;;  %v7016_v20 = vadd.f32 1.1283791, %v7015_v2  ;;  %v6469_v22 = vmul.f32 %v15255_v30, %v6448_v8  ;;  %v17269_v8 = vld [vmem:[#allocation73_spill] sm:$0xff] }
 0x884   : > { %v15404_v26 = vperm.slane %v15195_v59, 3  ;;  %v15406_v19 = vsel %vm2535_vm9, %v2537_v43, %v2533_v52  ;;  %v7093_v6 = vmul.f32 %v7092_v29, %v15050_v46  ;;  %v6965_v24 = vmul.f32 %v15391_v37, %v15391_v37 }
 0x885   : > { %v15413_v28 = vmul.f32 %v17268_v7, %v17076_v41  ;;  %v4136_v51 = vadd.f32 %v15312_v0, %v4135_v62  ;;  %vm4138_vm11 = vweird.f32 %v15312_v0  ;;  %v4150_v49 = vsub.f32 1.0, %v4149_v58 }
 0x886   : > { %2608 = vperm.xlu1 %8418, %v2524_v39   ;;  %v6471_v40 = vmul.f32 %v15255_v30, %v6450_v61  ;;  %v4143_v18 = vand.u32 2147483648, %v15263_v32  ;;  %v7031_v36 = vmul.f32 %v15320_v55, %v7030_v1  ;;  %v7109_v23 = vmul.f32 %v15400_v31, %v15296_v17 }
 0x887   : > { %v2540_v41 = vmul.f32 %v17269_v8, %v15406_v19  ;;  %vm4137_vm15 = vweird.f32 %v15263_v32  ;;  %v4141_v5 = vand.u32 2147483647, %v15263_v32  ;;  %v15429_v15 = vadd.f32 %v15348_v13, %v6469_v22 }
 0x888   : > { %8805 = vrcp.f32 %v15404_v26  ;;  %vm15432_vm12 = vmor %vm4137_vm15, %vm4138_vm11  ;;  %v7017_v57 = vmul.f32 %v7016_v20, %v14988_v21  ;;  %v7094_v39 = vadd.f32 0.18741608, %v7093_v6  ;;  %v15437_v34 = vmin.f32 %v6965_v24, 16.0  ;;  %v17272_v20 = vld [vmem:[#allocation79_spill] sm:$0xff] }
 0x889   : > { %v4140_v2 = vsel %vm15432_vm12, %v15312_v0, %v4136_v51  ;;  %v4151_v32 = vmul.f32 %v15365_v11, %v4150_v49  ;;  %v4165_v10 = vmul.f32 %v15417_v48, %v15355_v33  ;;  %v7039_v29 = vand.u32 2147483648, %v15270_v44 }
 0x88a   : > { %v4144_v52 = vor.u32 1.1754944e-38, %v4143_v18  ;;  %v7032_v62 = vadd.f32 %v15320_v55, %v7031_v36  ;;  %vm7034_vm8 = vweird.f32 %v15320_v55  ;;  %v7110_v21 = vsub.f32 1.0, %v7109_v23  ;;  %v17275_v18 = vld [vmem:[#allocation50_spill] sm:$0xff] }
 0x88b   : > { %vm4142_vm4 = vcmp.eq.f32.partialorder %v4141_v5, 8.507059e+37  ;;  %vm7033_vm13 = vweird.f32 %v15270_v44  ;;  %v7037_v58 = vand.u32 2147483647, %v15270_v44  ;;  %v15451_v0 = vmul.f32 0.70710677, %v15429_v15 }
 0x88c   : > { %v15454_v14 = vperm.slane %v15195_v59, 4  ;;  %v15456_v61 = vsel %vm4142_vm4, %v4144_v52, %v4140_v2  ;;  %v7095_v43 = vmul.f32 %v7094_v39, %v15050_v46  ;;  %v6978_v1 = vmul.f32 3.8918573e-05, %v15437_v34  ;;  %vm15464_vm5 = vmor %vm7033_vm13, %vm7034_vm8 }
 0x88d   : > { %v2428_v22 = vmul.f32 %v17272_v20, %v15075_v35  ;;  %v4152_v6 = vadd.f32 %v15365_v11, %v4151_v32  ;;  %vm4154_vm3 = vweird.f32 %v15365_v11  ;;  %v4166_v44 = vsub.f32 1.0, %v4165_v10 }
 0x88e   : > { %2618 = vperm.xlu1 %8418, %v2540_v41   ;;  %v15468_v7 = vpop.eup %8805  ;;  %v4159_v51 = vand.u32 2147483648, %v15303_v63  ;;  %v7036_v46 = vsel %vm15464_vm5, %v15320_v55, %v7032_v62  ;;  %v7040_v49 = vor.u32 1.1754944e-38, %v7039_v29  ;;  %v7111_v35 = vmul.f32 %v15400_v31, %v7110_v21 }
 0x88f   : > { %v4147_v36 = vmul.f32 %v17275_v18, %v15456_v61  ;;  %vm4153_vm10 = vweird.f32 %v15303_v63  ;;  %v4157_v23 = vand.u32 2147483647, %v15303_v63  ;;  %v7045_v8 = vmul.f32 %v15451_v0, %v15451_v0  ;;  %v15578_v18 = vld [vmem:[%s16493_s6 + $0x3] ss:$0 sm:$0xff] }
 0x890   : > { %8807 = vrcp.f32 %v15454_v14  ;;  %vm15482_vm9 = vmor %vm4153_vm10, %vm4154_vm3  ;;  %vm7038_vm11 = vcmp.eq.f32.partialorder %v7037_v58, 8.507059e+37  ;;  %v7096_v55 = vadd.f32 1.1283791, %v7095_v43  ;;  %v6979_v5 = vadd.f32 0.001143296, %v6978_v1  ;;  %v17278_v1 = vld [vmem:[#allocation59_spill] sm:$0xff] }
 0x891   : > { %v4156_v60 = vsel %vm15482_vm9, %v15365_v11, %v4152_v6  ;;  %v4167_v39 = vmul.f32 %v15417_v48, %v4166_v44  ;;  %v7041_v63 = vsel %vm7038_vm11, %v7040_v49, %v7036_v46  ;;  %v4181_v2 = vmul.f32 %v15468_v7, %v15404_v26 }
 0x892   : > { %v4160_v32 = vor.u32 1.1754944e-38, %v4159_v51  ;;  %v7112_v10 = vadd.f32 %v15400_v31, %v7111_v35  ;;  %vm7114_vm15 = vweird.f32 %v15400_v31  ;;  %v15495_v29 = vadd.f32 %v15348_v13, %v6471_v40  ;;  %v17281_v51 = vld [vmem:[#allocation75_spill] sm:$0xff] }
 0x893   : > { %vm4158_vm12 = vcmp.eq.f32.partialorder %v4157_v23, 8.507059e+37  ;;  %vm7113_vm8 = vweird.f32 %v15296_v17  ;;  %v7119_v52 = vand.u32 2147483648, %v15296_v17  ;;  %v15499_v11 = vmin.f32 %v7045_v8, 16.0 }
 0x894   : > { %2548 = vperm.xlu0 %8415, %v2428_v22   ;;  %v15502_v62 = vperm.slane %v15195_v59, 6  ;;  %v15504_v21 = vsel %vm4158_vm12, %v4160_v32, %v4156_v60  ;;  %v7042_v58 = vmul.f32 %v7041_v63, %v7017_v57  ;;  %v7117_v43 = vand.u32 2147483647, %v15296_v17  ;;  %vm15511_vm13 = vmor %vm7113_vm8, %vm7114_vm15 }
 0x895   : > { %v2444_v20 = vmul.f32 %v17278_v1, %v15107_v45  ;;  %v4168_v40 = vadd.f32 %v15417_v48, %v4167_v39  ;;  %vm4170_vm4 = vweird.f32 %v15417_v48  ;;  %v4182_v22 = vsub.f32 1.0, %v4181_v2 }
 0x896   : > { %4267 = vperm.xlu1 %8418, %v4147_v36   ;;  %v15515_v44 = vpop.eup %8807  ;;  %v4175_v24 = vand.u32 2147483648, %v15355_v33  ;;  %v7116_v17 = vsel %vm15511_vm13, %v15400_v31, %v7112_v10  ;;  %v6980_v57 = vmul.f32 %v6979_v5, %v15437_v34  ;;  %v15523_v45 = vmul.f32 0.70710677, %v15495_v29 }
 0x897   : > { %v4163_v46 = vmul.f32 %v17281_v51, %v15504_v21  ;;  %vm4169_vm3 = vweird.f32 %v15355_v33  ;;  %v4173_v49 = vand.u32 2147483647, %v15355_v33  ;;  %v7120_v35 = vor.u32 1.1754944e-38, %v7119_v52 }
 0x898   : > { %8809 = vrcp.f32 %v15502_v62  ;;  %vm15530_vm5 = vmor %vm4169_vm3, %vm4170_vm4  ;;  %v8295_v31 = vclamps-f32 %v7042_v58, 1.0  ;;  %vm7118_vm10 = vcmp.eq.f32.partialorder %v7117_v43, 8.507059e+37  ;;  %v4183_v23 = vmul.f32 %v15468_v7, %v4182_v22  ;;  %v17284_v58 = vld [vmem:[#allocation71_spill] sm:$0xff]  ;;  %v17285_v22 = vld [vmem:[#allocation68_spill] sm:$0xff] }
 0x899   : > { %v4172_v36 = vsel %vm15530_vm5, %v15417_v48, %v4168_v40  ;;  %v7121_v8 = vsel %vm7118_vm10, %v7120_v35, %v7116_v17  ;;  %v4197_v33 = vmul.f32 %v15515_v44, %v15454_v14  ;;  %v4176_v41 = vor.u32 1.1754944e-38, %v4175_v24 }
 0x89a   : > { %v7097_v5 = vmul.f32 %v7096_v55, %v15017_v27  ;;  %v7058_v60 = vmul.f32 3.8918573e-05, %v15499_v11  ;;  %v7125_v39 = vmul.f32 %v15523_v45, %v15523_v45  ;;  %v15545_v63 = vadd.f32 1e-05, %v15413_v28 }
 0x89b   : > { %vm4174_vm9 = vcmp.eq.f32.partialorder %v4173_v49, 8.507059e+37  ;;  %v6981_v2 = vadd.f32 0.014752088, %v6980_v57  ;;  %v15548_v48 = vperm.slane %v15195_v59, 7  ;;  %v7177_v10 = vadd.f32 1.0, %v8295_v31 }
 0x89c   : > { %2558 = vperm.xlu0 %8415, %v2444_v20   ;;  %v15550_v32 = vsel %vm4174_vm9, %v4176_v41, %v4172_v36  ;;  %v7122_v52 = vmul.f32 %v7121_v8, %v7097_v5  ;;  %v2460_v27 = vmul.f32 %v17284_v58, %v15143_v3  ;;  %v4184_v55 = vadd.f32 %v15468_v7, %v4183_v23  ;;  %v17286_v8 = vld [vmem:[#allocation90_spill] sm:$0xff]  ;;  %v17287_v58 = vld [vmem:[#allocation92_spill] sm:$0xff] }
 0x89d   : > { %vm4186_vm11 = vweird.f32 %v15468_v7  ;;  %v4198_v43 = vsub.f32 1.0, %v4197_v33  ;;  %v6505_v28 = vmul.f32 0.5, %v14980_v25  ;;  %v4191_v20 = vand.u32 2147483648, %v15404_v26 }
 0x89e   : > { %4277 = vperm.xlu1 %8418, %v4163_v46   ;;  %v15556_v1 = vpop.eup %8809  ;;  %v7059_v59 = vadd.f32 0.001143296, %v7058_v60  ;;  %v15560_v40 = vmin.f32 %v7125_v39, 16.0  ;;  %v4179_v6 = vmul.f32 %v17285_v22, %v15550_v32  ;;  %vm4185_vm15 = vweird.f32 %v15404_v26 }
 0x89f   : > { %v4189_v3 = vand.u32 2147483647, %v15404_v26  ;;  %8811 = vrcp.f32 %v15548_v48  ;;  %v7193_v24 = vmul.f32 %v7177_v10, %v6505_v28  ;;  %vm4187_vm12 = vmor %vm4185_vm15, %vm4186_vm11  ;;  %v8297_v17 = vclamps-f32 %v7122_v52, 1.0 }
 0x8a0   : > { %v6982_v25 = vmul.f32 %v6981_v2, %v15437_v34  ;;  %v4188_v57 = vsel %vm4187_vm12, %v15468_v7, %v4184_v55  ;;  %v4199_v51 = vmul.f32 %v15515_v44, %v4198_v43  ;;  %v4229_v46 = vmul.f32 %v15556_v1, %v15502_v62 }
 0x8a1   : > { %8813 = vrsqrt.f32 %v15545_v63  ;;  %v4192_v49 = vor.u32 1.1754944e-38, %v4191_v20  ;;  %v7060_v26 = vmul.f32 %v7059_v59, %v15499_v11  ;;  %v7138_v35 = vmul.f32 3.8918573e-05, %v15560_v40 }
 0x8a2   : > { %vm4190_vm8 = vcmp.eq.f32.partialorder %v4189_v3, 8.507059e+37  ;;  %v7214_v7 = vmul.f32 %v15578_v18, %v7193_v24  ;;  %v7179_v36 = vadd.f32 1.0, %v8297_v17  ;;  %v6983_v23 = vadd.f32 0.112945676, %v6982_v25 }
 0x8a3   : > { %v15581_v31 = vsel %vm4190_vm8, %v4192_v49, %v4188_v57  ;;  %v2476_v33 = vmul.f32 %v17286_v8, %v15202_v50  ;;  %v4200_v41 = vadd.f32 %v15515_v44, %v4199_v51  ;;  %vm4202_vm4 = vweird.f32 %v15515_v44  ;;  %v17288_v57 = vld [vmem:[#allocation25_spill] sm:$0xff] }
 0x8a4   : > { %2568 = vperm.xlu0 %8415, %v2460_v27   ;;  %v4230_v5 = vsub.f32 1.0, %v4229_v46  ;;  %v6507_v39 = vmul.f32 0.5, %v14998_v42  ;;  %v4207_v2 = vand.u32 2147483648, %v15454_v14  ;;  %v7061_v10 = vadd.f32 0.014752088, %v7060_v26 }
 0x8a5   : > { %v15587_v60 = vpop.eup %8811  ;;  %v7139_v52 = vadd.f32 0.001143296, %v7138_v35  ;;  %v4195_v27 = vmul.f32 %v17287_v58, %v15581_v31  ;;  %vm4201_vm13 = vweird.f32 %v15454_v14  ;;  %v4205_v50 = vand.u32 2147483647, %v15454_v14 }
 0x8a6   : > { %4287 = vperm.xlu1 %8418, %v4179_v6   ;;  %v7195_v43 = vmul.f32 %v7179_v36, %v6507_v39  ;;  %vm4203_vm3 = vmor %vm4201_vm13, %vm4202_vm4  ;;  %v6984_v28 = vmul.f32 %v6983_v23, %v15437_v34  ;;  %v4231_v20 = vmul.f32 %v15556_v1, %v4230_v5  ;;  %v4245_v59 = vmul.f32 %v15587_v60, %v15548_v48  ;;  %v17289_v36 = vld [vmem:[#allocation45_spill] sm:$0xff] }
 0x8a7   : > { %v15595_v55 = vpop.eup %8813  ;;  %v4204_v42 = vsel %vm4203_vm3, %v15515_v44, %v4200_v41  ;;  %v4208_v22 = vor.u32 1.1754944e-38, %v4207_v2  ;;  %v7062_v6 = vmul.f32 %v7061_v10, %v15499_v11  ;;  %v7140_v3 = vmul.f32 %v7139_v52, %v15560_v40 }
 0x8a8   : > { %v6376_v14 = vmul.f32 %v15595_v55, %v15545_v63  ;;  %vm4206_vm5 = vcmp.eq.f32.partialorder %v4205_v50, 8.507059e+37  ;;  %v7216_v24 = vmul.f32 %v15578_v18, %v7195_v43  ;;  %v6967_v44 = vmul.f32 2.1237322e-06, %v15437_v34  ;;  %v17290_v50 = vld [vmem:[#allocation91_spill] sm:$0xff] }
 0x8a9   : > { %v15607_v17 = vsel %vm4206_vm5, %v4208_v22, %v4204_v42  ;;  %v6985_v25 = vadd.f32 0.4994258, %v6984_v28  ;;  %v2492_v51 = vmul.f32 %v17288_v57, %v15265_v9  ;;  %v4232_v46 = vadd.f32 %v15556_v1, %v4231_v20 }
 0x8aa   : > { %7242 = vadd.xlane.f32.xlu2 %v7214_v7  ;;  %vm4234_vm10 = vweird.f32 %v15556_v1  ;;  %v4246_v49 = vsub.f32 1.0, %v4245_v59  ;;  %v4239_v26 = vand.u32 2147483648, %v15502_v62  ;;  %v7063_v35 = vadd.f32 0.112945676, %v7062_v6  ;;  %v17291_v6 = vld [vmem:[#allocation42_spill] sm:$0xff] }
 0x8ab   : > { %v7141_v7 = vadd.f32 0.014752088, %v7140_v3  ;;  %v4211_v23 = vmul.f32 %v17289_v36, %v15607_v17  ;;  %vm4233_vm9 = vweird.f32 %v15502_v62  ;;  %v4237_v8 = vand.u32 2147483647, %v15502_v62 }
 0x8ac   : > { %2578 = vperm.xlu0 %8415, %v2476_v33   ;;  %v6377_v9 = vmul.f32 %v15595_v55, %v6376_v14  ;;  %vm4235_vm11 = vmor %vm4233_vm9, %vm4234_vm10  ;;  %v6968_v33 = vadd.f32 0.00028619796, %v6967_v44  ;;  %v4247_v5 = vmul.f32 %v15587_v60, %v4246_v49  ;;  %v4240_v39 = vor.u32 1.1754944e-38, %v4239_v26 }
 0x8ad   : > { %v4236_v41 = vsel %vm4235_vm11, %v15556_v1, %v4232_v46  ;;  %v6986_v2 = vmul.f32 %v6985_v25, %v15437_v34  ;;  %v7064_v10 = vmul.f32 %v7063_v35, %v15499_v11  ;;  %v7142_v52 = vmul.f32 %v7141_v7, %v15560_v40 }
 0x8ae   : > { %4297 = vperm.xlu1 %8418, %v4195_v27   ;;  %vm4238_vm15 = vcmp.eq.f32.partialorder %v4237_v8, 8.507059e+37  ;;  %v6378_v58 = vmul.f32 0.5, %v6377_v9  ;;  %v6969_v62 = vmul.f32 %v6968_v33, %v15437_v34  ;;  %v2523_v43 = vmul.f32 %v17290_v50, %v15359_v16  ;;  %v17293_v8 = vld [vmem:[#allocation39_spill] sm:$0xff] }
 0x8af   : > { %v15625_v27 = vsel %vm4238_vm15, %v4240_v39, %v4236_v41  ;;  %v4248_v1 = vadd.f32 %v15587_v60, %v4247_v5  ;;  %vm4250_vm12 = vweird.f32 %v15587_v60  ;;  %v7047_v28 = vmul.f32 2.1237322e-06, %v15499_v11 }
 0x8b0   : > { %v4255_v42 = vand.u32 2147483648, %v15548_v48  ;;  %v15634_v20 = vadd.f32 1.0, %v6986_v2  ;;  %v7065_v59 = vadd.f32 0.4994258, %v7064_v10  ;;  %v7143_v22 = vadd.f32 0.112945676, %v7142_v52 }
 0x8b1   : > { %v4242_v3 = vmul.f32 %v17291_v6, %v15625_v27  ;;  %vm4249_vm8 = vweird.f32 %v15548_v48  ;;  %v4253_v16 = vand.u32 2147483647, %v15548_v48  ;;  %v6379_v14 = vsub.f32 1.5, %v6378_v58  ;;  %v17292_v48 = vld [vmem:[#allocation58_spill] sm:$0xff]  ;;  %v17294_v52 = vld [vmem:[#allocation97_spill] sm:$0xff] }
 0x8b2   : > { %7246 = vadd.xlane.f32.xlu2 %v7216_v24  ;;  %vm4251_vm4 = vmor %vm4249_vm8, %vm4250_vm12  ;;  %v6970_v44 = vadd.f32 0.0036580483, %v6969_v62  ;;  %v7048_v25 = vadd.f32 0.00028619796, %v7047_v28  ;;  %v4256_v57 = vor.u32 1.1754944e-38, %v4255_v42  ;;  %8815 = vrcp.f32 %v15634_v20  ;;  %v17295_v62 = vld [vmem:[#allocation61_spill] sm:$0xff] }
 0x8b3   : > { %v4252_v24 = vsel %vm4251_vm4, %v15587_v60, %v4248_v1  ;;  %v7144_v46 = vmul.f32 %v7143_v22, %v15560_v40  ;;  %vm4254_vm13 = vcmp.eq.f32.partialorder %v4253_v16, 8.507059e+37  ;;  %v6380_v26 = vmul.f32 %v15595_v55, %v6379_v14 }
 0x8b4   : > { %2588 = vperm.xlu0 %8415, %v2492_v51   ;;  %v7066_v51 = vmul.f32 %v7065_v59, %v15499_v11  ;;  %v15644_v49 = vsel %vm4254_vm13, %v4256_v57, %v4252_v24  ;;  %vm6382_vm3 = vweird.f32 %v15595_v55  ;;  %v2539_v35 = vmul.f32 %v17292_v48, %v15406_v19 }
 0x8b5   : > { %v6971_v60 = vmul.f32 %v6970_v44, %v15437_v34  ;;  %v7049_v7 = vmul.f32 %v7048_v25, %v15499_v11  ;;  %vm6381_vm5 = vweird.f32 %v15545_v63  ;;  %v4258_v9 = vmul.f32 %v17293_v8, %v15644_v49  ;;  %v17296_v25 = vld [vmem:[#allocation87_spill] sm:$0xff] }
 0x8b6   : > { %4307 = vperm.xlu1 %8418, %v4211_v23   ;;  %v15652_v36 = vadd.f32 1.0, %v7066_v51  ;;  %v7145_v23 = vadd.f32 0.4994258, %v7144_v46  ;;  %v7127_v33 = vmul.f32 2.1237322e-06, %v15560_v40  ;;  %vm6383_vm10 = vmor %vm6381_vm5, %vm6382_vm3  ;;  %v4146_v50 = vmul.f32 %v17295_v62, %v15456_v61 }
 0x8b7   : > { %v6384_v5 = vsel %vm6383_vm10, %v15595_v55, %v6380_v26  ;;  %v6972_v19 = vadd.f32 0.05243302, %v6971_v60  ;;  %v7050_v39 = vadd.f32 0.0036580483, %v7049_v7  ;;  %v4162_v57 = vmul.f32 %v17296_v25, %v15504_v21 }
 0x8b8   : > { %v8816_v41 = vpop.eup %8815  ;;  %8817 = vrcp.f32 %v15652_v36  ;;  %v7146_v2 = vmul.f32 %v7145_v23, %v15560_v40  ;;  %v7128_v63 = vadd.f32 0.00028619796, %v7127_v33  ;;  %v6445_v58 = vmul.f32 %v6384_v5, %v17294_v52 }
 0x8b9   : > { %v6989_v10 = vmul.f32 %v8816_v41, %v15634_v20  ;;  %v7051_v1 = vmul.f32 %v7050_v39, %v15499_v11  ;;  %vm6994_vm9 = vweird.f32 %v8816_v41  ;;  %v6999_v60 = vand.u32 2147483648, %v15634_v20 }
 0x8ba   : > { %v15667_v55 = vadd.f32 1.0, %v7146_v2  ;;  %v7129_v42 = vmul.f32 %v7128_v63, %v15560_v40  ;;  %v6466_v22 = vmul.f32 %v15255_v30, %v6445_v58  ;;  %vm6993_vm11 = vweird.f32 %v15634_v20  ;;  %v17297_v2 = vld [vmem:[#allocation41_spill] sm:$0xff] }
 0x8bb   : > { %v6990_v28 = vsub.f32 1.0, %v6989_v10  ;;  %v7052_v16 = vadd.f32 0.05243302, %v7051_v1  ;;  %v6997_v21 = vand.u32 2147483647, %v15634_v20  ;;  %vm6995_vm15 = vmor %vm6993_vm11, %vm6994_vm9  ;;  %v4178_v10 = vmul.f32 %v17297_v2, %v15550_v32 }
 0x8bc   : > { %2603 = vperm.xlu0 %8415, %v2523_v43   ;;  %v6973_v43 = vmul.f32 %v6972_v19, %v15437_v34  ;;  %8819 = vrcp.f32 %v15667_v55  ;;  %v7130_v24 = vadd.f32 0.0036580483, %v7129_v42  ;;  %v15676_v44 = vadd.f32 %v15348_v13, %v6466_v22 }
 0x8bd   : > { %v6991_v61 = vmul.f32 %v8816_v41, %v6990_v28  ;;  %v7053_v30 = vmul.f32 %v7052_v16, %v15499_v11  ;;  %v7000_v19 = vor.u32 1.1754944e-38, %v6999_v60  ;;  %vm6998_vm12 = vcmp.eq.f32.partialorder %v6997_v21, 8.507059e+37  ;;  %v17298_v16 = vld [vmem:[#allocation83_spill] sm:$0xff] }
 0x8be   : > { %4322 = vperm.xlu1 %8418, %v4242_v3   ;;  %v8818_v59 = vpop.eup %8817  ;;  %v6974_v3 = vadd.f32 0.18741608, %v6973_v43  ;;  %v7131_v48 = vmul.f32 %v7130_v24, %v15560_v40  ;;  %v15687_v13 = vmul.f32 0.70710677, %v15676_v44  ;;  %vm7073_vm4 = vweird.f32 %v15652_v36 }
 0x8bf   : > { %v7069_v14 = vmul.f32 %v8818_v59, %v15652_v36  ;;  %v6992_v46 = vadd.f32 %v8816_v41, %v6991_v61  ;;  %v7054_v7 = vadd.f32 0.18741608, %v7053_v30  ;;  %vm7074_vm8 = vweird.f32 %v8818_v59 }
 0x8c0   : > { %v6975_v51 = vmul.f32 %v6974_v3, %v15437_v34  ;;  %v6925_v39 = vmul.f32 %v15687_v13, %v15687_v13  ;;  %v7077_v32 = vand.u32 2147483647, %v15652_v36  ;;  %vm7075_vm13 = vmor %vm7073_vm4, %vm7074_vm8  ;;  %v4194_v61 = vmul.f32 %v17298_v16, %v15581_v31 }
 0x8c1   : > { %v7070_v26 = vsub.f32 1.0, %v7069_v14  ;;  %v6996_v23 = vsel %vm6995_vm15, %v8816_v41, %v6992_v46  ;;  %v7055_v41 = vmul.f32 %v7054_v7, %v15499_v11  ;;  %vm7153_vm10 = vweird.f32 %v15667_v55 }
 0x8c2   : > { %v6976_v34 = vadd.f32 1.1283791, %v6975_v51  ;;  %v7001_v63 = vsel %vm6998_vm12, %v7000_v19, %v6996_v23  ;;  %v15703_v43 = vmin.f32 %v6925_v39, 16.0  ;;  %vm7078_vm3 = vcmp.eq.f32.partialorder %v7077_v32, 8.507059e+37 }
 0x8c3   : > { %v7071_v8 = vmul.f32 %v8818_v59, %v7070_v26  ;;  %v7159_v51 = vand.u32 2147483648, %v15667_v55  ;;  %v7157_v31 = vand.u32 2147483647, %v15667_v55 }
 0x8c4   : > { %2613 = vperm.xlu0 %8415, %v2539_v35   ;;  %v15683_v35 = vpop.eup %8819  ;;  %v6977_v20 = vmul.f32 %v6976_v34, %v15391_v37  ;;  %v7056_v37 = vadd.f32 1.1283791, %v7055_v41  ;;  %v6938_v3 = vmul.f32 3.8918573e-05, %v15703_v43  ;;  %v17299_v34 = vld [vmem:[#allocation86_spill] sm:$0xff] }
 0x8c5   : > { %v7149_v33 = vmul.f32 %v15683_v35, %v15667_v55  ;;  %v7072_v52 = vadd.f32 %v8818_v59, %v7071_v8  ;;  %vm7154_vm5 = vweird.f32 %v15683_v35  ;;  %v4210_v7 = vmul.f32 %v17299_v34, %v15607_v17 }
 0x8c6   : > { %4332 = vperm.xlu1 %8418, %v4258_v9   ;;  %v7132_v9 = vadd.f32 0.05243302, %v7131_v48  ;;  %v7002_v1 = vmul.f32 %v7001_v63, %v6977_v20  ;;  %v6939_v30 = vadd.f32 0.001143296, %v6938_v3  ;;  %vm7155_vm9 = vmor %vm7153_vm10, %vm7154_vm5  ;;  %v6504_v48 = vmul.f32 0.5, %v15352_v12  ;;  %v17300_v20 = vld [vmem:[#allocation69_spill] sm:$0xff] }
 0x8c7   : > { %v7150_v62 = vsub.f32 1.0, %v7149_v33  ;;  %v7076_v28 = vsel %vm7075_vm13, %v8818_v59, %v7072_v52  ;;  %vm7158_vm11 = vcmp.eq.f32.partialorder %v7157_v31, 8.507059e+37  ;;  %v4227_v63 = vmul.f32 %v17300_v20, %v15346_v56 }
 0x8c8   : > { %v15671_v6 = vpop.permute.xlu1 %2543  ;;  %v7133_v58 = vmul.f32 %v7132_v9, %v15560_v40  ;;  %v8294_v14 = vclamps-f32 %v7002_v1, 1.0  ;;  %v6940_v21 = vmul.f32 %v6939_v30, %v15703_v43  ;;  %v15725_v9 = vpop.permute.xlu0 %7255  ;;  %v6927_v16 = vmul.f32 2.1237322e-06, %v15703_v43 }
 0x8c9   : > { %v7151_v11 = vmul.f32 %v15683_v35, %v7150_v62 }
 0x8ca   : > { %v7134_v42 = vadd.f32 0.18741608, %v7133_v58  ;;  %v7176_v46 = vadd.f32 1.0, %v8294_v14  ;;  %v6941_v12 = vadd.f32 0.014752088, %v6940_v21 }
 0x8cb   : > { %v7152_v59 = vadd.f32 %v15683_v35, %v7151_v11  ;;  %v17301_v11 = vld [vmem:[#allocation84_spill] sm:$0xff] }
 0x8cc   : > { %4262 = vperm.xlu0 %8415, %v4146_v50   ;;  %v7079_v50 = vand.u32 2147483648, %v15652_v36  ;;  %v7057_v36 = vmul.f32 %v7056_v37, %v15451_v0  ;;  %v7192_v23 = vmul.f32 %v7176_v46, %v6504_v48  ;;  %v6942_v17 = vmul.f32 %v6941_v12, %v15703_v43 }
 0x8cd   : > { %v7156_v0 = vsel %vm7155_vm9, %v15683_v35, %v7152_v59  ;;  %v6928_v46 = vadd.f32 0.00028619796, %v6927_v16 }
 0x8ce   : > { %v7080_v22 = vor.u32 1.1754944e-38, %v7079_v50  ;;  %v7213_v35 = vmul.f32 %v15578_v18, %v7192_v23  ;;  %v6943_v1 = vadd.f32 0.112945676, %v6942_v17 }
 0x8d0   : > { %v15693_v5 = vpop.permute.xlu1 %2553  ;;  %v7081_v25 = vsel %vm7078_vm3, %v7080_v22, %v7076_v28  ;;  %v6508_v28 = vmul.f32 0.5, %v15495_v29  ;;  %v4243_v22 = vmul.f32 %v17301_v11, %v15625_v27 }
 0x8d1   : > { %v7082_v26 = vmul.f32 %v7081_v25, %v7057_v36 }
 0x8d3   : > { %v8296_v8 = vclamps-f32 %v7082_v26, 1.0 }
 0x8d4   : > { %4272 = vperm.xlu0 %8415, %v4162_v57   ;;  %v7135_v57 = vmul.f32 %v7134_v42, %v15560_v40  ;;  %v7160_v40 = vor.u32 1.1754944e-38, %v7159_v51  ;;  %v6944_v42 = vmul.f32 %v6943_v1, %v15703_v43 }
 0x8d5   : > { %v7178_v39 = vadd.f32 1.0, %v8296_v8 }
 0x8d6   : > { %v7136_v60 = vadd.f32 1.1283791, %v7135_v57  ;;  %v7161_v33 = vsel %vm7158_vm11, %v7160_v40, %v7156_v0  ;;  %v6945_v36 = vadd.f32 0.4994258, %v6944_v42 }
 0x8d8   : > { %v15711_v24 = vpop.permute.xlu1 %2563  ;;  %v7137_v55 = vmul.f32 %v7136_v60, %v15523_v45  ;;  %v6946_v21 = vmul.f32 %v6945_v36, %v15703_v43 }
 0x8da   : > { %v7162_v2 = vmul.f32 %v7161_v33, %v7137_v55  ;;  %v15779_v11 = vadd.f32 1.0, %v6946_v21  ;;  %v7928_v21 = vld [vmem:[#allocation11 + $0x70] sm:$0xff] }
 0x8dc   : > { %4282 = vperm.xlu0 %8415, %v4178_v10   ;;  %v6506_v10 = vmul.f32 0.5, %v15429_v15  ;;  %v8298_v52 = vclamps-f32 %v7162_v2, 1.0 }
 0x8de   : > { %v7194_v41 = vmul.f32 %v7178_v39, %v6506_v10  ;;  %v7180_v32 = vadd.f32 1.0, %v8298_v52 }
 0x8e0   : > { %v15728_v19 = vpop.permute.xlu1 %2573  ;;  %v7215_v15 = vmul.f32 %v15578_v18, %v7194_v41  ;;  %v7196_v3 = vmul.f32 %v7180_v32, %v6508_v28  ;;  %v6929_v28 = vmul.f32 %v6928_v46, %v15703_v43 }
 0x8e2   : > { %v7217_v59 = vmul.f32 %v15578_v18, %v7196_v3  ;;  %v6930_v36 = vadd.f32 0.0036580483, %v6929_v28  ;;  %v7923_v28 = vld [vmem:[#allocation11 + $0x48] sm:$0xff] }
 0x8e4   : > { %4292 = vperm.xlu0 %8415, %v4194_v61  }
 0x8e8   : > { %v15745_v37 = vpop.permute.xlu1 %2583 }
 0x8ec   : > { %4302 = vperm.xlu0 %8415, %v4210_v7   ;;  %v17302_v7 = vld [vmem:[#allocation94_spill] sm:$0xff] }
 0x8ed   : > { %v4259_v23 = vmul.f32 %v17302_v7, %v15644_v49 }
 0x8f0   : > { %7240 = vadd.xlane.f32.xlu1 %v7213_v35  ;;  %v15762_v60 = vpop.permute.xlu1 %2598 }
 0x8f3   : > { %v15735_v58 = vpop.xlane.xlu0 %5832 }
 0x8f4   : > { %v5835_v45 = vperm.slane %v15735_v58, 0  ;;  %v15739_v62 = vperm.slane %v15735_v58, 1  ;;  %v15742_v50 = vperm.slane %v15735_v58, 2  ;;  %4317 = vperm.xlu0 %8415, %v4227_v63   ;;  %v15749_v56 = vperm.slane %v15735_v58, 3 }
 0x8f6   : > { %8821 = vrcp.f32 %v5835_v45  ;;  %v5860_v27 = vand.u32 2147483647, %v5835_v45  ;;  %v5862_v26 = vand.u32 2147483648, %v5835_v45  ;;  %v5878_v48 = vand.u32 2147483648, %v15739_v62 }
 0x8f7   : > { %8823 = vrcp.f32 %v15739_v62  ;;  %v5876_v33 = vand.u32 2147483647, %v15739_v62  ;;  %vm5856_vm8 = vweird.f32 %v5835_v45  ;;  %vm5872_vm4 = vweird.f32 %v15739_v62 }
 0x8f8   : > { %8825 = vrcp.f32 %v15742_v50  ;;  %7244 = vadd.xlane.f32.xlu1 %v7215_v15  ;;  %vm5861_vm3 = vcmp.eq.f32.partialorder %v5860_v27, 8.507059e+37  ;;  %v5863_v35 = vor.u32 1.1754944e-38, %v5862_v26  ;;  %v5879_v2 = vor.u32 1.1754944e-38, %v5878_v48 }
 0x8f9   : > { %8827 = vrcp.f32 %v15749_v56  ;;  %vm5877_vm9 = vcmp.eq.f32.partialorder %v5876_v33, 8.507059e+37  ;;  %v5894_v52 = vand.u32 2147483648, %v15742_v50  ;;  %vm5888_vm11 = vweird.f32 %v15742_v50 }
 0x8fa   : > { %v5892_v15 = vand.u32 2147483647, %v15742_v50  ;;  %8829 = vrcp.f32 %v15779_v11 }
 0x8fb   : > { %v5895_v16 = vor.u32 1.1754944e-38, %v5894_v52 }
 0x8fc   : > { %v8822_v61 = vpop.eup %8821  ;;  %4327 = vperm.xlu0 %8415, %v4243_v22   ;;  %v17304_v22 = vld [vmem:[#allocation62_spill] sm:$0xff] }
 0x8fd   : > { %v8824_v14 = vpop.eup %8823  ;;  %v5852_v25 = vmul.f32 %v8822_v61, %v5835_v45  ;;  %vm5857_vm15 = vweird.f32 %v8822_v61  ;;  %v17303_v45 = vld [vmem:[#allocation53_spill] sm:$0xff] }
 0x8fe   : > { %v8826_v57 = vpop.eup %8825  ;;  %v5868_v29 = vmul.f32 %v8824_v14, %v15739_v62  ;;  %vm5873_vm12 = vweird.f32 %v8824_v14  ;;  %vm5858_vm13 = vmor %vm5856_vm8, %vm5857_vm15 }
 0x8ff   : > { %v5853_v51 = vsub.f32 1.0, %v5852_v25  ;;  %v5884_v30 = vmul.f32 %v8826_v57, %v15742_v50  ;;  %v8828_v34 = vpop.eup %8827  ;;  %vm5874_vm5 = vmor %vm5872_vm4, %vm5873_vm12  ;;  %vm5889_vm10 = vweird.f32 %v8826_v57  ;;  %vm5893_vm12 = vcmp.eq.f32.partialorder %v5892_v15, 8.507059e+37  ;;  %v17308_v15 = vld [vmem:[#allocation64_spill] sm:$0xff] }
 0x900   : > { %7248 = vadd.xlane.f32.xlu1 %v7217_v59  ;;  %v5869_v31 = vsub.f32 1.0, %v5868_v29  ;;  %v5900_v49 = vmul.f32 %v8828_v34, %v15749_v56  ;;  %vm5890_vm15 = vmor %vm5888_vm11, %vm5889_vm10  ;;  %vm5905_vm8 = vweird.f32 %v8828_v34  ;;  %vm5904_vm4 = vweird.f32 %v15749_v56 }
 0x901   : > { %v5854_v0 = vmul.f32 %v8822_v61, %v5853_v51  ;;  %v5885_v40 = vsub.f32 1.0, %v5884_v30  ;;  %v5908_v51 = vand.u32 2147483647, %v15749_v56  ;;  %v6931_v30 = vmul.f32 %v6930_v36, %v15703_v43  ;;  %v15834_v36 = vld [vmem:[%s9438_s27 + $0x38] sm:$0xff] }
 0x902   : > { %v5870_v8 = vmul.f32 %v8824_v14, %v5869_v31  ;;  %v5901_v32 = vsub.f32 1.0, %v5900_v49  ;;  %v15792_v31 = vpop.eup %8829  ;;  %vm6953_vm10 = vweird.f32 %v15779_v11 }
 0x903   : > { %v5855_v55 = vadd.f32 %v8822_v61, %v5854_v0  ;;  %v5886_v12 = vmul.f32 %v8826_v57, %v5885_v40  ;;  %v6932_v0 = vadd.f32 0.05243302, %v6931_v30  ;;  %v7929_v40 = vld [vmem:[#allocation11 + $0x78] sm:$0xff]  ;;  %v6949_v7 = vmul.f32 %v15792_v31, %v15779_v11  ;;  %v15849_v30 = vld [vmem:[%s9438_s27] sm:$0xff] }
 0x904   : > { %4337 = vperm.xlu0 %8415, %v4259_v23   ;;  %v5871_v39 = vadd.f32 %v8824_v14, %v5870_v8  ;;  %7982 = vmatpush.msrb.mxu0 %v7929_v40  ;;  %v7927_v8 = vld [vmem:[#allocation11 + $0x68] sm:$0xff] }
 0x905   : > { %v5859_v10 = vsel %vm5858_vm13, %v8822_v61, %v5855_v55  ;;  %v5887_v17 = vadd.f32 %v8826_v57, %v5886_v12  ;;  %v5902_v61 = vmul.f32 %v8828_v34, %v5901_v32  ;;  %vm5906_vm13 = vmor %vm5904_vm4, %vm5905_vm8  ;;  %v6933_v33 = vmul.f32 %v6932_v0, %v15703_v43  ;;  %v17306_v12 = vld [vmem:[#allocation32_spill] sm:$0xff]  ;;  %v7921_v0 = vld [vmem:[#allocation11 + $0x38] sm:$0xff] }
 0x906   : > { %v15770_v20 = vpop.permute.xlu0 %2548  ;;  %v5864_v63 = vsel %vm5861_vm3, %v5863_v35, %v5859_v10  ;;  %v5875_v41 = vsel %vm5874_vm5, %v8824_v14, %v5871_v39  ;;  %v15783_v14 = vpop.permute.xlu1 %2608  ;;  %vm5909_vm3 = vcmp.eq.f32.partialorder %v5908_v51, 8.507059e+37  ;;  %7983 = vmatpush.msrb.mxu0 %v7928_v21  ;;  %v6950_v55 = vsub.f32 1.0, %v6949_v7  ;;  %v7926_v39 = vld [vmem:[#allocation11 + $0x60] sm:$0xff]  ;;  %v7924_v10 = vld [vmem:[#allocation11 + $0x50] sm:$0xff] }
 0x907   : > { %v5866_v62 = vmul.f32 %v17303_v45, %v5864_v63  ;;  %v15774_v1 = vsel %vm5877_vm9, %v5879_v2, %v5875_v41  ;;  %v5891_v42 = vsel %vm5890_vm15, %v8826_v57, %v5887_v17  ;;  %v5903_v50 = vadd.f32 %v8828_v34, %v5902_v61  ;;  %v7925_v2 = vld [vmem:[#allocation11 + $0x58] sm:$0xff]  ;;  %v15810_v41 = vld [vmem:[%s9438_s27 + $0x18] sm:$0xff] }
 0x908   : > { %v5881_v3 = vmul.f32 %v17304_v22, %v15774_v1  ;;  %v5896_v25 = vsel %vm5893_vm12, %v5895_v16, %v5891_v42  ;;  %v5910_v57 = vand.u32 2147483648, %v15749_v56  ;;  %7984 = vmatpush.msrb.mxu0 %v7927_v8  ;;  %v7258_v35 = vadd.f32 %v15725_v9, %v17306_v12  ;;  %v17307_v45 = vld [vmem:[#allocation26_spill] sm:$0xff]  ;;  %v15819_v42 = vld [vmem:[%s9438_s27 + $0x28] sm:$0xff] }
 0x909   : > { %5986 = vperm.xlu2 %8419, %v5866_v62   ;;  %v5897_v29 = vmul.f32 %v14732_v47, %v5896_v25  ;;  %v5907_v46 = vsel %vm5906_vm13, %v8828_v34, %v5903_v50  ;;  %v5898_v27 = vmul.f32 %v14734_v53, %v5896_v25  ;;  %v17305_v34 = vld [vmem:[#allocation57_spill] sm:$0xff]  ;;  %v6951_v49 = vmul.f32 %v15792_v31, %v6950_v55  ;;  %v15824_v16 = vld [vmem:[%s9438_s27 + $0x10] sm:$0xff] }
 0x90a   : > { %v5911_v26 = vor.u32 1.1754944e-38, %v5910_v57  ;;  %v5865_v23 = vmul.f32 %v17305_v34, %v5864_v63  ;;  %7985 = vmatpush.msrb.mxu0 %v7926_v39  ;;  %v15814_v62 = vadd.f32 %v7258_v35, %v17307_v45  ;;  %v5882_v32 = vmul.f32 %v17308_v15, %v15774_v1  ;;  %v15829_v25 = vld [vmem:[%s9438_s27 + $0x8] sm:$0xff]  ;;  %v15840_v57 = vld [vmem:[%s9438_s27 + $0x20] sm:$0xff]  ;;  %v15889_v45 = vld [vmem:[%s9438_s27 + $0x50] sm:$0xff] }
 0x90b   : > { %v2623_v61 = vmul.f32 %v15824_v16, %v15693_v5  ;;  %v2622_v1 = vmul.f32 %v15829_v25, %v15770_v20  ;;  %v2625_v5 = vmul.f32 %v15840_v57, %v15711_v24  ;;  %v6952_v20 = vadd.f32 %v15792_v31, %v6951_v49  ;;  %v7920_v34 = vld [vmem:[#allocation11 + $0x30] sm:$0xff]  ;;  %v15878_v39 = vld [vmem:[%s9438_s27 + $0x40] sm:$0xff] }
 0x90c   : > { %5991 = vperm.xlu0 %8415, %v5881_v3   ;;  %v15794_v48 = vsel %vm5909_vm3, %v5911_v26, %v5907_v46  ;;  %7986 = vmatpush.msrb.mxu0 %v7925_v2  ;;  %vm6954_vm5 = vweird.f32 %v15792_v31  ;;  %v2621_v46 = vmul.f32 %v15849_v30, %v15671_v6  ;;  %v6957_v21 = vand.u32 2147483647, %v15779_v11 }
 0x90d   : > { %v5914_v53 = vmul.f32 %v14771_v38, %v15794_v48  ;;  %v6934_v38 = vadd.f32 0.18741608, %v6933_v33  ;;  %vm15862_vm9 = vmor %vm6953_vm10, %vm6954_vm5  ;;  %v2629_v2 = vmul.f32 %v15878_v39, %v15745_v37  ;;  %vm17326_vm15 = vcmask 1045509  }
 0x90e   : > { %v2559_v59 = vpop.permute.xlu0 %2558  ;;  %v15796_v47 = vpop.permute.xlu1 %2618  ;;  %7987 = vmatpush.msrb.mxu0 %v7924_v10  ;;  %v2637_v7 = vadd.f32 %v2622_v1, %v2621_v46  ;;  %v6956_v12 = vsel %vm15862_vm9, %v15792_v31, %v6952_v20  ;;  %v15883_v10 = vld [vmem:[%s9438_s27 + $0x48] sm:$0xff]  ;;  %vm6958_vm11 = vcmp.eq.f32.partialorder %v6957_v21, 8.507059e+37  ;;  %v7917_v21 = vld [vmem:[#allocation11 + $0x18] sm:$0xff]  ;;  %vm17327_vm12 = vcmask 1046534   ;;  %vm17336_vm8 = vmmov %vm17326_vm15 }
 0x90f   : > { %v2624_v52 = vmul.f32 %v15810_v41, %v2559_v59  ;;  %v6935_v3 = vmul.f32 %v6934_v38, %v15703_v43  ;;  %v7922_v43 = vld [vmem:[#allocation11 + $0x40] sm:$0xff]  ;;  %v6959_v59 = vand.u32 2147483648, %v15779_v11  ;;  %v17312_v11 = vld [vmem:[#allocation29_spill] sm:$0xff]  ;;  %vm17337_vm4 = vmmov %vm17327_vm12  ;;  %vm17340_vm13 = vcmask 130112  }
 0x910   : > { %7988 = vmatpush.msrb.mxu0 %v7923_v28  ;;  %v17314_v1 = vld [vmem:[#allocation89_spill] sm:$0xff]  ;;  %vm17341_vm3 = vmmov %vm17340_vm13 }
 0x911   : > { %6001 = vperm.xlu2 %8419, %v5897_v29   ;;  %v17309_v29 = vld [vmem:[#allocation56_spill] sm:$0xff]  ;;  %v2644_v24 = vadd.f32 %v2624_v52, %v2623_v61  ;;  %v6936_v6 = vadd.f32 1.1283791, %v6935_v3  ;;  %v6960_v35 = vor.u32 1.1754944e-38, %v6959_v59  ;;  %vm17342_vm5 = vmmov %vm17341_vm3 }
 0x912   : > { %v7260_v51 = vadd.f32 %v15725_v9, %v17309_v29  ;;  %7989 = vmatpush.msrb.mxu0 %v7922_v43  ;;  %v7919_v52 = vld [vmem:[#allocation11 + $0x28] sm:$0xff]  ;;  %vm17343_vm10 = vmmov %vm17341_vm3 }
 0x913   : > { %v2645_v38 = vrot.slane %v2644_v24, 4  ;;  %v6961_v3 = vsel %vm6958_vm11, %v6960_v35, %v6956_v12  ;;  %v7916_v12 = vld [vmem:[#allocation11 + $0x10] sm:$0xff]  ;;  %vm17344_vm9 = vmmov %vm17341_vm3 }
 0x914   : > { %6006 = vperm.xlu0 %8415, %v5898_v27   ;;  %v15854_v27 = vld [vmem:[%s9438_s27 + $0x30] sm:$0xff]  ;;  %v15872_v55 = vadd.f32 %v7260_v51, %v17312_v11  ;;  %7990 = vmatpush.msrb.mxu0 %v7921_v0  ;;  %v7918_v0 = vld [vmem:[#allocation11 + $0x20] sm:$0xff]  ;;  %v15909_v11 = vld [vmem:[%s9438_s27 + $0x60] sm:$0xff] }
 0x915   : > { %v2627_v26 = vmul.f32 %v15854_v27, %v15728_v19  ;;  %v2646_v43 = vadd.f32 %v2645_v38, %v2644_v24  ;;  %vm17345_vm11 = vmmov %vm17341_vm3 }
 0x916   : > { %v2569_v56 = vpop.permute.xlu0 %2568  ;;  %v15807_v63 = vpop.permute.xlu1 %4267  ;;  %7991 = vmatpush.msrb.mxu0 %v7920_v34 }
 0x917   : > { %v2626_v22 = vmul.f32 %v15819_v42, %v2569_v56  ;;  %v2594_v56 = vpop.permute.xlu2 %2593 }
 0x918   : > { %v2631_v15 = vmul.f32 %v15889_v45, %v2594_v56  ;;  %7992 = vmatpush.msrb.mxu0 %v7919_v52 }
 0x919   : > { %6016 = vperm.xlu2 %8419, %v5914_v53   ;;  %5981 = vperm.xlu1 %8418, %v5865_v23   ;;  %v2651_v40 = vadd.f32 %v2626_v22, %v2625_v5  ;;  %v15867_v23 = vld [vmem:[%s9438_s27 + $0x58] sm:$0xff]  ;;  %v17315_v5 = vld [vmem:[#allocation54_spill] sm:$0xff] }
 0x91a   : > { %v2632_v8 = vmul.f32 %v15867_v23, %v15762_v60  ;;  %v7259_v29 = vadd.f32 %v15725_v9, %v17315_v5  ;;  %7993 = vmatpush.msrb.mxu0 %v7918_v0 }
 0x91b   : > { %v2652_v31 = vrot.slane %v2651_v40, 4 }
 0x91c   : > { %v2672_v61 = vadd.f32 %v2632_v8, %v2631_v15  ;;  %v17316_v8 = vld [vmem:[#allocation33_spill] sm:$0xff]  ;;  %7994 = vmatpush.msrb.mxu0 %v7917_v21  ;;  %v17318_v15 = vld [vmem:[#allocation46_spill] sm:$0xff] }
 0x91d   : > { %v2653_v51 = vadd.f32 %v2652_v31, %v2651_v40  ;;  %v7264_v31 = vadd.f32 %v15725_v9, %v17318_v15 }
 0x91e   : > { %v2579_v17 = vpop.permute.xlu0 %2578  ;;  %v15892_v28 = vpop.permute.xlu1 %4277  ;;  %v2673_v56 = vrot.slane %v2672_v61, 4  ;;  %7995 = vmatpush.msrb.mxu0 %v7916_v12 }
 0x91f   : > { %v2628_v50 = vmul.f32 %v15834_v36, %v2579_v17  ;;  %v17313_v17 = vld [vmem:[#allocation74_spill] sm:$0xff]  ;;  %v2654_v35 = vrot.slane %v2653_v51, 2 }
 0x920   : > { %v5913_v49 = vmul.f32 %v17313_v17, %v15794_v48  ;;  %v7262_v48 = vadd.f32 %v15725_v9, %v17314_v1 }
 0x921   : > { %7307 = vperm.xlu2 %8419, %v15814_v62   ;;  %5996 = vperm.xlu1 %8418, %v5882_v32   ;;  %v2658_v53 = vadd.f32 %v2628_v50, %v2627_v26  ;;  %v2638_v32 = vrot.slane %v2637_v7, 4  ;;  %v6937_v50 = vmul.f32 %v6936_v6, %v15687_v13  ;;  %v15904_v13 = vld [vmem:[%s9438_s27 + $0x68] sm:$0xff]  ;;  %v2647_v6 = vrot.slane %v2646_v43, 2 }
 0x922   : > { %v2634_v24 = vmul.f32 %v15904_v13, %v15783_v14  ;;  %v7915_v14 = vld [vmem:[#allocation11 + $0x8] sm:$0xff] }
 0x923   : > { %v2659_v37 = vrot.slane %v2658_v53, 4  ;;  %v6962_v20 = vmul.f32 %v6961_v3, %v6937_v50  ;;  %v2639_v46 = vadd.f32 %v2638_v32, %v2637_v7  ;;  %v17317_v7 = vld [vmem:[#allocation27_spill] sm:$0xff]  ;;  %v17319_v32 = vld [vmem:[#allocation81_spill] sm:$0xff]  ;;  %7996 = vmatpush.msrb.mxu0 %v7915_v14 }
 0x925   : > { %v2660_v26 = vadd.f32 %v2659_v37, %v2658_v53  ;;  %v15913_v53 = vadd.f32 %v7259_v29, %v17317_v7  ;;  %v2640_v38 = vrot.slane %v2639_v46, 2  ;;  %v7263_v37 = vadd.f32 %v15725_v9, %v17319_v32  ;;  %v17323_v32 = vld [vmem:[#allocation51_spill] sm:$0xff] }
 0x926   : > { %v2589_v33 = vpop.permute.xlu0 %2588  ;;  %v15921_v3 = vpop.permute.xlu1 %4287  ;;  %v6503_v29 = vmul.f32 0.5, %v15676_v44 }
 0x927   : > { %v2630_v60 = vmul.f32 %v15883_v10, %v2589_v33  ;;  %v15901_v33 = vadd.f32 %v7262_v48, %v17316_v8  ;;  %v2655_v48 = vadd.f32 %v2654_v35, %v2653_v51  ;;  %v17321_v8 = vld [vmem:[#allocation31_spill] sm:$0xff] }
 0x929   : > { %v2665_v22 = vadd.f32 %v2630_v60, %v2629_v2  ;;  %7313 = vperm.xlu2 %8419, %v15872_v55   ;;  %6011 = vperm.xlu1 %8418, %v5913_v49   ;;  %v8293_v2 = vclamps-f32 %v6962_v20, 1.0  ;;  %v2661_v60 = vrot.slane %v2660_v26, 2  ;;  %v2674_v49 = vadd.f32 %v2673_v56, %v2672_v61  ;;  %v17320_v56 = vld [vmem:[#allocation30_spill] sm:$0xff] }
 0x92a   : > { %v2656_v7 = vrot.slane %v2655_v48, 1 }
 0x92b   : > { %v2666_v59 = vrot.slane %v2665_v22, 4  ;;  %v7175_v50 = vadd.f32 1.0, %v8293_v2  ;;  %v2662_v5 = vadd.f32 %v2661_v60, %v2660_v26  ;;  %v2675_v20 = vrot.slane %v2674_v49, 2  ;;  %v15936_v26 = vld [vmem:[%s9438_s27 + $0x70] sm:$0xff] }
 0x92d   : > { %v2667_v34 = vadd.f32 %v2666_v59, %v2665_v22  ;;  %v2648_v22 = vadd.f32 %v2647_v6, %v2646_v43  ;;  %v2641_v59 = vadd.f32 %v2640_v38, %v2639_v46  ;;  %v15928_v43 = vadd.f32 %v7263_v37, %v17321_v8 }
 0x92e   : > { %v2604_v19 = vpop.permute.xlu0 %2603  ;;  %v7191_v12 = vmul.f32 %v7175_v50, %v6503_v29  ;;  %v2663_v2 = vrot.slane %v2662_v5, 1  ;;  %v7265_v37 = vadd.f32 %v15725_v9, %v17323_v32 }
 0x92f   : > { %v2633_v40 = vmul.f32 %v15909_v11, %v2604_v19  ;;  %v2668_v52 = vrot.slane %v2667_v34, 2  ;;  %v15925_v19 = vadd.f32 %v7264_v31, %v17320_v56  ;;  %v2649_v6 = vrot.slane %v2648_v22, 1  ;;  %v15948_v56 = vpop.permute.xlu1 %4297 }
 0x930   : > { %v2642_v35 = vrot.slane %v2641_v59, 1  ;;  %v7212_v50 = vmul.f32 %v15578_v18, %v7191_v12 }
 0x931   : > { %v2679_v17 = vadd.f32 %v2634_v24, %v2633_v40  ;;  %7319 = vperm.xlu2 %8419, %v15901_v33   ;;  %7310 = vperm.xlu1 %8418, %v15913_v53   ;;  %v2669_v0 = vadd.f32 %v2668_v52, %v2667_v34  ;;  %v15931_v24 = vld [vmem:[%s9438_s27 + $0x78] sm:$0xff]  ;;  %v15939_v34 = vpop.permute.xlu2 %4312  ;;  %v2676_v52 = vadd.f32 %v2675_v20, %v2674_v49 }
 0x932   : > { %v2636_v51 = vmul.f32 %v15931_v24, %v15796_v47  ;;  %v7914_v40 = vld [vmem:[#allocation11] sm:$0xff]  ;;  %v17322_v47 = vld [vmem:[#allocation96_spill] sm:$0xff]  ;;  %v2650_v15 = vadd.f32 %v2649_v6, %v2648_v22  ;;  %v2643_v29 = vadd.f32 %v2642_v35, %v2641_v59  ;;  %v17325_v6 = vld [vmem:[#allocation38_spill] sm:$0xff] }
 0x933   : > { %v2680_v1 = vrot.slane %v2679_v17, 4  ;;  %7997 = vmatpush.msrb.mxu0 %v7914_v40  ;;  %v7267_v60 = vadd.f32 %v15725_v9, %v17322_v47  ;;  %v2677_v22 = vrot.slane %v2676_v52, 1 }
 0x935   : > { %v2681_v61 = vadd.f32 %v2680_v1, %v2679_v17  ;;  %v2670_v17 = vrot.slane %v2669_v0, 1  ;;  %v2657_v1 = vadd.f32 %v2656_v7, %v2655_v48  ;;  %v15955_v48 = vadd.f32 %v7265_v37, %v17325_v6  ;;  %v17332_v6 = vld [vmem:[#allocation34_spill] sm:$0xff] }
 0x936   : > { %v2614_v21 = vpop.permute.xlu0 %2613  ;;  %v2678_v12 = vadd.f32 %v2677_v22, %v2676_v52  ;;  %v7944_v22 = vld [vmem:[#allocation11 + $0xf0] sm:$0xff] }
 0x937   : > { %v2682_v46 = vrot.slane %v2681_v61, 2  ;;  %v2635_v44 = vmul.f32 %v15936_v26, %v2614_v21  ;;  %v2664_v21 = vadd.f32 %v2663_v2, %v2662_v5  ;;  %v2671_v40 = vadd.f32 %v2670_v17, %v2669_v0  ;;  %v4308_v37 = vpop.permute.xlu1 %4307 }
 0x939   : > { %v2686_v38 = vadd.f32 %v2636_v51, %v2635_v44  ;;  %7325 = vperm.xlu2 %8419, %v15925_v19   ;;  %7322 = vperm.xlu1 %8418, %v15928_v43   ;;  %v2683_v14 = vadd.f32 %v2682_v46, %v2681_v61  ;;  %v17324_v51 = vld [vmem:[#allocation43_spill] sm:$0xff]  ;;  %v7858_v61 = vsel %vm2213_vm14, %v2650_v15, %v2643_v29  ;;  %v7243_v18 = vpop.xlane.xlu2 %7242  ;;  %v17330_v29 = vld [vmem:[#allocation28_spill] sm:$0xff] }
 0x93a   : > { %v15951_v44 = vadd.f32 %v7267_v60, %v17324_v51  ;;  %v7859_v59 = vsel %vm2215_vm0, %v2657_v1, %v7858_v61  ;;  %v7270_v35 = vadd.f32 %v15725_v9, %v7243_v18  ;;  %v17331_v51 = vld [vmem:[#allocation76_spill] sm:$0xff] }
 0x93b   : > { %v2687_v31 = vrot.slane %v2686_v38, 4  ;;  %v2684_v47 = vrot.slane %v2683_v14, 1  ;;  %v7860_v0 = vsel %vm2217_vm1, %v2664_v21, %v7859_v59 }
 0x93c   : > { %v7861_v7 = vsel %vm2219_vm2, %v2671_v40, %v7860_v0  ;;  %v7266_v40 = vadd.f32 %v15725_v9, %v17331_v51  ;;  %v7941_v0 = vld [vmem:[#allocation11 + $0xd8] sm:$0xff] }
 0x93d   : > { %v2688_v8 = vadd.f32 %v2687_v31, %v2686_v38  ;;  %v2685_v46 = vadd.f32 %v2684_v47, %v2683_v14  ;;  %v7862_v60 = vsel %vm17326_vm15, %v2678_v12, %v7861_v7  ;;  %v17328_v31 = vld [vmem:[#allocation48_spill] sm:$0xff]  ;;  %v17329_v14 = vld [vmem:[#allocation37_spill] sm:$0xff]  ;;  %v7945_v47 = vld [vmem:[#allocation11 + $0xf8] sm:$0xff] }
 0x93e   : > { %7238 = vadd.xlane.f32.xlu0 %v7212_v50  ;;  %v4263_v49 = vpop.permute.xlu0 %4262  ;;  %v15966_v32 = vadd.f32 %v7270_v35, %v17328_v31  ;;  %v7261_v52 = vadd.f32 %v15725_v9, %v17329_v14  ;;  %8002 = vmatpush.msrb.mxu1 %v7945_v47  ;;  %v15981_v18 = vadd.f32 %v7266_v40, %v17332_v6  ;;  %v7939_v12 = vld [vmem:[#allocation11 + $0xc8] sm:$0xff]  ;;  %v7937_v14 = vld [vmem:[#allocation11 + $0xb8] sm:$0xff]  ;;  %vm17346_vm15 = vmmov %vm17341_vm3 }
 0x93f   : > { %v2689_v20 = vrot.slane %v2688_v8, 2  ;;  %v7863_v15 = vsel %vm17327_vm12, %v2685_v46, %v7862_v60  ;;  %v7940_v46 = vld [vmem:[#allocation11 + $0xd0] sm:$0xff]  ;;  %v4343_v60 = vmul.f32 %v15810_v41, %v15892_v28  ;;  %v4347_v28 = vmul.f32 %v15834_v36, %v15948_v56  ;;  %vm17347_vm12 = vmmov %vm17336_vm8 }
 0x940   : > { %v15973_v21 = vadd.f32 %v7261_v52, %v17330_v29  ;;  %8003 = vmatpush.msrb.mxu1 %v7944_v22  ;;  %v4345_v52 = vmul.f32 %v15819_v42, %v15921_v3  ;;  %v4349_v40 = vmul.f32 %v15883_v10, %v4308_v37  ;;  %v17333_v22 = vld [vmem:[#allocation35_spill] sm:$0xff] }
 0x941   : > { %v2690_v5 = vadd.f32 %v2689_v20, %v2688_v8  ;;  %7334 = vperm.xlu2 %8419, %v15951_v44   ;;  %7328 = vperm.xlu1 %8418, %v15955_v48   ;;  %v15975_v8 = vpop.permute.xlu1 %4322  ;;  %v7943_v20 = vld [vmem:[#allocation11 + $0xe8] sm:$0xff] }
 0x942   : > { %8004 = vmatpush.msrb.mxu1 %v7943_v20  ;;  %v7247_v20 = vpop.xlane.xlu2 %7246 }
 0x943   : > { %v2691_v2 = vrot.slane %v2690_v5, 1 }
 0x945   : > { %v2692_v38 = vadd.f32 %v2691_v2, %v2690_v5  ;;  %v7942_v5 = vld [vmem:[#allocation11 + $0xe0] sm:$0xff] }
 0x946   : > { %v4273_v17 = vpop.permute.xlu0 %4272  ;;  %8005 = vmatpush.msrb.mxu1 %v7942_v5  ;;  %v7938_v2 = vld [vmem:[#allocation11 + $0xc0] sm:$0xff] }
 0x947   : > { %v7864_v1 = vsel %vm2225_vm6, %v2692_v38, %v7863_v15  ;;  %v4342_v35 = vmul.f32 %v15824_v16, %v4273_v17  ;;  %v4340_v15 = vmul.f32 %v15849_v30, %v4263_v49  ;;  %v7936_v49 = vld [vmem:[#allocation11 + $0xb0] sm:$0xff] }
 0x948   : > { %7998 = vmatmul.f32.vlgmr.msrb.gmra.mxu0 %v7864_v1  ;;  %8006 = vmatpush.msrb.mxu1 %v7941_v0  ;;  %v7935_v0 = vld [vmem:[#allocation11 + $0xa8] sm:$0xff] }
 0x949   : > { %7343 = vperm.xlu2 %8419, %v15966_v32   ;;  %v15984_v59 = vpop.permute.xlu1 %4332  ;;  %v4363_v51 = vadd.f32 %v4343_v60, %v4342_v35 }
 0x94a   : > { %8007 = vmatpush.msrb.mxu1 %v7940_v46  ;;  %v7934_v46 = vld [vmem:[#allocation11 + $0xa0] sm:$0xff] }
 0x94b   : > { %v4364_v10 = vrot.slane %v4363_v51, 4 }
 0x94c   : > { %8008 = vmatpush.msrb.mxu1 %v7939_v12 }
 0x94e   : > { %v4283_v50 = vpop.permute.xlu0 %4282  ;;  %8009 = vmatpush.msrb.mxu1 %v7938_v2 }
 0x94f   : > { %v4344_v38 = vmul.f32 %v15840_v57, %v4283_v50  ;;  %v4341_v50 = vmul.f32 %v15829_v25, %v15807_v63 }
 0x950   : > { %8010 = vmatpush.msrb.mxu1 %v7937_v14 }
 0x951   : > { %v4370_v47 = vadd.f32 %v4345_v52, %v4344_v38  ;;  %v4356_v6 = vadd.f32 %v4341_v50, %v4340_v15  ;;  %v7932_v15 = vld [vmem:[#allocation11 + $0x90] sm:$0xff] }
 0x952   : > { %7316 = vperm.xlu0 %8415, %v15973_v21   ;;  %8011 = vmatpush.msrb.mxu1 %v7936_v49  ;;  %v7931_v49 = vld [vmem:[#allocation11 + $0x88] sm:$0xff] }
 0x953   : > { %v4371_v12 = vrot.slane %v4370_v47, 4  ;;  %v4357_v35 = vrot.slane %v4356_v6, 4 }
 0x954   : > { %8012 = vmatpush.msrb.mxu1 %v7935_v0 }
 0x955   : > { %v4372_v14 = vadd.f32 %v4371_v12, %v4370_v47 }
 0x956   : > { %v4293_v61 = vpop.permute.xlu0 %4292  ;;  %8013 = vmatpush.msrb.mxu1 %v7934_v46 }
 0x957   : > { %v4346_v31 = vmul.f32 %v15854_v27, %v4293_v61 }
 0x959   : > { %v4377_v5 = vadd.f32 %v4347_v28, %v4346_v31  ;;  %v17334_v31 = vld [vmem:[#allocation52_spill] sm:$0xff] }
 0x95a   : > { %7331 = vperm.xlu0 %8415, %v15981_v18  }
 0x95b   : > { %v4378_v2 = vrot.slane %v4377_v5, 4 }
 0x95d   : > { %v4379_v50 = vadd.f32 %v4378_v2, %v4377_v5  ;;  %v7930_v5 = vld [vmem:[#allocation11 + $0x80] sm:$0xff] }
 0x95e   : > { %v4303_v7 = vpop.permute.xlu0 %4302 }
 0x95f   : > { %v4348_v29 = vmul.f32 %v15878_v39, %v4303_v7  ;;  %v4350_v39 = vmul.f32 %v15889_v45, %v15939_v34  ;;  %v7272_v7 = vadd.f32 %v15725_v9, %v7247_v20  ;;  %v7933_v34 = vld [vmem:[#allocation11 + $0x98] sm:$0xff]  ;;  %v4380_v20 = vrot.slane %v4379_v50, 2 }
 0x960   : > { %8014 = vmatpush.msrb.mxu1 %v7933_v34 }
 0x961   : > { %v4384_v56 = vadd.f32 %v4349_v40, %v4348_v29  ;;  %v4352_v29 = vmul.f32 %v15909_v11, %v15975_v8  ;;  %v4381_v2 = vadd.f32 %v4380_v20, %v4379_v50 }
 0x962   : > { %8015 = vmatpush.msrb.mxu1 %v7932_v15 }
 0x963   : > { %v7241_v1 = vpop.xlane.xlu1 %7240  ;;  %v4385_v38 = vrot.slane %v4384_v56, 4 }
 0x964   : > { %v7269_v17 = vadd.f32 %v15725_v9, %v7241_v1  ;;  %v16012_v1 = vadd.f32 %v7272_v7, %v17334_v31  ;;  %8016 = vmatpush.msrb.mxu1 %v7931_v49  ;;  %v17335_v7 = vld [vmem:[#allocation49_spill] sm:$0xff] }
 0x965   : > { %v4386_v40 = vadd.f32 %v4385_v38, %v4384_v56  ;;  %v4354_v56 = vmul.f32 %v15936_v26, %v15984_v59 }
 0x966   : > { %v16002_v61 = vadd.f32 %v7269_v17, %v17333_v22  ;;  %v4318_v3 = vpop.permute.xlu0 %4317  ;;  %v4358_v17 = vadd.f32 %v4357_v35, %v4356_v6  ;;  %8017 = vmatpush.msrb.mxu1 %v7930_v5 }
 0x967   : > { %v4351_v63 = vmul.f32 %v15867_v23, %v4318_v3  ;;  %v4365_v23 = vadd.f32 %v4364_v10, %v4363_v51  ;;  %v4387_v10 = vrot.slane %v4386_v40, 2 }
 0x968   : > { %7340 = vperm.xlu0 %8415, %v16002_v61   ;;  %v4359_v47 = vrot.slane %v4358_v17, 2 }
 0x969   : > { %v4391_v37 = vadd.f32 %v4351_v63, %v4350_v39  ;;  %v4366_v51 = vrot.slane %v4365_v23, 2  ;;  %v4373_v39 = vrot.slane %v4372_v14, 2 }
 0x96a   : > { %v4360_v35 = vadd.f32 %v4359_v47, %v4358_v17 }
 0x96b   : > { %v16009_v45 = vpop.xlane.xlu1 %7244  ;;  %v4392_v60 = vrot.slane %v4391_v37, 4  ;;  %v4367_v8 = vadd.f32 %v4366_v51, %v4365_v23  ;;  %v4374_v46 = vadd.f32 %v4373_v39, %v4372_v14  ;;  %v4382_v14 = vrot.slane %v4381_v2, 1 }
 0x96c   : > { %v4361_v59 = vrot.slane %v4360_v35, 1 }
 0x96d   : > { %v4393_v22 = vadd.f32 %v4392_v60, %v4391_v37  ;;  %v4388_v60 = vadd.f32 %v4387_v10, %v4386_v40  ;;  %v4368_v23 = vrot.slane %v4367_v8, 1  ;;  %v4383_v40 = vadd.f32 %v4382_v14, %v4381_v2 }
 0x96e   : > { %v4328_v52 = vpop.permute.xlu0 %4327 }
 0x96f   : > { %v4353_v28 = vmul.f32 %v15904_v13, %v4328_v52  ;;  %v4394_v6 = vrot.slane %v4393_v22, 2  ;;  %v4375_v52 = vrot.slane %v4374_v46, 1  ;;  %v4389_v49 = vrot.slane %v4388_v60, 1 }
 0x970   : > { %7349 = vperm.xlu0 %8415, %v16012_v1   ;;  %v4369_v51 = vadd.f32 %v4368_v23, %v4367_v8 }
 0x971   : > { %v4398_v3 = vadd.f32 %v4353_v28, %v4352_v29  ;;  %v4395_v15 = vadd.f32 %v4394_v6, %v4393_v22  ;;  %v5987_v29 = vpop.permute.xlu2 %5986  ;;  %v4376_v50 = vadd.f32 %v4375_v52, %v4374_v46 }
 0x973   : > { %v4399_v63 = vrot.slane %v4398_v3, 4  ;;  %v7249_v0 = vpop.xlane.xlu1 %7248 }
 0x974   : > { %v7273_v11 = vadd.f32 %v15725_v9, %v7249_v0 }
 0x975   : > { %v4400_v13 = vadd.f32 %v4399_v63, %v4398_v3  ;;  %v4396_v3 = vrot.slane %v4395_v15, 1  ;;  %v4390_v63 = vadd.f32 %v4389_v49, %v4388_v60 }
 0x976   : > { %v16022_v37 = vadd.f32 %v7273_v11, %v17335_v7  ;;  %v4338_v12 = vpop.permute.xlu0 %4337 }
 0x977   : > { %v4401_v34 = vrot.slane %v4400_v13, 2  ;;  %v4355_v38 = vmul.f32 %v15931_v24, %v4338_v12  ;;  %v4362_v24 = vadd.f32 %v4361_v59, %v4360_v35  ;;  %v4397_v0 = vadd.f32 %v4396_v3, %v4395_v15 }
 0x978   : > { %7352 = vperm.xlu2 %8419, %v16022_v37   ;;  %v6060_v15 = vmul.f32 %v15829_v25, %v5987_v29 }
 0x979   : > { %v4405_v31 = vadd.f32 %v4355_v38, %v4354_v56  ;;  %v4402_v26 = vadd.f32 %v4401_v34, %v4400_v13  ;;  %v7874_v22 = vsel %vm2213_vm14, %v4369_v51, %v4362_v24  ;;  %v6002_v8 = vpop.permute.xlu2 %6001 }
 0x97a   : > { %v7875_v6 = vsel %vm2215_vm0, %v4376_v50, %v7874_v22  ;;  %v6063_v2 = vmul.f32 %v15840_v57, %v6002_v8 }
 0x97b   : > { %v4406_v28 = vrot.slane %v4405_v31, 4  ;;  %v4403_v39 = vrot.slane %v4402_v26, 1  ;;  %v7876_v5 = vsel %vm2217_vm1, %v4383_v40, %v7875_v6 }
 0x97c   : > { %v7877_v56 = vsel %vm2219_vm2, %v4390_v63, %v7876_v5 }
 0x97d   : > { %v4407_v17 = vadd.f32 %v4406_v28, %v4405_v31  ;;  %v4404_v11 = vadd.f32 %v4403_v39, %v4402_v26  ;;  %v7878_v7 = vsel %vm17336_vm8, %v4397_v0, %v7877_v56  ;;  %vm17348_vm8 = vmmov %vm17341_vm3 }
 0x97e   : > { %v5992_v47 = vpop.permute.xlu0 %5991 }
 0x97f   : > { %v4408_v20 = vrot.slane %v4407_v17, 2  ;;  %v7879_v35 = vsel %vm17337_vm4, %v4404_v11, %v7878_v7  ;;  %v6061_v28 = vmul.f32 %v15824_v16, %v5992_v47 }
 0x981   : > { %v4409_v10 = vadd.f32 %v4408_v20, %v4407_v17  ;;  %v6017_v3 = vpop.permute.xlu2 %6016 }
 0x982   : > { %v6066_v24 = vmul.f32 %v15834_v36, %v6017_v3  ;;  %v7271_v36 = vadd.f32 %v15725_v9, %v16009_v45 }
 0x983   : > { %v4410_v13 = vrot.slane %v4409_v10, 1 }
 0x985   : > { %v4411_v46 = vadd.f32 %v4410_v13, %v4409_v10  ;;  %v17338_v10 = vld [vmem:[#allocation40_spill] sm:$0xff] }
 0x986   : > { %v6007_v12 = vpop.permute.xlu0 %6006 }
 0x987   : > { %v6064_v34 = vmul.f32 %v15819_v42, %v6007_v12  ;;  %v7880_v38 = vsel %vm2225_vm6, %v4411_v46, %v7879_v35 }
 0x988   : > { %8018 = vmatmul.f32.vlgmr.msrb.gmra.mxu1 %v7880_v38 }
 0x989   : > { %v6089_v60 = vadd.f32 %v6064_v34, %v6063_v2  ;;  %v7308_v8 = vpop.permute.xlu2 %7307 }
 0x98b   : > { %v5982_v23 = vpop.permute.xlu1 %5981  ;;  %v6090_v13 = vrot.slane %v6089_v60, 4 }
 0x98c   : > { %v6059_v31 = vmul.f32 %v15849_v30, %v5982_v23 }
 0x98d   : > { %v6091_v5 = vadd.f32 %v6090_v13, %v6089_v60 }
 0x98e   : > { %v6075_v52 = vadd.f32 %v6060_v15, %v6059_v31 }
 0x98f   : > { %v6092_v46 = vrot.slane %v6091_v5, 2 }
 0x990   : > { %v6076_v26 = vrot.slane %v6075_v52, 4 }
 0x991   : > { %v6093_v12 = vadd.f32 %v6092_v46, %v6091_v5  ;;  %v7314_v2 = vpop.permute.xlu2 %7313 }
 0x992   : > { %v6077_v59 = vadd.f32 %v6076_v26, %v6075_v52  ;;  %v7357_v3 = vperm.slane %v7314_v2, %v13782_v54 }
 0x993   : > { %v5997_v14 = vpop.permute.xlu1 %5996  ;;  %v6094_v34 = vrot.slane %v6093_v12, 1 }
 0x994   : > { %v6062_v49 = vmul.f32 %v15810_v41, %v5997_v14  ;;  %v6078_v57 = vrot.slane %v6077_v59, 2 }
 0x995   : > { %v6095_v23 = vadd.f32 %v6094_v34, %v6093_v12 }
 0x996   : > { %v6082_v51 = vadd.f32 %v6062_v49, %v6061_v28  ;;  %v6079_v17 = vadd.f32 %v6078_v57, %v6077_v59 }
 0x998   : > { %v6083_v42 = vrot.slane %v6082_v51, 4  ;;  %v6080_v29 = vrot.slane %v6079_v17, 1 }
 0x999   : > { %v7320_v45 = vpop.permute.xlu2 %7319 }
 0x99a   : > { %v6084_v50 = vadd.f32 %v6083_v42, %v6082_v51  ;;  %v6081_v22 = vadd.f32 %v6080_v29, %v6079_v17 }
 0x99b   : > { %v6012_v39 = vpop.permute.xlu1 %6011 }
 0x99c   : > { %v6085_v25 = vrot.slane %v6084_v50, 2  ;;  %v6065_v30 = vmul.f32 %v15854_v27, %v6012_v39  ;;  %v17339_v27 = vld [vmem:[#allocation44_spill] sm:$0xff]  ;;  %v7354_v39 = vperm.slane %v7308_v8, %v13782_v54 }
 0x99d   : > { %v16050_v6 = vadd.f32 %v7271_v36, %v17339_v27 }
 0x99e   : > { %v6086_v40 = vadd.f32 %v6085_v25, %v6084_v50  ;;  %v6096_v20 = vadd.f32 %v6066_v24, %v6065_v30 }
 0x9a0   : > { %v6087_v63 = vrot.slane %v6086_v40, 1  ;;  %v6097_v56 = vrot.slane %v6096_v20, 4 }
 0x9a1   : > { %v7326_v59 = vpop.permute.xlu2 %7325 }
 0x9a2   : > { %v6088_v16 = vadd.f32 %v6087_v63, %v6086_v40  ;;  %v6098_v7 = vadd.f32 %v6097_v56, %v6096_v20  ;;  %v7360_v40 = vperm.slane %v7320_v45, %v13782_v54 }
 0x9a3   : > { %v7311_v52 = vpop.permute.xlu1 %7310 }
 0x9a4   : > { %v7890_v41 = vsel %vm2213_vm14, %v6088_v16, %v6081_v22  ;;  %v6099_v35 = vrot.slane %v6098_v7, 2  ;;  %v7355_v17 = vperm.slane %v7311_v52, %v13789_v4 }
 0x9a6   : > { %v6100_v38 = vadd.f32 %v6099_v35, %v6098_v7  ;;  %v7356_v29 = vsel %vm17341_vm3, %v7355_v17, %v7354_v39 }
 0x9a8   : > { %v6101_v15 = vrot.slane %v6100_v38, 1 }
 0x9a9   : > { %v7335_v49 = vpop.permute.xlu2 %7334 }
 0x9aa   : > { %v6102_v31 = vadd.f32 %v6101_v15, %v6100_v38 }
 0x9ab   : > { %v7323_v14 = vpop.permute.xlu1 %7322 }
 0x9ac   : > { %v7361_v30 = vperm.slane %v7323_v14, %v13789_v4 }
 0x9b1   : > { %v7239_v47 = vpop.xlane.xlu0 %7238  ;;  %v7344_v50 = vpop.permute.xlu2 %7343 }
 0x9b2   : > { %v7268_v0 = vadd.f32 %v15725_v9, %v7239_v47  ;;  %v7891_v9 = vsel %vm2215_vm0, %v6095_v23, %v7890_v41  ;;  %v7367_v41 = vperm.slane %v7335_v49, %v13789_v4  ;;  %v7362_v47 = vsel %vm17342_vm5, %v7361_v30, %v7360_v40  ;;  %vm17350_vm5 = vmmov %vm17341_vm3 }
 0x9b3   : > { %v16055_v26 = vsel %vm2217_vm1, %v6102_v31, %v7891_v9  ;;  %v7329_v57 = vpop.permute.xlu1 %7328  ;;  %v7372_v12 = vperm.slane %v7344_v50, %v13782_v54 }
 0x9b4   : > { %v16044_v11 = vadd.f32 %v7268_v0, %v17338_v10  ;;  %v7364_v22 = vperm.slane %v7329_v57, %v13789_v4  ;;  %v7363_v10 = vperm.slane %v7326_v59, %v13782_v54 }
 0x9b6   : > { %7337 = vperm.xlu1 %8418, %v16044_v11   ;;  %v7365_v8 = vsel %vm17344_vm9, %v7364_v22, %v7363_v10  ;;  %vm17352_vm9 = vmmov %vm17341_vm3 }
 0x9be   : > { %7346 = vperm.xlu1 %8418, %v16050_v6  }
 0x9c4   : > { %v7317_v60 = vpop.permute.xlu0 %7316 }
 0x9c5   : > { %v7358_v42 = vperm.slane %v7317_v60, %v13789_v4 }
 0x9c7   : > { %v7359_v24 = vsel %vm17340_vm13, %v7358_v42, %v7357_v3  ;;  %vm17349_vm13 = vmmov %vm17341_vm3 }
 0x9c8   : > { %v7378_v20 = vsel %vm2213_vm14, %v7359_v24, %v7356_v29 }
 0x9c9   : > { %v7379_v36 = vsel %vm2215_vm0, %v7362_v47, %v7378_v20 }
 0x9ca   : > { %v7380_v35 = vsel %vm2217_vm1, %v7365_v8, %v7379_v36 }
 0x9cc   : > { %v7332_v28 = vpop.permute.xlu0 %7331 }
 0x9cd   : > { %v7366_v63 = vperm.slane %v7332_v28, %v13782_v54 }
 0x9cf   : > { %v7368_v13 = vsel %vm17343_vm10, %v7367_v41, %v7366_v63  ;;  %vm17351_vm10 = vmmov %vm17341_vm3 }
 0x9d0   : > { %v7381_v34 = vsel %vm2219_vm2, %v7368_v13, %v7380_v35 }
 0x9d2   : > { %v7353_v5 = vpop.permute.xlu2 %7352 }
 0x9d3   : > { %v7376_v38 = vperm.slane %v7353_v5, %v13789_v4 }
 0x9da   : > { %v7341_v51 = vpop.permute.xlu0 %7340 }
 0x9db   : > { %v7370_v27 = vperm.slane %v7341_v51, %v13789_v4 }
 0x9e2   : > { %v7350_v0 = vpop.permute.xlu0 %7349 }
 0x9e3   : > { %v7375_v56 = vperm.slane %v7350_v0, %v13782_v54 }
 0x9e5   : > { %v7377_v9 = vsel %vm17348_vm8, %v7376_v38, %v7375_v56  ;;  %vm17355_vm8 = vmmov %vm17341_vm3 }
 0xa28   : > { %v7338_v25 = vpop.permute.xlu1 %7337 }
 0xa29   : > { %v7369_v16 = vperm.slane %v7338_v25, %v13782_v54 }
 0xa2b   : > { %v7371_v46 = vsel %vm17345_vm11, %v7370_v27, %v7369_v16  ;;  %vm17353_vm11 = vmmov %vm17341_vm3 }
 0xa2c   : > { %v7382_v15 = vsel %vm17347_vm12, %v7371_v46, %v7381_v34 }
 0xa30   : > { %v7347_v7 = vpop.permute.xlu1 %7346 }
 0xa31   : > { %v7373_v2 = vperm.slane %v7347_v7, %v13789_v4 }
 0xa33   : > { %v7374_v23 = vsel %vm17346_vm15, %v7373_v2, %v7372_v12  ;;  %vm17354_vm15 = vmmov %vm17341_vm3 }
 0xa34   : > { %v7383_v45 = vsel %vm17337_vm4, %v7374_v23, %v7382_v15 }
 0xa35   : > { %v7384_v31 = vsel %vm2225_vm6, %v7377_v9, %v7383_v45 }
 0xa36   : > { %v7386_v52 = vsel %vm2228_vm7, %v7384_v31, -inf }
 0xa37   : > { %7387 = vmax.xlane.f32.xlu1 %v7386_v52 }
 0xaaa   : > { %v16089_v60 = vpop.xlane.xlu1 %7387 }
 0xaab   : > { %v7390_v59 = vperm.slane %v16089_v60, 0  ;;  %v7391_v49 = vperm.slane %v16089_v60, 1  ;;  %v7395_v57 = vperm.slane %v16089_v60, 5  ;;  %v7392_v39 = vperm.slane %v16089_v60, 2 }
 0xaac   : > { %v7394_v16 = vperm.slane %v16089_v60, 4  ;;  %v7396_v27 = vperm.slane %v16089_v60, 6  ;;  %v7397_v46 = vperm.slane %v16089_v60, 7 }
 0xaad   : > { %v7406_v14 = vsub.f32 %v15814_v62, %v7390_v59  ;;  %v7407_v28 = vsub.f32 %v15913_v53, %v7390_v59  ;;  %v7408_v3 = vsub.f32 %v15872_v55, %v7391_v49  ;;  %v7409_v17 = vsub.f32 %v15973_v21, %v7391_v49 }
 0xaae   : > { %v7416_v50 = vsub.f32 %v16044_v11, %v7395_v57  ;;  %v7410_v29 = vsub.f32 %v15901_v33, %v7392_v39  ;;  %v7411_v55 = vsub.f32 %v15928_v43, %v7392_v39  ;;  %v7393_v21 = vperm.slane %v16089_v60, 3 }
 0xaaf   : > { %v7422_v51 = vmul.f32 1.442695, %v7406_v14  ;;  %v7424_v42 = vmul.f32 1.442695, %v7407_v28  ;;  %v7426_v24 = vmul.f32 1.442695, %v7408_v3  ;;  %v7417_v56 = vsub.f32 %v16002_v61, %v7395_v57 }
 0xab0   : > { %v7428_v62 = vmul.f32 1.442695, %v7409_v17  ;;  %v7442_v53 = vmul.f32 1.442695, %v7416_v50  ;;  %v7430_v11 = vmul.f32 1.442695, %v7410_v29  ;;  %v7412_v33 = vsub.f32 %v15925_v19, %v7393_v21 }
 0xab1   : > { %8831 = vpow2.f32 %v7422_v51  ;;  %v7432_v40 = vmul.f32 1.442695, %v7411_v55  ;;  %v7413_v43 = vsub.f32 %v15955_v48, %v7393_v21  ;;  %v7414_v19 = vsub.f32 %v15981_v18, %v7394_v16 }
 0xab2   : > { %8833 = vpow2.f32 %v7424_v42  ;;  %v7434_v41 = vmul.f32 1.442695, %v7412_v33  ;;  %v7415_v48 = vsub.f32 %v15951_v44, %v7394_v16  ;;  %v7418_v18 = vsub.f32 %v15966_v32, %v7396_v27 }
 0xab3   : > { %8835 = vpow2.f32 %v7426_v24  ;;  %v7436_v47 = vmul.f32 1.442695, %v7413_v43  ;;  %v7438_v36 = vmul.f32 1.442695, %v7414_v19  ;;  %v7444_v44 = vmul.f32 1.442695, %v7417_v56 }
 0xab4   : > { %8837 = vpow2.f32 %v7428_v62  ;;  %v7440_v13 = vmul.f32 1.442695, %v7415_v48  ;;  %v7446_v7 = vmul.f32 1.442695, %v7418_v18  ;;  %v7419_v2 = vsub.f32 %v16050_v6, %v7396_v27 }
 0xab5   : > { %8839 = vpow2.f32 %v7442_v53  ;;  %v7420_v61 = vsub.f32 %v16012_v1, %v7397_v46  ;;  %v7421_v15 = vsub.f32 %v16022_v37, %v7397_v46 }
 0xab6   : > { %8841 = vpow2.f32 %v7430_v11  ;;  %v7448_v32 = vmul.f32 1.442695, %v7419_v2 }
 0xab7   : > { %v16100_v25 = vpop.eup %8831  ;;  %8843 = vpow2.f32 %v7432_v40  ;;  %v7450_v34 = vmul.f32 1.442695, %v7420_v61  ;;  %v7452_v6 = vmul.f32 1.442695, %v7421_v15 }
 0xab8   : > { %v16102_v30 = vpop.eup %8833  ;;  %7471 = vperm.xlu0 %8415, %v16100_v25   ;;  %8845 = vpow2.f32 %v7434_v41 }
 0xab9   : > { %7474 = vperm.xlu2 %8419, %v16102_v30   ;;  %v16109_v20 = vpop.eup %8835  ;;  %8847 = vpow2.f32 %v7436_v47 }
 0xaba   : > { %v16111_v63 = vpop.eup %8837  ;;  %8849 = vpow2.f32 %v7438_v36 }
 0xabb   : > { %v16114_v22 = vpop.eup %8839  ;;  %8851 = vpow2.f32 %v7440_v13 }
 0xabc   : > { %7501 = vperm.xlu1 %8418, %v16114_v22   ;;  %v16121_v0 = vpop.eup %8841  ;;  %8853 = vpow2.f32 %v7444_v44 }
 0xabd   : > { %v16123_v10 = vpop.eup %8843  ;;  %8855 = vpow2.f32 %v7446_v7 }
 0xabe   : > { %v16130_v5 = vpop.eup %8845  ;;  %8857 = vpow2.f32 %v7448_v32 }
 0xabf   : > { %v16132_v8 = vpop.eup %8847  ;;  %8859 = vpow2.f32 %v7450_v34 }
 0xac0   : > { %7477 = vperm.xlu0 %8415, %v16109_v20   ;;  %v16139_v12 = vpop.eup %8849  ;;  %8861 = vpow2.f32 %v7452_v6 }
 0xac1   : > { %7480 = vperm.xlu2 %8419, %v16111_v63   ;;  %v16141_v35 = vpop.eup %8851 }
 0xac2   : > { %v16147_v38 = vpop.eup %8853 }
 0xac3   : > { %v16149_v23 = vpop.eup %8855 }
 0xac4   : > { %v16154_v9 = vpop.eup %8857 }
 0xac5   : > { %v16156_v45 = vpop.eup %8859 }
 0xac6   : > { %v16160_v1 = vpop.eup %8861 }
 0xac8   : > { %7483 = vperm.xlu0 %8415, %v16121_v0  }
 0xac9   : > { %7486 = vperm.xlu2 %8419, %v16123_v10  }
 0xad0   : > { %7489 = vperm.xlu0 %8415, %v16130_v5  }
 0xad1   : > { %7492 = vperm.xlu2 %8419, %v16132_v8  }
 0xad8   : > { %7495 = vperm.xlu0 %8415, %v16139_v12  }
 0xad9   : > { %7498 = vperm.xlu2 %8419, %v16141_v35  }
 0xae0   : > { %7504 = vperm.xlu0 %8415, %v16147_v38  }
 0xae1   : > { %7507 = vperm.xlu2 %8419, %v16149_v23  }
 0xae8   : > { %7510 = vperm.xlu0 %8415, %v16154_v9  }
 0xae9   : > { %7513 = vperm.xlu2 %8419, %v16156_v45  }
 0xaf0   : > { %7516 = vperm.xlu0 %8415, %v16160_v1  }
 0xb13   : > { %v7475_v31 = vpop.permute.xlu2 %7474 }
 0xb14   : > { %v7519_v11 = vperm.slane %v7475_v31, %v13789_v4 }
 0xb1b   : > { %v7481_v52 = vpop.permute.xlu2 %7480 }
 0xb1c   : > { %v7522_v24 = vperm.slane %v7481_v52, %v13789_v4 }
 0xb23   : > { %v7487_v59 = vpop.permute.xlu2 %7486 }
 0xb24   : > { %v7525_v29 = vperm.slane %v7487_v59, %v13789_v4  ;;  %v16196_v59 = vperm.slane %v15735_v58, 7 }
 0xb26   : > { %8863 = vrcp.f32 %v16196_v59 }
 0xb2a   : > { %v7472_v37 = vpop.permute.xlu0 %7471 }
 0xb2b   : > { %v7493_v28 = vpop.permute.xlu2 %7492  ;;  %v7518_v62 = vperm.slane %v7472_v37, %v13782_v54 }
 0xb2c   : > { %v7528_v40 = vperm.slane %v7493_v28, %v13789_v4 }
 0xb2d   : > { %v7520_v48 = vsel %vm17350_vm5, %v7519_v11, %v7518_v62 }
 0xb2e   : > { %v7502_v55 = vpop.permute.xlu1 %7501 }
 0xb2f   : > { %v7533_v19 = vperm.slane %v7502_v55, %v13782_v54 }
 0xb32   : > { %v7478_v60 = vpop.permute.xlu0 %7477 }
 0xb33   : > { %v7499_v51 = vpop.permute.xlu2 %7498  ;;  %v7521_v17 = vperm.slane %v7478_v60, %v13782_v54 }
 0xb34   : > { %v7531_v16 = vperm.slane %v7499_v51, %v13789_v4 }
 0xb35   : > { %v7523_v33 = vsel %vm17349_vm13, %v7522_v24, %v7521_v17 }
 0xb36   : > { %v7542_v27 = vsel %vm2213_vm14, %v7523_v33, %v7520_v48 }
 0xb3a   : > { %v7484_v14 = vpop.permute.xlu0 %7483 }
 0xb3b   : > { %v7508_v3 = vpop.permute.xlu2 %7507  ;;  %v7524_v50 = vperm.slane %v7484_v14, %v13782_v54  ;;  %v16205_v14 = vpop.eup %8863 }
 0xb3c   : > { %v7536_v13 = vperm.slane %v7508_v3, %v13782_v54 }
 0xb3d   : > { %v7526_v41 = vsel %vm17341_vm3, %v7525_v29, %v7524_v50  ;;  %v16223_v50 = vperm.slane %v15735_v58, 5 }
 0xb3e   : > { %v7543_v44 = vsel %vm2215_vm0, %v7526_v41, %v7542_v27 }
 0xb42   : > { %v7490_v49 = vpop.permute.xlu0 %7489 }
 0xb43   : > { %v7527_v53 = vperm.slane %v7490_v49, %v13782_v54  ;;  %v7514_v56 = vpop.permute.xlu2 %7513 }
 0xb44   : > { %v7539_v32 = vperm.slane %v7514_v56, %v13782_v54 }
 0xb45   : > { %v7529_v36 = vsel %vm17351_vm10, %v7528_v40, %v7527_v53 }
 0xb46   : > { %v7544_v7 = vsel %vm2217_vm1, %v7529_v36, %v7543_v44 }
 0xb4a   : > { %v7496_v57 = vpop.permute.xlu0 %7495 }
 0xb4b   : > { %v7530_v21 = vperm.slane %v7496_v57, %v13782_v54  ;;  %v16199_v54 = vperm.slane %v15735_v58, 4 }
 0xb4d   : > { %v7532_v18 = vsel %vm17352_vm9, %v7531_v16, %v7530_v21  ;;  %8865 = vrcp.f32 %v16199_v54 }
 0xb4e   : > { %v7545_v34 = vsel %vm2219_vm2, %v7532_v18, %v7544_v7 }
 0xb52   : > { %v7505_v42 = vpop.permute.xlu0 %7504 }
 0xb53   : > { %v7534_v43 = vperm.slane %v7505_v42, %v13789_v4  ;;  %v16212_v51 = vpop.eup %8865  ;;  %v5964_v42 = vmul.f32 %v16205_v14, %v16196_v59 }
 0xb54   : > { %v5916_v17 = vmul.f32 %v16212_v51, %v16199_v54 }
 0xb55   : > { %v7535_v46 = vsel %vm17353_vm11, %v7534_v43, %v7533_v19 }
 0xb56   : > { %v7546_v6 = vsel %vm17347_vm12, %v7535_v46, %v7545_v34  ;;  %v5917_v55 = vsub.f32 1.0, %v5916_v17 }
 0xb58   : > { %v5918_v36 = vmul.f32 %v16212_v51, %v5917_v55 }
 0xb5a   : > { %v7511_v39 = vpop.permute.xlu0 %7510 }
 0xb5b   : > { %v7537_v47 = vperm.slane %v7511_v39, %v13789_v4  ;;  %v5965_v39 = vsub.f32 1.0, %v5964_v42 }
 0xb5d   : > { %v7538_v2 = vsel %vm17354_vm15, %v7537_v47, %v7536_v13  ;;  %v5966_v43 = vmul.f32 %v16205_v14, %v5965_v39 }
 0xb5e   : > { %v7547_v37 = vsel %vm17337_vm4, %v7538_v2, %v7546_v6 }
 0xb62   : > { %v7517_v61 = vpop.permute.xlu0 %7516 }
 0xb63   : > { %v7540_v15 = vperm.slane %v7517_v61, %v13789_v4 }
 0xb65   : > { %v7541_v31 = vsel %vm17355_vm8, %v7540_v15, %v7539_v32 }
 0xb66   : > { %v7548_v52 = vsel %vm2225_vm6, %v7541_v31, %v7547_v37 }
 0xb67   : > { %v7550_v60 = vsel %vm2228_vm7, %v7548_v52, 0.0  ;;  %vm5969_vm7 = vweird.f32 %v16205_v14 }
 0xb68   : > { %7551 = vadd.xlane.f32.xlu2 %v7550_v60 }
 0xbdb   : > { %v16203_v4 = vpop.xlane.xlu2 %7551 }
 0xbdc   : > { %v7554_v28 = vperm.slane %v16203_v4, 0  ;;  %v16209_v49 = vperm.slane %v16203_v4, 1  ;;  %v7557_v57 = vperm.slane %v16203_v4, 3  ;;  %v16218_v3 = vperm.slane %v16203_v4, 6 }
 0xbdd   : > { %v16226_v62 = vperm.slane %v16203_v4, 2  ;;  %v16235_v40 = vperm.slane %v16203_v4, 7 }
 0xbde   : > { %8867 = vrcp.f32 %v7554_v28  ;;  %v7581_v41 = vand.u32 2147483648, %v7554_v28  ;;  %v7579_v48 = vand.u32 2147483647, %v7554_v28  ;;  %vm7623_vm3 = vweird.f32 %v7557_v57 }
 0xbdf   : > { %8869 = vrcp.f32 %v16209_v49  ;;  %v7629_v56 = vand.u32 2147483648, %v7557_v57  ;;  %v7627_v44 = vand.u32 2147483647, %v7557_v57  ;;  %vm7575_vm5 = vweird.f32 %v7554_v28 }
 0xbe0   : > { %8871 = vrcp.f32 %v7557_v57  ;;  %v7582_v2 = vor.u32 1.1754944e-38, %v7581_v41  ;;  %vm7580_vm11 = vcmp.eq.f32.partialorder %v7579_v48, 8.507059e+37  ;;  %v7597_v60 = vand.u32 2147483648, %v16209_v49 }
 0xbe1   : > { %8873 = vrcp.f32 %v16218_v3  ;;  %v7630_v37 = vor.u32 1.1754944e-38, %v7629_v56  ;;  %vm7591_vm8 = vweird.f32 %v16209_v49  ;;  %v7595_v17 = vand.u32 2147483647, %v16209_v49 }
 0xbe2   : > { %8875 = vrcp.f32 %v16223_v50  ;;  %vm7628_vm4 = vcmp.eq.f32.partialorder %v7627_v44, 8.507059e+37  ;;  %v5926_v48 = vand.u32 2147483648, %v16199_v54 }
 0xbe3   : > { %8877 = vrcp.f32 %v16226_v62 }
 0xbe4   : > { %v8868_v24 = vpop.eup %8867  ;;  %8879 = vrcp.f32 %v16235_v40 }
 0xbe5   : > { %v16229_v53 = vpop.eup %8869  ;;  %v7571_v29 = vmul.f32 %v8868_v24, %v7554_v28  ;;  %vm7576_vm13 = vweird.f32 %v8868_v24 }
 0xbe6   : > { %v7587_v21 = vmul.f32 %v16229_v53, %v16209_v49  ;;  %v8872_v11 = vpop.eup %8871  ;;  %vm7577_vm9 = vmor %vm7575_vm5, %vm7576_vm13  ;;  %vm7592_vm15 = vweird.f32 %v16229_v53 }
 0xbe7   : > { %v7572_v33 = vsub.f32 1.0, %v7571_v29  ;;  %v7619_v16 = vmul.f32 %v8872_v11, %v7557_v57  ;;  %v16241_v27 = vpop.eup %8873  ;;  %vm7624_vm10 = vweird.f32 %v8872_v11  ;;  %vm16260_vm13 = vmor %vm7591_vm8, %vm7592_vm15  ;;  %vm7671_vm8 = vweird.f32 %v16218_v3 }
 0xbe8   : > { %v7588_v47 = vsub.f32 1.0, %v7587_v21  ;;  %v7667_v61 = vmul.f32 %v16241_v27, %v16218_v3  ;;  %v16247_v32 = vpop.eup %8875  ;;  %vm7625_vm12 = vmor %vm7623_vm3, %vm7624_vm10  ;;  %vm5968_vm3 = vweird.f32 %v16196_v59  ;;  %vm7596_vm10 = vcmp.eq.f32.partialorder %v7595_v17, 8.507059e+37 }
 0xbe9   : > { %v7573_v19 = vmul.f32 %v8868_v24, %v7572_v33  ;;  %v7620_v13 = vsub.f32 1.0, %v7619_v16  ;;  %v16251_v6 = vpop.eup %8877  ;;  %v5972_v33 = vand.u32 2147483647, %v16196_v59  ;;  %v16279_v16 = vperm.slane %v15735_v58, 6  ;;  %vm16283_vm5 = vmor %vm5968_vm3, %vm5969_vm7 }
 0xbea   : > { %v7589_v18 = vmul.f32 %v16229_v53, %v7588_v47  ;;  %v7668_v55 = vsub.f32 1.0, %v7667_v61  ;;  %v16264_v21 = vpop.eup %8879  ;;  %v7603_v49 = vmul.f32 %v16251_v6, %v16226_v62  ;;  %v5932_v61 = vmul.f32 %v16247_v32, %v16223_v50 }
 0xbeb   : > { %v7574_v46 = vadd.f32 %v8868_v24, %v7573_v19  ;;  %v7621_v7 = vmul.f32 %v8872_v11, %v7620_v13  ;;  %v7683_v47 = vmul.f32 %v16264_v21, %v16235_v40  ;;  %vm5973_vm7 = vcmp.eq.f32.partialorder %v5972_v33, 8.507059e+37 }
 0xbec   : > { %v7590_v15 = vadd.f32 %v16229_v53, %v7589_v18  ;;  %v7669_v58 = vmul.f32 %v16241_v27, %v7668_v55  ;;  %v7604_v13 = vsub.f32 1.0, %v7603_v49  ;;  %8881 = vrcp.f32 %v16279_v16 }
 0xbed   : > { %v7578_v34 = vsel %vm7577_vm9, %v8868_v24, %v7574_v46  ;;  %v7622_v31 = vadd.f32 %v8872_v11, %v7621_v7  ;;  %v5967_v24 = vadd.f32 %v16205_v14, %v5966_v43  ;;  %v7598_v43 = vor.u32 1.1754944e-38, %v7597_v60 }
 0xbee   : > { %v7583_v52 = vsel %vm7580_vm11, %v7582_v2, %v7578_v34  ;;  %vm5921_vm9 = vweird.f32 %v16212_v51  ;;  %vm5920_vm11 = vweird.f32 %v16199_v54  ;;  %v7670_v46 = vadd.f32 %v16241_v27, %v7669_v58  ;;  %v17362_v34 = vld [vmem:[#allocation60_spill] sm:$0xff] }
 0xbef   : > { %v7585_v28 = vmul.f32 %v16102_v30, %v7583_v52  ;;  %v7584_v42 = vmul.f32 %v16100_v25, %v7583_v52  ;;  %v7626_v39 = vsel %vm7625_vm12, %v8872_v11, %v7622_v31  ;;  %v5974_v25 = vand.u32 2147483648, %v16196_v59  ;;  %vm16305_vm15 = vmor %vm5920_vm11, %vm5921_vm9 }
 0xbf0   : > { %v16266_v57 = vsel %vm7628_vm4, %v7630_v37, %v7626_v39  ;;  %v7594_v30 = vsel %vm16260_vm13, %v16229_v53, %v7590_v15  ;;  %v5919_v53 = vadd.f32 %v16212_v51, %v5918_v36  ;;  %v5924_v36 = vand.u32 2147483647, %v16199_v54 }
 0xbf1   : > { %7705 = vperm.xlu0 %8415, %v7585_v28   ;;  %7700 = vperm.xlu1 %8418, %v7584_v42   ;;  %v7632_v11 = vmul.f32 %v16130_v5, %v16266_v57  ;;  %v5971_v5 = vsel %vm16283_vm5, %v16205_v14, %v5967_v24  ;;  %v7599_v59 = vsel %vm7596_vm10, %v7598_v43, %v7594_v30  ;;  %v5975_v19 = vor.u32 1.1754944e-38, %v5974_v25  ;;  %v17364_v25 = vld [vmem:[#allocation65_spill] sm:$0xff] }
 0xbf2   : > { %v7601_v14 = vmul.f32 %v16111_v63, %v7599_v59  ;;  %v7600_v18 = vmul.f32 %v16109_v20, %v7599_v59  ;;  %vm7672_vm12 = vweird.f32 %v16241_v27  ;;  %v5923_v54 = vsel %vm16305_vm15, %v16212_v51, %v5919_v53  ;;  %v16327_v28 = vpop.eup %8881 }
 0xbf3   : > { %7730 = vperm.xlu2 %8419, %v7632_v11   ;;  %v16299_v56 = vsel %vm5973_vm7, %v5975_v19, %v5971_v5  ;;  %v7684_v7 = vsub.f32 1.0, %v7683_v47  ;;  %v7677_v63 = vand.u32 2147483648, %v16218_v3  ;;  %v5927_v20 = vor.u32 1.1754944e-38, %v5926_v48  ;;  %vm7673_vm13 = vmor %vm7671_vm8, %vm7672_vm12 }
 0xbf4   : > { %v7605_v2 = vmul.f32 %v16251_v6, %v7604_v13  ;;  %v5978_v15 = vmul.f32 %v17362_v34, %v16299_v56  ;;  %v7675_v31 = vand.u32 2147483647, %v16218_v3  ;;  %vm5925_vm4 = vcmp.eq.f32.partialorder %v5924_v36, 8.507059e+37  ;;  %v17363_v3 = vld [vmem:[#allocation93_spill] sm:$0xff] }
 0xbf5   : > { %v5928_v51 = vsel %vm5925_vm4, %v5927_v20, %v5923_v54  ;;  %v16323_v37 = vperm.slane %v16203_v4, 4  ;;  %v7674_v52 = vsel %vm7673_vm13, %v16241_v27, %v7670_v46  ;;  %v7685_v60 = vmul.f32 %v16264_v21, %v7684_v7  ;;  %v17367_v20 = vld [vmem:[#allocation36_spill] sm:$0xff] }
 0xbf6   : > { %v7678_v42 = vor.u32 1.1754944e-38, %v7677_v63  ;;  %v7606_v17 = vadd.f32 %v16251_v6, %v7605_v2  ;;  %vm7608_vm3 = vweird.f32 %v16251_v6  ;;  %v5933_v39 = vsub.f32 1.0, %v5932_v61  ;;  %v17368_v61 = vld [vmem:[#allocation66_spill] sm:$0xff] }
 0xbf7   : > { %vm7676_vm5 = vcmp.eq.f32.partialorder %v7675_v31, 8.507059e+37  ;;  %v5930_v24 = vmul.f32 %v17363_v3, %v5928_v51  ;;  %v7613_v29 = vand.u32 2147483648, %v16226_v62  ;;  %v5929_v30 = vmul.f32 %v17364_v25, %v5928_v51  ;;  %v7977_v25 = vld [vmem:[#allocation11 + $0x1f8] sm:$0xff] }
 0xbf8   : > { %v16333_v55 = vsel %vm7676_vm5, %v7678_v42, %v7674_v52  ;;  %vm7607_vm10 = vweird.f32 %v16226_v62  ;;  %v7611_v27 = vand.u32 2147483647, %v16226_v62  ;;  %8883 = vrcp.f32 %v16323_v37  ;;  %8042 = vmatpush.msrb.mxu3 %v7977_v25  ;;  %v16407_v25 = vld [vmem:[%s9438_s27 + $0x58] sm:$0xff] }
 0xbf9   : > { %7715 = vperm.xlu0 %8415, %v7601_v14   ;;  %7710 = vperm.xlu1 %8418, %v7600_v18   ;;  %v7686_v49 = vadd.f32 %v16264_v21, %v7685_v60  ;;  %vm7688_vm9 = vweird.f32 %v16264_v21  ;;  %vm16341_vm7 = vmor %vm7607_vm10, %vm7608_vm3  ;;  %v7693_v33 = vand.u32 2147483648, %v16235_v40  ;;  %v5934_v62 = vmul.f32 %v16247_v32, %v5933_v39 }
 0xbfa   : > { %v7610_v43 = vsel %vm16341_vm7, %v16251_v6, %v7606_v17  ;;  %v5948_v41 = vmul.f32 %v16327_v28, %v16279_v16  ;;  %v7680_v53 = vmul.f32 %v16149_v23, %v16333_v55  ;;  %vm7687_vm11 = vweird.f32 %v16235_v40  ;;  %v17369_v17 = vld [vmem:[#allocation47_spill] sm:$0xff] }
 0xbfb   : > { %6056 = vperm.xlu2 %8419, %v5978_v15   ;;  %v7691_v5 = vand.u32 2147483647, %v16235_v40  ;;  %v7614_v59 = vor.u32 1.1754944e-38, %v7613_v29  ;;  %vm7689_vm15 = vmor %vm7687_vm11, %vm7688_vm9  ;;  %vm7612_vm12 = vcmp.eq.f32.partialorder %v7611_v27, 8.507059e+37  ;;  %v7694_v6 = vor.u32 1.1754944e-38, %v7693_v33  ;;  %v7961_v29 = vld [vmem:[#allocation11 + $0x178] sm:$0xff] }
 0xbfc   : > { %v7690_v58 = vsel %vm7689_vm15, %v16264_v21, %v7686_v49  ;;  %v5935_v19 = vadd.f32 %v16247_v32, %v5934_v62  ;;  %vm5937_vm8 = vweird.f32 %v16247_v32  ;;  %v5949_v48 = vsub.f32 1.0, %v5948_v41  ;;  %8022 = vmatpush.msrb.mxu2 %v7961_v29  ;;  %v7976_v49 = vld [vmem:[#allocation11 + $0x1f0] sm:$0xff] }
 0xbfd   : > { %v7615_v47 = vsel %vm7612_vm12, %v7614_v59, %v7610_v43  ;;  %vm7692_vm4 = vcmp.eq.f32.partialorder %v7691_v5, 8.507059e+37  ;;  %vm5936_vm13 = vweird.f32 %v16223_v50  ;;  %v5942_v23 = vand.u32 2147483648, %v16223_v50  ;;  %8043 = vmatpush.msrb.mxu3 %v7976_v49 }
 0xbfe   : > { %v8884_v13 = vpop.eup %8883  ;;  %v16361_v40 = vsel %vm7692_vm4, %v7694_v6, %v7690_v58  ;;  %v7617_v36 = vmul.f32 %v16123_v10, %v7615_v47  ;;  %v7616_v14 = vmul.f32 %v16121_v0, %v7615_v47  ;;  %v5940_v21 = vand.u32 2147483647, %v16223_v50  ;;  %vm5938_vm3 = vmor %vm5936_vm13, %vm5937_vm8 }
 0xbff   : > { %v5939_v18 = vsel %vm5938_vm3, %v16247_v32, %v5935_v19  ;;  %v5950_v44 = vmul.f32 %v16327_v28, %v5949_v48  ;;  %v7635_v46 = vmul.f32 %v8884_v13, %v16323_v37  ;;  %v7697_v54 = vmul.f32 %v16160_v1, %v16361_v40 }
 0xc00   : > { %v5943_v7 = vor.u32 1.1754944e-38, %v5942_v23  ;;  %vm5941_vm5 = vcmp.eq.f32.partialorder %v5940_v21, 8.507059e+37  ;;  %v7559_v10 = vperm.slane %v16203_v4, 5  ;;  %vm5953_vm10 = vweird.f32 %v16327_v28  ;;  %v7975_v23 = vld [vmem:[#allocation11 + $0x1e8] sm:$0xff]  ;;  %v7956_v21 = vld [vmem:[#allocation11 + $0x150] sm:$0xff] }
 0xc01   : > { %6026 = vperm.xlu0 %8415, %v5930_v24   ;;  %6021 = vperm.xlu1 %8418, %v5929_v30   ;;  %v5951_v50 = vadd.f32 %v16327_v28, %v5950_v44  ;;  %v7636_v63 = vsub.f32 1.0, %v7635_v46  ;;  %v5958_v32 = vand.u32 2147483648, %v16279_v16  ;;  %vm5952_vm9 = vweird.f32 %v16279_v16  ;;  %v7960_v30 = vld [vmem:[#allocation11 + $0x170] sm:$0xff] }
 0xc02   : > { %v5944_v0 = vsel %vm5941_vm5, %v5943_v7, %v5939_v18  ;;  %v5956_v1 = vand.u32 2147483647, %v16279_v16  ;;  %8885 = vrcp.f32 %v7559_v10  ;;  %vm5954_vm7 = vmor %vm5952_vm9, %vm5953_vm10  ;;  %vm7640_vm15 = vweird.f32 %v8884_v13  ;;  %8023 = vmatpush.msrb.mxu2 %v7960_v30  ;;  %8044 = vmatpush.msrb.mxu3 %v7975_v23  ;;  %v7972_v18 = vld [vmem:[#allocation11 + $0x1d0] sm:$0xff] }
 0xc03   : > { %7760 = vperm.xlu2 %8419, %v7680_v53   ;;  %v5946_v2 = vmul.f32 %v17367_v20, %v5944_v0  ;;  %v5945_v34 = vmul.f32 %v17368_v61, %v5944_v0  ;;  %v5955_v4 = vsel %vm5954_vm7, %v16327_v28, %v5951_v50  ;;  %v7637_v15 = vmul.f32 %v8884_v13, %v7636_v63  ;;  %v17371_v53 = vld [vmem:[#allocation55_spill] sm:$0xff]  ;;  %v7953_v63 = vld [vmem:[#allocation11 + $0x138] sm:$0xff]  ;;  %v7952_v61 = vld [vmem:[#allocation11 + $0x130] sm:$0xff] }
 0xc04   : > { %v5959_v31 = vor.u32 1.1754944e-38, %v5958_v32  ;;  %vm5957_vm11 = vcmp.eq.f32.partialorder %v5956_v1, 8.507059e+37  ;;  %v7645_v42 = vand.u32 2147483648, %v16323_v37  ;;  %v7633_v16 = vmul.f32 %v16132_v8, %v16266_v57  ;;  %v7969_v32 = vld [vmem:[#allocation11 + $0x1b8] sm:$0xff] }
 0xc05   : > { %v7638_v52 = vadd.f32 %v8884_v13, %v7637_v15  ;;  %vm7639_vm12 = vweird.f32 %v16323_v37  ;;  %v7643_v3 = vand.u32 2147483647, %v16323_v37  ;;  %v17370_v37 = vld [vmem:[#allocation72_spill] sm:$0xff]  ;;  %v7661_v41 = vand.u32 2147483648, %v7559_v10 }
 0xc06   : > { %v5960_v51 = vsel %vm5957_vm11, %v5959_v31, %v5955_v4  ;;  %vm7641_vm8 = vmor %vm7639_vm12, %vm7640_vm15  ;;  %v7646_v27 = vor.u32 1.1754944e-38, %v7645_v42  ;;  %v5977_v5 = vmul.f32 %v17371_v53, %v16299_v56  ;;  %vm7655_vm3 = vweird.f32 %v7559_v10  ;;  %v7951_v15 = vld [vmem:[#allocation11 + $0x128] sm:$0xff]  ;;  %v7966_v42 = vld [vmem:[#allocation11 + $0x1a0] sm:$0xff] }
 0xc07   : > { %v5961_v39 = vmul.f32 %v17369_v17, %v5960_v51  ;;  %v7642_v28 = vsel %vm7641_vm8, %v8884_v13, %v7638_v52  ;;  %vm7644_vm4 = vcmp.eq.f32.partialorder %v7643_v3, 8.507059e+37  ;;  %v5962_v33 = vmul.f32 %v17370_v37, %v5960_v51  ;;  %v7959_v13 = vld [vmem:[#allocation11 + $0x168] sm:$0xff]  ;;  %v7948_v53 = vld [vmem:[#allocation11 + $0x110] sm:$0xff] }
 0xc08   : > { %v8886_v60 = vpop.eup %8885  ;;  %v7647_v11 = vsel %vm7644_vm4, %v7646_v27, %v7642_v28  ;;  %v7659_v58 = vand.u32 2147483647, %v7559_v10  ;;  %8024 = vmatpush.msrb.mxu2 %v7959_v13  ;;  %v7681_v56 = vmul.f32 %v16154_v9, %v16333_v55  ;;  %v7954_v9 = vld [vmem:[#allocation11 + $0x140] sm:$0xff]  ;;  %v7967_v31 = vld [vmem:[#allocation11 + $0x1a8] sm:$0xff]  ;;  %v16411_v27 = vld [vmem:[%s9438_s27 + $0x50] sm:$0xff]  ;;  %vm17372_vm9 = vcmask 1045509  }
 0xc09   : > { %7725 = vperm.xlu0 %8415, %v7617_v36   ;;  %7720 = vperm.xlu1 %8418, %v7616_v14   ;;  %v7651_v24 = vmul.f32 %v8886_v60, %v7559_v10  ;;  %v7648_v57 = vmul.f32 %v16139_v12, %v7647_v11  ;;  %vm7656_vm13 = vweird.f32 %v8886_v60  ;;  %v7649_v59 = vmul.f32 %v16141_v35, %v7647_v11  ;;  %v7958_v36 = vld [vmem:[#allocation11 + $0x160] sm:$0xff]  ;;  %v8944_v10 = vld [vmem:[%s9438_s27] sm:$0xff]  ;;  %v7949_v11 = vld [vmem:[#allocation11 + $0x118] sm:$0xff] }
 0xc0a   : > { %vm7657_vm5 = vmor %vm7655_vm3, %vm7656_vm13  ;;  %v7662_v12 = vor.u32 1.1754944e-38, %v7661_v41  ;;  %vm7660_vm10 = vcmp.eq.f32.partialorder %v7659_v58, 8.507059e+37  ;;  %v7696_v35 = vmul.f32 %v16156_v45, %v16361_v40  ;;  %v7974_v14 = vld [vmem:[#allocation11 + $0x1e0] sm:$0xff]  ;;  %8025 = vmatpush.msrb.mxu2 %v7958_v36  ;;  %v7955_v45 = vld [vmem:[#allocation11 + $0x148] sm:$0xff]  ;;  %vm17373_vm7 = vcmask 1046534  }
 0xc0b   : > { %7775 = vperm.xlu2 %8419, %v7697_v54   ;;  %v7652_v8 = vsub.f32 1.0, %v7651_v24  ;;  %8045 = vmatpush.msrb.mxu3 %v7974_v14  ;;  %v7971_v40 = vld [vmem:[#allocation11 + $0x1c8] sm:$0xff]  ;;  %v7970_v55 = vld [vmem:[#allocation11 + $0x1c0] sm:$0xff]  ;;  %v8943_v54 = vld [vmem:[%s9438_s27 + $0x8] sm:$0xff] }
 0xc0c   : > { %v8946_v28 = vld [vmem:[%s9438_s27 + $0x40] sm:$0xff]  ;;  %v8951_v36 = vld [vmem:[%s9438_s27 + $0x18] sm:$0xff]  ;;  %vm17374_vm11 = vmmov %vm17372_vm9 }
 0xc0d   : > { %v7653_v43 = vmul.f32 %v8886_v60, %v7652_v8  ;;  %v7965_v8 = vld [vmem:[#allocation11 + $0x198] sm:$0xff]  ;;  %vm17375_vm15 = vmmov %vm17373_vm7 }
 0xc0f   : > { %v7654_v62 = vadd.f32 %v8886_v60, %v7653_v43 }
 0xc11   : > { %6036 = vperm.xlu0 %8415, %v5946_v2   ;;  %6031 = vperm.xlu1 %8418, %v5945_v34   ;;  %v7658_v47 = vsel %vm7657_vm5, %v8886_v60, %v7654_v62  ;;  %v7968_v34 = vld [vmem:[#allocation11 + $0x1b0] sm:$0xff]  ;;  %v7950_v60 = vld [vmem:[#allocation11 + $0x120] sm:$0xff] }
 0xc12   : > { %v7663_v6 = vsel %vm7660_vm10, %v7662_v12, %v7658_v47 }
 0xc13   : > { %v7665_v19 = vmul.f32 %v16147_v38, %v7663_v6  ;;  %v7664_v48 = vmul.f32 %v16114_v22, %v7663_v6  ;;  %v7957_v38 = vld [vmem:[#allocation11 + $0x158] sm:$0xff]  ;;  %v16415_v6 = vld [vmem:[%s9438_s27 + $0x60] sm:$0xff] }
 0xc14   : > { %v7973_v22 = vld [vmem:[#allocation11 + $0x1d8] sm:$0xff]  ;;  %8026 = vmatpush.msrb.mxu2 %v7957_v38 }
 0xc15   : > { %8046 = vmatpush.msrb.mxu3 %v7973_v22  ;;  %v8952_v38 = vld [vmem:[%s9438_s27 + $0x10] sm:$0xff] }
 0xc16   : > { %8027 = vmatpush.msrb.mxu2 %v7956_v21  ;;  %v8953_v21 = vld [vmem:[%s9438_s27 + $0x28] sm:$0xff] }
 0xc17   : > { %8047 = vmatpush.msrb.mxu3 %v7972_v18 }
 0xc18   : > { %8028 = vmatpush.msrb.mxu2 %v7955_v45  ;;  %v8954_v45 = vld [vmem:[%s9438_s27 + $0x20] sm:$0xff] }
 0xc19   : > { %6041 = vperm.xlu0 %8415, %v5961_v39   ;;  %7735 = vperm.xlu1 %8418, %v7633_v16   ;;  %v16402_v16 = vld [vmem:[%s9438_s27 + $0x48] sm:$0xff] }
 0xc1a   : > { %8048 = vmatpush.msrb.mxu3 %v7971_v40  ;;  %8029 = vmatpush.msrb.mxu2 %v7954_v9 }
 0xc1c   : > { %8049 = vmatpush.msrb.mxu3 %v7970_v55  ;;  %8030 = vmatpush.msrb.mxu2 %v7953_v63  ;;  %v7946_v55 = vld [vmem:[#allocation11 + $0x100] sm:$0xff] }
 0xc1e   : > { %8050 = vmatpush.msrb.mxu3 %v7969_v32  ;;  %8031 = vmatpush.msrb.mxu2 %v7952_v61  ;;  %v8956_v32 = vld [vmem:[%s9438_s27 + $0x30] sm:$0xff] }
 0xc20   : > { %8051 = vmatpush.msrb.mxu3 %v7968_v34  ;;  %8032 = vmatpush.msrb.mxu2 %v7951_v15 }
 0xc21   : > { %7740 = vperm.xlu0 %8415, %v7648_v57   ;;  %6046 = vperm.xlu1 %8418, %v5962_v33  }
 0xc22   : > { %8052 = vmatpush.msrb.mxu3 %v7967_v31  ;;  %8033 = vmatpush.msrb.mxu2 %v7950_v60 }
 0xc24   : > { %8053 = vmatpush.msrb.mxu3 %v7966_v42  ;;  %8034 = vmatpush.msrb.mxu2 %v7949_v11 }
 0xc26   : > { %8054 = vmatpush.msrb.mxu3 %v7965_v8  ;;  %8035 = vmatpush.msrb.mxu2 %v7948_v53 }
 0xc29   : > { %6051 = vperm.xlu0 %8415, %v5977_v5   ;;  %7745 = vperm.xlu1 %8418, %v7649_v59   ;;  %v7964_v5 = vld [vmem:[#allocation11 + $0x190] sm:$0xff]  ;;  %v7947_v59 = vld [vmem:[#allocation11 + $0x108] sm:$0xff] }
 0xc2a   : > { %8055 = vmatpush.msrb.mxu3 %v7964_v5  ;;  %8036 = vmatpush.msrb.mxu2 %v7947_v59 }
 0xc2c   : > { %8037 = vmatpush.msrb.mxu2 %v7946_v55 }
 0xc31   : > { %7755 = vperm.xlu0 %8415, %v7665_v19   ;;  %7750 = vperm.xlu1 %8418, %v7664_v48   ;;  %v16419_v48 = vld [vmem:[%s9438_s27 + $0x68] sm:$0xff] }
 0xc39   : > { %7770 = vperm.xlu0 %8415, %v7696_v35   ;;  %7765 = vperm.xlu1 %8418, %v7681_v56  }
 0xc4d   : > { %v7731_v29 = vpop.permute.xlu2 %7730 }
 0xc55   : > { %v6057_v12 = vpop.permute.xlu2 %6056 }
 0xc63   : > { %v7706_v44 = vpop.permute.xlu0 %7705  ;;  %v7701_v46 = vpop.permute.xlu1 %7700 }
 0xc64   : > { %v7779_v7 = vmul.f32 %v8943_v54, %v7706_v44  ;;  %v7778_v0 = vmul.f32 %v8944_v10, %v7701_v46  ;;  %v7963_v44 = vld [vmem:[#allocation11 + $0x188] sm:$0xff]  ;;  %v7962_v46 = vld [vmem:[#allocation11 + $0x180] sm:$0xff] }
 0xc65   : > { %8056 = vmatpush.msrb.mxu3 %v7963_v44 }
 0xc66   : > { %v16399_v50 = vadd.f32 %v7779_v7, %v7778_v0  ;;  %v8955_v7 = vld [vmem:[%s9438_s27 + $0x38] sm:$0xff] }
 0xc67   : > { %8057 = vmatpush.msrb.mxu3 %v7962_v46 }
 0xc6b   : > { %v7716_v20 = vpop.permute.xlu0 %7715  ;;  %v7711_v2 = vpop.permute.xlu1 %7710 }
 0xc6c   : > { %v7781_v14 = vmul.f32 %v8951_v36, %v7716_v20  ;;  %v7780_v22 = vmul.f32 %v8952_v38, %v7711_v2  ;;  %v7784_v20 = vmul.f32 %v8956_v32, %v7731_v29  ;;  %v8957_v2 = vld [vmem:[%s9438_s27 + $0x78] sm:$0xff] }
 0xc6d   : > { %v6074_v61 = vmul.f32 %v8957_v2, %v6057_v12 }
 0xc6e   : > { %v7801_v34 = vadd.f32 %v7781_v14, %v7780_v22 }
 0xc70   : > { %v7802_v29 = vrot.slane %v7801_v34, 4 }
 0xc72   : > { %v7803_v53 = vadd.f32 %v7802_v29, %v7801_v34 }
 0xc73   : > { %v6027_v1 = vpop.permute.xlu0 %6026  ;;  %v6022_v4 = vpop.permute.xlu1 %6021 }
 0xc74   : > { %v6068_v3 = vmul.f32 %v16402_v16, %v6027_v1  ;;  %v6067_v24 = vmul.f32 %v8946_v28, %v6022_v4  ;;  %v7804_v22 = vrot.slane %v7803_v53, 2 }
 0xc76   : > { %v6103_v33 = vadd.f32 %v6068_v3, %v6067_v24  ;;  %v7761_v3 = vpop.permute.xlu2 %7760 }
 0xc77   : > { %v7790_v55 = vmul.f32 %v16415_v6, %v7761_v3 }
 0xc78   : > { %v6104_v62 = vrot.slane %v6103_v33, 4 }
 0xc7a   : > { %v6105_v23 = vadd.f32 %v6104_v62, %v6103_v33 }
 0xc7b   : > { %v7726_v51 = vpop.permute.xlu0 %7725  ;;  %v7721_v52 = vpop.permute.xlu1 %7720 }
 0xc7c   : > { %v7783_v18 = vmul.f32 %v8953_v21, %v7726_v51  ;;  %v7782_v40 = vmul.f32 %v8954_v45, %v7721_v52  ;;  %v6106_v54 = vrot.slane %v6105_v23, 2  ;;  %v8958_v52 = vld [vmem:[%s9438_s27 + $0x70] sm:$0xff] }
 0xc7e   : > { %v7808_v1 = vadd.f32 %v7783_v18, %v7782_v40  ;;  %v7776_v45 = vpop.permute.xlu2 %7775 }
 0xc80   : > { %v7809_v11 = vrot.slane %v7808_v1, 4 }
 0xc82   : > { %v7810_v5 = vadd.f32 %v7809_v11, %v7808_v1 }
 0xc83   : > { %v6037_v17 = vpop.permute.xlu0 %6036  ;;  %v6032_v39 = vpop.permute.xlu1 %6031 }
 0xc84   : > { %v6070_v30 = vmul.f32 %v16407_v25, %v6037_v17  ;;  %v6069_v49 = vmul.f32 %v16411_v27, %v6032_v39  ;;  %v6107_v17 = vadd.f32 %v6106_v54, %v6105_v23  ;;  %v7811_v21 = vrot.slane %v7810_v5, 2 }
 0xc86   : > { %v6110_v43 = vadd.f32 %v6070_v30, %v6069_v49  ;;  %v6108_v33 = vrot.slane %v6107_v17, 1 }
 0xc88   : > { %v6111_v41 = vrot.slane %v6110_v43, 4  ;;  %v6109_v23 = vadd.f32 %v6108_v33, %v6107_v17 }
 0xc8a   : > { %v6112_v35 = vadd.f32 %v6111_v41, %v6110_v43 }
 0xc8b   : > { %v6042_v57 = vpop.permute.xlu0 %6041  ;;  %v7736_v37 = vpop.permute.xlu1 %7735 }
 0xc8c   : > { %v6071_v19 = vmul.f32 %v16415_v6, %v6042_v57  ;;  %v7785_v10 = vmul.f32 %v8955_v7, %v7736_v37  ;;  %v6113_v0 = vrot.slane %v6112_v35, 2  ;;  %v7795_v37 = vrot.slane %v16399_v50, 4 }
 0xc8e   : > { %v7815_v39 = vadd.f32 %v7785_v10, %v7784_v20  ;;  %v6114_v24 = vadd.f32 %v6113_v0, %v6112_v35  ;;  %v7793_v10 = vmul.f32 %v8957_v2, %v7776_v45  ;;  %v7805_v0 = vadd.f32 %v7804_v22, %v7803_v53 }
 0xc90   : > { %v7816_v43 = vrot.slane %v7815_v39, 4 }
 0xc92   : > { %v7817_v35 = vadd.f32 %v7816_v43, %v7815_v39 }
 0xc93   : > { %v7741_v58 = vpop.permute.xlu0 %7740  ;;  %v6047_v47 = vpop.permute.xlu1 %6046 }
 0xc94   : > { %v6072_v13 = vmul.f32 %v16419_v48, %v6047_v47  ;;  %v7786_v31 = vmul.f32 %v8946_v28, %v7741_v58  ;;  %v6115_v28 = vrot.slane %v6114_v24, 1 }
 0xc96   : > { %v6117_v56 = vadd.f32 %v6072_v13, %v6071_v19  ;;  %v7796_v13 = vadd.f32 %v7795_v37, %v16399_v50 }
 0xc98   : > { %v6118_v9 = vrot.slane %v6117_v56, 4  ;;  %v7797_v44 = vrot.slane %v7796_v13, 2 }
 0xc9a   : > { %v6119_v63 = vadd.f32 %v6118_v9, %v6117_v56  ;;  %v6116_v56 = vadd.f32 %v6115_v28, %v6114_v24 }
 0xc9b   : > { %v6052_v4 = vpop.permute.xlu0 %6051  ;;  %v7746_v15 = vpop.permute.xlu1 %7745 }
 0xc9c   : > { %v6120_v51 = vrot.slane %v6119_v63, 2  ;;  %v6073_v60 = vmul.f32 %v8958_v52, %v6052_v4  ;;  %v7787_v42 = vmul.f32 %v16402_v16, %v7746_v15  ;;  %v7798_v15 = vadd.f32 %v7797_v44, %v7796_v13 }
 0xc9e   : > { %v6124_v30 = vadd.f32 %v6074_v61, %v6073_v60  ;;  %v7822_v49 = vadd.f32 %v7787_v42, %v7786_v31  ;;  %v6121_v8 = vadd.f32 %v6120_v51, %v6119_v63  ;;  %v7812_v63 = vadd.f32 %v7811_v21, %v7810_v5 }
 0xc9f   : > { %v7806_v42 = vrot.slane %v7805_v0, 1  ;;  %v7799_v24 = vrot.slane %v7798_v15, 1 }
 0xca0   : > { %v6125_v57 = vrot.slane %v6124_v30, 4  ;;  %v7823_v41 = vrot.slane %v7822_v49, 4  ;;  %v6122_v16 = vrot.slane %v6121_v8, 1  ;;  %v7813_v17 = vrot.slane %v7812_v63, 1 }
 0xca1   : > { %v7807_v11 = vadd.f32 %v7806_v42, %v7805_v0  ;;  %v7800_v33 = vadd.f32 %v7799_v24, %v7798_v15 }
 0xca2   : > { %v6126_v62 = vadd.f32 %v6125_v57, %v6124_v30  ;;  %v7824_v14 = vadd.f32 %v7823_v41, %v7822_v49  ;;  %v6123_v18 = vadd.f32 %v6122_v16, %v6121_v8  ;;  %v7814_v8 = vadd.f32 %v7813_v17, %v7812_v63 }
 0xca3   : > { %v7756_v59 = vpop.permute.xlu0 %7755  ;;  %v7751_v58 = vpop.permute.xlu1 %7750  ;;  %v7906_v53 = vsel %vm2213_vm14, %v7807_v11, %v7800_v33 }
 0xca4   : > { %v6127_v47 = vrot.slane %v6126_v62, 2  ;;  %v7789_v12 = vmul.f32 %v16407_v25, %v7756_v59  ;;  %v7788_v19 = vmul.f32 %v16411_v27, %v7751_v58  ;;  %v7818_v25 = vrot.slane %v7817_v35, 2 }
 0xca5   : > { %v7893_v27 = vsel %vm2219_vm2, %v6109_v23, %v16055_v26  ;;  %v7825_v50 = vrot.slane %v7824_v14, 2  ;;  %v7907_v58 = vsel %vm2215_vm0, %v7814_v8, %v7906_v53 }
 0xca6   : > { %v6128_v36 = vadd.f32 %v6127_v47, %v6126_v62  ;;  %v7829_v38 = vadd.f32 %v7789_v12, %v7788_v19  ;;  %v7894_v7 = vsel %vm17372_vm9, %v6116_v56, %v7893_v27  ;;  %v7819_v26 = vadd.f32 %v7818_v25, %v7817_v35 }
 0xca7   : > { %v7895_v61 = vsel %vm17373_vm7, %v6123_v18, %v7894_v7  ;;  %v7826_v31 = vadd.f32 %v7825_v50, %v7824_v14  ;;  %v7999_v14 = vpop.f32.mrf.mxu0 }
 0xca8   : > { %v7830_v40 = vrot.slane %v7829_v38, 4  ;;  %v6129_v9 = vrot.slane %v6128_v36, 1  ;;  %v7820_v30 = vrot.slane %v7819_v26, 1 }
 0xca9   : > { %v7827_v49 = vrot.slane %v7826_v31, 1 }
 0xcaa   : > { %v7831_v46 = vadd.f32 %v7830_v40, %v7829_v38  ;;  %v6130_v54 = vadd.f32 %v6129_v9, %v6128_v36  ;;  %v7821_v43 = vadd.f32 %v7820_v30, %v7819_v26  ;;  %v8436_v36 = vld [vmem:[%s16496_s9] ss:$0 sm:$0xff]  ;;  %v8019_v38 = vpop.f32.mrf.mxu1 }
 0xcab   : > { %v7771_v32 = vpop.permute.xlu0 %7770  ;;  %v7766_v20 = vpop.permute.xlu1 %7765  ;;  %v7828_v28 = vadd.f32 %v7827_v49, %v7826_v31  ;;  %v8000_v22 = vadd.f32 %v8436_v36, %v7999_v14 }
 0xcac   : > { %v7832_v34 = vrot.slane %v7831_v46, 2  ;;  %v7792_v1 = vmul.f32 %v8958_v52, %v7771_v32  ;;  %v7791_v6 = vmul.f32 %v16419_v48, %v7766_v20  ;;  %v7896_v4 = vsel %vm2225_vm6, %v6130_v54, %v7895_v61 }
 0xcad   : > { %8038 = vmatmul.f32.vlgmr.msrb.gmra.mxu2 %v7896_v4  ;;  %v7908_v47 = vsel %vm2217_vm1, %v7821_v43, %v7907_v58  ;;  %v8020_v18 = vadd.f32 %v8019_v38, %v8000_v22 }
 0xcae   : > { %v7843_v51 = vadd.f32 %v7793_v10, %v7792_v1  ;;  %v7836_v60 = vadd.f32 %v7791_v6, %v7790_v55  ;;  %v7833_v2 = vadd.f32 %v7832_v34, %v7831_v46  ;;  %v7909_v13 = vsel %vm2219_vm2, %v7828_v28, %v7908_v47 }
 0xcb0   : > { %v7844_v39 = vrot.slane %v7843_v51, 4  ;;  %v7837_v3 = vrot.slane %v7836_v60, 4  ;;  %v7834_v48 = vrot.slane %v7833_v2, 1 }
 0xcb2   : > { %v7845_v29 = vadd.f32 %v7844_v39, %v7843_v51  ;;  %v7838_v52 = vadd.f32 %v7837_v3, %v7836_v60  ;;  %v7835_v5 = vadd.f32 %v7834_v48, %v7833_v2 }
 0xcb4   : > { %v7846_v57 = vrot.slane %v7845_v29, 2  ;;  %v7839_v37 = vrot.slane %v7838_v52, 2  ;;  %v7910_v23 = vsel %vm17374_vm11, %v7835_v5, %v7909_v13 }
 0xcb6   : > { %v7847_v62 = vadd.f32 %v7846_v57, %v7845_v29  ;;  %v7840_v41 = vadd.f32 %v7839_v37, %v7838_v52 }
 0xcb8   : > { %v7841_v16 = vrot.slane %v7840_v41, 1  ;;  %v7848_v59 = vrot.slane %v7847_v62, 1 }
 0xcba   : > { %v7842_v12 = vadd.f32 %v7841_v16, %v7840_v41  ;;  %v7849_v19 = vadd.f32 %v7848_v59, %v7847_v62 }
 0xcbc   : > { %v7911_v35 = vsel %vm17375_vm15, %v7842_v12, %v7910_v23 }
 0xcbd   : > { %v7912_v56 = vsel %vm2225_vm6, %v7849_v19, %v7911_v35 }
 0xcbe   : > { %8058 = vmatmul.f32.vlgmr.msrb.gmra.mxu3 %v7912_v56 }
 0xd30   : > { %v8039_v21 = vpop.f32.mrf.mxu2 }
 0xd31   : > { %v8040_v45 = vadd.f32 %v8039_v21, %v8020_v18 }
 0xd41   : > { %v8059_v40 = vpop.f32.mrf.mxu3 }
 0xd42   : > { %v8060_v9 = vadd.f32 %v8059_v40, %v8040_v45 }
 0xd44   : > { %8062 = vst [vmem:[%s485_s18] sm:$0xff] %v8060_v9 }
 0xd45   : > { %9166 = shalt.err (!%p9163_p9)
}
 0xd46   : > { %8327 = dma.vmem_to_hbm [thread:$0]  (%p9380_p5), %s8077_s24, 128, %s8079_s20, %s8064_s17  }
 0xd47 PF: > { %s17376_s4 = sld [smem:[#allocation20_spill]]  ;;  %p17378_p12 = scmp.ge.s32.totalorder %s9221_s16, 2 }
 0xd49   : > { %p8350_p13 = pnand %p17378_p12, %p9325_p6 }
 0xd4b   : > { %p8351_p0 = pneg %p8350_p13 }
 0xd4d   : > { %s8090_s2 = sand.u32 1, %s17376_s4  }
 0xd4e   : > { %s8091_s5 = scalar_lea.sflag [#allocation4], %s8090_s2 }
 0xd4f   : > { %9204 = dma.done.wait (%p8351_p0), %s8091_s5, 128  }
 0xd50   : > { %9206 = vsyncadd (%p8351_p0), %s8091_s5, 4294967168  ;;  %s17379_s16 = sld [smem:[#allocation23_spill]]  ;;  %s17382_s13 = smov %s9213_s14 }
 0xd51   : > { %s17380_s27 = sld [smem:[#allocation21_spill]] }
 0xd52   : > { %s17381_s15 = sld [smem:[#allocation24_spill]] }
 0xd56   : > { %p28_p3 = scmp.ge.s32.totalorder %s17379_s16, 4  }
 0xd57   : > { %s17383_s14 = smov %s17380_s27 }
 0xd58   :  { %30 = sbr.rel (!%p28_p3) target bundleno = 14 (0xe), region = 146 }
 0xd5d   :  { %8097 = vsyncpa [#allocation3], 1 }
 0xd5e   :  { %8099 = vsyncpa [#allocation3 + $0x1], 1 }
 0xd5f   :  { %8100 = vsyncpa [#allocation6], 1 }
 0xd60   :  { %8102 = vsyncpa [#allocation6 + $0x1], 1 }
 0xd61   :  { %8103 = vsyncpa [#allocation9], 1 }
 0xd62   :  { %8104 = vsyncpa [#allocation12], 1 }
 0xd63   :  { %8105 = vsyncpa [#allocation4], 1 }
 0xd64   :  { %8107 = vsyncpa [#allocation4 + $0x1], 1 }

</bundles_post_ra>
